<compile_context>
chip_gen: v7x
topology: tpu7x:2x2x1
jax: 0.10.0
libtpu: 0.0.40
codegen_flags: <defaults>
</compile_context>

<pallas_src>
import jax
import jax.numpy as jnp
from jax import lax
from jax.experimental import pallas as pl
from jax.experimental.pallas import tpu as pltpu

EMBED_LEN = 50
HIDDEN_DIM = 128
N_LAYERS = 2
NUM_DIRECTIONS = 2          # bidirectional
VOCAB_SIZE = 100            # stand-in for len(vocab) (vocab.pt not loadable here)
NUM_CLASSES = 6
MLP_HIDDEN = 128


def _round_up(x, m):
    return ((x + m - 1) // m) * m


def _sig(x):
    # sigmoid(x) == 0.5 * tanh(0.5 * x) + 0.5 : one EUP tanh instead of exp + divide.
    return 0.5 * jnp.tanh(0.5 * x) + 0.5


# ---------------------------------------------------------------------------
# Fused Pallas kernel: 2-layer bidirectional LSTM + MLP head
# ---------------------------------------------------------------------------
def _rnn_classifier_kernel(x_ref, wih0_ref, b0_ref, b1_ref, h0_ref, c0_ref,
                           fb1_ref, fb2_ref,
                           wih1_hbm, whh_hbm, w1_hbm, w2_hbm,
                           out_ref,
                           gx0_scr, gx1_scr, y0_scr,
                           wih1_vmem, whh_vmem, w1_vmem, w2_vmem, dma_sems):
    """
    x_ref    : (T*Bp, Ep)  bf16  time-major, batch/embed padded, flattened
    wih0_ref : (Ep, 8H)    bf16  layer-0 W_ih, both directions concatenated on gate axis
    b0_ref   : (1, 8H)     f32   layer-0 b_ih + b_hh, both directions
    b1_ref   : (1, 8H)     f32   layer-1 biases
    h0_ref   : (4, Bp, H)  f32   initial hidden states
    c0_ref   : (4, Bp, H)  f32   initial cell states
    fb1_ref  : (1, 128)    f32   fc1 bias
    fb2_ref  : (1, Cp)     f32   fc2 bias (lane-padded)
    wih1_hbm : (2H, 8H)    bf16  layer-1 W_ih (HBM, manual DMA)
    whh_hbm  : (4, H, 4H)  bf16  W_hh per (layer, direction) (HBM, manual DMA)
    w1_hbm   : (2H, 128)   bf16  fc1 weight (transposed)     (HBM, manual DMA)
    w2_hbm   : (128, Cp)   bf16  fc2 weight (transposed)     (HBM, manual DMA)
    out_ref  : (Bp, Cp)    f32   sigmoid probabilities (padded)
    """
    Bp = h0_ref.shape[1]
    H = h0_ref.shape[2]
    G = 4 * H
    T = x_ref.shape[0] // Bp

    # ---- prologue: start the later-used weight DMAs; they overlap layer-0 compute ----
    cp_whh = pltpu.make_async_copy(whh_hbm, whh_vmem, dma_sems.at[0])
    cp_wih1 = pltpu.make_async_copy(wih1_hbm, wih1_vmem, dma_sems.at[1])
    cp_w1 = pltpu.make_async_copy(w1_hbm, w1_vmem, dma_sems.at[2])
    cp_w2 = pltpu.make_async_copy(w2_hbm, w2_vmem, dma_sems.at[3])
    cp_whh.start()
    cp_wih1.start()
    cp_w1.start()
    cp_w2.start()

    def cell(gx, h, c, d):
        # W_hh indexed here (not hoisted) so the (H,4H) load sits next to its dot and
        # is not pinned across the unrolled loop (vreg pressure).
        gates = gx + jnp.dot(h.astype(jnp.bfloat16), whh_vmem[d],
                             preferred_element_type=jnp.float32)
        i_g = _sig(gates[:, 0 * H:1 * H])
        f_g = _sig(gates[:, 1 * H:2 * H])
        g_g = jnp.tanh(gates[:, 2 * H:3 * H])
        o_g = _sig(gates[:, 3 * H:4 * H])
        c_new = f_g * c + i_g * g_g
        h_new = o_g * jnp.tanh(c_new)
        return h_new, c_new

    # ---- layer 0: hoisted input projection (single MXU matmul, bias folded in) ----
    gx0_scr[...] = (jnp.dot(x_ref[...], wih0_ref[...],
                            preferred_element_type=jnp.float32) + b0_ref[...])

    # ---- layer 0 recurrence: fwd & bwd chains interleaved, fully unrolled ----
    cp_whh.wait()
    h_f, c_f = h0_ref[0], c0_ref[0]
    h_b, c_b = h0_ref[1], c0_ref[1]
    for t in range(T):
        tr = T - 1 - t
        h_f, c_f = cell(gx0_scr[t * Bp:(t + 1) * Bp, 0:G], h_f, c_f, 0)
        h_b, c_b = cell(gx0_scr[tr * Bp:(tr + 1) * Bp, G:2 * G], h_b, c_b, 1)
        y0_scr[t * Bp:(t + 1) * Bp, 0:H] = h_f
        y0_scr[tr * Bp:(tr + 1) * Bp, H:2 * H] = h_b

    # ---- layer 1 projection: forward gates for all T; backward gates only at t=T-1 ----
    cp_wih1.wait()
    gx1_scr[...] = (jnp.dot(y0_scr[...].astype(jnp.bfloat16), wih1_vmem[:, 0:G],
                            preferred_element_type=jnp.float32) + b1_ref[:, 0:G])
    gxb = (jnp.dot(y0_scr[(T - 1) * Bp:T * Bp, :].astype(jnp.bfloat16),
                   wih1_vmem[:, G:2 * G],
                   preferred_element_type=jnp.float32) + b1_ref[:, G:2 * G])

    # ---- layer 1 recurrence: only output[:, -1] is consumed by the head ----
    # Backward direction: its first step processes position T-1, which is exactly the
    # backward half of output[:, -1]; no further steps are consumed downstream.
    h_b1, _ = cell(gxb, h0_ref[3], c0_ref[3], 3)
    # Forward direction: full T steps, final h only (no per-step output stored).
    h_f1, c_f1 = h0_ref[2], c0_ref[2]
    for t in range(T):
        h_f1, c_f1 = cell(gx1_scr[t * Bp:(t + 1) * Bp, :], h_f1, c_f1, 2)

    # ---- fused MLP head: Linear(2H->128) -> ReLU -> Linear(128->Cp) -> Sigmoid ----
    cp_w1.wait()
    cp_w2.wait()
    # fc1 is split into two row blocks so the (fwd, bwd) concat is never materialized.
    hid = (jnp.dot(h_f1.astype(jnp.bfloat16), w1_vmem[0:H, :],
                   preferred_element_type=jnp.float32)
           + jnp.dot(h_b1.astype(jnp.bfloat16), w1_vmem[H:2 * H, :],
                     preferred_element_type=jnp.float32)
           + fb1_ref[...])
    hid = jnp.maximum(hid, 0.0)
    logits = jnp.dot(hid.astype(jnp.bfloat16), w2_vmem[...],
                     preferred_element_type=jnp.float32) + fb2_ref[...]
    out_ref[...] = _sig(logits).astype(out_ref.dtype)


# ---------------------------------------------------------------------------
# Parameter init (deterministic, PyTorch-default-like uniform)
# ---------------------------------------------------------------------------
def init_params(key):
    params = {}
    keys = jax.random.split(key, 32)
    ki = iter(keys)

    params["embedding"] = jax.random.normal(next(ki), (VOCAB_SIZE, EMBED_LEN),
                                            jnp.float32)

    lstm = []
    bound = 1.0 / jnp.sqrt(HIDDEN_DIM)
    for layer in range(N_LAYERS):
        in_feat = EMBED_LEN if layer == 0 else NUM_DIRECTIONS * HIDDEN_DIM
        for _direction in range(NUM_DIRECTIONS):
            w_ih = jax.random.uniform(next(ki), (4 * HIDDEN_DIM, in_feat),
                                      jnp.float32, -bound, bound)
            w_hh = jax.random.uniform(next(ki), (4 * HIDDEN_DIM, HIDDEN_DIM),
                                      jnp.float32, -bound, bound)
            b_ih = jax.random.uniform(next(ki), (4 * HIDDEN_DIM,),
                                      jnp.float32, -bound, bound)
            b_hh = jax.random.uniform(next(ki), (4 * HIDDEN_DIM,),
                                      jnp.float32, -bound, bound)
            lstm.append({"w_ih": w_ih, "w_hh": w_hh, "b_ih": b_ih, "b_hh": b_hh})
    params["lstm"] = lstm

    in1 = NUM_DIRECTIONS * HIDDEN_DIM
    b1 = 1.0 / jnp.sqrt(in1)
    params["fc1_w"] = jax.random.uniform(next(ki), (MLP_HIDDEN, in1),
                                         jnp.float32, -b1, b1)
    params["fc1_b"] = jax.random.uniform(next(ki), (MLP_HIDDEN,),
                                         jnp.float32, -b1, b1)
    b2 = 1.0 / jnp.sqrt(MLP_HIDDEN)
    params["fc2_w"] = jax.random.uniform(next(ki), (NUM_CLASSES, MLP_HIDDEN),
                                         jnp.float32, -b2, b2)
    params["fc2_b"] = jax.random.uniform(next(ki), (NUM_CLASSES,),
                                         jnp.float32, -b2, b2)
    return params


# ---------------------------------------------------------------------------
# One-time weight preparation (transpose / concat / pad / bf16 cast)
# ---------------------------------------------------------------------------
def prepare_params(params):
    H = HIDDEN_DIM
    Ep = _round_up(EMBED_LEN, 128)
    Cp = _round_up(NUM_CLASSES, 128)

    def layer_input_proj(layer, in_feat, pad_to):
        wihs, biases = [], []
        for d in range(NUM_DIRECTIONS):
            p = params["lstm"][layer * NUM_DIRECTIONS + d]
            w = jnp.transpose(p["w_ih"])                       # (F, 4H)
            w = jnp.pad(w, ((0, pad_to - in_feat), (0, 0)))    # zero-pad unused rows
            wihs.append(w)
            biases.append(p["b_ih"] + p["b_hh"])
        return (jnp.concatenate(wihs, axis=1).astype(jnp.bfloat16),      # (F_pad, 8H)
                jnp.concatenate(biases)[None, :].astype(jnp.float32))    # (1, 8H)

    wih0, b0 = layer_input_proj(0, EMBED_LEN, Ep)
    wih1, b1 = layer_input_proj(1, 2 * H, 2 * H)

    whh = jnp.stack([jnp.transpose(p["w_hh"]) for p in params["lstm"]],
                    axis=0).astype(jnp.bfloat16)                          # (4, H, 4H)

    w1 = jnp.transpose(params["fc1_w"]).astype(jnp.bfloat16)              # (2H, 128)
    fb1 = params["fc1_b"][None, :].astype(jnp.float32)                    # (1, 128)
    w2 = jnp.pad(jnp.transpose(params["fc2_w"]),
                 ((0, 0), (0, Cp - NUM_CLASSES))).astype(jnp.bfloat16)    # (128, Cp)
    fb2 = jnp.pad(params["fc2_b"],
                  (0, Cp - NUM_CLASSES))[None, :].astype(jnp.float32)     # (1, Cp)

    # Embedding pre-padded to the 128-lane tile and pre-cast to bf16 once here, so the
    # per-call wrapper only has to gather rows (no per-call pad/cast ops).
    emb = jnp.pad(params["embedding"],
                  ((0, 0), (0, Ep - EMBED_LEN))).astype(jnp.bfloat16)     # (V, Ep)

    return {"embedding": emb,
            "wih0": wih0, "b0": b0, "wih1": wih1, "b1": b1, "whh": whh,
            "w1": w1, "fb1": fb1, "w2": w2, "fb2": fb2}


# ---------------------------------------------------------------------------
# Forward pass (mirrors RNNClassifier.forward)
# ---------------------------------------------------------------------------
def rnn_classifier_forward(prepped, token_ids, h0, c0):
    B, T = token_ids.shape
    H = HIDDEN_DIM
    Bp = _round_up(max(B, 8), 8)          # pad batch to f32 sublane tile
    Ep = _round_up(EMBED_LEN, 128)        # embed width already padded in the table
    Cp = _round_up(NUM_CLASSES, 128)      # lane-dense output store

    # TODO(synk): fold this row-gather into the kernel (token_ids in SMEM + table in
    # VMEM) to drop the extra XLA launch; at B*T=16 rows it is launch overhead only.
    emb = jnp.take(prepped["embedding"], token_ids, axis=0)       # (B, T, Ep) bf16
    x = jnp.transpose(emb, (1, 0, 2))                             # (T, B, Ep) time-major
    x = jnp.pad(x, ((0, 0), (0, Bp - B), (0, 0)))
    x = x.reshape(T * Bp, Ep)

    h0p = jnp.pad(h0, ((0, 0), (0, Bp - B), (0, 0))).astype(jnp.float32)
    c0p = jnp.pad(c0, ((0, 0), (0, Bp - B), (0, 0))).astype(jnp.float32)

    vmem = pltpu.MemorySpace.VMEM
    out = pl.pallas_call(
        _rnn_classifier_kernel,
        out_shape=jax.ShapeDtypeStruct((Bp, Cp), jnp.float32),
        in_specs=[pl.BlockSpec(memory_space=vmem)] * 8
                 + [pl.BlockSpec(memory_space=pl.ANY)] * 4,
        out_specs=pl.BlockSpec(memory_space=vmem),
        scratch_shapes=[
            pltpu.VMEM((T * Bp, 8 * H), jnp.float32),     # layer-0 precomputed gates
            pltpu.VMEM((T * Bp, 4 * H), jnp.float32),     # layer-1 gates (fwd half only)
            pltpu.VMEM((T * Bp, 2 * H), jnp.float32),     # layer-0 output sequence
            pltpu.VMEM((2 * H, 8 * H), jnp.bfloat16),     # wih1 (manual DMA dst)
            pltpu.VMEM((NUM_DIRECTIONS * N_LAYERS, H, 4 * H), jnp.bfloat16),  # whh
            pltpu.VMEM((2 * H, MLP_HIDDEN), jnp.bfloat16),  # fc1 weight
            pltpu.VMEM((MLP_HIDDEN, Cp), jnp.bfloat16),     # fc2 weight
            pltpu.SemaphoreType.DMA((4,)),                  # one sem per manual copy
        ],
    )(x, prepped["wih0"], prepped["b0"], prepped["b1"], h0p, c0p,
      prepped["fb1"], prepped["fb2"],
      prepped["wih1"], prepped["whh"], prepped["w1"], prepped["w2"])

    # TODO(synk): if B is ever scaled up, add a batch grid axis with
    # dimension_semantics=("parallel",) and a per-core Bp block so the kernel runs on
    # both of v7x's TensorCores (VMEM footprint is <2 MiB, so capacity is not the limit).
    return out[:B, :NUM_CLASSES]


# ---------------------------------------------------------------------------
# Pure-JAX reference (matches the PyTorch module; MXU ops done in bf16 like the kernel)
# ---------------------------------------------------------------------------
def _mxu_dot(a, b):
    return jnp.dot(a.astype(jnp.bfloat16), b.astype(jnp.bfloat16),
                   preferred_element_type=jnp.float32)


def rnn_classifier_reference(params, token_ids, h0, c0):
    H = HIDDEN_DIM
    emb = jnp.take(params["embedding"], token_ids, axis=0)        # (B, T, E)
    layer_in = jnp.transpose(emb, (1, 0, 2))                      # (T, B, E)
    for layer in range(N_LAYERS):
        outs = []
        for d in range(NUM_DIRECTIONS):
            idx = layer * NUM_DIRECTIONS + d
            p = params["lstm"][idx]
            wih, whh = jnp.transpose(p["w_ih"]), jnp.transpose(p["w_hh"])
            b = (p["b_ih"] + p["b_hh"])[None, :]
            xs = layer_in if d == 0 else jnp.flip(layer_in, axis=0)

            def step(carry, x_t, wih=wih, whh=whh, b=b):
                h, c = carry
                g = _mxu_dot(x_t, wih) + _mxu_dot(h, whh) + b
                i = jax.nn.sigmoid(g[:, :H])
                f = jax.nn.sigmoid(g[:, H:2 * H])
                gg = jnp.tanh(g[:, 2 * H:3 * H])
                o = jax.nn.sigmoid(g[:, 3 * H:])
                c = f * c + i * gg
                h = o * jnp.tanh(c)
                return (h, c), h

            _, hs = lax.scan(step, (h0[idx], c0[idx]), xs)
            if d == 1:
                hs = jnp.flip(hs, axis=0)
            outs.append(hs)
        layer_in = jnp.concatenate(outs, axis=-1)                 # (T, B, 2H)
    last = layer_in[-1]                                           # output[:, -1]
    hid = jnp.maximum(_mxu_dot(last, jnp.transpose(params["fc1_w"]))
                      + params["fc1_b"], 0.0)
    return jax.nn.sigmoid(_mxu_dot(hid, jnp.transpose(params["fc2_w"]))
                          + params["fc2_b"])


# ---------------------------------------------------------------------------
if __name__ == "__main__":
    B, T = 2, 8

    key = jax.random.PRNGKey(0)
    k_params, k_ids, k_h0, k_c0 = jax.random.split(key, 4)

    params = init_params(k_params)
    prepped = prepare_params(params)
    token_ids = jax.random.randint(k_ids, (B, T), 0, VOCAB_SIZE, dtype=jnp.int32)

    # torch.randn initial states in the reference forward -> deterministic randn here.
    h0 = jax.random.normal(k_h0, (NUM_DIRECTIONS * N_LAYERS, B, HIDDEN_DIM), jnp.float32)
    c0 = jax.random.normal(k_c0, (NUM_DIRECTIONS * N_LAYERS, B, HIDDEN_DIM), jnp.float32)

    out = jax.jit(rnn_classifier_forward)(prepped, token_ids, h0, c0)
    out = jax.block_until_ready(out)
    assert out.shape == (B, NUM_CLASSES)
    assert bool(jnp.all((out >= 0.0) & (out <= 1.0)))

    ref = rnn_classifier_reference(params, token_ids, h0, c0)
    max_diff = float(jnp.max(jnp.abs(out - ref)))
    assert jnp.allclose(out, ref, atol=5e-3, rtol=5e-3), f"max abs diff {max_diff}"

    print("KERNEL_OK")
</pallas_src>

<mosaic_0001>
module attributes {stable_mosaic.version = 11 : i64} {
  func.func @_rnn_classifier_kernel(%arg0: memref<64x128xbf16, #tpu.memory_space<vmem>>, %arg1: memref<128x1024xbf16, #tpu.memory_space<vmem>>, %arg2: memref<1x1024xf32, #tpu.memory_space<vmem>>, %arg3: memref<1x1024xf32, #tpu.memory_space<vmem>>, %arg4: memref<4x8x128xf32, #tpu.memory_space<vmem>>, %arg5: memref<4x8x128xf32, #tpu.memory_space<vmem>>, %arg6: memref<1x128xf32, #tpu.memory_space<vmem>>, %arg7: memref<1x128xf32, #tpu.memory_space<vmem>>, %arg8: memref<256x1024xbf16, #tpu.memory_space<any>>, %arg9: memref<4x128x512xbf16, #tpu.memory_space<any>>, %arg10: memref<256x128xbf16, #tpu.memory_space<any>>, %arg11: memref<128x128xbf16, #tpu.memory_space<any>>, %arg12: memref<8x128xf32, #tpu.memory_space<vmem>>, %arg13: memref<64x1024xf32, #tpu.memory_space<vmem>>, %arg14: memref<64x512xf32, #tpu.memory_space<vmem>>, %arg15: memref<64x256xf32, #tpu.memory_space<vmem>>, %arg16: memref<256x1024xbf16, #tpu.memory_space<vmem>>, %arg17: memref<4x128x512xbf16, #tpu.memory_space<vmem>>, %arg18: memref<256x128xbf16, #tpu.memory_space<vmem>>, %arg19: memref<128x128xbf16, #tpu.memory_space<vmem>>, %arg20: memref<4x!tpu.dma_semaphore, #tpu.memory_space<semaphore_mem>>) attributes {dimension_semantics = [], scalar_prefetch = 0 : i64, scratch_operands = 8 : i64, tpu.core_type = #tpu.core_type<tc>} {
    %c0_i32 = arith.constant 0 : i32
    %0 = tpu.memref_slice %arg20[%c0_i32] : memref<4x!tpu.dma_semaphore, #tpu.memory_space<semaphore_mem>> -> memref<1x!tpu.dma_semaphore, #tpu.memory_space<semaphore_mem>>
    %1 = tpu.memref_squeeze %0 : memref<1x!tpu.dma_semaphore, #tpu.memory_space<semaphore_mem>> -> memref<!tpu.dma_semaphore, #tpu.memory_space<semaphore_mem>>
    tpu.enqueue_dma source(%arg9 : memref<4x128x512xbf16, #tpu.memory_space<any>>) target(%arg17 : memref<4x128x512xbf16, #tpu.memory_space<vmem>>) target_semaphore(%1 : memref<!tpu.dma_semaphore, #tpu.memory_space<semaphore_mem>>)
    %c1_i32 = arith.constant 1 : i32
    %2 = tpu.memref_slice %arg20[%c1_i32] : memref<4x!tpu.dma_semaphore, #tpu.memory_space<semaphore_mem>> -> memref<1x!tpu.dma_semaphore, #tpu.memory_space<semaphore_mem>>
    %3 = tpu.memref_squeeze %2 : memref<1x!tpu.dma_semaphore, #tpu.memory_space<semaphore_mem>> -> memref<!tpu.dma_semaphore, #tpu.memory_space<semaphore_mem>>
    tpu.enqueue_dma source(%arg8 : memref<256x1024xbf16, #tpu.memory_space<any>>) target(%arg16 : memref<256x1024xbf16, #tpu.memory_space<vmem>>) target_semaphore(%3 : memref<!tpu.dma_semaphore, #tpu.memory_space<semaphore_mem>>)
    %c2_i32 = arith.constant 2 : i32
    %4 = tpu.memref_slice %arg20[%c2_i32] : memref<4x!tpu.dma_semaphore, #tpu.memory_space<semaphore_mem>> -> memref<1x!tpu.dma_semaphore, #tpu.memory_space<semaphore_mem>>
    %5 = tpu.memref_squeeze %4 : memref<1x!tpu.dma_semaphore, #tpu.memory_space<semaphore_mem>> -> memref<!tpu.dma_semaphore, #tpu.memory_space<semaphore_mem>>
    tpu.enqueue_dma source(%arg10 : memref<256x128xbf16, #tpu.memory_space<any>>) target(%arg18 : memref<256x128xbf16, #tpu.memory_space<vmem>>) target_semaphore(%5 : memref<!tpu.dma_semaphore, #tpu.memory_space<semaphore_mem>>)
    %c3_i32 = arith.constant 3 : i32
    %6 = tpu.memref_slice %arg20[%c3_i32] : memref<4x!tpu.dma_semaphore, #tpu.memory_space<semaphore_mem>> -> memref<1x!tpu.dma_semaphore, #tpu.memory_space<semaphore_mem>>
    %7 = tpu.memref_squeeze %6 : memref<1x!tpu.dma_semaphore, #tpu.memory_space<semaphore_mem>> -> memref<!tpu.dma_semaphore, #tpu.memory_space<semaphore_mem>>
    tpu.enqueue_dma source(%arg11 : memref<128x128xbf16, #tpu.memory_space<any>>) target(%arg19 : memref<128x128xbf16, #tpu.memory_space<vmem>>) target_semaphore(%7 : memref<!tpu.dma_semaphore, #tpu.memory_space<semaphore_mem>>)
    %c0 = arith.constant 0 : index
    %c0_0 = arith.constant 0 : index
    %8 = vector.load %arg0[%c0, %c0_0] : memref<64x128xbf16, #tpu.memory_space<vmem>>, vector<64x128xbf16>
    %c0_1 = arith.constant 0 : index
    %c0_2 = arith.constant 0 : index
    %9 = vector.load %arg1[%c0_1, %c0_2] : memref<128x1024xbf16, #tpu.memory_space<vmem>>, vector<128x1024xbf16>
    %cst = arith.constant dense<0.000000e+00> : vector<64x1024xf32>
    %10 = tpu.matmul %8, %9, %cst {dimension_numbers = #tpu.dot_dimension_numbers<[1], [0], [0], [1], [0, 0, 1, 1], [], []>} : vector<64x128xbf16>, vector<128x1024xbf16>, vector<64x1024xf32> -> vector<64x1024xf32>
    %c0_3 = arith.constant 0 : index
    %c0_4 = arith.constant 0 : index
    %11 = vector.load %arg2[%c0_3, %c0_4] : memref<1x1024xf32, #tpu.memory_space<vmem>>, vector<1x1024xf32>
    %12 = vector.broadcast %11 : vector<1x1024xf32> to vector<64x1024xf32>
    %13 = arith.addf %10, %12 : vector<64x1024xf32>
    %c0_5 = arith.constant 0 : index
    %c0_6 = arith.constant 0 : index
    %14 = vector.load %arg13[%c0_5, %c0_6] : memref<64x1024xf32, #tpu.memory_space<vmem>>, vector<64x1024xf32>
    tpu.vector_store %arg13[%c0_5, %c0_6], %13 {strides = array<i32>} : memref<64x1024xf32, #tpu.memory_space<vmem>>, vector<64x1024xf32>,
    %c0_i32_7 = arith.constant 0 : i32
    %15 = tpu.memref_slice %arg20[%c0_i32_7] : memref<4x!tpu.dma_semaphore, #tpu.memory_space<semaphore_mem>> -> memref<1x!tpu.dma_semaphore, #tpu.memory_space<semaphore_mem>>
    %16 = tpu.memref_squeeze %15 : memref<1x!tpu.dma_semaphore, #tpu.memory_space<semaphore_mem>> -> memref<!tpu.dma_semaphore, #tpu.memory_space<semaphore_mem>>
    tpu.wait_dma2 semaphore(%16 : memref<!tpu.dma_semaphore, #tpu.memory_space<semaphore_mem>>) src(%arg9 : memref<4x128x512xbf16, #tpu.memory_space<any>>) dst(%arg17 : memref<4x128x512xbf16, #tpu.memory_space<vmem>>)
    %c0_8 = arith.constant 0 : index
    %c0_9 = arith.constant 0 : index
    %c0_10 = arith.constant 0 : index
    %17 = vector.load %arg4[%c0_8, %c0_9, %c0_10] : memref<4x8x128xf32, #tpu.memory_space<vmem>>, vector<1x8x128xf32>
    %18 = vector.shape_cast %17 : vector<1x8x128xf32> to vector<8x128xf32>
    %c0_11 = arith.constant 0 : index
    %c0_12 = arith.constant 0 : index
    %c0_13 = arith.constant 0 : index
    %19 = vector.load %arg5[%c0_11, %c0_12, %c0_13] : memref<4x8x128xf32, #tpu.memory_space<vmem>>, vector<1x8x128xf32>
    %20 = vector.shape_cast %19 : vector<1x8x128xf32> to vector<8x128xf32>
    %c1 = arith.constant 1 : index
    %c0_14 = arith.constant 0 : index
    %c0_15 = arith.constant 0 : index
    %21 = vector.load %arg4[%c1, %c0_14, %c0_15] : memref<4x8x128xf32, #tpu.memory_space<vmem>>, vector<1x8x128xf32>
    %22 = vector.shape_cast %21 : vector<1x8x128xf32> to vector<8x128xf32>
    %c1_16 = arith.constant 1 : index
    %c0_17 = arith.constant 0 : index
    %c0_18 = arith.constant 0 : index
    %23 = vector.load %arg5[%c1_16, %c0_17, %c0_18] : memref<4x8x128xf32, #tpu.memory_space<vmem>>, vector<1x8x128xf32>
    %24 = vector.shape_cast %23 : vector<1x8x128xf32> to vector<8x128xf32>
    %c0_19 = arith.constant 0 : index
    %c0_20 = arith.constant 0 : index
    %25 = vector.load %arg13[%c0_19, %c0_20] : memref<64x1024xf32, #tpu.memory_space<vmem>>, vector<8x512xf32>
    %26 = arith.truncf %18 : vector<8x128xf32> to vector<8x128xbf16>
    %c0_21 = arith.constant 0 : index
    %c0_22 = arith.constant 0 : index
    %c0_23 = arith.constant 0 : index
    %27 = vector.load %arg17[%c0_21, %c0_22, %c0_23] : memref<4x128x512xbf16, #tpu.memory_space<vmem>>, vector<1x128x512xbf16>
    %28 = vector.shape_cast %27 : vector<1x128x512xbf16> to vector<128x512xbf16>
    %cst_24 = arith.constant dense<0.000000e+00> : vector<8x512xf32>
    %29 = tpu.matmul %26, %28, %cst_24 {dimension_numbers = #tpu.dot_dimension_numbers<[1], [0], [0], [1], [0, 0, 1, 1], [], []>} : vector<8x128xbf16>, vector<128x512xbf16>, vector<8x512xf32> -> vector<8x512xf32>
    %30 = arith.addf %25, %29 : vector<8x512xf32>
    %31 = vector.extract_strided_slice %30 {offsets = [0, 0], sizes = [8, 128], strides = [1, 1]} : vector<8x512xf32> to vector<8x128xf32>
    %cst_25 = arith.constant 5.000000e-01 : f32
    %32 = vector.broadcast %cst_25 : f32 to vector<8x128xf32>
    %33 = arith.mulf %32, %31 : vector<8x128xf32>
    %34 = math.tanh %33 : vector<8x128xf32>
    %cst_26 = arith.constant 5.000000e-01 : f32
    %35 = vector.broadcast %cst_26 : f32 to vector<8x128xf32>
    %36 = arith.mulf %35, %34 : vector<8x128xf32>
    %cst_27 = arith.constant 5.000000e-01 : f32
    %37 = vector.broadcast %cst_27 : f32 to vector<8x128xf32>
    %38 = arith.addf %36, %37 : vector<8x128xf32>
    %39 = vector.extract_strided_slice %30 {offsets = [0, 128], sizes = [8, 128], strides = [1, 1]} : vector<8x512xf32> to vector<8x128xf32>
    %cst_28 = arith.constant 5.000000e-01 : f32
    %40 = vector.broadcast %cst_28 : f32 to vector<8x128xf32>
    %41 = arith.mulf %40, %39 : vector<8x128xf32>
    %42 = math.tanh %41 : vector<8x128xf32>
    %cst_29 = arith.constant 5.000000e-01 : f32
    %43 = vector.broadcast %cst_29 : f32 to vector<8x128xf32>
    %44 = arith.mulf %43, %42 : vector<8x128xf32>
    %cst_30 = arith.constant 5.000000e-01 : f32
    %45 = vector.broadcast %cst_30 : f32 to vector<8x128xf32>
    %46 = arith.addf %44, %45 : vector<8x128xf32>
    %47 = vector.extract_strided_slice %30 {offsets = [0, 256], sizes = [8, 128], strides = [1, 1]} : vector<8x512xf32> to vector<8x128xf32>
    %48 = math.tanh %47 : vector<8x128xf32>
    %49 = vector.extract_strided_slice %30 {offsets = [0, 384], sizes = [8, 128], strides = [1, 1]} : vector<8x512xf32> to vector<8x128xf32>
    %cst_31 = arith.constant 5.000000e-01 : f32
    %50 = vector.broadcast %cst_31 : f32 to vector<8x128xf32>
    %51 = arith.mulf %50, %49 : vector<8x128xf32>
    %52 = math.tanh %51 : vector<8x128xf32>
    %cst_32 = arith.constant 5.000000e-01 : f32
    %53 = vector.broadcast %cst_32 : f32 to vector<8x128xf32>
    %54 = arith.mulf %53, %52 : vector<8x128xf32>
    %cst_33 = arith.constant 5.000000e-01 : f32
    %55 = vector.broadcast %cst_33 : f32 to vector<8x128xf32>
    %56 = arith.addf %54, %55 : vector<8x128xf32>
    %57 = arith.mulf %46, %20 : vector<8x128xf32>
    %58 = arith.mulf %38, %48 : vector<8x128xf32>
    %59 = arith.addf %57, %58 : vector<8x128xf32>
    %60 = math.tanh %59 : vector<8x128xf32>
    %61 = arith.mulf %56, %60 : vector<8x128xf32>
    %c56 = arith.constant 56 : index
    %c512 = arith.constant 512 : index
    %62 = vector.load %arg13[%c56, %c512] : memref<64x1024xf32, #tpu.memory_space<vmem>>, vector<8x512xf32>
    %63 = arith.truncf %22 : vector<8x128xf32> to vector<8x128xbf16>
    %c1_34 = arith.constant 1 : index
    %c0_35 = arith.constant 0 : index
    %c0_36 = arith.constant 0 : index
    %64 = vector.load %arg17[%c1_34, %c0_35, %c0_36] : memref<4x128x512xbf16, #tpu.memory_space<vmem>>, vector<1x128x512xbf16>
    %65 = vector.shape_cast %64 : vector<1x128x512xbf16> to vector<128x512xbf16>
    %cst_37 = arith.constant dense<0.000000e+00> : vector<8x512xf32>
    %66 = tpu.matmul %63, %65, %cst_37 {dimension_numbers = #tpu.dot_dimension_numbers<[1], [0], [0], [1], [0, 0, 1, 1], [], []>} : vector<8x128xbf16>, vector<128x512xbf16>, vector<8x512xf32> -> vector<8x512xf32>
    %67 = arith.addf %62, %66 : vector<8x512xf32>
    %68 = vector.extract_strided_slice %67 {offsets = [0, 0], sizes = [8, 128], strides = [1, 1]} : vector<8x512xf32> to vector<8x128xf32>
    %cst_38 = arith.constant 5.000000e-01 : f32
    %69 = vector.broadcast %cst_38 : f32 to vector<8x128xf32>
    %70 = arith.mulf %69, %68 : vector<8x128xf32>
    %71 = math.tanh %70 : vector<8x128xf32>
    %cst_39 = arith.constant 5.000000e-01 : f32
    %72 = vector.broadcast %cst_39 : f32 to vector<8x128xf32>
    %73 = arith.mulf %72, %71 : vector<8x128xf32>
    %cst_40 = arith.constant 5.000000e-01 : f32
    %74 = vector.broadcast %cst_40 : f32 to vector<8x128xf32>
    %75 = arith.addf %73, %74 : vector<8x128xf32>
    %76 = vector.extract_strided_slice %67 {offsets = [0, 128], sizes = [8, 128], strides = [1, 1]} : vector<8x512xf32> to vector<8x128xf32>
    %cst_41 = arith.constant 5.000000e-01 : f32
    %77 = vector.broadcast %cst_41 : f32 to vector<8x128xf32>
    %78 = arith.mulf %77, %76 : vector<8x128xf32>
    %79 = math.tanh %78 : vector<8x128xf32>
    %cst_42 = arith.constant 5.000000e-01 : f32
    %80 = vector.broadcast %cst_42 : f32 to vector<8x128xf32>
    %81 = arith.mulf %80, %79 : vector<8x128xf32>
    %cst_43 = arith.constant 5.000000e-01 : f32
    %82 = vector.broadcast %cst_43 : f32 to vector<8x128xf32>
    %83 = arith.addf %81, %82 : vector<8x128xf32>
    %84 = vector.extract_strided_slice %67 {offsets = [0, 256], sizes = [8, 128], strides = [1, 1]} : vector<8x512xf32> to vector<8x128xf32>
    %85 = math.tanh %84 : vector<8x128xf32>
    %86 = vector.extract_strided_slice %67 {offsets = [0, 384], sizes = [8, 128], strides = [1, 1]} : vector<8x512xf32> to vector<8x128xf32>
    %cst_44 = arith.constant 5.000000e-01 : f32
    %87 = vector.broadcast %cst_44 : f32 to vector<8x128xf32>
    %88 = arith.mulf %87, %86 : vector<8x128xf32>
    %89 = math.tanh %88 : vector<8x128xf32>
    %cst_45 = arith.constant 5.000000e-01 : f32
    %90 = vector.broadcast %cst_45 : f32 to vector<8x128xf32>
    %91 = arith.mulf %90, %89 : vector<8x128xf32>
    %cst_46 = arith.constant 5.000000e-01 : f32
    %92 = vector.broadcast %cst_46 : f32 to vector<8x128xf32>
    %93 = arith.addf %91, %92 : vector<8x128xf32>
    %94 = arith.mulf %83, %24 : vector<8x128xf32>
    %95 = arith.mulf %75, %85 : vector<8x128xf32>
    %96 = arith.addf %94, %95 : vector<8x128xf32>
    %97 = math.tanh %96 : vector<8x128xf32>
    %98 = arith.mulf %93, %97 : vector<8x128xf32>
    %c0_47 = arith.constant 0 : index
    %c0_48 = arith.constant 0 : index
    %99 = vector.load %arg15[%c0_47, %c0_48] : memref<64x256xf32, #tpu.memory_space<vmem>>, vector<8x128xf32>
    tpu.vector_store %arg15[%c0_47, %c0_48], %61 {strides = array<i32>} : memref<64x256xf32, #tpu.memory_space<vmem>>, vector<8x128xf32>,
    %c56_49 = arith.constant 56 : index
    %c128 = arith.constant 128 : index
    %100 = vector.load %arg15[%c56_49, %c128] : memref<64x256xf32, #tpu.memory_space<vmem>>, vector<8x128xf32>
    tpu.vector_store %arg15[%c56_49, %c128], %98 {strides = array<i32>} : memref<64x256xf32, #tpu.memory_space<vmem>>, vector<8x128xf32>,
    %c8 = arith.constant 8 : index
    %c0_50 = arith.constant 0 : index
    %101 = vector.load %arg13[%c8, %c0_50] : memref<64x1024xf32, #tpu.memory_space<vmem>>, vector<8x512xf32>
    %102 = arith.truncf %61 : vector<8x128xf32> to vector<8x128xbf16>
    %c0_51 = arith.constant 0 : index
    %c0_52 = arith.constant 0 : index
    %c0_53 = arith.constant 0 : index
    %103 = vector.load %arg17[%c0_51, %c0_52, %c0_53] : memref<4x128x512xbf16, #tpu.memory_space<vmem>>, vector<1x128x512xbf16>
    %104 = vector.shape_cast %103 : vector<1x128x512xbf16> to vector<128x512xbf16>
    %cst_54 = arith.constant dense<0.000000e+00> : vector<8x512xf32>
    %105 = tpu.matmul %102, %104, %cst_54 {dimension_numbers = #tpu.dot_dimension_numbers<[1], [0], [0], [1], [0, 0, 1, 1], [], []>} : vector<8x128xbf16>, vector<128x512xbf16>, vector<8x512xf32> -> vector<8x512xf32>
    %106 = arith.addf %101, %105 : vector<8x512xf32>
    %107 = vector.extract_strided_slice %106 {offsets = [0, 0], sizes = [8, 128], strides = [1, 1]} : vector<8x512xf32> to vector<8x128xf32>
    %cst_55 = arith.constant 5.000000e-01 : f32
    %108 = vector.broadcast %cst_55 : f32 to vector<8x128xf32>
    %109 = arith.mulf %108, %107 : vector<8x128xf32>
    %110 = math.tanh %109 : vector<8x128xf32>
    %cst_56 = arith.constant 5.000000e-01 : f32
    %111 = vector.broadcast %cst_56 : f32 to vector<8x128xf32>
    %112 = arith.mulf %111, %110 : vector<8x128xf32>
    %cst_57 = arith.constant 5.000000e-01 : f32
    %113 = vector.broadcast %cst_57 : f32 to vector<8x128xf32>
    %114 = arith.addf %112, %113 : vector<8x128xf32>
    %115 = vector.extract_strided_slice %106 {offsets = [0, 128], sizes = [8, 128], strides = [1, 1]} : vector<8x512xf32> to vector<8x128xf32>
    %cst_58 = arith.constant 5.000000e-01 : f32
    %116 = vector.broadcast %cst_58 : f32 to vector<8x128xf32>
    %117 = arith.mulf %116, %115 : vector<8x128xf32>
    %118 = math.tanh %117 : vector<8x128xf32>
    %cst_59 = arith.constant 5.000000e-01 : f32
    %119 = vector.broadcast %cst_59 : f32 to vector<8x128xf32>
    %120 = arith.mulf %119, %118 : vector<8x128xf32>
    %cst_60 = arith.constant 5.000000e-01 : f32
    %121 = vector.broadcast %cst_60 : f32 to vector<8x128xf32>
    %122 = arith.addf %120, %121 : vector<8x128xf32>
    %123 = vector.extract_strided_slice %106 {offsets = [0, 256], sizes = [8, 128], strides = [1, 1]} : vector<8x512xf32> to vector<8x128xf32>
    %124 = math.tanh %123 : vector<8x128xf32>
    %125 = vector.extract_strided_slice %106 {offsets = [0, 384], sizes = [8, 128], strides = [1, 1]} : vector<8x512xf32> to vector<8x128xf32>
    %cst_61 = arith.constant 5.000000e-01 : f32
    %126 = vector.broadcast %cst_61 : f32 to vector<8x128xf32>
    %127 = arith.mulf %126, %125 : vector<8x128xf32>
    %128 = math.tanh %127 : vector<8x128xf32>
    %cst_62 = arith.constant 5.000000e-01 : f32
    %129 = vector.broadcast %cst_62 : f32 to vector<8x128xf32>
    %130 = arith.mulf %129, %128 : vector<8x128xf32>
    %cst_63 = arith.constant 5.000000e-01 : f32
    %131 = vector.broadcast %cst_63 : f32 to vector<8x128xf32>
    %132 = arith.addf %130, %131 : vector<8x128xf32>
    %133 = arith.mulf %122, %59 : vector<8x128xf32>
    %134 = arith.mulf %114, %124 : vector<8x128xf32>
    %135 = arith.addf %133, %134 : vector<8x128xf32>
    %136 = math.tanh %135 : vector<8x128xf32>
    %137 = arith.mulf %132, %136 : vector<8x128xf32>
    %c48 = arith.constant 48 : index
    %c512_64 = arith.constant 512 : index
    %138 = vector.load %arg13[%c48, %c512_64] : memref<64x1024xf32, #tpu.memory_space<vmem>>, vector<8x512xf32>
    %139 = arith.truncf %98 : vector<8x128xf32> to vector<8x128xbf16>
    %c1_65 = arith.constant 1 : index
    %c0_66 = arith.constant 0 : index
    %c0_67 = arith.constant 0 : index
    %140 = vector.load %arg17[%c1_65, %c0_66, %c0_67] : memref<4x128x512xbf16, #tpu.memory_space<vmem>>, vector<1x128x512xbf16>
    %141 = vector.shape_cast %140 : vector<1x128x512xbf16> to vector<128x512xbf16>
    %cst_68 = arith.constant dense<0.000000e+00> : vector<8x512xf32>
    %142 = tpu.matmul %139, %141, %cst_68 {dimension_numbers = #tpu.dot_dimension_numbers<[1], [0], [0], [1], [0, 0, 1, 1], [], []>} : vector<8x128xbf16>, vector<128x512xbf16>, vector<8x512xf32> -> vector<8x512xf32>
    %143 = arith.addf %138, %142 : vector<8x512xf32>
    %144 = vector.extract_strided_slice %143 {offsets = [0, 0], sizes = [8, 128], strides = [1, 1]} : vector<8x512xf32> to vector<8x128xf32>
    %cst_69 = arith.constant 5.000000e-01 : f32
    %145 = vector.broadcast %cst_69 : f32 to vector<8x128xf32>
    %146 = arith.mulf %145, %144 : vector<8x128xf32>
    %147 = math.tanh %146 : vector<8x128xf32>
    %cst_70 = arith.constant 5.000000e-01 : f32
    %148 = vector.broadcast %cst_70 : f32 to vector<8x128xf32>
    %149 = arith.mulf %148, %147 : vector<8x128xf32>
    %cst_71 = arith.constant 5.000000e-01 : f32
    %150 = vector.broadcast %cst_71 : f32 to vector<8x128xf32>
    %151 = arith.addf %149, %150 : vector<8x128xf32>
    %152 = vector.extract_strided_slice %143 {offsets = [0, 128], sizes = [8, 128], strides = [1, 1]} : vector<8x512xf32> to vector<8x128xf32>
    %cst_72 = arith.constant 5.000000e-01 : f32
    %153 = vector.broadcast %cst_72 : f32 to vector<8x128xf32>
    %154 = arith.mulf %153, %152 : vector<8x128xf32>
    %155 = math.tanh %154 : vector<8x128xf32>
    %cst_73 = arith.constant 5.000000e-01 : f32
    %156 = vector.broadcast %cst_73 : f32 to vector<8x128xf32>
    %157 = arith.mulf %156, %155 : vector<8x128xf32>
    %cst_74 = arith.constant 5.000000e-01 : f32
    %158 = vector.broadcast %cst_74 : f32 to vector<8x128xf32>
    %159 = arith.addf %157, %158 : vector<8x128xf32>
    %160 = vector.extract_strided_slice %143 {offsets = [0, 256], sizes = [8, 128], strides = [1, 1]} : vector<8x512xf32> to vector<8x128xf32>
    %161 = math.tanh %160 : vector<8x128xf32>
    %162 = vector.extract_strided_slice %143 {offsets = [0, 384], sizes = [8, 128], strides = [1, 1]} : vector<8x512xf32> to vector<8x128xf32>
    %cst_75 = arith.constant 5.000000e-01 : f32
    %163 = vector.broadcast %cst_75 : f32 to vector<8x128xf32>
    %164 = arith.mulf %163, %162 : vector<8x128xf32>
    %165 = math.tanh %164 : vector<8x128xf32>
    %cst_76 = arith.constant 5.000000e-01 : f32
    %166 = vector.broadcast %cst_76 : f32 to vector<8x128xf32>
    %167 = arith.mulf %166, %165 : vector<8x128xf32>
    %cst_77 = arith.constant 5.000000e-01 : f32
    %168 = vector.broadcast %cst_77 : f32 to vector<8x128xf32>
    %169 = arith.addf %167, %168 : vector<8x128xf32>
    %170 = arith.mulf %159, %96 : vector<8x128xf32>
    %171 = arith.mulf %151, %161 : vector<8x128xf32>
    %172 = arith.addf %170, %171 : vector<8x128xf32>
    %173 = math.tanh %172 : vector<8x128xf32>
    %174 = arith.mulf %169, %173 : vector<8x128xf32>
    %c8_78 = arith.constant 8 : index
    %c0_79 = arith.constant 0 : index
    %175 = vector.load %arg15[%c8_78, %c0_79] : memref<64x256xf32, #tpu.memory_space<vmem>>, vector<8x128xf32>
    tpu.vector_store %arg15[%c8_78, %c0_79], %137 {strides = array<i32>} : memref<64x256xf32, #tpu.memory_space<vmem>>, vector<8x128xf32>,
    %c48_80 = arith.constant 48 : index
    %c128_81 = arith.constant 128 : index
    %176 = vector.load %arg15[%c48_80, %c128_81] : memref<64x256xf32, #tpu.memory_space<vmem>>, vector<8x128xf32>
    tpu.vector_store %arg15[%c48_80, %c128_81], %174 {strides = array<i32>} : memref<64x256xf32, #tpu.memory_space<vmem>>, vector<8x128xf32>,
    %c16 = arith.constant 16 : index
    %c0_82 = arith.constant 0 : index
    %177 = vector.load %arg13[%c16, %c0_82] : memref<64x1024xf32, #tpu.memory_space<vmem>>, vector<8x512xf32>
    %178 = arith.truncf %137 : vector<8x128xf32> to vector<8x128xbf16>
    %c0_83 = arith.constant 0 : index
    %c0_84 = arith.constant 0 : index
    %c0_85 = arith.constant 0 : index
    %179 = vector.load %arg17[%c0_83, %c0_84, %c0_85] : memref<4x128x512xbf16, #tpu.memory_space<vmem>>, vector<1x128x512xbf16>
    %180 = vector.shape_cast %179 : vector<1x128x512xbf16> to vector<128x512xbf16>
    %cst_86 = arith.constant dense<0.000000e+00> : vector<8x512xf32>
    %181 = tpu.matmul %178, %180, %cst_86 {dimension_numbers = #tpu.dot_dimension_numbers<[1], [0], [0], [1], [0, 0, 1, 1], [], []>} : vector<8x128xbf16>, vector<128x512xbf16>, vector<8x512xf32> -> vector<8x512xf32>
    %182 = arith.addf %177, %181 : vector<8x512xf32>
    %183 = vector.extract_strided_slice %182 {offsets = [0, 0], sizes = [8, 128], strides = [1, 1]} : vector<8x512xf32> to vector<8x128xf32>
    %cst_87 = arith.constant 5.000000e-01 : f32
    %184 = vector.broadcast %cst_87 : f32 to vector<8x128xf32>
    %185 = arith.mulf %184, %183 : vector<8x128xf32>
    %186 = math.tanh %185 : vector<8x128xf32>
    %cst_88 = arith.constant 5.000000e-01 : f32
    %187 = vector.broadcast %cst_88 : f32 to vector<8x128xf32>
    %188 = arith.mulf %187, %186 : vector<8x128xf32>
    %cst_89 = arith.constant 5.000000e-01 : f32
    %189 = vector.broadcast %cst_89 : f32 to vector<8x128xf32>
    %190 = arith.addf %188, %189 : vector<8x128xf32>
    %191 = vector.extract_strided_slice %182 {offsets = [0, 128], sizes = [8, 128], strides = [1, 1]} : vector<8x512xf32> to vector<8x128xf32>
    %cst_90 = arith.constant 5.000000e-01 : f32
    %192 = vector.broadcast %cst_90 : f32 to vector<8x128xf32>
    %193 = arith.mulf %192, %191 : vector<8x128xf32>
    %194 = math.tanh %193 : vector<8x128xf32>
    %cst_91 = arith.constant 5.000000e-01 : f32
    %195 = vector.broadcast %cst_91 : f32 to vector<8x128xf32>
    %196 = arith.mulf %195, %194 : vector<8x128xf32>
    %cst_92 = arith.constant 5.000000e-01 : f32
    %197 = vector.broadcast %cst_92 : f32 to vector<8x128xf32>
    %198 = arith.addf %196, %197 : vector<8x128xf32>
    %199 = vector.extract_strided_slice %182 {offsets = [0, 256], sizes = [8, 128], strides = [1, 1]} : vector<8x512xf32> to vector<8x128xf32>
    %200 = math.tanh %199 : vector<8x128xf32>
    %201 = vector.extract_strided_slice %182 {offsets = [0, 384], sizes = [8, 128], strides = [1, 1]} : vector<8x512xf32> to vector<8x128xf32>
    %cst_93 = arith.constant 5.000000e-01 : f32
    %202 = vector.broadcast %cst_93 : f32 to vector<8x128xf32>
    %203 = arith.mulf %202, %201 : vector<8x128xf32>
    %204 = math.tanh %203 : vector<8x128xf32>
    %cst_94 = arith.constant 5.000000e-01 : f32
    %205 = vector.broadcast %cst_94 : f32 to vector<8x128xf32>
    %206 = arith.mulf %205, %204 : vector<8x128xf32>
    %cst_95 = arith.constant 5.000000e-01 : f32
    %207 = vector.broadcast %cst_95 : f32 to vector<8x128xf32>
    %208 = arith.addf %206, %207 : vector<8x128xf32>
    %209 = arith.mulf %198, %135 : vector<8x128xf32>
    %210 = arith.mulf %190, %200 : vector<8x128xf32>
    %211 = arith.addf %209, %210 : vector<8x128xf32>
    %212 = math.tanh %211 : vector<8x128xf32>
    %213 = arith.mulf %208, %212 : vector<8x128xf32>
    %c40 = arith.constant 40 : index
    %c512_96 = arith.constant 512 : index
    %214 = vector.load %arg13[%c40, %c512_96] : memref<64x1024xf32, #tpu.memory_space<vmem>>, vector<8x512xf32>
    %215 = arith.truncf %174 : vector<8x128xf32> to vector<8x128xbf16>
    %c1_97 = arith.constant 1 : index
    %c0_98 = arith.constant 0 : index
    %c0_99 = arith.constant 0 : index
    %216 = vector.load %arg17[%c1_97, %c0_98, %c0_99] : memref<4x128x512xbf16, #tpu.memory_space<vmem>>, vector<1x128x512xbf16>
    %217 = vector.shape_cast %216 : vector<1x128x512xbf16> to vector<128x512xbf16>
    %cst_100 = arith.constant dense<0.000000e+00> : vector<8x512xf32>
    %218 = tpu.matmul %215, %217, %cst_100 {dimension_numbers = #tpu.dot_dimension_numbers<[1], [0], [0], [1], [0, 0, 1, 1], [], []>} : vector<8x128xbf16>, vector<128x512xbf16>, vector<8x512xf32> -> vector<8x512xf32>
    %219 = arith.addf %214, %218 : vector<8x512xf32>
    %220 = vector.extract_strided_slice %219 {offsets = [0, 0], sizes = [8, 128], strides = [1, 1]} : vector<8x512xf32> to vector<8x128xf32>
    %cst_101 = arith.constant 5.000000e-01 : f32
    %221 = vector.broadcast %cst_101 : f32 to vector<8x128xf32>
    %222 = arith.mulf %221, %220 : vector<8x128xf32>
    %223 = math.tanh %222 : vector<8x128xf32>
    %cst_102 = arith.constant 5.000000e-01 : f32
    %224 = vector.broadcast %cst_102 : f32 to vector<8x128xf32>
    %225 = arith.mulf %224, %223 : vector<8x128xf32>
    %cst_103 = arith.constant 5.000000e-01 : f32
    %226 = vector.broadcast %cst_103 : f32 to vector<8x128xf32>
    %227 = arith.addf %225, %226 : vector<8x128xf32>
    %228 = vector.extract_strided_slice %219 {offsets = [0, 128], sizes = [8, 128], strides = [1, 1]} : vector<8x512xf32> to vector<8x128xf32>
    %cst_104 = arith.constant 5.000000e-01 : f32
    %229 = vector.broadcast %cst_104 : f32 to vector<8x128xf32>
    %230 = arith.mulf %229, %228 : vector<8x128xf32>
    %231 = math.tanh %230 : vector<8x128xf32>
    %cst_105 = arith.constant 5.000000e-01 : f32
    %232 = vector.broadcast %cst_105 : f32 to vector<8x128xf32>
    %233 = arith.mulf %232, %231 : vector<8x128xf32>
    %cst_106 = arith.constant 5.000000e-01 : f32
    %234 = vector.broadcast %cst_106 : f32 to vector<8x128xf32>
    %235 = arith.addf %233, %234 : vector<8x128xf32>
    %236 = vector.extract_strided_slice %219 {offsets = [0, 256], sizes = [8, 128], strides = [1, 1]} : vector<8x512xf32> to vector<8x128xf32>
    %237 = math.tanh %236 : vector<8x128xf32>
    %238 = vector.extract_strided_slice %219 {offsets = [0, 384], sizes = [8, 128], strides = [1, 1]} : vector<8x512xf32> to vector<8x128xf32>
    %cst_107 = arith.constant 5.000000e-01 : f32
    %239 = vector.broadcast %cst_107 : f32 to vector<8x128xf32>
    %240 = arith.mulf %239, %238 : vector<8x128xf32>
    %241 = math.tanh %240 : vector<8x128xf32>
    %cst_108 = arith.constant 5.000000e-01 : f32
    %242 = vector.broadcast %cst_108 : f32 to vector<8x128xf32>
    %243 = arith.mulf %242, %241 : vector<8x128xf32>
    %cst_109 = arith.constant 5.000000e-01 : f32
    %244 = vector.broadcast %cst_109 : f32 to vector<8x128xf32>
    %245 = arith.addf %243, %244 : vector<8x128xf32>
    %246 = arith.mulf %235, %172 : vector<8x128xf32>
    %247 = arith.mulf %227, %237 : vector<8x128xf32>
    %248 = arith.addf %246, %247 : vector<8x128xf32>
    %249 = math.tanh %248 : vector<8x128xf32>
    %250 = arith.mulf %245, %249 : vector<8x128xf32>
    %c16_110 = arith.constant 16 : index
    %c0_111 = arith.constant 0 : index
    %251 = vector.load %arg15[%c16_110, %c0_111] : memref<64x256xf32, #tpu.memory_space<vmem>>, vector<8x128xf32>
    tpu.vector_store %arg15[%c16_110, %c0_111], %213 {strides = array<i32>} : memref<64x256xf32, #tpu.memory_space<vmem>>, vector<8x128xf32>,
    %c40_112 = arith.constant 40 : index
    %c128_113 = arith.constant 128 : index
    %252 = vector.load %arg15[%c40_112, %c128_113] : memref<64x256xf32, #tpu.memory_space<vmem>>, vector<8x128xf32>
    tpu.vector_store %arg15[%c40_112, %c128_113], %250 {strides = array<i32>} : memref<64x256xf32, #tpu.memory_space<vmem>>, vector<8x128xf32>,
    %c24 = arith.constant 24 : index
    %c0_114 = arith.constant 0 : index
    %253 = vector.load %arg13[%c24, %c0_114] : memref<64x1024xf32, #tpu.memory_space<vmem>>, vector<8x512xf32>
    %254 = arith.truncf %213 : vector<8x128xf32> to vector<8x128xbf16>
    %c0_115 = arith.constant 0 : index
    %c0_116 = arith.constant 0 : index
    %c0_117 = arith.constant 0 : index
    %255 = vector.load %arg17[%c0_115, %c0_116, %c0_117] : memref<4x128x512xbf16, #tpu.memory_space<vmem>>, vector<1x128x512xbf16>
    %256 = vector.shape_cast %255 : vector<1x128x512xbf16> to vector<128x512xbf16>
    %cst_118 = arith.constant dense<0.000000e+00> : vector<8x512xf32>
    %257 = tpu.matmul %254, %256, %cst_118 {dimension_numbers = #tpu.dot_dimension_numbers<[1], [0], [0], [1], [0, 0, 1, 1], [], []>} : vector<8x128xbf16>, vector<128x512xbf16>, vector<8x512xf32> -> vector<8x512xf32>
    %258 = arith.addf %253, %257 : vector<8x512xf32>
    %259 = vector.extract_strided_slice %258 {offsets = [0, 0], sizes = [8, 128], strides = [1, 1]} : vector<8x512xf32> to vector<8x128xf32>
    %cst_119 = arith.constant 5.000000e-01 : f32
    %260 = vector.broadcast %cst_119 : f32 to vector<8x128xf32>
    %261 = arith.mulf %260, %259 : vector<8x128xf32>
    %262 = math.tanh %261 : vector<8x128xf32>
    %cst_120 = arith.constant 5.000000e-01 : f32
    %263 = vector.broadcast %cst_120 : f32 to vector<8x128xf32>
    %264 = arith.mulf %263, %262 : vector<8x128xf32>
    %cst_121 = arith.constant 5.000000e-01 : f32
    %265 = vector.broadcast %cst_121 : f32 to vector<8x128xf32>
    %266 = arith.addf %264, %265 : vector<8x128xf32>
    %267 = vector.extract_strided_slice %258 {offsets = [0, 128], sizes = [8, 128], strides = [1, 1]} : vector<8x512xf32> to vector<8x128xf32>
    %cst_122 = arith.constant 5.000000e-01 : f32
    %268 = vector.broadcast %cst_122 : f32 to vector<8x128xf32>
    %269 = arith.mulf %268, %267 : vector<8x128xf32>
    %270 = math.tanh %269 : vector<8x128xf32>
    %cst_123 = arith.constant 5.000000e-01 : f32
    %271 = vector.broadcast %cst_123 : f32 to vector<8x128xf32>
    %272 = arith.mulf %271, %270 : vector<8x128xf32>
    %cst_124 = arith.constant 5.000000e-01 : f32
    %273 = vector.broadcast %cst_124 : f32 to vector<8x128xf32>
    %274 = arith.addf %272, %273 : vector<8x128xf32>
    %275 = vector.extract_strided_slice %258 {offsets = [0, 256], sizes = [8, 128], strides = [1, 1]} : vector<8x512xf32> to vector<8x128xf32>
    %276 = math.tanh %275 : vector<8x128xf32>
    %277 = vector.extract_strided_slice %258 {offsets = [0, 384], sizes = [8, 128], strides = [1, 1]} : vector<8x512xf32> to vector<8x128xf32>
    %cst_125 = arith.constant 5.000000e-01 : f32
    %278 = vector.broadcast %cst_125 : f32 to vector<8x128xf32>
    %279 = arith.mulf %278, %277 : vector<8x128xf32>
    %280 = math.tanh %279 : vector<8x128xf32>
    %cst_126 = arith.constant 5.000000e-01 : f32
    %281 = vector.broadcast %cst_126 : f32 to vector<8x128xf32>
    %282 = arith.mulf %281, %280 : vector<8x128xf32>
    %cst_127 = arith.constant 5.000000e-01 : f32
    %283 = vector.broadcast %cst_127 : f32 to vector<8x128xf32>
    %284 = arith.addf %282, %283 : vector<8x128xf32>
    %285 = arith.mulf %274, %211 : vector<8x128xf32>
    %286 = arith.mulf %266, %276 : vector<8x128xf32>
    %287 = arith.addf %285, %286 : vector<8x128xf32>
    %288 = math.tanh %287 : vector<8x128xf32>
    %289 = arith.mulf %284, %288 : vector<8x128xf32>
    %c32 = arith.constant 32 : index
    %c512_128 = arith.constant 512 : index
    %290 = vector.load %arg13[%c32, %c512_128] : memref<64x1024xf32, #tpu.memory_space<vmem>>, vector<8x512xf32>
    %291 = arith.truncf %250 : vector<8x128xf32> to vector<8x128xbf16>
    %c1_129 = arith.constant 1 : index
    %c0_130 = arith.constant 0 : index
    %c0_131 = arith.constant 0 : index
    %292 = vector.load %arg17[%c1_129, %c0_130, %c0_131] : memref<4x128x512xbf16, #tpu.memory_space<vmem>>, vector<1x128x512xbf16>
    %293 = vector.shape_cast %292 : vector<1x128x512xbf16> to vector<128x512xbf16>
    %cst_132 = arith.constant dense<0.000000e+00> : vector<8x512xf32>
    %294 = tpu.matmul %291, %293, %cst_132 {dimension_numbers = #tpu.dot_dimension_numbers<[1], [0], [0], [1], [0, 0, 1, 1], [], []>} : vector<8x128xbf16>, vector<128x512xbf16>, vector<8x512xf32> -> vector<8x512xf32>
    %295 = arith.addf %290, %294 : vector<8x512xf32>
    %296 = vector.extract_strided_slice %295 {offsets = [0, 0], sizes = [8, 128], strides = [1, 1]} : vector<8x512xf32> to vector<8x128xf32>
    %cst_133 = arith.constant 5.000000e-01 : f32
    %297 = vector.broadcast %cst_133 : f32 to vector<8x128xf32>
    %298 = arith.mulf %297, %296 : vector<8x128xf32>
    %299 = math.tanh %298 : vector<8x128xf32>
    %cst_134 = arith.constant 5.000000e-01 : f32
    %300 = vector.broadcast %cst_134 : f32 to vector<8x128xf32>
    %301 = arith.mulf %300, %299 : vector<8x128xf32>
    %cst_135 = arith.constant 5.000000e-01 : f32
    %302 = vector.broadcast %cst_135 : f32 to vector<8x128xf32>
    %303 = arith.addf %301, %302 : vector<8x128xf32>
    %304 = vector.extract_strided_slice %295 {offsets = [0, 128], sizes = [8, 128], strides = [1, 1]} : vector<8x512xf32> to vector<8x128xf32>
    %cst_136 = arith.constant 5.000000e-01 : f32
    %305 = vector.broadcast %cst_136 : f32 to vector<8x128xf32>
    %306 = arith.mulf %305, %304 : vector<8x128xf32>
    %307 = math.tanh %306 : vector<8x128xf32>
    %cst_137 = arith.constant 5.000000e-01 : f32
    %308 = vector.broadcast %cst_137 : f32 to vector<8x128xf32>
    %309 = arith.mulf %308, %307 : vector<8x128xf32>
    %cst_138 = arith.constant 5.000000e-01 : f32
    %310 = vector.broadcast %cst_138 : f32 to vector<8x128xf32>
    %311 = arith.addf %309, %310 : vector<8x128xf32>
    %312 = vector.extract_strided_slice %295 {offsets = [0, 256], sizes = [8, 128], strides = [1, 1]} : vector<8x512xf32> to vector<8x128xf32>
    %313 = math.tanh %312 : vector<8x128xf32>
    %314 = vector.extract_strided_slice %295 {offsets = [0, 384], sizes = [8, 128], strides = [1, 1]} : vector<8x512xf32> to vector<8x128xf32>
    %cst_139 = arith.constant 5.000000e-01 : f32
    %315 = vector.broadcast %cst_139 : f32 to vector<8x128xf32>
    %316 = arith.mulf %315, %314 : vector<8x128xf32>
    %317 = math.tanh %316 : vector<8x128xf32>
    %cst_140 = arith.constant 5.000000e-01 : f32
    %318 = vector.broadcast %cst_140 : f32 to vector<8x128xf32>
    %319 = arith.mulf %318, %317 : vector<8x128xf32>
    %cst_141 = arith.constant 5.000000e-01 : f32
    %320 = vector.broadcast %cst_141 : f32 to vector<8x128xf32>
    %321 = arith.addf %319, %320 : vector<8x128xf32>
    %322 = arith.mulf %311, %248 : vector<8x128xf32>
    %323 = arith.mulf %303, %313 : vector<8x128xf32>
    %324 = arith.addf %322, %323 : vector<8x128xf32>
    %325 = math.tanh %324 : vector<8x128xf32>
    %326 = arith.mulf %321, %325 : vector<8x128xf32>
    %c24_142 = arith.constant 24 : index
    %c0_143 = arith.constant 0 : index
    %327 = vector.load %arg15[%c24_142, %c0_143] : memref<64x256xf32, #tpu.memory_space<vmem>>, vector<8x128xf32>
    tpu.vector_store %arg15[%c24_142, %c0_143], %289 {strides = array<i32>} : memref<64x256xf32, #tpu.memory_space<vmem>>, vector<8x128xf32>,
    %c32_144 = arith.constant 32 : index
    %c128_145 = arith.constant 128 : index
    %328 = vector.load %arg15[%c32_144, %c128_145] : memref<64x256xf32, #tpu.memory_space<vmem>>, vector<8x128xf32>
    tpu.vector_store %arg15[%c32_144, %c128_145], %326 {strides = array<i32>} : memref<64x256xf32, #tpu.memory_space<vmem>>, vector<8x128xf32>,
    %c32_146 = arith.constant 32 : index
    %c0_147 = arith.constant 0 : index
    %329 = vector.load %arg13[%c32_146, %c0_147] : memref<64x1024xf32, #tpu.memory_space<vmem>>, vector<8x512xf32>
    %330 = arith.truncf %289 : vector<8x128xf32> to vector<8x128xbf16>
    %c0_148 = arith.constant 0 : index
    %c0_149 = arith.constant 0 : index
    %c0_150 = arith.constant 0 : index
    %331 = vector.load %arg17[%c0_148, %c0_149, %c0_150] : memref<4x128x512xbf16, #tpu.memory_space<vmem>>, vector<1x128x512xbf16>
    %332 = vector.shape_cast %331 : vector<1x128x512xbf16> to vector<128x512xbf16>
    %cst_151 = arith.constant dense<0.000000e+00> : vector<8x512xf32>
    %333 = tpu.matmul %330, %332, %cst_151 {dimension_numbers = #tpu.dot_dimension_numbers<[1], [0], [0], [1], [0, 0, 1, 1], [], []>} : vector<8x128xbf16>, vector<128x512xbf16>, vector<8x512xf32> -> vector<8x512xf32>
    %334 = arith.addf %329, %333 : vector<8x512xf32>
    %335 = vector.extract_strided_slice %334 {offsets = [0, 0], sizes = [8, 128], strides = [1, 1]} : vector<8x512xf32> to vector<8x128xf32>
    %cst_152 = arith.constant 5.000000e-01 : f32
    %336 = vector.broadcast %cst_152 : f32 to vector<8x128xf32>
    %337 = arith.mulf %336, %335 : vector<8x128xf32>
    %338 = math.tanh %337 : vector<8x128xf32>
    %cst_153 = arith.constant 5.000000e-01 : f32
    %339 = vector.broadcast %cst_153 : f32 to vector<8x128xf32>
    %340 = arith.mulf %339, %338 : vector<8x128xf32>
    %cst_154 = arith.constant 5.000000e-01 : f32
    %341 = vector.broadcast %cst_154 : f32 to vector<8x128xf32>
    %342 = arith.addf %340, %341 : vector<8x128xf32>
    %343 = vector.extract_strided_slice %334 {offsets = [0, 128], sizes = [8, 128], strides = [1, 1]} : vector<8x512xf32> to vector<8x128xf32>
    %cst_155 = arith.constant 5.000000e-01 : f32
    %344 = vector.broadcast %cst_155 : f32 to vector<8x128xf32>
    %345 = arith.mulf %344, %343 : vector<8x128xf32>
    %346 = math.tanh %345 : vector<8x128xf32>
    %cst_156 = arith.constant 5.000000e-01 : f32
    %347 = vector.broadcast %cst_156 : f32 to vector<8x128xf32>
    %348 = arith.mulf %347, %346 : vector<8x128xf32>
    %cst_157 = arith.constant 5.000000e-01 : f32
    %349 = vector.broadcast %cst_157 : f32 to vector<8x128xf32>
    %350 = arith.addf %348, %349 : vector<8x128xf32>
    %351 = vector.extract_strided_slice %334 {offsets = [0, 256], sizes = [8, 128], strides = [1, 1]} : vector<8x512xf32> to vector<8x128xf32>
    %352 = math.tanh %351 : vector<8x128xf32>
    %353 = vector.extract_strided_slice %334 {offsets = [0, 384], sizes = [8, 128], strides = [1, 1]} : vector<8x512xf32> to vector<8x128xf32>
    %cst_158 = arith.constant 5.000000e-01 : f32
    %354 = vector.broadcast %cst_158 : f32 to vector<8x128xf32>
    %355 = arith.mulf %354, %353 : vector<8x128xf32>
    %356 = math.tanh %355 : vector<8x128xf32>
    %cst_159 = arith.constant 5.000000e-01 : f32
    %357 = vector.broadcast %cst_159 : f32 to vector<8x128xf32>
    %358 = arith.mulf %357, %356 : vector<8x128xf32>
    %cst_160 = arith.constant 5.000000e-01 : f32
    %359 = vector.broadcast %cst_160 : f32 to vector<8x128xf32>
    %360 = arith.addf %358, %359 : vector<8x128xf32>
    %361 = arith.mulf %350, %287 : vector<8x128xf32>
    %362 = arith.mulf %342, %352 : vector<8x128xf32>
    %363 = arith.addf %361, %362 : vector<8x128xf32>
    %364 = math.tanh %363 : vector<8x128xf32>
    %365 = arith.mulf %360, %364 : vector<8x128xf32>
    %c24_161 = arith.constant 24 : index
    %c512_162 = arith.constant 512 : index
    %366 = vector.load %arg13[%c24_161, %c512_162] : memref<64x1024xf32, #tpu.memory_space<vmem>>, vector<8x512xf32>
    %367 = arith.truncf %326 : vector<8x128xf32> to vector<8x128xbf16>
    %c1_163 = arith.constant 1 : index
    %c0_164 = arith.constant 0 : index
    %c0_165 = arith.constant 0 : index
    %368 = vector.load %arg17[%c1_163, %c0_164, %c0_165] : memref<4x128x512xbf16, #tpu.memory_space<vmem>>, vector<1x128x512xbf16>
    %369 = vector.shape_cast %368 : vector<1x128x512xbf16> to vector<128x512xbf16>
    %cst_166 = arith.constant dense<0.000000e+00> : vector<8x512xf32>
    %370 = tpu.matmul %367, %369, %cst_166 {dimension_numbers = #tpu.dot_dimension_numbers<[1], [0], [0], [1], [0, 0, 1, 1], [], []>} : vector<8x128xbf16>, vector<128x512xbf16>, vector<8x512xf32> -> vector<8x512xf32>
    %371 = arith.addf %366, %370 : vector<8x512xf32>
    %372 = vector.extract_strided_slice %371 {offsets = [0, 0], sizes = [8, 128], strides = [1, 1]} : vector<8x512xf32> to vector<8x128xf32>
    %cst_167 = arith.constant 5.000000e-01 : f32
    %373 = vector.broadcast %cst_167 : f32 to vector<8x128xf32>
    %374 = arith.mulf %373, %372 : vector<8x128xf32>
    %375 = math.tanh %374 : vector<8x128xf32>
    %cst_168 = arith.constant 5.000000e-01 : f32
    %376 = vector.broadcast %cst_168 : f32 to vector<8x128xf32>
    %377 = arith.mulf %376, %375 : vector<8x128xf32>
    %cst_169 = arith.constant 5.000000e-01 : f32
    %378 = vector.broadcast %cst_169 : f32 to vector<8x128xf32>
    %379 = arith.addf %377, %378 : vector<8x128xf32>
    %380 = vector.extract_strided_slice %371 {offsets = [0, 128], sizes = [8, 128], strides = [1, 1]} : vector<8x512xf32> to vector<8x128xf32>
    %cst_170 = arith.constant 5.000000e-01 : f32
    %381 = vector.broadcast %cst_170 : f32 to vector<8x128xf32>
    %382 = arith.mulf %381, %380 : vector<8x128xf32>
    %383 = math.tanh %382 : vector<8x128xf32>
    %cst_171 = arith.constant 5.000000e-01 : f32
    %384 = vector.broadcast %cst_171 : f32 to vector<8x128xf32>
    %385 = arith.mulf %384, %383 : vector<8x128xf32>
    %cst_172 = arith.constant 5.000000e-01 : f32
    %386 = vector.broadcast %cst_172 : f32 to vector<8x128xf32>
    %387 = arith.addf %385, %386 : vector<8x128xf32>
    %388 = vector.extract_strided_slice %371 {offsets = [0, 256], sizes = [8, 128], strides = [1, 1]} : vector<8x512xf32> to vector<8x128xf32>
    %389 = math.tanh %388 : vector<8x128xf32>
    %390 = vector.extract_strided_slice %371 {offsets = [0, 384], sizes = [8, 128], strides = [1, 1]} : vector<8x512xf32> to vector<8x128xf32>
    %cst_173 = arith.constant 5.000000e-01 : f32
    %391 = vector.broadcast %cst_173 : f32 to vector<8x128xf32>
    %392 = arith.mulf %391, %390 : vector<8x128xf32>
    %393 = math.tanh %392 : vector<8x128xf32>
    %cst_174 = arith.constant 5.000000e-01 : f32
    %394 = vector.broadcast %cst_174 : f32 to vector<8x128xf32>
    %395 = arith.mulf %394, %393 : vector<8x128xf32>
    %cst_175 = arith.constant 5.000000e-01 : f32
    %396 = vector.broadcast %cst_175 : f32 to vector<8x128xf32>
    %397 = arith.addf %395, %396 : vector<8x128xf32>
    %398 = arith.mulf %387, %324 : vector<8x128xf32>
    %399 = arith.mulf %379, %389 : vector<8x128xf32>
    %400 = arith.addf %398, %399 : vector<8x128xf32>
    %401 = math.tanh %400 : vector<8x128xf32>
    %402 = arith.mulf %397, %401 : vector<8x128xf32>
    %c32_176 = arith.constant 32 : index
    %c0_177 = arith.constant 0 : index
    %403 = vector.load %arg15[%c32_176, %c0_177] : memref<64x256xf32, #tpu.memory_space<vmem>>, vector<8x128xf32>
    tpu.vector_store %arg15[%c32_176, %c0_177], %365 {strides = array<i32>} : memref<64x256xf32, #tpu.memory_space<vmem>>, vector<8x128xf32>,
    %c24_178 = arith.constant 24 : index
    %c128_179 = arith.constant 128 : index
    %404 = vector.load %arg15[%c24_178, %c128_179] : memref<64x256xf32, #tpu.memory_space<vmem>>, vector<8x128xf32>
    tpu.vector_store %arg15[%c24_178, %c128_179], %402 {strides = array<i32>} : memref<64x256xf32, #tpu.memory_space<vmem>>, vector<8x128xf32>,
    %c40_180 = arith.constant 40 : index
    %c0_181 = arith.constant 0 : index
    %405 = vector.load %arg13[%c40_180, %c0_181] : memref<64x1024xf32, #tpu.memory_space<vmem>>, vector<8x512xf32>
    %406 = arith.truncf %365 : vector<8x128xf32> to vector<8x128xbf16>
    %c0_182 = arith.constant 0 : index
    %c0_183 = arith.constant 0 : index
    %c0_184 = arith.constant 0 : index
    %407 = vector.load %arg17[%c0_182, %c0_183, %c0_184] : memref<4x128x512xbf16, #tpu.memory_space<vmem>>, vector<1x128x512xbf16>
    %408 = vector.shape_cast %407 : vector<1x128x512xbf16> to vector<128x512xbf16>
    %cst_185 = arith.constant dense<0.000000e+00> : vector<8x512xf32>
    %409 = tpu.matmul %406, %408, %cst_185 {dimension_numbers = #tpu.dot_dimension_numbers<[1], [0], [0], [1], [0, 0, 1, 1], [], []>} : vector<8x128xbf16>, vector<128x512xbf16>, vector<8x512xf32> -> vector<8x512xf32>
    %410 = arith.addf %405, %409 : vector<8x512xf32>
    %411 = vector.extract_strided_slice %410 {offsets = [0, 0], sizes = [8, 128], strides = [1, 1]} : vector<8x512xf32> to vector<8x128xf32>
    %cst_186 = arith.constant 5.000000e-01 : f32
    %412 = vector.broadcast %cst_186 : f32 to vector<8x128xf32>
    %413 = arith.mulf %412, %411 : vector<8x128xf32>
    %414 = math.tanh %413 : vector<8x128xf32>
    %cst_187 = arith.constant 5.000000e-01 : f32
    %415 = vector.broadcast %cst_187 : f32 to vector<8x128xf32>
    %416 = arith.mulf %415, %414 : vector<8x128xf32>
    %cst_188 = arith.constant 5.000000e-01 : f32
    %417 = vector.broadcast %cst_188 : f32 to vector<8x128xf32>
    %418 = arith.addf %416, %417 : vector<8x128xf32>
    %419 = vector.extract_strided_slice %410 {offsets = [0, 128], sizes = [8, 128], strides = [1, 1]} : vector<8x512xf32> to vector<8x128xf32>
    %cst_189 = arith.constant 5.000000e-01 : f32
    %420 = vector.broadcast %cst_189 : f32 to vector<8x128xf32>
    %421 = arith.mulf %420, %419 : vector<8x128xf32>
    %422 = math.tanh %421 : vector<8x128xf32>
    %cst_190 = arith.constant 5.000000e-01 : f32
    %423 = vector.broadcast %cst_190 : f32 to vector<8x128xf32>
    %424 = arith.mulf %423, %422 : vector<8x128xf32>
    %cst_191 = arith.constant 5.000000e-01 : f32
    %425 = vector.broadcast %cst_191 : f32 to vector<8x128xf32>
    %426 = arith.addf %424, %425 : vector<8x128xf32>
    %427 = vector.extract_strided_slice %410 {offsets = [0, 256], sizes = [8, 128], strides = [1, 1]} : vector<8x512xf32> to vector<8x128xf32>
    %428 = math.tanh %427 : vector<8x128xf32>
    %429 = vector.extract_strided_slice %410 {offsets = [0, 384], sizes = [8, 128], strides = [1, 1]} : vector<8x512xf32> to vector<8x128xf32>
    %cst_192 = arith.constant 5.000000e-01 : f32
    %430 = vector.broadcast %cst_192 : f32 to vector<8x128xf32>
    %431 = arith.mulf %430, %429 : vector<8x128xf32>
    %432 = math.tanh %431 : vector<8x128xf32>
    %cst_193 = arith.constant 5.000000e-01 : f32
    %433 = vector.broadcast %cst_193 : f32 to vector<8x128xf32>
    %434 = arith.mulf %433, %432 : vector<8x128xf32>
    %cst_194 = arith.constant 5.000000e-01 : f32
    %435 = vector.broadcast %cst_194 : f32 to vector<8x128xf32>
    %436 = arith.addf %434, %435 : vector<8x128xf32>
    %437 = arith.mulf %426, %363 : vector<8x128xf32>
    %438 = arith.mulf %418, %428 : vector<8x128xf32>
    %439 = arith.addf %437, %438 : vector<8x128xf32>
    %440 = math.tanh %439 : vector<8x128xf32>
    %441 = arith.mulf %436, %440 : vector<8x128xf32>
    %c16_195 = arith.constant 16 : index
    %c512_196 = arith.constant 512 : index
    %442 = vector.load %arg13[%c16_195, %c512_196] : memref<64x1024xf32, #tpu.memory_space<vmem>>, vector<8x512xf32>
    %443 = arith.truncf %402 : vector<8x128xf32> to vector<8x128xbf16>
    %c1_197 = arith.constant 1 : index
    %c0_198 = arith.constant 0 : index
    %c0_199 = arith.constant 0 : index
    %444 = vector.load %arg17[%c1_197, %c0_198, %c0_199] : memref<4x128x512xbf16, #tpu.memory_space<vmem>>, vector<1x128x512xbf16>
    %445 = vector.shape_cast %444 : vector<1x128x512xbf16> to vector<128x512xbf16>
    %cst_200 = arith.constant dense<0.000000e+00> : vector<8x512xf32>
    %446 = tpu.matmul %443, %445, %cst_200 {dimension_numbers = #tpu.dot_dimension_numbers<[1], [0], [0], [1], [0, 0, 1, 1], [], []>} : vector<8x128xbf16>, vector<128x512xbf16>, vector<8x512xf32> -> vector<8x512xf32>
    %447 = arith.addf %442, %446 : vector<8x512xf32>
    %448 = vector.extract_strided_slice %447 {offsets = [0, 0], sizes = [8, 128], strides = [1, 1]} : vector<8x512xf32> to vector<8x128xf32>
    %cst_201 = arith.constant 5.000000e-01 : f32
    %449 = vector.broadcast %cst_201 : f32 to vector<8x128xf32>
    %450 = arith.mulf %449, %448 : vector<8x128xf32>
    %451 = math.tanh %450 : vector<8x128xf32>
    %cst_202 = arith.constant 5.000000e-01 : f32
    %452 = vector.broadcast %cst_202 : f32 to vector<8x128xf32>
    %453 = arith.mulf %452, %451 : vector<8x128xf32>
    %cst_203 = arith.constant 5.000000e-01 : f32
    %454 = vector.broadcast %cst_203 : f32 to vector<8x128xf32>
    %455 = arith.addf %453, %454 : vector<8x128xf32>
    %456 = vector.extract_strided_slice %447 {offsets = [0, 128], sizes = [8, 128], strides = [1, 1]} : vector<8x512xf32> to vector<8x128xf32>
    %cst_204 = arith.constant 5.000000e-01 : f32
    %457 = vector.broadcast %cst_204 : f32 to vector<8x128xf32>
    %458 = arith.mulf %457, %456 : vector<8x128xf32>
    %459 = math.tanh %458 : vector<8x128xf32>
    %cst_205 = arith.constant 5.000000e-01 : f32
    %460 = vector.broadcast %cst_205 : f32 to vector<8x128xf32>
    %461 = arith.mulf %460, %459 : vector<8x128xf32>
    %cst_206 = arith.constant 5.000000e-01 : f32
    %462 = vector.broadcast %cst_206 : f32 to vector<8x128xf32>
    %463 = arith.addf %461, %462 : vector<8x128xf32>
    %464 = vector.extract_strided_slice %447 {offsets = [0, 256], sizes = [8, 128], strides = [1, 1]} : vector<8x512xf32> to vector<8x128xf32>
    %465 = math.tanh %464 : vector<8x128xf32>
    %466 = vector.extract_strided_slice %447 {offsets = [0, 384], sizes = [8, 128], strides = [1, 1]} : vector<8x512xf32> to vector<8x128xf32>
    %cst_207 = arith.constant 5.000000e-01 : f32
    %467 = vector.broadcast %cst_207 : f32 to vector<8x128xf32>
    %468 = arith.mulf %467, %466 : vector<8x128xf32>
    %469 = math.tanh %468 : vector<8x128xf32>
    %cst_208 = arith.constant 5.000000e-01 : f32
    %470 = vector.broadcast %cst_208 : f32 to vector<8x128xf32>
    %471 = arith.mulf %470, %469 : vector<8x128xf32>
    %cst_209 = arith.constant 5.000000e-01 : f32
    %472 = vector.broadcast %cst_209 : f32 to vector<8x128xf32>
    %473 = arith.addf %471, %472 : vector<8x128xf32>
    %474 = arith.mulf %463, %400 : vector<8x128xf32>
    %475 = arith.mulf %455, %465 : vector<8x128xf32>
    %476 = arith.addf %474, %475 : vector<8x128xf32>
    %477 = math.tanh %476 : vector<8x128xf32>
    %478 = arith.mulf %473, %477 : vector<8x128xf32>
    %c40_210 = arith.constant 40 : index
    %c0_211 = arith.constant 0 : index
    %479 = vector.load %arg15[%c40_210, %c0_211] : memref<64x256xf32, #tpu.memory_space<vmem>>, vector<8x128xf32>
    tpu.vector_store %arg15[%c40_210, %c0_211], %441 {strides = array<i32>} : memref<64x256xf32, #tpu.memory_space<vmem>>, vector<8x128xf32>,
    %c16_212 = arith.constant 16 : index
    %c128_213 = arith.constant 128 : index
    %480 = vector.load %arg15[%c16_212, %c128_213] : memref<64x256xf32, #tpu.memory_space<vmem>>, vector<8x128xf32>
    tpu.vector_store %arg15[%c16_212, %c128_213], %478 {strides = array<i32>} : memref<64x256xf32, #tpu.memory_space<vmem>>, vector<8x128xf32>,
    %c48_214 = arith.constant 48 : index
    %c0_215 = arith.constant 0 : index
    %481 = vector.load %arg13[%c48_214, %c0_215] : memref<64x1024xf32, #tpu.memory_space<vmem>>, vector<8x512xf32>
    %482 = arith.truncf %441 : vector<8x128xf32> to vector<8x128xbf16>
    %c0_216 = arith.constant 0 : index
    %c0_217 = arith.constant 0 : index
    %c0_218 = arith.constant 0 : index
    %483 = vector.load %arg17[%c0_216, %c0_217, %c0_218] : memref<4x128x512xbf16, #tpu.memory_space<vmem>>, vector<1x128x512xbf16>
    %484 = vector.shape_cast %483 : vector<1x128x512xbf16> to vector<128x512xbf16>
    %cst_219 = arith.constant dense<0.000000e+00> : vector<8x512xf32>
    %485 = tpu.matmul %482, %484, %cst_219 {dimension_numbers = #tpu.dot_dimension_numbers<[1], [0], [0], [1], [0, 0, 1, 1], [], []>} : vector<8x128xbf16>, vector<128x512xbf16>, vector<8x512xf32> -> vector<8x512xf32>
    %486 = arith.addf %481, %485 : vector<8x512xf32>
    %487 = vector.extract_strided_slice %486 {offsets = [0, 0], sizes = [8, 128], strides = [1, 1]} : vector<8x512xf32> to vector<8x128xf32>
    %cst_220 = arith.constant 5.000000e-01 : f32
    %488 = vector.broadcast %cst_220 : f32 to vector<8x128xf32>
    %489 = arith.mulf %488, %487 : vector<8x128xf32>
    %490 = math.tanh %489 : vector<8x128xf32>
    %cst_221 = arith.constant 5.000000e-01 : f32
    %491 = vector.broadcast %cst_221 : f32 to vector<8x128xf32>
    %492 = arith.mulf %491, %490 : vector<8x128xf32>
    %cst_222 = arith.constant 5.000000e-01 : f32
    %493 = vector.broadcast %cst_222 : f32 to vector<8x128xf32>
    %494 = arith.addf %492, %493 : vector<8x128xf32>
    %495 = vector.extract_strided_slice %486 {offsets = [0, 128], sizes = [8, 128], strides = [1, 1]} : vector<8x512xf32> to vector<8x128xf32>
    %cst_223 = arith.constant 5.000000e-01 : f32
    %496 = vector.broadcast %cst_223 : f32 to vector<8x128xf32>
    %497 = arith.mulf %496, %495 : vector<8x128xf32>
    %498 = math.tanh %497 : vector<8x128xf32>
    %cst_224 = arith.constant 5.000000e-01 : f32
    %499 = vector.broadcast %cst_224 : f32 to vector<8x128xf32>
    %500 = arith.mulf %499, %498 : vector<8x128xf32>
    %cst_225 = arith.constant 5.000000e-01 : f32
    %501 = vector.broadcast %cst_225 : f32 to vector<8x128xf32>
    %502 = arith.addf %500, %501 : vector<8x128xf32>
    %503 = vector.extract_strided_slice %486 {offsets = [0, 256], sizes = [8, 128], strides = [1, 1]} : vector<8x512xf32> to vector<8x128xf32>
    %504 = math.tanh %503 : vector<8x128xf32>
    %505 = vector.extract_strided_slice %486 {offsets = [0, 384], sizes = [8, 128], strides = [1, 1]} : vector<8x512xf32> to vector<8x128xf32>
    %cst_226 = arith.constant 5.000000e-01 : f32
    %506 = vector.broadcast %cst_226 : f32 to vector<8x128xf32>
    %507 = arith.mulf %506, %505 : vector<8x128xf32>
    %508 = math.tanh %507 : vector<8x128xf32>
    %cst_227 = arith.constant 5.000000e-01 : f32
    %509 = vector.broadcast %cst_227 : f32 to vector<8x128xf32>
    %510 = arith.mulf %509, %508 : vector<8x128xf32>
    %cst_228 = arith.constant 5.000000e-01 : f32
    %511 = vector.broadcast %cst_228 : f32 to vector<8x128xf32>
    %512 = arith.addf %510, %511 : vector<8x128xf32>
    %513 = arith.mulf %502, %439 : vector<8x128xf32>
    %514 = arith.mulf %494, %504 : vector<8x128xf32>
    %515 = arith.addf %513, %514 : vector<8x128xf32>
    %516 = math.tanh %515 : vector<8x128xf32>
    %517 = arith.mulf %512, %516 : vector<8x128xf32>
    %c8_229 = arith.constant 8 : index
    %c512_230 = arith.constant 512 : index
    %518 = vector.load %arg13[%c8_229, %c512_230] : memref<64x1024xf32, #tpu.memory_space<vmem>>, vector<8x512xf32>
    %519 = arith.truncf %478 : vector<8x128xf32> to vector<8x128xbf16>
    %c1_231 = arith.constant 1 : index
    %c0_232 = arith.constant 0 : index
    %c0_233 = arith.constant 0 : index
    %520 = vector.load %arg17[%c1_231, %c0_232, %c0_233] : memref<4x128x512xbf16, #tpu.memory_space<vmem>>, vector<1x128x512xbf16>
    %521 = vector.shape_cast %520 : vector<1x128x512xbf16> to vector<128x512xbf16>
    %cst_234 = arith.constant dense<0.000000e+00> : vector<8x512xf32>
    %522 = tpu.matmul %519, %521, %cst_234 {dimension_numbers = #tpu.dot_dimension_numbers<[1], [0], [0], [1], [0, 0, 1, 1], [], []>} : vector<8x128xbf16>, vector<128x512xbf16>, vector<8x512xf32> -> vector<8x512xf32>
    %523 = arith.addf %518, %522 : vector<8x512xf32>
    %524 = vector.extract_strided_slice %523 {offsets = [0, 0], sizes = [8, 128], strides = [1, 1]} : vector<8x512xf32> to vector<8x128xf32>
    %cst_235 = arith.constant 5.000000e-01 : f32
    %525 = vector.broadcast %cst_235 : f32 to vector<8x128xf32>
    %526 = arith.mulf %525, %524 : vector<8x128xf32>
    %527 = math.tanh %526 : vector<8x128xf32>
    %cst_236 = arith.constant 5.000000e-01 : f32
    %528 = vector.broadcast %cst_236 : f32 to vector<8x128xf32>
    %529 = arith.mulf %528, %527 : vector<8x128xf32>
    %cst_237 = arith.constant 5.000000e-01 : f32
    %530 = vector.broadcast %cst_237 : f32 to vector<8x128xf32>
    %531 = arith.addf %529, %530 : vector<8x128xf32>
    %532 = vector.extract_strided_slice %523 {offsets = [0, 128], sizes = [8, 128], strides = [1, 1]} : vector<8x512xf32> to vector<8x128xf32>
    %cst_238 = arith.constant 5.000000e-01 : f32
    %533 = vector.broadcast %cst_238 : f32 to vector<8x128xf32>
    %534 = arith.mulf %533, %532 : vector<8x128xf32>
    %535 = math.tanh %534 : vector<8x128xf32>
    %cst_239 = arith.constant 5.000000e-01 : f32
    %536 = vector.broadcast %cst_239 : f32 to vector<8x128xf32>
    %537 = arith.mulf %536, %535 : vector<8x128xf32>
    %cst_240 = arith.constant 5.000000e-01 : f32
    %538 = vector.broadcast %cst_240 : f32 to vector<8x128xf32>
    %539 = arith.addf %537, %538 : vector<8x128xf32>
    %540 = vector.extract_strided_slice %523 {offsets = [0, 256], sizes = [8, 128], strides = [1, 1]} : vector<8x512xf32> to vector<8x128xf32>
    %541 = math.tanh %540 : vector<8x128xf32>
    %542 = vector.extract_strided_slice %523 {offsets = [0, 384], sizes = [8, 128], strides = [1, 1]} : vector<8x512xf32> to vector<8x128xf32>
    %cst_241 = arith.constant 5.000000e-01 : f32
    %543 = vector.broadcast %cst_241 : f32 to vector<8x128xf32>
    %544 = arith.mulf %543, %542 : vector<8x128xf32>
    %545 = math.tanh %544 : vector<8x128xf32>
    %cst_242 = arith.constant 5.000000e-01 : f32
    %546 = vector.broadcast %cst_242 : f32 to vector<8x128xf32>
    %547 = arith.mulf %546, %545 : vector<8x128xf32>
    %cst_243 = arith.constant 5.000000e-01 : f32
    %548 = vector.broadcast %cst_243 : f32 to vector<8x128xf32>
    %549 = arith.addf %547, %548 : vector<8x128xf32>
    %550 = arith.mulf %539, %476 : vector<8x128xf32>
    %551 = arith.mulf %531, %541 : vector<8x128xf32>
    %552 = arith.addf %550, %551 : vector<8x128xf32>
    %553 = math.tanh %552 : vector<8x128xf32>
    %554 = arith.mulf %549, %553 : vector<8x128xf32>
    %c48_244 = arith.constant 48 : index
    %c0_245 = arith.constant 0 : index
    %555 = vector.load %arg15[%c48_244, %c0_245] : memref<64x256xf32, #tpu.memory_space<vmem>>, vector<8x128xf32>
    tpu.vector_store %arg15[%c48_244, %c0_245], %517 {strides = array<i32>} : memref<64x256xf32, #tpu.memory_space<vmem>>, vector<8x128xf32>,
    %c8_246 = arith.constant 8 : index
    %c128_247 = arith.constant 128 : index
    %556 = vector.load %arg15[%c8_246, %c128_247] : memref<64x256xf32, #tpu.memory_space<vmem>>, vector<8x128xf32>
    tpu.vector_store %arg15[%c8_246, %c128_247], %554 {strides = array<i32>} : memref<64x256xf32, #tpu.memory_space<vmem>>, vector<8x128xf32>,
    %c56_248 = arith.constant 56 : index
    %c0_249 = arith.constant 0 : index
    %557 = vector.load %arg13[%c56_248, %c0_249] : memref<64x1024xf32, #tpu.memory_space<vmem>>, vector<8x512xf32>
    %558 = arith.truncf %517 : vector<8x128xf32> to vector<8x128xbf16>
    %c0_250 = arith.constant 0 : index
    %c0_251 = arith.constant 0 : index
    %c0_252 = arith.constant 0 : index
    %559 = vector.load %arg17[%c0_250, %c0_251, %c0_252] : memref<4x128x512xbf16, #tpu.memory_space<vmem>>, vector<1x128x512xbf16>
    %560 = vector.shape_cast %559 : vector<1x128x512xbf16> to vector<128x512xbf16>
    %cst_253 = arith.constant dense<0.000000e+00> : vector<8x512xf32>
    %561 = tpu.matmul %558, %560, %cst_253 {dimension_numbers = #tpu.dot_dimension_numbers<[1], [0], [0], [1], [0, 0, 1, 1], [], []>} : vector<8x128xbf16>, vector<128x512xbf16>, vector<8x512xf32> -> vector<8x512xf32>
    %562 = arith.addf %557, %561 : vector<8x512xf32>
    %563 = vector.extract_strided_slice %562 {offsets = [0, 0], sizes = [8, 128], strides = [1, 1]} : vector<8x512xf32> to vector<8x128xf32>
    %cst_254 = arith.constant 5.000000e-01 : f32
    %564 = vector.broadcast %cst_254 : f32 to vector<8x128xf32>
    %565 = arith.mulf %564, %563 : vector<8x128xf32>
    %566 = math.tanh %565 : vector<8x128xf32>
    %cst_255 = arith.constant 5.000000e-01 : f32
    %567 = vector.broadcast %cst_255 : f32 to vector<8x128xf32>
    %568 = arith.mulf %567, %566 : vector<8x128xf32>
    %cst_256 = arith.constant 5.000000e-01 : f32
    %569 = vector.broadcast %cst_256 : f32 to vector<8x128xf32>
    %570 = arith.addf %568, %569 : vector<8x128xf32>
    %571 = vector.extract_strided_slice %562 {offsets = [0, 128], sizes = [8, 128], strides = [1, 1]} : vector<8x512xf32> to vector<8x128xf32>
    %cst_257 = arith.constant 5.000000e-01 : f32
    %572 = vector.broadcast %cst_257 : f32 to vector<8x128xf32>
    %573 = arith.mulf %572, %571 : vector<8x128xf32>
    %574 = math.tanh %573 : vector<8x128xf32>
    %cst_258 = arith.constant 5.000000e-01 : f32
    %575 = vector.broadcast %cst_258 : f32 to vector<8x128xf32>
    %576 = arith.mulf %575, %574 : vector<8x128xf32>
    %cst_259 = arith.constant 5.000000e-01 : f32
    %577 = vector.broadcast %cst_259 : f32 to vector<8x128xf32>
    %578 = arith.addf %576, %577 : vector<8x128xf32>
    %579 = vector.extract_strided_slice %562 {offsets = [0, 256], sizes = [8, 128], strides = [1, 1]} : vector<8x512xf32> to vector<8x128xf32>
    %580 = math.tanh %579 : vector<8x128xf32>
    %581 = vector.extract_strided_slice %562 {offsets = [0, 384], sizes = [8, 128], strides = [1, 1]} : vector<8x512xf32> to vector<8x128xf32>
    %cst_260 = arith.constant 5.000000e-01 : f32
    %582 = vector.broadcast %cst_260 : f32 to vector<8x128xf32>
    %583 = arith.mulf %582, %581 : vector<8x128xf32>
    %584 = math.tanh %583 : vector<8x128xf32>
    %cst_261 = arith.constant 5.000000e-01 : f32
    %585 = vector.broadcast %cst_261 : f32 to vector<8x128xf32>
    %586 = arith.mulf %585, %584 : vector<8x128xf32>
    %cst_262 = arith.constant 5.000000e-01 : f32
    %587 = vector.broadcast %cst_262 : f32 to vector<8x128xf32>
    %588 = arith.addf %586, %587 : vector<8x128xf32>
    %589 = arith.mulf %578, %515 : vector<8x128xf32>
    %590 = arith.mulf %570, %580 : vector<8x128xf32>
    %591 = arith.addf %589, %590 : vector<8x128xf32>
    %592 = math.tanh %591 : vector<8x128xf32>
    %593 = arith.mulf %588, %592 : vector<8x128xf32>
    %c0_263 = arith.constant 0 : index
    %c512_264 = arith.constant 512 : index
    %594 = vector.load %arg13[%c0_263, %c512_264] : memref<64x1024xf32, #tpu.memory_space<vmem>>, vector<8x512xf32>
    %595 = arith.truncf %554 : vector<8x128xf32> to vector<8x128xbf16>
    %c1_265 = arith.constant 1 : index
    %c0_266 = arith.constant 0 : index
    %c0_267 = arith.constant 0 : index
    %596 = vector.load %arg17[%c1_265, %c0_266, %c0_267] : memref<4x128x512xbf16, #tpu.memory_space<vmem>>, vector<1x128x512xbf16>
    %597 = vector.shape_cast %596 : vector<1x128x512xbf16> to vector<128x512xbf16>
    %cst_268 = arith.constant dense<0.000000e+00> : vector<8x512xf32>
    %598 = tpu.matmul %595, %597, %cst_268 {dimension_numbers = #tpu.dot_dimension_numbers<[1], [0], [0], [1], [0, 0, 1, 1], [], []>} : vector<8x128xbf16>, vector<128x512xbf16>, vector<8x512xf32> -> vector<8x512xf32>
    %599 = arith.addf %594, %598 : vector<8x512xf32>
    %600 = vector.extract_strided_slice %599 {offsets = [0, 0], sizes = [8, 128], strides = [1, 1]} : vector<8x512xf32> to vector<8x128xf32>
    %cst_269 = arith.constant 5.000000e-01 : f32
    %601 = vector.broadcast %cst_269 : f32 to vector<8x128xf32>
    %602 = arith.mulf %601, %600 : vector<8x128xf32>
    %603 = math.tanh %602 : vector<8x128xf32>
    %cst_270 = arith.constant 5.000000e-01 : f32
    %604 = vector.broadcast %cst_270 : f32 to vector<8x128xf32>
    %605 = arith.mulf %604, %603 : vector<8x128xf32>
    %cst_271 = arith.constant 5.000000e-01 : f32
    %606 = vector.broadcast %cst_271 : f32 to vector<8x128xf32>
    %607 = arith.addf %605, %606 : vector<8x128xf32>
    %608 = vector.extract_strided_slice %599 {offsets = [0, 128], sizes = [8, 128], strides = [1, 1]} : vector<8x512xf32> to vector<8x128xf32>
    %cst_272 = arith.constant 5.000000e-01 : f32
    %609 = vector.broadcast %cst_272 : f32 to vector<8x128xf32>
    %610 = arith.mulf %609, %608 : vector<8x128xf32>
    %611 = math.tanh %610 : vector<8x128xf32>
    %cst_273 = arith.constant 5.000000e-01 : f32
    %612 = vector.broadcast %cst_273 : f32 to vector<8x128xf32>
    %613 = arith.mulf %612, %611 : vector<8x128xf32>
    %cst_274 = arith.constant 5.000000e-01 : f32
    %614 = vector.broadcast %cst_274 : f32 to vector<8x128xf32>
    %615 = arith.addf %613, %614 : vector<8x128xf32>
    %616 = vector.extract_strided_slice %599 {offsets = [0, 256], sizes = [8, 128], strides = [1, 1]} : vector<8x512xf32> to vector<8x128xf32>
    %617 = math.tanh %616 : vector<8x128xf32>
    %618 = vector.extract_strided_slice %599 {offsets = [0, 384], sizes = [8, 128], strides = [1, 1]} : vector<8x512xf32> to vector<8x128xf32>
    %cst_275 = arith.constant 5.000000e-01 : f32
    %619 = vector.broadcast %cst_275 : f32 to vector<8x128xf32>
    %620 = arith.mulf %619, %618 : vector<8x128xf32>
    %621 = math.tanh %620 : vector<8x128xf32>
    %cst_276 = arith.constant 5.000000e-01 : f32
    %622 = vector.broadcast %cst_276 : f32 to vector<8x128xf32>
    %623 = arith.mulf %622, %621 : vector<8x128xf32>
    %cst_277 = arith.constant 5.000000e-01 : f32
    %624 = vector.broadcast %cst_277 : f32 to vector<8x128xf32>
    %625 = arith.addf %623, %624 : vector<8x128xf32>
    %626 = arith.mulf %615, %552 : vector<8x128xf32>
    %627 = arith.mulf %607, %617 : vector<8x128xf32>
    %628 = arith.addf %626, %627 : vector<8x128xf32>
    %629 = math.tanh %628 : vector<8x128xf32>
    %630 = arith.mulf %625, %629 : vector<8x128xf32>
    %c56_278 = arith.constant 56 : index
    %c0_279 = arith.constant 0 : index
    %631 = vector.load %arg15[%c56_278, %c0_279] : memref<64x256xf32, #tpu.memory_space<vmem>>, vector<8x128xf32>
    tpu.vector_store %arg15[%c56_278, %c0_279], %593 {strides = array<i32>} : memref<64x256xf32, #tpu.memory_space<vmem>>, vector<8x128xf32>,
    %c0_280 = arith.constant 0 : index
    %c128_281 = arith.constant 128 : index
    %632 = vector.load %arg15[%c0_280, %c128_281] : memref<64x256xf32, #tpu.memory_space<vmem>>, vector<8x128xf32>
    tpu.vector_store %arg15[%c0_280, %c128_281], %630 {strides = array<i32>} : memref<64x256xf32, #tpu.memory_space<vmem>>, vector<8x128xf32>,
    %c1_i32_282 = arith.constant 1 : i32
    %633 = tpu.memref_slice %arg20[%c1_i32_282] : memref<4x!tpu.dma_semaphore, #tpu.memory_space<semaphore_mem>> -> memref<1x!tpu.dma_semaphore, #tpu.memory_space<semaphore_mem>>
    %634 = tpu.memref_squeeze %633 : memref<1x!tpu.dma_semaphore, #tpu.memory_space<semaphore_mem>> -> memref<!tpu.dma_semaphore, #tpu.memory_space<semaphore_mem>>
    tpu.wait_dma2 semaphore(%634 : memref<!tpu.dma_semaphore, #tpu.memory_space<semaphore_mem>>) src(%arg8 : memref<256x1024xbf16, #tpu.memory_space<any>>) dst(%arg16 : memref<256x1024xbf16, #tpu.memory_space<vmem>>)
    %c0_283 = arith.constant 0 : index
    %c0_284 = arith.constant 0 : index
    %635 = vector.load %arg15[%c0_283, %c0_284] : memref<64x256xf32, #tpu.memory_space<vmem>>, vector<64x256xf32>
    %636 = arith.truncf %635 : vector<64x256xf32> to vector<64x256xbf16>
    %c0_285 = arith.constant 0 : index
    %c0_286 = arith.constant 0 : index
    %637 = vector.load %arg16[%c0_285, %c0_286] : memref<256x1024xbf16, #tpu.memory_space<vmem>>, vector<256x512xbf16>
    %cst_287 = arith.constant dense<0.000000e+00> : vector<64x512xf32>
    %638 = tpu.matmul %636, %637, %cst_287 {dimension_numbers = #tpu.dot_dimension_numbers<[1], [0], [0], [1], [0, 0, 1, 1], [], []>} : vector<64x256xbf16>, vector<256x512xbf16>, vector<64x512xf32> -> vector<64x512xf32>
    %c0_288 = arith.constant 0 : index
    %c0_289 = arith.constant 0 : index
    %639 = vector.load %arg3[%c0_288, %c0_289] : memref<1x1024xf32, #tpu.memory_space<vmem>>, vector<1x512xf32>
    %640 = vector.broadcast %639 : vector<1x512xf32> to vector<64x512xf32>
    %641 = arith.addf %638, %640 : vector<64x512xf32>
    %c0_290 = arith.constant 0 : index
    %c0_291 = arith.constant 0 : index
    %642 = vector.load %arg14[%c0_290, %c0_291] : memref<64x512xf32, #tpu.memory_space<vmem>>, vector<64x512xf32>
    tpu.vector_store %arg14[%c0_290, %c0_291], %641 {strides = array<i32>} : memref<64x512xf32, #tpu.memory_space<vmem>>, vector<64x512xf32>,
    %c56_292 = arith.constant 56 : index
    %c0_293 = arith.constant 0 : index
    %643 = vector.load %arg15[%c56_292, %c0_293] : memref<64x256xf32, #tpu.memory_space<vmem>>, vector<8x256xf32>
    %644 = arith.truncf %643 : vector<8x256xf32> to vector<8x256xbf16>
    %c0_294 = arith.constant 0 : index
    %c512_295 = arith.constant 512 : index
    %645 = vector.load %arg16[%c0_294, %c512_295] : memref<256x1024xbf16, #tpu.memory_space<vmem>>, vector<256x512xbf16>
    %cst_296 = arith.constant dense<0.000000e+00> : vector<8x512xf32>
    %646 = tpu.matmul %644, %645, %cst_296 {dimension_numbers = #tpu.dot_dimension_numbers<[1], [0], [0], [1], [0, 0, 1, 1], [], []>} : vector<8x256xbf16>, vector<256x512xbf16>, vector<8x512xf32> -> vector<8x512xf32>
    %c0_297 = arith.constant 0 : index
    %c512_298 = arith.constant 512 : index
    %647 = vector.load %arg3[%c0_297, %c512_298] : memref<1x1024xf32, #tpu.memory_space<vmem>>, vector<1x512xf32>
    %648 = vector.broadcast %647 : vector<1x512xf32> to vector<8x512xf32>
    %649 = arith.addf %646, %648 : vector<8x512xf32>
    %c3 = arith.constant 3 : index
    %c0_299 = arith.constant 0 : index
    %c0_300 = arith.constant 0 : index
    %650 = vector.load %arg4[%c3, %c0_299, %c0_300] : memref<4x8x128xf32, #tpu.memory_space<vmem>>, vector<1x8x128xf32>
    %651 = vector.shape_cast %650 : vector<1x8x128xf32> to vector<8x128xf32>
    %c3_301 = arith.constant 3 : index
    %c0_302 = arith.constant 0 : index
    %c0_303 = arith.constant 0 : index
    %652 = vector.load %arg5[%c3_301, %c0_302, %c0_303] : memref<4x8x128xf32, #tpu.memory_space<vmem>>, vector<1x8x128xf32>
    %653 = vector.shape_cast %652 : vector<1x8x128xf32> to vector<8x128xf32>
    %654 = arith.truncf %651 : vector<8x128xf32> to vector<8x128xbf16>
    %c3_304 = arith.constant 3 : index
    %c0_305 = arith.constant 0 : index
    %c0_306 = arith.constant 0 : index
    %655 = vector.load %arg17[%c3_304, %c0_305, %c0_306] : memref<4x128x512xbf16, #tpu.memory_space<vmem>>, vector<1x128x512xbf16>
    %656 = vector.shape_cast %655 : vector<1x128x512xbf16> to vector<128x512xbf16>
    %cst_307 = arith.constant dense<0.000000e+00> : vector<8x512xf32>
    %657 = tpu.matmul %654, %656, %cst_307 {dimension_numbers = #tpu.dot_dimension_numbers<[1], [0], [0], [1], [0, 0, 1, 1], [], []>} : vector<8x128xbf16>, vector<128x512xbf16>, vector<8x512xf32> -> vector<8x512xf32>
    %658 = arith.addf %649, %657 : vector<8x512xf32>
    %659 = vector.extract_strided_slice %658 {offsets = [0, 0], sizes = [8, 128], strides = [1, 1]} : vector<8x512xf32> to vector<8x128xf32>
    %cst_308 = arith.constant 5.000000e-01 : f32
    %660 = vector.broadcast %cst_308 : f32 to vector<8x128xf32>
    %661 = arith.mulf %660, %659 : vector<8x128xf32>
    %662 = math.tanh %661 : vector<8x128xf32>
    %cst_309 = arith.constant 5.000000e-01 : f32
    %663 = vector.broadcast %cst_309 : f32 to vector<8x128xf32>
    %664 = arith.mulf %663, %662 : vector<8x128xf32>
    %cst_310 = arith.constant 5.000000e-01 : f32
    %665 = vector.broadcast %cst_310 : f32 to vector<8x128xf32>
    %666 = arith.addf %664, %665 : vector<8x128xf32>
    %667 = vector.extract_strided_slice %658 {offsets = [0, 128], sizes = [8, 128], strides = [1, 1]} : vector<8x512xf32> to vector<8x128xf32>
    %cst_311 = arith.constant 5.000000e-01 : f32
    %668 = vector.broadcast %cst_311 : f32 to vector<8x128xf32>
    %669 = arith.mulf %668, %667 : vector<8x128xf32>
    %670 = math.tanh %669 : vector<8x128xf32>
    %cst_312 = arith.constant 5.000000e-01 : f32
    %671 = vector.broadcast %cst_312 : f32 to vector<8x128xf32>
    %672 = arith.mulf %671, %670 : vector<8x128xf32>
    %cst_313 = arith.constant 5.000000e-01 : f32
    %673 = vector.broadcast %cst_313 : f32 to vector<8x128xf32>
    %674 = arith.addf %672, %673 : vector<8x128xf32>
    %675 = vector.extract_strided_slice %658 {offsets = [0, 256], sizes = [8, 128], strides = [1, 1]} : vector<8x512xf32> to vector<8x128xf32>
    %676 = math.tanh %675 : vector<8x128xf32>
    %677 = vector.extract_strided_slice %658 {offsets = [0, 384], sizes = [8, 128], strides = [1, 1]} : vector<8x512xf32> to vector<8x128xf32>
    %cst_314 = arith.constant 5.000000e-01 : f32
    %678 = vector.broadcast %cst_314 : f32 to vector<8x128xf32>
    %679 = arith.mulf %678, %677 : vector<8x128xf32>
    %680 = math.tanh %679 : vector<8x128xf32>
    %cst_315 = arith.constant 5.000000e-01 : f32
    %681 = vector.broadcast %cst_315 : f32 to vector<8x128xf32>
    %682 = arith.mulf %681, %680 : vector<8x128xf32>
    %cst_316 = arith.constant 5.000000e-01 : f32
    %683 = vector.broadcast %cst_316 : f32 to vector<8x128xf32>
    %684 = arith.addf %682, %683 : vector<8x128xf32>
    %685 = arith.mulf %674, %653 : vector<8x128xf32>
    %686 = arith.mulf %666, %676 : vector<8x128xf32>
    %687 = arith.addf %685, %686 : vector<8x128xf32>
    %688 = math.tanh %687 : vector<8x128xf32>
    %689 = arith.mulf %684, %688 : vector<8x128xf32>
    %c2 = arith.constant 2 : index
    %c0_317 = arith.constant 0 : index
    %c0_318 = arith.constant 0 : index
    %690 = vector.load %arg4[%c2, %c0_317, %c0_318] : memref<4x8x128xf32, #tpu.memory_space<vmem>>, vector<1x8x128xf32>
    %691 = vector.shape_cast %690 : vector<1x8x128xf32> to vector<8x128xf32>
    %c2_319 = arith.constant 2 : index
    %c0_320 = arith.constant 0 : index
    %c0_321 = arith.constant 0 : index
    %692 = vector.load %arg5[%c2_319, %c0_320, %c0_321] : memref<4x8x128xf32, #tpu.memory_space<vmem>>, vector<1x8x128xf32>
    %693 = vector.shape_cast %692 : vector<1x8x128xf32> to vector<8x128xf32>
    %c0_322 = arith.constant 0 : index
    %c0_323 = arith.constant 0 : index
    %694 = vector.load %arg14[%c0_322, %c0_323] : memref<64x512xf32, #tpu.memory_space<vmem>>, vector<8x512xf32>
    %695 = arith.truncf %691 : vector<8x128xf32> to vector<8x128xbf16>
    %c2_324 = arith.constant 2 : index
    %c0_325 = arith.constant 0 : index
    %c0_326 = arith.constant 0 : index
    %696 = vector.load %arg17[%c2_324, %c0_325, %c0_326] : memref<4x128x512xbf16, #tpu.memory_space<vmem>>, vector<1x128x512xbf16>
    %697 = vector.shape_cast %696 : vector<1x128x512xbf16> to vector<128x512xbf16>
    %cst_327 = arith.constant dense<0.000000e+00> : vector<8x512xf32>
    %698 = tpu.matmul %695, %697, %cst_327 {dimension_numbers = #tpu.dot_dimension_numbers<[1], [0], [0], [1], [0, 0, 1, 1], [], []>} : vector<8x128xbf16>, vector<128x512xbf16>, vector<8x512xf32> -> vector<8x512xf32>
    %699 = arith.addf %694, %698 : vector<8x512xf32>
    %700 = vector.extract_strided_slice %699 {offsets = [0, 0], sizes = [8, 128], strides = [1, 1]} : vector<8x512xf32> to vector<8x128xf32>
    %cst_328 = arith.constant 5.000000e-01 : f32
    %701 = vector.broadcast %cst_328 : f32 to vector<8x128xf32>
    %702 = arith.mulf %701, %700 : vector<8x128xf32>
    %703 = math.tanh %702 : vector<8x128xf32>
    %cst_329 = arith.constant 5.000000e-01 : f32
    %704 = vector.broadcast %cst_329 : f32 to vector<8x128xf32>
    %705 = arith.mulf %704, %703 : vector<8x128xf32>
    %cst_330 = arith.constant 5.000000e-01 : f32
    %706 = vector.broadcast %cst_330 : f32 to vector<8x128xf32>
    %707 = arith.addf %705, %706 : vector<8x128xf32>
    %708 = vector.extract_strided_slice %699 {offsets = [0, 128], sizes = [8, 128], strides = [1, 1]} : vector<8x512xf32> to vector<8x128xf32>
    %cst_331 = arith.constant 5.000000e-01 : f32
    %709 = vector.broadcast %cst_331 : f32 to vector<8x128xf32>
    %710 = arith.mulf %709, %708 : vector<8x128xf32>
    %711 = math.tanh %710 : vector<8x128xf32>
    %cst_332 = arith.constant 5.000000e-01 : f32
    %712 = vector.broadcast %cst_332 : f32 to vector<8x128xf32>
    %713 = arith.mulf %712, %711 : vector<8x128xf32>
    %cst_333 = arith.constant 5.000000e-01 : f32
    %714 = vector.broadcast %cst_333 : f32 to vector<8x128xf32>
    %715 = arith.addf %713, %714 : vector<8x128xf32>
    %716 = vector.extract_strided_slice %699 {offsets = [0, 256], sizes = [8, 128], strides = [1, 1]} : vector<8x512xf32> to vector<8x128xf32>
    %717 = math.tanh %716 : vector<8x128xf32>
    %718 = vector.extract_strided_slice %699 {offsets = [0, 384], sizes = [8, 128], strides = [1, 1]} : vector<8x512xf32> to vector<8x128xf32>
    %cst_334 = arith.constant 5.000000e-01 : f32
    %719 = vector.broadcast %cst_334 : f32 to vector<8x128xf32>
    %720 = arith.mulf %719, %718 : vector<8x128xf32>
    %721 = math.tanh %720 : vector<8x128xf32>
    %cst_335 = arith.constant 5.000000e-01 : f32
    %722 = vector.broadcast %cst_335 : f32 to vector<8x128xf32>
    %723 = arith.mulf %722, %721 : vector<8x128xf32>
    %cst_336 = arith.constant 5.000000e-01 : f32
    %724 = vector.broadcast %cst_336 : f32 to vector<8x128xf32>
    %725 = arith.addf %723, %724 : vector<8x128xf32>
    %726 = arith.mulf %715, %693 : vector<8x128xf32>
    %727 = arith.mulf %707, %717 : vector<8x128xf32>
    %728 = arith.addf %726, %727 : vector<8x128xf32>
    %729 = math.tanh %728 : vector<8x128xf32>
    %730 = arith.mulf %725, %729 : vector<8x128xf32>
    %c8_337 = arith.constant 8 : index
    %c0_338 = arith.constant 0 : index
    %731 = vector.load %arg14[%c8_337, %c0_338] : memref<64x512xf32, #tpu.memory_space<vmem>>, vector<8x512xf32>
    %732 = arith.truncf %730 : vector<8x128xf32> to vector<8x128xbf16>
    %c2_339 = arith.constant 2 : index
    %c0_340 = arith.constant 0 : index
    %c0_341 = arith.constant 0 : index
    %733 = vector.load %arg17[%c2_339, %c0_340, %c0_341] : memref<4x128x512xbf16, #tpu.memory_space<vmem>>, vector<1x128x512xbf16>
    %734 = vector.shape_cast %733 : vector<1x128x512xbf16> to vector<128x512xbf16>
    %cst_342 = arith.constant dense<0.000000e+00> : vector<8x512xf32>
    %735 = tpu.matmul %732, %734, %cst_342 {dimension_numbers = #tpu.dot_dimension_numbers<[1], [0], [0], [1], [0, 0, 1, 1], [], []>} : vector<8x128xbf16>, vector<128x512xbf16>, vector<8x512xf32> -> vector<8x512xf32>
    %736 = arith.addf %731, %735 : vector<8x512xf32>
    %737 = vector.extract_strided_slice %736 {offsets = [0, 0], sizes = [8, 128], strides = [1, 1]} : vector<8x512xf32> to vector<8x128xf32>
    %cst_343 = arith.constant 5.000000e-01 : f32
    %738 = vector.broadcast %cst_343 : f32 to vector<8x128xf32>
    %739 = arith.mulf %738, %737 : vector<8x128xf32>
    %740 = math.tanh %739 : vector<8x128xf32>
    %cst_344 = arith.constant 5.000000e-01 : f32
    %741 = vector.broadcast %cst_344 : f32 to vector<8x128xf32>
    %742 = arith.mulf %741, %740 : vector<8x128xf32>
    %cst_345 = arith.constant 5.000000e-01 : f32
    %743 = vector.broadcast %cst_345 : f32 to vector<8x128xf32>
    %744 = arith.addf %742, %743 : vector<8x128xf32>
    %745 = vector.extract_strided_slice %736 {offsets = [0, 128], sizes = [8, 128], strides = [1, 1]} : vector<8x512xf32> to vector<8x128xf32>
    %cst_346 = arith.constant 5.000000e-01 : f32
    %746 = vector.broadcast %cst_346 : f32 to vector<8x128xf32>
    %747 = arith.mulf %746, %745 : vector<8x128xf32>
    %748 = math.tanh %747 : vector<8x128xf32>
    %cst_347 = arith.constant 5.000000e-01 : f32
    %749 = vector.broadcast %cst_347 : f32 to vector<8x128xf32>
    %750 = arith.mulf %749, %748 : vector<8x128xf32>
    %cst_348 = arith.constant 5.000000e-01 : f32
    %751 = vector.broadcast %cst_348 : f32 to vector<8x128xf32>
    %752 = arith.addf %750, %751 : vector<8x128xf32>
    %753 = vector.extract_strided_slice %736 {offsets = [0, 256], sizes = [8, 128], strides = [1, 1]} : vector<8x512xf32> to vector<8x128xf32>
    %754 = math.tanh %753 : vector<8x128xf32>
    %755 = vector.extract_strided_slice %736 {offsets = [0, 384], sizes = [8, 128], strides = [1, 1]} : vector<8x512xf32> to vector<8x128xf32>
    %cst_349 = arith.constant 5.000000e-01 : f32
    %756 = vector.broadcast %cst_349 : f32 to vector<8x128xf32>
    %757 = arith.mulf %756, %755 : vector<8x128xf32>
    %758 = math.tanh %757 : vector<8x128xf32>
    %cst_350 = arith.constant 5.000000e-01 : f32
    %759 = vector.broadcast %cst_350 : f32 to vector<8x128xf32>
    %760 = arith.mulf %759, %758 : vector<8x128xf32>
    %cst_351 = arith.constant 5.000000e-01 : f32
    %761 = vector.broadcast %cst_351 : f32 to vector<8x128xf32>
    %762 = arith.addf %760, %761 : vector<8x128xf32>
    %763 = arith.mulf %752, %728 : vector<8x128xf32>
    %764 = arith.mulf %744, %754 : vector<8x128xf32>
    %765 = arith.addf %763, %764 : vector<8x128xf32>
    %766 = math.tanh %765 : vector<8x128xf32>
    %767 = arith.mulf %762, %766 : vector<8x128xf32>
    %c16_352 = arith.constant 16 : index
    %c0_353 = arith.constant 0 : index
    %768 = vector.load %arg14[%c16_352, %c0_353] : memref<64x512xf32, #tpu.memory_space<vmem>>, vector<8x512xf32>
    %769 = arith.truncf %767 : vector<8x128xf32> to vector<8x128xbf16>
    %c2_354 = arith.constant 2 : index
    %c0_355 = arith.constant 0 : index
    %c0_356 = arith.constant 0 : index
    %770 = vector.load %arg17[%c2_354, %c0_355, %c0_356] : memref<4x128x512xbf16, #tpu.memory_space<vmem>>, vector<1x128x512xbf16>
    %771 = vector.shape_cast %770 : vector<1x128x512xbf16> to vector<128x512xbf16>
    %cst_357 = arith.constant dense<0.000000e+00> : vector<8x512xf32>
    %772 = tpu.matmul %769, %771, %cst_357 {dimension_numbers = #tpu.dot_dimension_numbers<[1], [0], [0], [1], [0, 0, 1, 1], [], []>} : vector<8x128xbf16>, vector<128x512xbf16>, vector<8x512xf32> -> vector<8x512xf32>
    %773 = arith.addf %768, %772 : vector<8x512xf32>
    %774 = vector.extract_strided_slice %773 {offsets = [0, 0], sizes = [8, 128], strides = [1, 1]} : vector<8x512xf32> to vector<8x128xf32>
    %cst_358 = arith.constant 5.000000e-01 : f32
    %775 = vector.broadcast %cst_358 : f32 to vector<8x128xf32>
    %776 = arith.mulf %775, %774 : vector<8x128xf32>
    %777 = math.tanh %776 : vector<8x128xf32>
    %cst_359 = arith.constant 5.000000e-01 : f32
    %778 = vector.broadcast %cst_359 : f32 to vector<8x128xf32>
    %779 = arith.mulf %778, %777 : vector<8x128xf32>
    %cst_360 = arith.constant 5.000000e-01 : f32
    %780 = vector.broadcast %cst_360 : f32 to vector<8x128xf32>
    %781 = arith.addf %779, %780 : vector<8x128xf32>
    %782 = vector.extract_strided_slice %773 {offsets = [0, 128], sizes = [8, 128], strides = [1, 1]} : vector<8x512xf32> to vector<8x128xf32>
    %cst_361 = arith.constant 5.000000e-01 : f32
    %783 = vector.broadcast %cst_361 : f32 to vector<8x128xf32>
    %784 = arith.mulf %783, %782 : vector<8x128xf32>
    %785 = math.tanh %784 : vector<8x128xf32>
    %cst_362 = arith.constant 5.000000e-01 : f32
    %786 = vector.broadcast %cst_362 : f32 to vector<8x128xf32>
    %787 = arith.mulf %786, %785 : vector<8x128xf32>
    %cst_363 = arith.constant 5.000000e-01 : f32
    %788 = vector.broadcast %cst_363 : f32 to vector<8x128xf32>
    %789 = arith.addf %787, %788 : vector<8x128xf32>
    %790 = vector.extract_strided_slice %773 {offsets = [0, 256], sizes = [8, 128], strides = [1, 1]} : vector<8x512xf32> to vector<8x128xf32>
    %791 = math.tanh %790 : vector<8x128xf32>
    %792 = vector.extract_strided_slice %773 {offsets = [0, 384], sizes = [8, 128], strides = [1, 1]} : vector<8x512xf32> to vector<8x128xf32>
    %cst_364 = arith.constant 5.000000e-01 : f32
    %793 = vector.broadcast %cst_364 : f32 to vector<8x128xf32>
    %794 = arith.mulf %793, %792 : vector<8x128xf32>
    %795 = math.tanh %794 : vector<8x128xf32>
    %cst_365 = arith.constant 5.000000e-01 : f32
    %796 = vector.broadcast %cst_365 : f32 to vector<8x128xf32>
    %797 = arith.mulf %796, %795 : vector<8x128xf32>
    %cst_366 = arith.constant 5.000000e-01 : f32
    %798 = vector.broadcast %cst_366 : f32 to vector<8x128xf32>
    %799 = arith.addf %797, %798 : vector<8x128xf32>
    %800 = arith.mulf %789, %765 : vector<8x128xf32>
    %801 = arith.mulf %781, %791 : vector<8x128xf32>
    %802 = arith.addf %800, %801 : vector<8x128xf32>
    %803 = math.tanh %802 : vector<8x128xf32>
    %804 = arith.mulf %799, %803 : vector<8x128xf32>
    %c24_367 = arith.constant 24 : index
    %c0_368 = arith.constant 0 : index
    %805 = vector.load %arg14[%c24_367, %c0_368] : memref<64x512xf32, #tpu.memory_space<vmem>>, vector<8x512xf32>
    %806 = arith.truncf %804 : vector<8x128xf32> to vector<8x128xbf16>
    %c2_369 = arith.constant 2 : index
    %c0_370 = arith.constant 0 : index
    %c0_371 = arith.constant 0 : index
    %807 = vector.load %arg17[%c2_369, %c0_370, %c0_371] : memref<4x128x512xbf16, #tpu.memory_space<vmem>>, vector<1x128x512xbf16>
    %808 = vector.shape_cast %807 : vector<1x128x512xbf16> to vector<128x512xbf16>
    %cst_372 = arith.constant dense<0.000000e+00> : vector<8x512xf32>
    %809 = tpu.matmul %806, %808, %cst_372 {dimension_numbers = #tpu.dot_dimension_numbers<[1], [0], [0], [1], [0, 0, 1, 1], [], []>} : vector<8x128xbf16>, vector<128x512xbf16>, vector<8x512xf32> -> vector<8x512xf32>
    %810 = arith.addf %805, %809 : vector<8x512xf32>
    %811 = vector.extract_strided_slice %810 {offsets = [0, 0], sizes = [8, 128], strides = [1, 1]} : vector<8x512xf32> to vector<8x128xf32>
    %cst_373 = arith.constant 5.000000e-01 : f32
    %812 = vector.broadcast %cst_373 : f32 to vector<8x128xf32>
    %813 = arith.mulf %812, %811 : vector<8x128xf32>
    %814 = math.tanh %813 : vector<8x128xf32>
    %cst_374 = arith.constant 5.000000e-01 : f32
    %815 = vector.broadcast %cst_374 : f32 to vector<8x128xf32>
    %816 = arith.mulf %815, %814 : vector<8x128xf32>
    %cst_375 = arith.constant 5.000000e-01 : f32
    %817 = vector.broadcast %cst_375 : f32 to vector<8x128xf32>
    %818 = arith.addf %816, %817 : vector<8x128xf32>
    %819 = vector.extract_strided_slice %810 {offsets = [0, 128], sizes = [8, 128], strides = [1, 1]} : vector<8x512xf32> to vector<8x128xf32>
    %cst_376 = arith.constant 5.000000e-01 : f32
    %820 = vector.broadcast %cst_376 : f32 to vector<8x128xf32>
    %821 = arith.mulf %820, %819 : vector<8x128xf32>
    %822 = math.tanh %821 : vector<8x128xf32>
    %cst_377 = arith.constant 5.000000e-01 : f32
    %823 = vector.broadcast %cst_377 : f32 to vector<8x128xf32>
    %824 = arith.mulf %823, %822 : vector<8x128xf32>
    %cst_378 = arith.constant 5.000000e-01 : f32
    %825 = vector.broadcast %cst_378 : f32 to vector<8x128xf32>
    %826 = arith.addf %824, %825 : vector<8x128xf32>
    %827 = vector.extract_strided_slice %810 {offsets = [0, 256], sizes = [8, 128], strides = [1, 1]} : vector<8x512xf32> to vector<8x128xf32>
    %828 = math.tanh %827 : vector<8x128xf32>
    %829 = vector.extract_strided_slice %810 {offsets = [0, 384], sizes = [8, 128], strides = [1, 1]} : vector<8x512xf32> to vector<8x128xf32>
    %cst_379 = arith.constant 5.000000e-01 : f32
    %830 = vector.broadcast %cst_379 : f32 to vector<8x128xf32>
    %831 = arith.mulf %830, %829 : vector<8x128xf32>
    %832 = math.tanh %831 : vector<8x128xf32>
    %cst_380 = arith.constant 5.000000e-01 : f32
    %833 = vector.broadcast %cst_380 : f32 to vector<8x128xf32>
    %834 = arith.mulf %833, %832 : vector<8x128xf32>
    %cst_381 = arith.constant 5.000000e-01 : f32
    %835 = vector.broadcast %cst_381 : f32 to vector<8x128xf32>
    %836 = arith.addf %834, %835 : vector<8x128xf32>
    %837 = arith.mulf %826, %802 : vector<8x128xf32>
    %838 = arith.mulf %818, %828 : vector<8x128xf32>
    %839 = arith.addf %837, %838 : vector<8x128xf32>
    %840 = math.tanh %839 : vector<8x128xf32>
    %841 = arith.mulf %836, %840 : vector<8x128xf32>
    %c32_382 = arith.constant 32 : index
    %c0_383 = arith.constant 0 : index
    %842 = vector.load %arg14[%c32_382, %c0_383] : memref<64x512xf32, #tpu.memory_space<vmem>>, vector<8x512xf32>
    %843 = arith.truncf %841 : vector<8x128xf32> to vector<8x128xbf16>
    %c2_384 = arith.constant 2 : index
    %c0_385 = arith.constant 0 : index
    %c0_386 = arith.constant 0 : index
    %844 = vector.load %arg17[%c2_384, %c0_385, %c0_386] : memref<4x128x512xbf16, #tpu.memory_space<vmem>>, vector<1x128x512xbf16>
    %845 = vector.shape_cast %844 : vector<1x128x512xbf16> to vector<128x512xbf16>
    %cst_387 = arith.constant dense<0.000000e+00> : vector<8x512xf32>
    %846 = tpu.matmul %843, %845, %cst_387 {dimension_numbers = #tpu.dot_dimension_numbers<[1], [0], [0], [1], [0, 0, 1, 1], [], []>} : vector<8x128xbf16>, vector<128x512xbf16>, vector<8x512xf32> -> vector<8x512xf32>
    %847 = arith.addf %842, %846 : vector<8x512xf32>
    %848 = vector.extract_strided_slice %847 {offsets = [0, 0], sizes = [8, 128], strides = [1, 1]} : vector<8x512xf32> to vector<8x128xf32>
    %cst_388 = arith.constant 5.000000e-01 : f32
    %849 = vector.broadcast %cst_388 : f32 to vector<8x128xf32>
    %850 = arith.mulf %849, %848 : vector<8x128xf32>
    %851 = math.tanh %850 : vector<8x128xf32>
    %cst_389 = arith.constant 5.000000e-01 : f32
    %852 = vector.broadcast %cst_389 : f32 to vector<8x128xf32>
    %853 = arith.mulf %852, %851 : vector<8x128xf32>
    %cst_390 = arith.constant 5.000000e-01 : f32
    %854 = vector.broadcast %cst_390 : f32 to vector<8x128xf32>
    %855 = arith.addf %853, %854 : vector<8x128xf32>
    %856 = vector.extract_strided_slice %847 {offsets = [0, 128], sizes = [8, 128], strides = [1, 1]} : vector<8x512xf32> to vector<8x128xf32>
    %cst_391 = arith.constant 5.000000e-01 : f32
    %857 = vector.broadcast %cst_391 : f32 to vector<8x128xf32>
    %858 = arith.mulf %857, %856 : vector<8x128xf32>
    %859 = math.tanh %858 : vector<8x128xf32>
    %cst_392 = arith.constant 5.000000e-01 : f32
    %860 = vector.broadcast %cst_392 : f32 to vector<8x128xf32>
    %861 = arith.mulf %860, %859 : vector<8x128xf32>
    %cst_393 = arith.constant 5.000000e-01 : f32
    %862 = vector.broadcast %cst_393 : f32 to vector<8x128xf32>
    %863 = arith.addf %861, %862 : vector<8x128xf32>
    %864 = vector.extract_strided_slice %847 {offsets = [0, 256], sizes = [8, 128], strides = [1, 1]} : vector<8x512xf32> to vector<8x128xf32>
    %865 = math.tanh %864 : vector<8x128xf32>
    %866 = vector.extract_strided_slice %847 {offsets = [0, 384], sizes = [8, 128], strides = [1, 1]} : vector<8x512xf32> to vector<8x128xf32>
    %cst_394 = arith.constant 5.000000e-01 : f32
    %867 = vector.broadcast %cst_394 : f32 to vector<8x128xf32>
    %868 = arith.mulf %867, %866 : vector<8x128xf32>
    %869 = math.tanh %868 : vector<8x128xf32>
    %cst_395 = arith.constant 5.000000e-01 : f32
    %870 = vector.broadcast %cst_395 : f32 to vector<8x128xf32>
    %871 = arith.mulf %870, %869 : vector<8x128xf32>
    %cst_396 = arith.constant 5.000000e-01 : f32
    %872 = vector.broadcast %cst_396 : f32 to vector<8x128xf32>
    %873 = arith.addf %871, %872 : vector<8x128xf32>
    %874 = arith.mulf %863, %839 : vector<8x128xf32>
    %875 = arith.mulf %855, %865 : vector<8x128xf32>
    %876 = arith.addf %874, %875 : vector<8x128xf32>
    %877 = math.tanh %876 : vector<8x128xf32>
    %878 = arith.mulf %873, %877 : vector<8x128xf32>
    %c40_397 = arith.constant 40 : index
    %c0_398 = arith.constant 0 : index
    %879 = vector.load %arg14[%c40_397, %c0_398] : memref<64x512xf32, #tpu.memory_space<vmem>>, vector<8x512xf32>
    %880 = arith.truncf %878 : vector<8x128xf32> to vector<8x128xbf16>
    %c2_399 = arith.constant 2 : index
    %c0_400 = arith.constant 0 : index
    %c0_401 = arith.constant 0 : index
    %881 = vector.load %arg17[%c2_399, %c0_400, %c0_401] : memref<4x128x512xbf16, #tpu.memory_space<vmem>>, vector<1x128x512xbf16>
    %882 = vector.shape_cast %881 : vector<1x128x512xbf16> to vector<128x512xbf16>
    %cst_402 = arith.constant dense<0.000000e+00> : vector<8x512xf32>
    %883 = tpu.matmul %880, %882, %cst_402 {dimension_numbers = #tpu.dot_dimension_numbers<[1], [0], [0], [1], [0, 0, 1, 1], [], []>} : vector<8x128xbf16>, vector<128x512xbf16>, vector<8x512xf32> -> vector<8x512xf32>
    %884 = arith.addf %879, %883 : vector<8x512xf32>
    %885 = vector.extract_strided_slice %884 {offsets = [0, 0], sizes = [8, 128], strides = [1, 1]} : vector<8x512xf32> to vector<8x128xf32>
    %cst_403 = arith.constant 5.000000e-01 : f32
    %886 = vector.broadcast %cst_403 : f32 to vector<8x128xf32>
    %887 = arith.mulf %886, %885 : vector<8x128xf32>
    %888 = math.tanh %887 : vector<8x128xf32>
    %cst_404 = arith.constant 5.000000e-01 : f32
    %889 = vector.broadcast %cst_404 : f32 to vector<8x128xf32>
    %890 = arith.mulf %889, %888 : vector<8x128xf32>
    %cst_405 = arith.constant 5.000000e-01 : f32
    %891 = vector.broadcast %cst_405 : f32 to vector<8x128xf32>
    %892 = arith.addf %890, %891 : vector<8x128xf32>
    %893 = vector.extract_strided_slice %884 {offsets = [0, 128], sizes = [8, 128], strides = [1, 1]} : vector<8x512xf32> to vector<8x128xf32>
    %cst_406 = arith.constant 5.000000e-01 : f32
    %894 = vector.broadcast %cst_406 : f32 to vector<8x128xf32>
    %895 = arith.mulf %894, %893 : vector<8x128xf32>
    %896 = math.tanh %895 : vector<8x128xf32>
    %cst_407 = arith.constant 5.000000e-01 : f32
    %897 = vector.broadcast %cst_407 : f32 to vector<8x128xf32>
    %898 = arith.mulf %897, %896 : vector<8x128xf32>
    %cst_408 = arith.constant 5.000000e-01 : f32
    %899 = vector.broadcast %cst_408 : f32 to vector<8x128xf32>
    %900 = arith.addf %898, %899 : vector<8x128xf32>
    %901 = vector.extract_strided_slice %884 {offsets = [0, 256], sizes = [8, 128], strides = [1, 1]} : vector<8x512xf32> to vector<8x128xf32>
    %902 = math.tanh %901 : vector<8x128xf32>
    %903 = vector.extract_strided_slice %884 {offsets = [0, 384], sizes = [8, 128], strides = [1, 1]} : vector<8x512xf32> to vector<8x128xf32>
    %cst_409 = arith.constant 5.000000e-01 : f32
    %904 = vector.broadcast %cst_409 : f32 to vector<8x128xf32>
    %905 = arith.mulf %904, %903 : vector<8x128xf32>
    %906 = math.tanh %905 : vector<8x128xf32>
    %cst_410 = arith.constant 5.000000e-01 : f32
    %907 = vector.broadcast %cst_410 : f32 to vector<8x128xf32>
    %908 = arith.mulf %907, %906 : vector<8x128xf32>
    %cst_411 = arith.constant 5.000000e-01 : f32
    %909 = vector.broadcast %cst_411 : f32 to vector<8x128xf32>
    %910 = arith.addf %908, %909 : vector<8x128xf32>
    %911 = arith.mulf %900, %876 : vector<8x128xf32>
    %912 = arith.mulf %892, %902 : vector<8x128xf32>
    %913 = arith.addf %911, %912 : vector<8x128xf32>
    %914 = math.tanh %913 : vector<8x128xf32>
    %915 = arith.mulf %910, %914 : vector<8x128xf32>
    %c48_412 = arith.constant 48 : index
    %c0_413 = arith.constant 0 : index
    %916 = vector.load %arg14[%c48_412, %c0_413] : memref<64x512xf32, #tpu.memory_space<vmem>>, vector<8x512xf32>
    %917 = arith.truncf %915 : vector<8x128xf32> to vector<8x128xbf16>
    %c2_414 = arith.constant 2 : index
    %c0_415 = arith.constant 0 : index
    %c0_416 = arith.constant 0 : index
    %918 = vector.load %arg17[%c2_414, %c0_415, %c0_416] : memref<4x128x512xbf16, #tpu.memory_space<vmem>>, vector<1x128x512xbf16>
    %919 = vector.shape_cast %918 : vector<1x128x512xbf16> to vector<128x512xbf16>
    %cst_417 = arith.constant dense<0.000000e+00> : vector<8x512xf32>
    %920 = tpu.matmul %917, %919, %cst_417 {dimension_numbers = #tpu.dot_dimension_numbers<[1], [0], [0], [1], [0, 0, 1, 1], [], []>} : vector<8x128xbf16>, vector<128x512xbf16>, vector<8x512xf32> -> vector<8x512xf32>
    %921 = arith.addf %916, %920 : vector<8x512xf32>
    %922 = vector.extract_strided_slice %921 {offsets = [0, 0], sizes = [8, 128], strides = [1, 1]} : vector<8x512xf32> to vector<8x128xf32>
    %cst_418 = arith.constant 5.000000e-01 : f32
    %923 = vector.broadcast %cst_418 : f32 to vector<8x128xf32>
    %924 = arith.mulf %923, %922 : vector<8x128xf32>
    %925 = math.tanh %924 : vector<8x128xf32>
    %cst_419 = arith.constant 5.000000e-01 : f32
    %926 = vector.broadcast %cst_419 : f32 to vector<8x128xf32>
    %927 = arith.mulf %926, %925 : vector<8x128xf32>
    %cst_420 = arith.constant 5.000000e-01 : f32
    %928 = vector.broadcast %cst_420 : f32 to vector<8x128xf32>
    %929 = arith.addf %927, %928 : vector<8x128xf32>
    %930 = vector.extract_strided_slice %921 {offsets = [0, 128], sizes = [8, 128], strides = [1, 1]} : vector<8x512xf32> to vector<8x128xf32>
    %cst_421 = arith.constant 5.000000e-01 : f32
    %931 = vector.broadcast %cst_421 : f32 to vector<8x128xf32>
    %932 = arith.mulf %931, %930 : vector<8x128xf32>
    %933 = math.tanh %932 : vector<8x128xf32>
    %cst_422 = arith.constant 5.000000e-01 : f32
    %934 = vector.broadcast %cst_422 : f32 to vector<8x128xf32>
    %935 = arith.mulf %934, %933 : vector<8x128xf32>
    %cst_423 = arith.constant 5.000000e-01 : f32
    %936 = vector.broadcast %cst_423 : f32 to vector<8x128xf32>
    %937 = arith.addf %935, %936 : vector<8x128xf32>
    %938 = vector.extract_strided_slice %921 {offsets = [0, 256], sizes = [8, 128], strides = [1, 1]} : vector<8x512xf32> to vector<8x128xf32>
    %939 = math.tanh %938 : vector<8x128xf32>
    %940 = vector.extract_strided_slice %921 {offsets = [0, 384], sizes = [8, 128], strides = [1, 1]} : vector<8x512xf32> to vector<8x128xf32>
    %cst_424 = arith.constant 5.000000e-01 : f32
    %941 = vector.broadcast %cst_424 : f32 to vector<8x128xf32>
    %942 = arith.mulf %941, %940 : vector<8x128xf32>
    %943 = math.tanh %942 : vector<8x128xf32>
    %cst_425 = arith.constant 5.000000e-01 : f32
    %944 = vector.broadcast %cst_425 : f32 to vector<8x128xf32>
    %945 = arith.mulf %944, %943 : vector<8x128xf32>
    %cst_426 = arith.constant 5.000000e-01 : f32
    %946 = vector.broadcast %cst_426 : f32 to vector<8x128xf32>
    %947 = arith.addf %945, %946 : vector<8x128xf32>
    %948 = arith.mulf %937, %913 : vector<8x128xf32>
    %949 = arith.mulf %929, %939 : vector<8x128xf32>
    %950 = arith.addf %948, %949 : vector<8x128xf32>
    %951 = math.tanh %950 : vector<8x128xf32>
    %952 = arith.mulf %947, %951 : vector<8x128xf32>
    %c56_427 = arith.constant 56 : index
    %c0_428 = arith.constant 0 : index
    %953 = vector.load %arg14[%c56_427, %c0_428] : memref<64x512xf32, #tpu.memory_space<vmem>>, vector<8x512xf32>
    %954 = arith.truncf %952 : vector<8x128xf32> to vector<8x128xbf16>
    %c2_429 = arith.constant 2 : index
    %c0_430 = arith.constant 0 : index
    %c0_431 = arith.constant 0 : index
    %955 = vector.load %arg17[%c2_429, %c0_430, %c0_431] : memref<4x128x512xbf16, #tpu.memory_space<vmem>>, vector<1x128x512xbf16>
    %956 = vector.shape_cast %955 : vector<1x128x512xbf16> to vector<128x512xbf16>
    %cst_432 = arith.constant dense<0.000000e+00> : vector<8x512xf32>
    %957 = tpu.matmul %954, %956, %cst_432 {dimension_numbers = #tpu.dot_dimension_numbers<[1], [0], [0], [1], [0, 0, 1, 1], [], []>} : vector<8x128xbf16>, vector<128x512xbf16>, vector<8x512xf32> -> vector<8x512xf32>
    %958 = arith.addf %953, %957 : vector<8x512xf32>
    %959 = vector.extract_strided_slice %958 {offsets = [0, 0], sizes = [8, 128], strides = [1, 1]} : vector<8x512xf32> to vector<8x128xf32>
    %cst_433 = arith.constant 5.000000e-01 : f32
    %960 = vector.broadcast %cst_433 : f32 to vector<8x128xf32>
    %961 = arith.mulf %960, %959 : vector<8x128xf32>
    %962 = math.tanh %961 : vector<8x128xf32>
    %cst_434 = arith.constant 5.000000e-01 : f32
    %963 = vector.broadcast %cst_434 : f32 to vector<8x128xf32>
    %964 = arith.mulf %963, %962 : vector<8x128xf32>
    %cst_435 = arith.constant 5.000000e-01 : f32
    %965 = vector.broadcast %cst_435 : f32 to vector<8x128xf32>
    %966 = arith.addf %964, %965 : vector<8x128xf32>
    %967 = vector.extract_strided_slice %958 {offsets = [0, 128], sizes = [8, 128], strides = [1, 1]} : vector<8x512xf32> to vector<8x128xf32>
    %cst_436 = arith.constant 5.000000e-01 : f32
    %968 = vector.broadcast %cst_436 : f32 to vector<8x128xf32>
    %969 = arith.mulf %968, %967 : vector<8x128xf32>
    %970 = math.tanh %969 : vector<8x128xf32>
    %cst_437 = arith.constant 5.000000e-01 : f32
    %971 = vector.broadcast %cst_437 : f32 to vector<8x128xf32>
    %972 = arith.mulf %971, %970 : vector<8x128xf32>
    %cst_438 = arith.constant 5.000000e-01 : f32
    %973 = vector.broadcast %cst_438 : f32 to vector<8x128xf32>
    %974 = arith.addf %972, %973 : vector<8x128xf32>
    %975 = vector.extract_strided_slice %958 {offsets = [0, 256], sizes = [8, 128], strides = [1, 1]} : vector<8x512xf32> to vector<8x128xf32>
    %976 = math.tanh %975 : vector<8x128xf32>
    %977 = vector.extract_strided_slice %958 {offsets = [0, 384], sizes = [8, 128], strides = [1, 1]} : vector<8x512xf32> to vector<8x128xf32>
    %cst_439 = arith.constant 5.000000e-01 : f32
    %978 = vector.broadcast %cst_439 : f32 to vector<8x128xf32>
    %979 = arith.mulf %978, %977 : vector<8x128xf32>
    %980 = math.tanh %979 : vector<8x128xf32>
    %cst_440 = arith.constant 5.000000e-01 : f32
    %981 = vector.broadcast %cst_440 : f32 to vector<8x128xf32>
    %982 = arith.mulf %981, %980 : vector<8x128xf32>
    %cst_441 = arith.constant 5.000000e-01 : f32
    %983 = vector.broadcast %cst_441 : f32 to vector<8x128xf32>
    %984 = arith.addf %982, %983 : vector<8x128xf32>
    %985 = arith.mulf %974, %950 : vector<8x128xf32>
    %986 = arith.mulf %966, %976 : vector<8x128xf32>
    %987 = arith.addf %985, %986 : vector<8x128xf32>
    %988 = math.tanh %987 : vector<8x128xf32>
    %989 = arith.mulf %984, %988 : vector<8x128xf32>
    %c2_i32_442 = arith.constant 2 : i32
    %990 = tpu.memref_slice %arg20[%c2_i32_442] : memref<4x!tpu.dma_semaphore, #tpu.memory_space<semaphore_mem>> -> memref<1x!tpu.dma_semaphore, #tpu.memory_space<semaphore_mem>>
    %991 = tpu.memref_squeeze %990 : memref<1x!tpu.dma_semaphore, #tpu.memory_space<semaphore_mem>> -> memref<!tpu.dma_semaphore, #tpu.memory_space<semaphore_mem>>
    tpu.wait_dma2 semaphore(%991 : memref<!tpu.dma_semaphore, #tpu.memory_space<semaphore_mem>>) src(%arg10 : memref<256x128xbf16, #tpu.memory_space<any>>) dst(%arg18 : memref<256x128xbf16, #tpu.memory_space<vmem>>)
    %c3_i32_443 = arith.constant 3 : i32
    %992 = tpu.memref_slice %arg20[%c3_i32_443] : memref<4x!tpu.dma_semaphore, #tpu.memory_space<semaphore_mem>> -> memref<1x!tpu.dma_semaphore, #tpu.memory_space<semaphore_mem>>
    %993 = tpu.memref_squeeze %992 : memref<1x!tpu.dma_semaphore, #tpu.memory_space<semaphore_mem>> -> memref<!tpu.dma_semaphore, #tpu.memory_space<semaphore_mem>>
    tpu.wait_dma2 semaphore(%993 : memref<!tpu.dma_semaphore, #tpu.memory_space<semaphore_mem>>) src(%arg11 : memref<128x128xbf16, #tpu.memory_space<any>>) dst(%arg19 : memref<128x128xbf16, #tpu.memory_space<vmem>>)
    %994 = arith.truncf %989 : vector<8x128xf32> to vector<8x128xbf16>
    %c0_444 = arith.constant 0 : index
    %c0_445 = arith.constant 0 : index
    %995 = vector.load %arg18[%c0_444, %c0_445] : memref<256x128xbf16, #tpu.memory_space<vmem>>, vector<128x128xbf16>
    %cst_446 = arith.constant dense<0.000000e+00> : vector<8x128xf32>
    %996 = tpu.matmul %994, %995, %cst_446 {dimension_numbers = #tpu.dot_dimension_numbers<[1], [0], [0], [1], [0, 0, 1, 1], [], []>} : vector<8x128xbf16>, vector<128x128xbf16>, vector<8x128xf32> -> vector<8x128xf32>
    %997 = arith.truncf %689 : vector<8x128xf32> to vector<8x128xbf16>
    %c128_447 = arith.constant 128 : index
    %c0_448 = arith.constant 0 : index
    %998 = vector.load %arg18[%c128_447, %c0_448] : memref<256x128xbf16, #tpu.memory_space<vmem>>, vector<128x128xbf16>
    %cst_449 = arith.constant dense<0.000000e+00> : vector<8x128xf32>
    %999 = tpu.matmul %997, %998, %cst_449 {dimension_numbers = #tpu.dot_dimension_numbers<[1], [0], [0], [1], [0, 0, 1, 1], [], []>} : vector<8x128xbf16>, vector<128x128xbf16>, vector<8x128xf32> -> vector<8x128xf32>
    %1000 = arith.addf %996, %999 : vector<8x128xf32>
    %c0_450 = arith.constant 0 : index
    %c0_451 = arith.constant 0 : index
    %1001 = vector.load %arg6[%c0_450, %c0_451] : memref<1x128xf32, #tpu.memory_space<vmem>>, vector<1x128xf32>
    %1002 = vector.broadcast %1001 : vector<1x128xf32> to vector<8x128xf32>
    %1003 = arith.addf %1000, %1002 : vector<8x128xf32>
    %cst_452 = arith.constant 0.000000e+00 : f32
    %1004 = vector.broadcast %cst_452 : f32 to vector<8x128xf32>
    %1005 = arith.maximumf %1003, %1004 : vector<8x128xf32>
    %1006 = arith.truncf %1005 : vector<8x128xf32> to vector<8x128xbf16>
    %c0_453 = arith.constant 0 : index
    %c0_454 = arith.constant 0 : index
    %1007 = vector.load %arg19[%c0_453, %c0_454] : memref<128x128xbf16, #tpu.memory_space<vmem>>, vector<128x128xbf16>
    %cst_455 = arith.constant dense<0.000000e+00> : vector<8x128xf32>
    %1008 = tpu.matmul %1006, %1007, %cst_455 {dimension_numbers = #tpu.dot_dimension_numbers<[1], [0], [0], [1], [0, 0, 1, 1], [], []>} : vector<8x128xbf16>, vector<128x128xbf16>, vector<8x128xf32> -> vector<8x128xf32>
    %c0_456 = arith.constant 0 : index
    %c0_457 = arith.constant 0 : index
    %1009 = vector.load %arg7[%c0_456, %c0_457] : memref<1x128xf32, #tpu.memory_space<vmem>>, vector<1x128xf32>
    %1010 = vector.broadcast %1009 : vector<1x128xf32> to vector<8x128xf32>
    %1011 = arith.addf %1008, %1010 : vector<8x128xf32>
    %cst_458 = arith.constant 5.000000e-01 : f32
    %1012 = vector.broadcast %cst_458 : f32 to vector<8x128xf32>
    %1013 = arith.mulf %1012, %1011 : vector<8x128xf32>
    %1014 = math.tanh %1013 : vector<8x128xf32>
    %cst_459 = arith.constant 5.000000e-01 : f32
    %1015 = vector.broadcast %cst_459 : f32 to vector<8x128xf32>
    %1016 = arith.mulf %1015, %1014 : vector<8x128xf32>
    %cst_460 = arith.constant 5.000000e-01 : f32
    %1017 = vector.broadcast %cst_460 : f32 to vector<8x128xf32>
    %1018 = arith.addf %1016, %1017 : vector<8x128xf32>
    %c0_461 = arith.constant 0 : index
    %c0_462 = arith.constant 0 : index
    %1019 = vector.load %arg12[%c0_461, %c0_462] : memref<8x128xf32, #tpu.memory_space<vmem>>, vector<8x128xf32>
    tpu.vector_store %arg12[%c0_461, %c0_462], %1018 {strides = array<i32>} : memref<8x128xf32, #tpu.memory_space<vmem>>, vector<8x128xf32>,
    return
  }
}

</mosaic_0001>

<bundles_post_ra>
// kernel: rnn_classifier_forward.1
= control target key start
LH: loop header
LB: loop body
LE: loop exit
PB: predicated region body
PF: predicated region fallthrough
CT: control target
= control target key end

     0   :  { %17 = vsyncpa [#allocation11], 0  ;;  %s5606_s21 = smov [#allocation10]   ;;  %s7863_s0 = inlined_call_operand.vmem [shape: bf16[64,128], index: 0, kind: input, shape index: {}]   ;;  %s7864_s1 = inlined_call_operand.hbm [shape: bf16[128,1024], index: 1, kind: input, shape index: {}]   ;;  %s7865_s2 = inlined_call_operand.vmem [shape: f32[1,1024], index: 2, kind: input, shape index: {}]   ;;  %s7866_s3 = inlined_call_operand.vmem [shape: f32[1,1024], index: 3, kind: input, shape index: {}]   ;;  %s7867_s4 = inlined_call_operand.vmem [shape: f32[4,8,128], index: 4, kind: input, shape index: {}]   ;;  %s7868_s5 = inlined_call_operand.vmem [shape: f32[4,8,128], index: 5, kind: input, shape index: {}]   ;;  %s7869_s6 = inlined_call_operand.vmem [shape: f32[1,128], index: 6, kind: input, shape index: {}]   ;;  %s7870_s7 = inlined_call_operand.vmem [shape: f32[1,128], index: 7, kind: input, shape index: {}]   ;;  %s7871_s8 = inlined_call_operand.hbm [shape: bf16[256,1024], index: 8, kind: input, shape index: {}]   ;;  %s7872_s9 = inlined_call_operand.hbm [shape: bf16[4,128,512], index: 9, kind: input, shape index: {}]   ;;  %s7873_s10 = inlined_call_operand.vmem [shape: bf16[256,128], index: 10, kind: input, shape index: {}]   ;;  %s7874_s11 = inlined_call_operand.vmem [shape: bf16[128,128], index: 11, kind: input, shape index: {}]   ;;  %s7875_s12 = inlined_call_operand.vmem [shape: f32[8,128], index: 12, kind: output, shape index: {}]  }
   0x1   :  { %s25_s22 = sshll.u32 %s5606_s21, 4  ;;  %s5574_s25 = scalar_lea.hbm %s7864_s1, 8192  ;;  %s26_s22 = int_to_ptr.vmem [resolvable:$true] %s25_s22 }
   0x2   :  { %p5575_p0 = scmp.ne.s32.totalorder %s7864_s1, %s5574_s25  ;;  %p5578_p1 = scmp.lt.u32.totalorder %s5574_s25, %s7864_s1 }
   0x4   :  { %p5580_p2 = pnand %p5578_p1, %p5575_p0 }
   0x6   :  { %5583 = shalt.err (!%p5580_p2)
}
   0x7   :  { %s5584_s30 = scalar_lea.vmem %s26_s22, 8192  ;;  %p5589_p4 = scmp.lt.s32.totalorder %s26_s22, %s26_s22 }
   0x8   :  { %p5585_p3 = scmp.ne.s32.totalorder %s26_s22, %s5584_s30  ;;  %p5590_p5 = scmp.lt.s32.totalorder %s5584_s30, %s5584_s30 }
   0xa   :  { %p5591_p6 = por %p5590_p5, %p5589_p4 }
   0xc   :  { %p5592_p7 = pnand %p5591_p6, %p5585_p3 }
   0xe   :  { %5595 = shalt.err (!%p5592_p7)
}
   0xf   :  { %s5607_s13 = smov 512   ;;  %s5608_s14 = smov 32  }
  0x10   :  { %31 = dma.hbm_to_vmem [thread:$0]  %s7864_s1, 8192, %s26_s22, [#allocation11], %s5607_s13, %s5607_s13, %s5608_s14  }
  0x11   :  { %5596 = dma.done.wait [#allocation11], 8192  }
  0x12   :  { %5597 = vsyncadd [#allocation11], 4294959104  ;;  %s52_s17 = sld [smem:[#allocation0]]   ;;  %64 = sst [smem:[#allocation13]] %s5607_s13 }
  0x13   :  { %66 = sst [smem:[#allocation13 + $0x1]] %s5607_s13  ;;  %s5609_s18 = smov [#allocation6]  }
  0x14   :  { %s60_s19 = sshll.u32 %s5609_s18, 4  ;;  %s5610_s20 = smov 256   ;;  %s61_s19 = int_to_ptr.vmem [resolvable:$true] %s60_s19 }
  0x15   :  { %76 = sst [smem:[#allocation13 + $0x6]] %s5610_s20  ;;  %s5611_s21 = smov 4  }
  0x16   :  { %68 = sst [smem:[#allocation13 + $0x2]] %s5611_s21  ;;  %s5612_s23 = smov 64  }
  0x17   :  { %70 = sst [smem:[#allocation13 + $0x3]] %s5612_s23  ;;  %s5613_s25 = smov 128  }
  0x18   :  { %s5084_s24 = sshll.u32 %s52_s17, 26  ;;  %72 = sst [smem:[#allocation13 + $0x4]] %s5613_s25 }
  0x19   :  { %s5085_s1 = sadd.s32 134217728, %s5084_s24  ;;  %s5614_s22 = smov 2  }
  0x1a   :  { %74 = sst [smem:[#allocation13 + $0x5]] %s5614_s22  ;;  %s5615_s26 = smov [#allocation9]  }
  0x1b   :  { %78 = sst [smem:[#allocation13 + $0x7]] %s5612_s23  ;;  %s5616_s27 = smov [#allocation12]  }
  0x1c   :  { %80 = sst [smem:[#allocation13 + $0x8]] %s5611_s21  ;;  %s5617_s30 = smov 1024  }
  0x1d   :  { %82 = dma.general %s7872_s9, 16384, %s61_s19, %s5615_s26, %s5616_s27, [#allocation13], %s5085_s1, 0  }
  0x1e   :  { %99 = sst [smem:[#allocation15]] %s5617_s30  ;;  %s5618_s14 = smov [#allocation5]  }
  0x1f   :  { %101 = sst [smem:[#allocation15 + $0x1]] %s5617_s30  ;;  %s95_s15 = sshll.u32 %s5618_s14, 4  ;;  %s96_s15 = int_to_ptr.vmem [resolvable:$true] %s95_s15 }
  0x20   :  { %s5619_s16 = smov 8   ;;  %105 = sst [smem:[#allocation15 + $0x3]] %s5612_s23 }
  0x21   :  { %103 = sst [smem:[#allocation15 + $0x2]] %s5619_s16  ;;  %s5620_s17 = smov [#allocation9 + $0x1]  }
  0x22   :  { %107 = sst [smem:[#allocation15 + $0x4]] %s5613_s25  ;;  %s5621_s18 = smov [#allocation14]  }
  0x23   :  { %109 = sst [smem:[#allocation15 + $0x5]] %s5614_s22 }
  0x24   :  { %111 = sst [smem:[#allocation15 + $0x6]] %s5607_s13 }
  0x25   :  { %113 = sst [smem:[#allocation15 + $0x7]] %s5612_s23 }
  0x26   :  { %115 = sst [smem:[#allocation15 + $0x8]] %s5611_s21 }
  0x27   :  { %117 = dma.general %s7871_s8, 16384, %s96_s15, %s5620_s17, %s5621_s18, [#allocation15], %s5085_s1, 0  }
  0x28   :  { %v5716_v0 = vld [vmem:[%s7873_s10] sm:$0xff]  ;;  %v5721_v1 = vld [vmem:[%s7873_s10 + $0x8] sm:$0xff]  ;;  %v5726_v2 = vld [vmem:[%s7873_s10 + $0x10] sm:$0xff] }
  0x29   :  { %7976 = vst [vmem:[#allocation23_spill] sm:$0xff] %v5716_v0  ;;  %7977 = vst [vmem:[#allocation24_spill] sm:$0xff] %v5721_v1  ;;  %v5731_v3 = vld [vmem:[%s7873_s10 + $0x18] sm:$0xff]  ;;  %v5736_v4 = vld [vmem:[%s7873_s10 + $0x20] sm:$0xff] }
  0x2a   :  { %7978 = vst [vmem:[#allocation25_spill] sm:$0xff] %v5726_v2  ;;  %7979 = vst [vmem:[#allocation26_spill] sm:$0xff] %v5731_v3  ;;  %v5741_v5 = vld [vmem:[%s7873_s10 + $0x28] sm:$0xff]  ;;  %v5746_v6 = vld [vmem:[%s7873_s10 + $0x30] sm:$0xff] }
  0x2b   :  { %7980 = vst [vmem:[#allocation27_spill] sm:$0xff] %v5736_v4  ;;  %7981 = vst [vmem:[#allocation28_spill] sm:$0xff] %v5741_v5  ;;  %v5751_v7 = vld [vmem:[%s7873_s10 + $0x38] sm:$0xff]  ;;  %v5756_v8 = vld [vmem:[%s7873_s10 + $0x40] sm:$0xff] }
  0x2c   :  { %7982 = vst [vmem:[#allocation29_spill] sm:$0xff] %v5746_v6  ;;  %7983 = vst [vmem:[#allocation30_spill] sm:$0xff] %v5751_v7  ;;  %v5761_v9 = vld [vmem:[%s7873_s10 + $0x48] sm:$0xff]  ;;  %v5766_v10 = vld [vmem:[%s7873_s10 + $0x50] sm:$0xff] }
  0x2d   :  { %7984 = vst [vmem:[#allocation31_spill] sm:$0xff] %v5756_v8  ;;  %7985 = vst [vmem:[#allocation32_spill] sm:$0xff] %v5761_v9  ;;  %v5771_v11 = vld [vmem:[%s7873_s10 + $0x58] sm:$0xff]  ;;  %v5776_v12 = vld [vmem:[%s7873_s10 + $0x60] sm:$0xff] }
  0x2e   :  { %7986 = vst [vmem:[#allocation33_spill] sm:$0xff] %v5766_v10  ;;  %7987 = vst [vmem:[#allocation34_spill] sm:$0xff] %v5771_v11  ;;  %v5781_v13 = vld [vmem:[%s7873_s10 + $0x68] sm:$0xff]  ;;  %v5786_v14 = vld [vmem:[%s7873_s10 + $0x70] sm:$0xff] }
  0x2f   :  { %7988 = vst [vmem:[#allocation35_spill] sm:$0xff] %v5776_v12  ;;  %7989 = vst [vmem:[#allocation36_spill] sm:$0xff] %v5781_v13  ;;  %v5791_v15 = vld [vmem:[%s7873_s10 + $0x78] sm:$0xff] }
  0x30   :  { %7990 = vst [vmem:[#allocation37_spill] sm:$0xff] %v5786_v14  ;;  %7991 = vst [vmem:[#allocation38_spill] sm:$0xff] %v5791_v15 }
  0x31   :  { %190 = vsyncadd [#allocation9 + $0x2], 2048  ;;  %v5796_v16 = vld [vmem:[%s7874_s11] sm:$0xff]  ;;  %v5801_v17 = vld [vmem:[%s7874_s11 + $0x8] sm:$0xff] }
  0x32   :  { %7992 = vst [vmem:[#allocation39_spill] sm:$0xff] %v5796_v16  ;;  %7993 = vst [vmem:[#allocation40_spill] sm:$0xff] %v5801_v17  ;;  %v5806_v18 = vld [vmem:[%s7874_s11 + $0x10] sm:$0xff]  ;;  %v5811_v19 = vld [vmem:[%s7874_s11 + $0x18] sm:$0xff] }
  0x33   :  { %7994 = vst [vmem:[#allocation41_spill] sm:$0xff] %v5806_v18  ;;  %7995 = vst [vmem:[#allocation42_spill] sm:$0xff] %v5811_v19  ;;  %v5816_v20 = vld [vmem:[%s7874_s11 + $0x20] sm:$0xff]  ;;  %v5821_v21 = vld [vmem:[%s7874_s11 + $0x28] sm:$0xff] }
  0x34   :  { %7996 = vst [vmem:[#allocation43_spill] sm:$0xff] %v5816_v20  ;;  %7997 = vst [vmem:[#allocation44_spill] sm:$0xff] %v5821_v21  ;;  %v5826_v22 = vld [vmem:[%s7874_s11 + $0x30] sm:$0xff]  ;;  %v5831_v23 = vld [vmem:[%s7874_s11 + $0x38] sm:$0xff] }
  0x35   :  { %7998 = vst [vmem:[#allocation45_spill] sm:$0xff] %v5826_v22  ;;  %7999 = vst [vmem:[#allocation46_spill] sm:$0xff] %v5831_v23 }
  0x36   :  { %247 = vsyncadd [#allocation9 + $0x3], 1024  ;;  %v256_v24 = vld [vmem:[#allocation10] sm:$0xff]  ;;  %v257_v27 = vld [vmem:[#allocation10 + $0x8] sm:$0xff]  ;;  %v7876_v31 = vmov 0  }
  0x37   :  { %v260_v25 = vld [vmem:[#allocation10 + $0x20] sm:$0xff]  ;;  %v261_v28 = vld [vmem:[#allocation10 + $0x28] sm:$0xff]  ;;  %738 = vmatprep.mubr.bf16.mxu0 %v7876_v31  ;;  %811 = vmatprep.mubr.bf16.mxu1 %v7876_v31 }
  0x38   :  { %v5093_v26 = vcombine.high %v256_v24, %v260_v25  ;;  %v5092_v29 = vcombine.low %v256_v24, %v260_v25  ;;  %v264_v30 = vld [vmem:[#allocation10 + $0x40] sm:$0xff]  ;;  %v5095_v32 = vcombine.high %v257_v27, %v261_v28  ;;  %v5094_v33 = vcombine.low %v257_v27, %v261_v28  ;;  %v265_v35 = vld [vmem:[#allocation10 + $0x48] sm:$0xff] }
  0x39   :  { %v268_v34 = vld [vmem:[#allocation10 + $0x60] sm:$0xff]  ;;  %v269_v36 = vld [vmem:[#allocation10 + $0x68] sm:$0xff] }
  0x3a   :  { %706 = vmatprep.subr.bf16.mxu0 %v5093_v26  ;;  %v5101_v37 = vcombine.high %v264_v30, %v268_v34  ;;  %v5103_v38 = vcombine.high %v265_v35, %v269_v36  ;;  %v272_v39 = vld [vmem:[#allocation10 + $0x80] sm:$0xff]  ;;  %v273_v41 = vld [vmem:[#allocation10 + $0x88] sm:$0xff]  ;;  %779 = vmatprep.subr.bf16.mxu1 %v5095_v32  ;;  %v5100_v42 = vcombine.low %v264_v30, %v268_v34 }
  0x3b   :  { %v276_v40 = vld [vmem:[#allocation10 + $0xa0] sm:$0xff]  ;;  %707 = vmatpush1.bf16.msra.mxu0 %v5092_v29  ;;  %v277_v43 = vld [vmem:[#allocation10 + $0xa8] sm:$0xff]  ;;  %780 = vmatpush1.bf16.msra.mxu1 %v5094_v33  ;;  %v5102_v44 = vcombine.low %v265_v35, %v269_v36 }
  0x3c   :  { %708 = vmatprep.subr.bf16.mxu0 %v5101_v37  ;;  %v5109_v45 = vcombine.high %v272_v39, %v276_v40  ;;  %781 = vmatprep.subr.bf16.mxu1 %v5103_v38  ;;  %v5111_v46 = vcombine.high %v273_v41, %v277_v43  ;;  %v280_v47 = vld [vmem:[#allocation10 + $0xc0] sm:$0xff]  ;;  %v281_v49 = vld [vmem:[#allocation10 + $0xc8] sm:$0xff]  ;;  %v5108_v51 = vcombine.low %v272_v39, %v276_v40 }
  0x3d   :  { %v284_v48 = vld [vmem:[#allocation10 + $0xe0] sm:$0xff]  ;;  %v285_v50 = vld [vmem:[#allocation10 + $0xe8] sm:$0xff]  ;;  %v5110_v52 = vcombine.low %v273_v41, %v277_v43 }
  0x3e   :  { %v5117_v53 = vcombine.high %v280_v47, %v284_v48  ;;  %v5119_v54 = vcombine.high %v281_v49, %v285_v50  ;;  %v288_v55 = vld [vmem:[#allocation10 + $0x100] sm:$0xff]  ;;  %v289_v57 = vld [vmem:[#allocation10 + $0x108] sm:$0xff]  ;;  %v5116_v59 = vcombine.low %v280_v47, %v284_v48  ;;  %v5118_v60 = vcombine.low %v281_v49, %v285_v50  ;;  %v258_v48 = vld [vmem:[#allocation10 + $0x10] sm:$0xff] }
  0x3f   :  { %709 = vmatpush1.bf16.msra.mxu0 %v5100_v42  ;;  %782 = vmatpush1.bf16.msra.mxu1 %v5102_v44  ;;  %v292_v56 = vld [vmem:[#allocation10 + $0x120] sm:$0xff]  ;;  %v293_v58 = vld [vmem:[#allocation10 + $0x128] sm:$0xff]  ;;  %v262_v49 = vld [vmem:[#allocation10 + $0x30] sm:$0xff] }
  0x40   :  { %710 = vmatprep.subr.bf16.mxu0 %v5109_v45  ;;  %783 = vmatprep.subr.bf16.mxu1 %v5111_v46  ;;  %v5125_v61 = vcombine.high %v288_v55, %v292_v56  ;;  %v5127_v62 = vcombine.high %v289_v57, %v293_v58  ;;  %v296_v63 = vld [vmem:[#allocation10 + $0x140] sm:$0xff]  ;;  %v297_v25 = vld [vmem:[#allocation10 + $0x148] sm:$0xff]  ;;  %v5124_v27 = vcombine.low %v288_v55, %v292_v56  ;;  %v259_v50 = vld [vmem:[#allocation10 + $0x18] sm:$0xff] }
  0x41   :  { %v300_v24 = vld [vmem:[#allocation10 + $0x160] sm:$0xff]  ;;  %v301_v26 = vld [vmem:[#allocation10 + $0x168] sm:$0xff]  ;;  %v5126_v28 = vcombine.low %v289_v57, %v293_v58  ;;  %v266_v56 = vld [vmem:[#allocation10 + $0x50] sm:$0xff] }
  0x42   :  { %v5133_v29 = vcombine.high %v296_v63, %v300_v24  ;;  %v304_v30 = vld [vmem:[#allocation10 + $0x180] sm:$0xff]  ;;  %v5135_v32 = vcombine.high %v297_v25, %v301_v26  ;;  %v305_v34 = vld [vmem:[#allocation10 + $0x188] sm:$0xff]  ;;  %v5132_v36 = vcombine.low %v296_v63, %v300_v24  ;;  %v5134_v37 = vcombine.low %v297_v25, %v301_v26  ;;  %v270_v57 = vld [vmem:[#allocation10 + $0x70] sm:$0xff] }
  0x43   :  { %711 = vmatpush1.bf16.msra.mxu0 %v5108_v51  ;;  %784 = vmatpush1.bf16.msra.mxu1 %v5110_v52  ;;  %v308_v33 = vld [vmem:[#allocation10 + $0x1a0] sm:$0xff]  ;;  %v309_v35 = vld [vmem:[#allocation10 + $0x1a8] sm:$0xff]  ;;  %v263_v51 = vld [vmem:[#allocation10 + $0x38] sm:$0xff]  ;;  %v5105_v63 = vcombine.high %v266_v56, %v270_v57 }
  0x44   :  { %712 = vmatprep.subr.bf16.mxu0 %v5117_v53  ;;  %785 = vmatprep.subr.bf16.mxu1 %v5119_v54  ;;  %v5141_v38 = vcombine.high %v304_v30, %v308_v33  ;;  %v312_v39 = vld [vmem:[#allocation10 + $0x1c0] sm:$0xff]  ;;  %v5143_v40 = vcombine.high %v305_v34, %v309_v35  ;;  %v313_v42 = vld [vmem:[#allocation10 + $0x1c8] sm:$0xff]  ;;  %v5140_v44 = vcombine.low %v304_v30, %v308_v33  ;;  %v274_v25 = vld [vmem:[#allocation10 + $0x90] sm:$0xff] }
  0x45   :  { %v316_v41 = vld [vmem:[#allocation10 + $0x1e0] sm:$0xff]  ;;  %v317_v43 = vld [vmem:[#allocation10 + $0x1e8] sm:$0xff]  ;;  %v5142_v45 = vcombine.low %v305_v34, %v309_v35  ;;  %v5097_v54 = vcombine.high %v258_v48, %v262_v49  ;;  %v5099_v55 = vcombine.high %v259_v50, %v263_v51  ;;  %v278_v26 = vld [vmem:[#allocation10 + $0xb0] sm:$0xff] }
  0x46   :  { %v5149_v46 = vcombine.high %v312_v39, %v316_v41  ;;  %v5151_v47 = vcombine.high %v313_v42, %v317_v43  ;;  %v5148_v52 = vcombine.low %v312_v39, %v316_v41  ;;  %v5150_v53 = vcombine.low %v313_v42, %v317_v43  ;;  %v5838_v58 = vld [vmem:[%s7863_s0] sm:$0xff]   ;;  %v282_v34 = vld [vmem:[#allocation10 + $0xd0] sm:$0xff] }
  0x47   :  { %713 = vmatpush1.bf16.msra.mxu0 %v5116_v59  ;;  %786 = vmatpush1.bf16.msra.mxu1 %v5118_v60  ;;  %v267_v59 = vld [vmem:[#allocation10 + $0x58] sm:$0xff]  ;;  %v286_v35 = vld [vmem:[#allocation10 + $0xf0] sm:$0xff]  ;;  %v5112_v39 = vcombine.low %v274_v25, %v278_v26 }
  0x48   :  { %714 = vmatprep.subr.bf16.mxu0 %v5125_v61  ;;  %787 = vmatprep.subr.bf16.mxu1 %v5127_v62  ;;  %v271_v60 = vld [vmem:[#allocation10 + $0x78] sm:$0xff]  ;;  %v5096_v61 = vcombine.low %v258_v48, %v262_v49  ;;  %v5098_v62 = vcombine.low %v259_v50, %v263_v51  ;;  %v5121_v41 = vcombine.high %v282_v34, %v286_v35  ;;  %v290_v43 = vld [vmem:[#allocation10 + $0x110] sm:$0xff] }
  0x49   :  { %v5107_v24 = vcombine.high %v267_v59, %v271_v60  ;;  %v5106_v30 = vcombine.low %v267_v59, %v271_v60  ;;  %v298_v51 = vld [vmem:[#allocation10 + $0x150] sm:$0xff] }
  0x4b   :  { %715 = vmatpush1.bf16.msra.mxu0 %v5124_v27  ;;  %788 = vmatpush1.bf16.msra.mxu1 %v5126_v28  ;;  %v275_v27 = vld [vmem:[#allocation10 + $0x98] sm:$0xff] }
  0x4c   :  { %716 = vmatprep.subr.bf16.mxu0 %v5133_v29  ;;  %789 = vmatprep.subr.bf16.mxu1 %v5135_v32  ;;  %v279_v28 = vld [vmem:[#allocation10 + $0xb8] sm:$0xff]  ;;  %v5104_v29 = vcombine.low %v266_v56, %v270_v57  ;;  %v5113_v32 = vcombine.high %v274_v25, %v278_v26 }
  0x4d   :  { %v5115_v33 = vcombine.high %v275_v27, %v279_v28 }
  0x4f   :  { %717 = vmatpush1.bf16.msra.mxu0 %v5132_v36  ;;  %790 = vmatpush1.bf16.msra.mxu1 %v5134_v37  ;;  %v5847_v36 = vld [vmem:[%s7863_s0 + $0x8] sm:$0xff]   ;;  %v283_v37 = vld [vmem:[#allocation10 + $0xd8] sm:$0xff] }
  0x50   :  { %718 = vmatprep.subr.bf16.mxu0 %v5141_v38  ;;  %791 = vmatprep.subr.bf16.mxu1 %v5143_v40  ;;  %v287_v38 = vld [vmem:[#allocation10 + $0xf8] sm:$0xff]  ;;  %v5114_v40 = vcombine.low %v275_v27, %v279_v28 }
  0x51   :  { %v5123_v42 = vcombine.high %v283_v37, %v287_v38  ;;  %v5122_v48 = vcombine.low %v283_v37, %v287_v38 }
  0x53   :  { %719 = vmatpush1.bf16.msra.mxu0 %v5140_v44  ;;  %792 = vmatpush1.bf16.msra.mxu1 %v5142_v45  ;;  %v294_v44 = vld [vmem:[#allocation10 + $0x130] sm:$0xff]  ;;  %v291_v45 = vld [vmem:[#allocation10 + $0x118] sm:$0xff] }
  0x54   :  { %720 = vmatprep.subr.bf16.mxu0 %v5149_v46  ;;  %793 = vmatprep.subr.bf16.mxu1 %v5151_v47  ;;  %v295_v46 = vld [vmem:[#allocation10 + $0x138] sm:$0xff]  ;;  %v5120_v47 = vcombine.low %v282_v34, %v286_v35  ;;  %v5129_v49 = vcombine.high %v290_v43, %v294_v44  ;;  %v5128_v56 = vcombine.low %v290_v43, %v294_v44 }
  0x55   :  { %v5131_v50 = vcombine.high %v291_v45, %v295_v46  ;;  %v5130_v57 = vcombine.low %v291_v45, %v295_v46  ;;  %v319_v34 = vld [vmem:[#allocation10 + $0x1f8] sm:$0xff] }
  0x57   :  { %721 = vmatpush1.bf16.msra.mxu0 %v5148_v52  ;;  %794 = vmatpush1.bf16.msra.mxu1 %v5150_v53  ;;  %v302_v52 = vld [vmem:[#allocation10 + $0x170] sm:$0xff] }
  0x58   :  { %852 = vmatprep.subr.bf16.mxu0 %v5097_v54  ;;  %925 = vmatprep.subr.bf16.mxu1 %v5099_v55  ;;  %v5288_v53 = vld [vmem:[%s7863_s0 + $0x10] sm:$0xff]   ;;  %v299_v54 = vld [vmem:[#allocation10 + $0x158] sm:$0xff]  ;;  %v5137_v59 = vcombine.high %v298_v51, %v302_v52  ;;  %v5136_v25 = vcombine.low %v298_v51, %v302_v52 }
  0x59   :  { %v303_v55 = vld [vmem:[#allocation10 + $0x178] sm:$0xff] }
  0x5a   :  { %739 = vmatmul.mubr.bf16.vlgmr.msra.gmra.mrb[0].mxu0 %v5838_v58  ;;  %812 = vmatmul.mubr.bf16.vlgmr.msra.gmra.mrb[0].mxu1 %v5838_v58  ;;  %v5139_v60 = vcombine.high %v299_v54, %v303_v55  ;;  %v5138_v26 = vcombine.low %v299_v54, %v303_v55 }
  0x5b   :  { %853 = vmatpush1.bf16.msra.mxu0 %v5096_v61  ;;  %926 = vmatpush1.bf16.msra.mxu1 %v5098_v62  ;;  %v306_v61 = vld [vmem:[#allocation10 + $0x190] sm:$0xff] }
  0x5c   :  { %854 = vmatprep.subr.bf16.mxu0 %v5105_v63  ;;  %927 = vmatprep.subr.bf16.mxu1 %v5107_v24  ;;  %v310_v62 = vld [vmem:[#allocation10 + $0x1b0] sm:$0xff]  ;;  %v307_v63 = vld [vmem:[#allocation10 + $0x198] sm:$0xff] }
  0x5d   :  { %748 = vmatprep.mubr.bf16.mxu0 %v7876_v31  ;;  %821 = vmatprep.mubr.bf16.mxu1 %v7876_v31  ;;  %v311_v24 = vld [vmem:[#allocation10 + $0x1b8] sm:$0xff]  ;;  %v5145_v27 = vcombine.high %v306_v61, %v310_v62  ;;  %v5144_v35 = vcombine.low %v306_v61, %v310_v62 }
  0x5e   :  { %v5147_v28 = vcombine.high %v307_v63, %v311_v24  ;;  %v5146_v37 = vcombine.low %v307_v63, %v311_v24 }
  0x5f   :  { %855 = vmatpush1.bf16.msra.mxu0 %v5104_v29  ;;  %928 = vmatpush1.bf16.msra.mxu1 %v5106_v30  ;;  %v314_v29 = vld [vmem:[#allocation10 + $0x1d0] sm:$0xff] }
  0x60   :  { %856 = vmatprep.subr.bf16.mxu0 %v5113_v32  ;;  %929 = vmatprep.subr.bf16.mxu1 %v5115_v33  ;;  %v318_v30 = vld [vmem:[#allocation10 + $0x1f0] sm:$0xff]  ;;  %v5289_v32 = vld [vmem:[%s7863_s0 + $0x18] sm:$0xff]  }
  0x61   :  { %v315_v33 = vld [vmem:[#allocation10 + $0x1d8] sm:$0xff]  ;;  %v5153_v38 = vcombine.high %v314_v29, %v318_v30 }
  0x62   :  { %749 = vmatmul.mubr.bf16.gmra.mrb[4].mxu0 %v5847_v36  ;;  %822 = vmatmul.mubr.bf16.gmra.mrb[4].mxu1 %v5847_v36 }
  0x63   :  { %857 = vmatpush1.bf16.msra.mxu0 %v5112_v39  ;;  %930 = vmatpush1.bf16.msra.mxu1 %v5114_v40  ;;  %v5155_v39 = vcombine.high %v315_v33, %v319_v34  ;;  %v5152_v40 = vcombine.low %v314_v29, %v318_v30 }
  0x64   :  { %858 = vmatprep.subr.bf16.mxu0 %v5121_v41  ;;  %931 = vmatprep.subr.bf16.mxu1 %v5123_v42  ;;  %v5154_v41 = vcombine.low %v315_v33, %v319_v34 }
  0x65   :  { %758 = vmatprep.mubr.bf16.mxu0 %v7876_v31  ;;  %831 = vmatprep.mubr.bf16.mxu1 %v7876_v31 }
  0x67   :  { %859 = vmatpush1.bf16.msra.mxu0 %v5120_v47  ;;  %932 = vmatpush1.bf16.msra.mxu1 %v5122_v48 }
  0x68   :  { %860 = vmatprep.subr.bf16.mxu0 %v5129_v49  ;;  %933 = vmatprep.subr.bf16.mxu1 %v5131_v50 }
  0x6a   :  { %759 = vmatmul.mubr.bf16.gmra.mrb[8].mxu0 %v5288_v53  ;;  %832 = vmatmul.mubr.bf16.gmra.mrb[8].mxu1 %v5288_v53 }
  0x6b   :  { %861 = vmatpush1.bf16.msra.mxu0 %v5128_v56  ;;  %934 = vmatpush1.bf16.msra.mxu1 %v5130_v57 }
  0x6c   :  { %862 = vmatprep.subr.bf16.mxu0 %v5137_v59  ;;  %935 = vmatprep.subr.bf16.mxu1 %v5139_v60 }
  0x6d   :  { %768 = vmatprep.mubr.bf16.mxu0 %v7876_v31  ;;  %841 = vmatprep.mubr.bf16.mxu1 %v7876_v31 }
  0x6f   :  { %863 = vmatpush1.bf16.msra.mxu0 %v5136_v25  ;;  %936 = vmatpush1.bf16.msra.mxu1 %v5138_v26 }
  0x70   :  { %864 = vmatprep.subr.bf16.mxu0 %v5145_v27  ;;  %937 = vmatprep.subr.bf16.mxu1 %v5147_v28 }
  0x72   :  { %769 = vmatmul.mubr.bf16.gmra.mrb[12].mxu0 %v5289_v32  ;;  %842 = vmatmul.mubr.bf16.gmra.mrb[12].mxu1 %v5289_v32 }
  0x73   :  { %865 = vmatpush1.bf16.msra.mxu0 %v5144_v35  ;;  %938 = vmatpush1.bf16.msra.mxu1 %v5146_v37 }
  0x74   :  { %866 = vmatprep.subr.bf16.mxu0 %v5153_v38  ;;  %939 = vmatprep.subr.bf16.mxu1 %v5155_v39 }
  0x75   :  { %884 = vmatprep.mubr.bf16.mxu0 %v7876_v31  ;;  %957 = vmatprep.mubr.bf16.mxu1 %v7876_v31 }
  0x77   :  { %867 = vmatpush1.bf16.msra.mxu0 %v5152_v40  ;;  %940 = vmatpush1.bf16.msra.mxu1 %v5154_v41 }
  0x7a   :  { %885 = vmatmul.mubr.bf16.vlgmr.msra.gmra.mrb[16].mxu0 %v5838_v58  ;;  %958 = vmatmul.mubr.bf16.vlgmr.msra.gmra.mrb[16].mxu1 %v5838_v58  ;;  %v322_v58 = vlaneseq }
  0x7b   :  { %894 = vmatprep.mubr.bf16.mxu0 %v7876_v31  ;;  %967 = vmatprep.mubr.bf16.mxu1 %v7876_v31 }
  0x7c   :  { %v5873_v42 = vshrl.u32 %v322_v58, 7 }
  0x7e   :  { %v5876_v43 = vsub.s32 0, %v5873_v42  ;;  %v5884_v44 = vsub.s32 2, %v5873_v42  ;;  %v5887_v45 = vsub.s32 1, %v5873_v42  ;;  %v5890_v46 = vsub.s32 3, %v5873_v42 }
  0x7f   :  { %v348_v19 = vsub.s32 6, %v5873_v42 }
  0x80   :  { %8000 = vst [vmem:[#allocation47_spill] sm:$0xff] %v5876_v43  ;;  %8001 = vst [vmem:[#allocation48_spill] sm:$0xff] %v5884_v44 }
  0x81   :  { %8002 = vst [vmem:[#allocation49_spill] sm:$0xff] %v5887_v45  ;;  %8003 = vst [vmem:[#allocation50_spill] sm:$0xff] %v5890_v46 }
  0x82   :  { %895 = vmatmul.mubr.bf16.gmra.mrb[20].mxu0 %v5847_v36  ;;  %968 = vmatmul.mubr.bf16.gmra.mrb[20].mxu1 %v5847_v36  ;;  %v5881_v36 = vld [vmem:[%s7865_s2] sm:$0xff] }
  0x83   :  { %904 = vmatprep.mubr.bf16.mxu0 %v7876_v31  ;;  %977 = vmatprep.mubr.bf16.mxu1 %v7876_v31  ;;  %v5894_v47 = vrot.slane %v5881_v36, %v5876_v43  ;;  %v5898_v48 = vrot.slane %v5881_v36, %v5884_v44  ;;  %v5902_v49 = vrot.slane %v5881_v36, %v5887_v45 }
  0x84   :  { %v5906_v50 = vrot.slane %v5881_v36, %v5890_v46  ;;  %v6010_v14 = vrot.slane %v5881_v36, %v348_v19 }
  0x8a   :  { %905 = vmatmul.mubr.bf16.gmra.mrb[24].mxu0 %v5288_v53  ;;  %978 = vmatmul.mubr.bf16.gmra.mrb[24].mxu1 %v5288_v53 }
  0x8b   :  { %914 = vmatprep.mubr.bf16.mxu0 %v7876_v31  ;;  %987 = vmatprep.mubr.bf16.mxu1 %v7876_v31 }
  0x92   :  { %915 = vmatmul.mubr.bf16.gmra.mrb[28].mxu0 %v5289_v32  ;;  %988 = vmatmul.mubr.bf16.gmra.mrb[28].mxu1 %v5289_v32 }
 0x12d   :  { %v740_v51 = vpop.f32.mrb[0].mxu0  ;;  %v813_v53 = vpop.f32.mrb[0].mxu1 }
 0x12e   :  { %v5909_v52 = vadd.f32 %v740_v51, %v5894_v47  ;;  %v742_v54 = vpop.f32.mrb[1].mxu0  ;;  %v5912_v55 = vadd.f32 %v813_v53, %v5898_v48  ;;  %v815_v57 = vpop.f32.mrb[1].mxu1 }
 0x12f   :  { %v5915_v56 = vadd.f32 %v742_v54, %v5902_v49  ;;  %v744_v59 = vpop.f32.mrb[2].mxu0  ;;  %v5918_v60 = vadd.f32 %v815_v57, %v5906_v50  ;;  %v817_v62 = vpop.f32.mrb[2].mxu1 }
 0x130   :  { %v5921_v61 = vadd.f32 %v744_v59, %v5894_v47  ;;  %v746_v63 = vpop.f32.mrb[3].mxu0  ;;  %v5924_v24 = vadd.f32 %v817_v62, %v5898_v48  ;;  %v819_v26 = vpop.f32.mrb[3].mxu1 }
 0x131   :  { %v5927_v25 = vadd.f32 %v746_v63, %v5902_v49  ;;  %v5930_v27 = vadd.f32 %v819_v26, %v5906_v50 }
 0x132   :  { %8004 = vst [vmem:[#allocation51_spill] sm:$0xff] %v5921_v61  ;;  %8005 = vst [vmem:[#allocation52_spill] sm:$0xff] %v5924_v24 }
 0x133   :  { %8006 = vst [vmem:[#allocation53_spill] sm:$0xff] %v5927_v25  ;;  %8007 = vst [vmem:[#allocation54_spill] sm:$0xff] %v5930_v27 }
 0x135   :  { %v750_v28 = vpop.f32.mrb[4].mxu0  ;;  %v823_v30 = vpop.f32.mrb[4].mxu1 }
 0x136   :  { %v5933_v29 = vadd.f32 %v750_v28, %v5894_v47  ;;  %v752_v32 = vpop.f32.mrb[5].mxu0  ;;  %v5936_v33 = vadd.f32 %v823_v30, %v5898_v48  ;;  %v825_v35 = vpop.f32.mrb[5].mxu1 }
 0x137   :  { %v5939_v34 = vadd.f32 %v752_v32, %v5902_v49  ;;  %v754_v37 = vpop.f32.mrb[6].mxu0  ;;  %v5942_v38 = vadd.f32 %v825_v35, %v5906_v50  ;;  %v827_v40 = vpop.f32.mrb[6].mxu1 }
 0x138   :  { %8008 = vst [vmem:[#allocation55_spill] sm:$0xff] %v5933_v29  ;;  %8009 = vst [vmem:[#allocation56_spill] sm:$0xff] %v5936_v33  ;;  %v5945_v39 = vadd.f32 %v754_v37, %v5894_v47  ;;  %v756_v41 = vpop.f32.mrb[7].mxu0  ;;  %v5948_v58 = vadd.f32 %v827_v40, %v5898_v48  ;;  %v829_v53 = vpop.f32.mrb[7].mxu1 }
 0x139   :  { %8010 = vst [vmem:[#allocation57_spill] sm:$0xff] %v5939_v34  ;;  %8011 = vst [vmem:[#allocation58_spill] sm:$0xff] %v5942_v38  ;;  %v5951_v51 = vadd.f32 %v756_v41, %v5902_v49  ;;  %v5954_v54 = vadd.f32 %v829_v53, %v5906_v50 }
 0x13a   :  { %8012 = vst [vmem:[#allocation59_spill] sm:$0xff] %v5945_v39  ;;  %8013 = vst [vmem:[#allocation60_spill] sm:$0xff] %v5948_v58 }
 0x13b   :  { %8014 = vst [vmem:[#allocation61_spill] sm:$0xff] %v5951_v51  ;;  %8015 = vst [vmem:[#allocation62_spill] sm:$0xff] %v5954_v54 }
 0x13d   :  { %v760_v57 = vpop.f32.mrb[8].mxu0  ;;  %v833_v62 = vpop.f32.mrb[8].mxu1 }
 0x13e   :  { %v5957_v59 = vadd.f32 %v760_v57, %v5894_v47  ;;  %v762_v63 = vpop.f32.mrb[9].mxu0  ;;  %v5960_v26 = vadd.f32 %v833_v62, %v5898_v48  ;;  %v835_v30 = vpop.f32.mrb[9].mxu1 }
 0x13f   :  { %v5963_v28 = vadd.f32 %v762_v63, %v5902_v49  ;;  %v764_v32 = vpop.f32.mrb[10].mxu0  ;;  %v5966_v35 = vadd.f32 %v835_v30, %v5906_v50  ;;  %v837_v40 = vpop.f32.mrb[10].mxu1 }
 0x140   :  { %8016 = vst [vmem:[#allocation63_spill] sm:$0xff] %v5957_v59  ;;  %8017 = vst [vmem:[#allocation64_spill] sm:$0xff] %v5960_v26  ;;  %v5969_v37 = vadd.f32 %v764_v32, %v5894_v47  ;;  %v766_v41 = vpop.f32.mrb[11].mxu0  ;;  %v5972_v53 = vadd.f32 %v837_v40, %v5898_v48  ;;  %v839_v62 = vpop.f32.mrb[11].mxu1  ;;  %v340_v32 = vsub.s32 4, %v5873_v42 }
 0x141   :  { %8018 = vst [vmem:[#allocation65_spill] sm:$0xff] %v5963_v28  ;;  %8019 = vst [vmem:[#allocation66_spill] sm:$0xff] %v5966_v35  ;;  %v5975_v57 = vadd.f32 %v766_v41, %v5902_v49  ;;  %v5978_v63 = vadd.f32 %v839_v62, %v5906_v50  ;;  %v344_v62 = vsub.s32 5, %v5873_v42 }
 0x142   :  { %8020 = vst [vmem:[#allocation67_spill] sm:$0xff] %v5969_v37  ;;  %8021 = vst [vmem:[#allocation68_spill] sm:$0xff] %v5972_v53 }
 0x143   :  { %8022 = vst [vmem:[#allocation69_spill] sm:$0xff] %v5975_v57  ;;  %8023 = vst [vmem:[#allocation70_spill] sm:$0xff] %v5978_v63 }
 0x145   :  { %v770_v31 = vpop.f32.mrb[12].mxu0  ;;  %v843_v30 = vpop.f32.mrb[12].mxu1 }
 0x146   :  { %v5981_v23 = vadd.f32 %v770_v31, %v5894_v47  ;;  %v772_v22 = vpop.f32.mrb[13].mxu0  ;;  %v5985_v21 = vadd.f32 %v843_v30, %v5898_v48  ;;  %v845_v41 = vpop.f32.mrb[13].mxu1  ;;  %v352_v30 = vsub.s32 7, %v5873_v42 }
 0x147   :  { %v5988_v40 = vadd.f32 %v772_v22, %v5902_v49  ;;  %v774_v20 = vpop.f32.mrb[14].mxu0  ;;  %v5993_v18 = vadd.f32 %v845_v41, %v5906_v50  ;;  %v847_v17 = vpop.f32.mrb[14].mxu1  ;;  %v341_v41 = vrot.slane %v5881_v36, %v340_v32 }
 0x148   :  { %8024 = vst [vmem:[#allocation71_spill] sm:$0xff] %v5981_v23  ;;  %8025 = vst [vmem:[#allocation72_spill] sm:$0xff] %v5985_v21  ;;  %v5996_v31 = vadd.f32 %v774_v20, %v5894_v47  ;;  %v776_v16 = vpop.f32.mrb[15].mxu0  ;;  %v6000_v7 = vadd.f32 %v847_v17, %v5898_v48  ;;  %v849_v15 = vpop.f32.mrb[15].mxu1  ;;  %v6013_v20 = vrot.slane %v5881_v36, %v344_v62 }
 0x149   :  { %8026 = vst [vmem:[#allocation73_spill] sm:$0xff] %v5988_v40  ;;  %8027 = vst [vmem:[#allocation74_spill] sm:$0xff] %v5993_v18  ;;  %v6003_v22 = vadd.f32 %v776_v16, %v5902_v49  ;;  %v6006_v6 = vadd.f32 %v849_v15, %v5906_v50  ;;  %v6016_v42 = vrot.slane %v5881_v36, %v352_v30 }
 0x14a   :  { %8028 = vst [vmem:[#allocation75_spill] sm:$0xff] %v5996_v31  ;;  %8029 = vst [vmem:[#allocation76_spill] sm:$0xff] %v6000_v7 }
 0x14b   :  { %8030 = vst [vmem:[#allocation77_spill] sm:$0xff] %v6003_v22  ;;  %8031 = vst [vmem:[#allocation78_spill] sm:$0xff] %v6006_v6 }
 0x14d   :  { %v886_v17 = vpop.f32.mrb[16].mxu0  ;;  %v959_v16 = vpop.f32.mrb[16].mxu1 }
 0x14e   :  { %v6018_v47 = vadd.f32 %v886_v17, %v341_v41  ;;  %v888_v48 = vpop.f32.mrb[17].mxu0  ;;  %v6021_v49 = vadd.f32 %v959_v16, %v6010_v14  ;;  %v961_v50 = vpop.f32.mrb[17].mxu1 }
 0x14f   :  { %v6024_v15 = vadd.f32 %v888_v48, %v6013_v20  ;;  %v890_v19 = vpop.f32.mrb[18].mxu0  ;;  %v6027_v32 = vadd.f32 %v961_v50, %v6016_v42  ;;  %v963_v36 = vpop.f32.mrb[18].mxu1 }
 0x150   :  { %8032 = vst [vmem:[#allocation79_spill] sm:$0xff] %v6018_v47  ;;  %8033 = vst [vmem:[#allocation80_spill] sm:$0xff] %v6021_v49  ;;  %v6029_v62 = vadd.f32 %v890_v19, %v341_v41  ;;  %v892_v30 = vpop.f32.mrb[19].mxu0  ;;  %v6032_v17 = vadd.f32 %v963_v36, %v6010_v14  ;;  %v965_v16 = vpop.f32.mrb[19].mxu1 }
 0x151   :  { %8034 = vst [vmem:[#allocation81_spill] sm:$0xff] %v6024_v15  ;;  %8035 = vst [vmem:[#allocation82_spill] sm:$0xff] %v6027_v32  ;;  %v6035_v5 = vadd.f32 %v892_v30, %v6013_v20  ;;  %v6038_v13 = vadd.f32 %v965_v16, %v6016_v42 }
 0x152   :  { %8036 = vst [vmem:[#allocation83_spill] sm:$0xff] %v6029_v62  ;;  %8037 = vst [vmem:[#allocation84_spill] sm:$0xff] %v6032_v17 }
 0x153   :  { %8038 = vst [vmem:[#allocation85_spill] sm:$0xff] %v6035_v5  ;;  %8039 = vst [vmem:[#allocation86_spill] sm:$0xff] %v6038_v13 }
 0x155   :  { %v896_v48 = vpop.f32.mrb[20].mxu0  ;;  %v969_v12 = vpop.f32.mrb[20].mxu1 }
 0x156   :  { %v6040_v4 = vadd.f32 %v896_v48, %v341_v41  ;;  %v898_v50 = vpop.f32.mrb[21].mxu0  ;;  %v6043_v19 = vadd.f32 %v969_v12, %v6010_v14  ;;  %v971_v36 = vpop.f32.mrb[21].mxu1 }
 0x157   :  { %v6046_v3 = vadd.f32 %v898_v50, %v6013_v20  ;;  %v900_v11 = vpop.f32.mrb[22].mxu0  ;;  %v6049_v30 = vadd.f32 %v971_v36, %v6016_v42  ;;  %v973_v16 = vpop.f32.mrb[22].mxu1 }
 0x158   :  { %8040 = vst [vmem:[#allocation87_spill] sm:$0xff] %v6040_v4  ;;  %8041 = vst [vmem:[#allocation88_spill] sm:$0xff] %v6043_v19  ;;  %v6051_v2 = vadd.f32 %v900_v11, %v341_v41  ;;  %v902_v10 = vpop.f32.mrb[23].mxu0  ;;  %v6054_v48 = vadd.f32 %v973_v16, %v6010_v14  ;;  %v975_v12 = vpop.f32.mrb[23].mxu1 }
 0x159   :  { %8042 = vst [vmem:[#allocation89_spill] sm:$0xff] %v6046_v3  ;;  %8043 = vst [vmem:[#allocation90_spill] sm:$0xff] %v6049_v30  ;;  %v6057_v1 = vadd.f32 %v902_v10, %v6013_v20  ;;  %v6060_v9 = vadd.f32 %v975_v12, %v6016_v42 }
 0x15a   :  { %8044 = vst [vmem:[#allocation91_spill] sm:$0xff] %v6051_v2  ;;  %8045 = vst [vmem:[#allocation92_spill] sm:$0xff] %v6054_v48 }
 0x15b   :  { %8046 = vst [vmem:[#allocation93_spill] sm:$0xff] %v6057_v1  ;;  %8047 = vst [vmem:[#allocation94_spill] sm:$0xff] %v6060_v9 }
 0x15d   :  { %v906_v50 = vpop.f32.mrb[24].mxu0  ;;  %v979_v8 = vpop.f32.mrb[24].mxu1 }
 0x15e   :  { %v6062_v0 = vadd.f32 %v906_v50, %v341_v41  ;;  %v908_v36 = vpop.f32.mrb[25].mxu0  ;;  %v6065_v11 = vadd.f32 %v979_v8, %v6010_v14  ;;  %v981_v16 = vpop.f32.mrb[25].mxu1 }
 0x15f   :  { %v6068_v45 = vadd.f32 %v908_v36, %v6013_v20  ;;  %v910_v46 = vpop.f32.mrb[26].mxu0  ;;  %v6071_v10 = vadd.f32 %v981_v16, %v6016_v42  ;;  %v983_v12 = vpop.f32.mrb[26].mxu1 }
 0x160   :  { %8048 = vst [vmem:[#allocation95_spill] sm:$0xff] %v6062_v0  ;;  %8049 = vst [vmem:[#allocation96_spill] sm:$0xff] %v6065_v11  ;;  %v6073_v44 = vadd.f32 %v910_v46, %v341_v41  ;;  %v912_v43 = vpop.f32.mrb[27].mxu0  ;;  %v6076_v50 = vadd.f32 %v983_v12, %v6010_v14  ;;  %v985_v8 = vpop.f32.mrb[27].mxu1 }
 0x161   :  { %8050 = vst [vmem:[#allocation97_spill] sm:$0xff] %v6068_v45  ;;  %8051 = vst [vmem:[#allocation98_spill] sm:$0xff] %v6071_v10  ;;  %v6079_v32 = vadd.f32 %v912_v43, %v6013_v20  ;;  %v6082_v49 = vadd.f32 %v985_v8, %v6016_v42 }
 0x162   :  { %8052 = vst [vmem:[#allocation99_spill] sm:$0xff] %v6073_v44  ;;  %8053 = vst [vmem:[#allocation100_spill] sm:$0xff] %v6076_v50 }
 0x163   :  { %8054 = vst [vmem:[#allocation101_spill] sm:$0xff] %v6079_v32  ;;  %8055 = vst [vmem:[#allocation102_spill] sm:$0xff] %v6082_v49 }
 0x165   :  { %v916_v36 = vpop.f32.mrb[28].mxu0  ;;  %v989_v47 = vpop.f32.mrb[28].mxu1 }
 0x166   :  { %v6084_v15 = vadd.f32 %v916_v36, %v341_v41  ;;  %v918_v16 = vpop.f32.mrb[29].mxu0  ;;  %v6087_v46 = vadd.f32 %v989_v47, %v6010_v14  ;;  %v991_v12 = vpop.f32.mrb[29].mxu1 }
 0x167   :  { %v6090_v6 = vadd.f32 %v918_v16, %v6013_v20  ;;  %v920_v7 = vpop.f32.mrb[30].mxu0  ;;  %v6093_v43 = vadd.f32 %v991_v12, %v6016_v42  ;;  %v993_v8 = vpop.f32.mrb[30].mxu1 }
 0x168   :  { %8056 = vst [vmem:[#allocation103_spill] sm:$0xff] %v6084_v15  ;;  %8057 = vst [vmem:[#allocation104_spill] sm:$0xff] %v6087_v46  ;;  %v6095_v22 = vadd.f32 %v920_v7, %v341_v41  ;;  %v922_v31 = vpop.f32.mrb[31].mxu0  ;;  %v6098_v36 = vadd.f32 %v993_v8, %v6010_v14  ;;  %v995_v47 = vpop.f32.mrb[31].mxu1 }
 0x169   :  { %8058 = vst [vmem:[#allocation105_spill] sm:$0xff] %v6090_v6  ;;  %8059 = vst [vmem:[#allocation106_spill] sm:$0xff] %v6093_v43  ;;  %v6101_v13 = vadd.f32 %v922_v31, %v6013_v20  ;;  %v6104_v17 = vadd.f32 %v995_v47, %v6016_v42 }
 0x16a   :  { %5598 = dma.done.wait [#allocation9], 16384 }
 0x16b   :  { %5599 = vsyncadd [#allocation9], 4294950912  ;;  %v8060_v16 = vmov 0   ;;  %v6108_v7 = vld [vmem:[#allocation6 + $0x8] sm:$0xff]  ;;  %v6110_v41 = vld [vmem:[#allocation6] sm:$0xff] }
 0x16c   :  { %1142 = vmatprep.mubr.bf16.mxu0 %v8060_v16  ;;  %1183 = vmatprep.mubr.bf16.mxu1 %v8060_v16  ;;  %v6112_v12 = vld [vmem:[#allocation6 + $0x28] sm:$0xff]  ;;  %v6115_v14 = vld [vmem:[#allocation6 + $0x18] sm:$0xff]  ;;  %v6117_v31 = vld [vmem:[#allocation6 + $0x10] sm:$0xff] }
 0x16d   :  { %1110 = vmatprep.subr.bf16.mxu0 %v6108_v7  ;;  %1151 = vmatprep.subr.bf16.mxu1 %v6115_v14  ;;  %v6121_v20 = vld [vmem:[#allocation6 + $0x38] sm:$0xff]  ;;  %v6124_v42 = vld [vmem:[#allocation6 + $0x20] sm:$0xff]  ;;  %v6127_v8 = vld [vmem:[#allocation6 + $0x48] sm:$0xff] }
 0x16e   :  { %1111 = vmatpush1.bf16.msra.mxu0 %v6110_v41  ;;  %1152 = vmatpush1.bf16.msra.mxu1 %v6117_v31  ;;  %v6130_v47 = vld [vmem:[#allocation6 + $0x30] sm:$0xff]  ;;  %v6132_v5 = vld [vmem:[#allocation6 + $0x58] sm:$0xff]  ;;  %v6136_v62 = vld [vmem:[#allocation6 + $0x40] sm:$0xff] }
 0x16f   :  { %1112 = vmatprep.subr.bf16.mxu0 %v6112_v12  ;;  %1153 = vmatprep.subr.bf16.mxu1 %v6121_v20  ;;  %v6139_v18 = vld [vmem:[#allocation6 + $0x68] sm:$0xff]  ;;  %v6142_v21 = vld [vmem:[#allocation6 + $0x50] sm:$0xff]  ;;  %v6144_v40 = vld [vmem:[#allocation6 + $0x78] sm:$0xff] }
 0x170   :  { %v6148_v23 = vld [vmem:[#allocation6 + $0x60] sm:$0xff]  ;;  %v6151_v30 = vld [vmem:[#allocation6 + $0x88] sm:$0xff]  ;;  %v6154_v19 = vld [vmem:[#allocation6 + $0x70] sm:$0xff] }
 0x171   :  { %v6156_v3 = vld [vmem:[#allocation6 + $0x98] sm:$0xff]  ;;  %v6160_v4 = vld [vmem:[#allocation6 + $0x80] sm:$0xff]  ;;  %v6163_v63 = vld [vmem:[#allocation6 + $0xa8] sm:$0xff] }
 0x172   :  { %1113 = vmatpush1.bf16.msra.mxu0 %v6124_v42  ;;  %1154 = vmatpush1.bf16.msra.mxu1 %v6130_v47  ;;  %8061 = vst [vmem:[#allocation107_spill] sm:$0xff] %v6163_v63  ;;  %v6166_v53 = vld [vmem:[#allocation6 + $0x90] sm:$0xff]  ;;  %v6168_v57 = vld [vmem:[#allocation6 + $0xb8] sm:$0xff]  ;;  %v6172_v37 = vld [vmem:[#allocation6 + $0xa0] sm:$0xff] }
 0x173   :  { %1114 = vmatprep.subr.bf16.mxu0 %v6127_v8  ;;  %1155 = vmatprep.subr.bf16.mxu1 %v6132_v5  ;;  %8062 = vst [vmem:[#allocation108_spill] sm:$0xff] %v6166_v53  ;;  %8063 = vst [vmem:[#allocation109_spill] sm:$0xff] %v6168_v57  ;;  %v6175_v9 = vld [vmem:[#allocation6 + $0xc8] sm:$0xff]  ;;  %v6178_v48 = vld [vmem:[#allocation6 + $0xb0] sm:$0xff] }
 0x174   :  { %8064 = vst [vmem:[#allocation110_spill] sm:$0xff] %v6172_v37  ;;  %8065 = vst [vmem:[#allocation111_spill] sm:$0xff] %v6175_v9  ;;  %v6180_v1 = vld [vmem:[#allocation6 + $0xd8] sm:$0xff]  ;;  %v6184_v2 = vld [vmem:[#allocation6 + $0xc0] sm:$0xff] }
 0x175   :  { %8066 = vst [vmem:[#allocation112_spill] sm:$0xff] %v6178_v48  ;;  %8067 = vst [vmem:[#allocation113_spill] sm:$0xff] %v6180_v1  ;;  %v6187_v35 = vld [vmem:[#allocation6 + $0xe8] sm:$0xff]  ;;  %v6190_v26 = vld [vmem:[#allocation6 + $0xd0] sm:$0xff] }
 0x176   :  { %1115 = vmatpush1.bf16.msra.mxu0 %v6136_v62  ;;  %1156 = vmatpush1.bf16.msra.mxu1 %v6142_v21  ;;  %8068 = vst [vmem:[#allocation114_spill] sm:$0xff] %v6184_v2  ;;  %8069 = vst [vmem:[#allocation115_spill] sm:$0xff] %v6187_v35  ;;  %v6192_v28 = vld [vmem:[#allocation6 + $0xf8] sm:$0xff]  ;;  %v1067_v59 = vld [vmem:[%s7867_s4] sm:$0xff] }
 0x177   :  { %1116 = vmatprep.subr.bf16.mxu0 %v6139_v18  ;;  %1157 = vmatprep.subr.bf16.mxu1 %v6144_v40  ;;  %8070 = vst [vmem:[#allocation116_spill] sm:$0xff] %v6190_v26  ;;  %8071 = vst [vmem:[#allocation117_spill] sm:$0xff] %v6192_v28  ;;  %v6199_v10 = vld [vmem:[#allocation6 + $0xe0] sm:$0xff]  ;;  %v6203_v11 = vld [vmem:[#allocation6 + $0x108] sm:$0xff]  ;;  %v1077_v0 = vpack.c.bf16 %v1067_v59, %v1067_v59 }
 0x178   :  { %8072 = vst [vmem:[#allocation118_spill] sm:$0xff] %v6199_v10  ;;  %8073 = vst [vmem:[#allocation119_spill] sm:$0xff] %v6203_v11  ;;  %v6205_v45 = vld [vmem:[#allocation6 + $0xf0] sm:$0xff]  ;;  %v6207_v54 = vld [vmem:[#allocation6 + $0x118] sm:$0xff] }
 0x179   :  { %8074 = vst [vmem:[#allocation120_spill] sm:$0xff] %v6205_v45  ;;  %8075 = vst [vmem:[#allocation121_spill] sm:$0xff] %v6207_v54  ;;  %v6212_v58 = vld [vmem:[#allocation6 + $0x100] sm:$0xff]  ;;  %v6214_v51 = vld [vmem:[#allocation6 + $0x128] sm:$0xff] }
 0x17a   :  { %1117 = vmatpush1.bf16.msra.mxu0 %v6148_v23  ;;  %1158 = vmatpush1.bf16.msra.mxu1 %v6154_v19  ;;  %v6217_v39 = vld [vmem:[#allocation6 + $0x110] sm:$0xff]  ;;  %v6219_v49 = vld [vmem:[#allocation6 + $0x138] sm:$0xff]  ;;  %v6223_v59 = vld [vmem:[#allocation6 + $0x120] sm:$0xff] }
 0x17b   :  { %1118 = vmatprep.subr.bf16.mxu0 %v6151_v30  ;;  %1159 = vmatprep.subr.bf16.mxu1 %v6156_v3  ;;  %v6226_v50 = vld [vmem:[#allocation6 + $0x148] sm:$0xff]  ;;  %v6229_v32 = vld [vmem:[#allocation6 + $0x130] sm:$0xff]  ;;  %v6232_v44 = vld [vmem:[#allocation6 + $0x158] sm:$0xff] }
 0x17c   :  { %v6240_v38 = vld [vmem:[#allocation6 + $0x168] sm:$0xff]  ;;  %v6243_v33 = vld [vmem:[#allocation6 + $0x150] sm:$0xff]  ;;  %v6245_v34 = vld [vmem:[#allocation6 + $0x178] sm:$0xff] }
 0x17d   :  { %v6249_v29 = vld [vmem:[#allocation6 + $0x160] sm:$0xff]  ;;  %v6252_v43 = vld [vmem:[#allocation6 + $0x188] sm:$0xff]  ;;  %v6255_v46 = vld [vmem:[#allocation6 + $0x170] sm:$0xff] }
 0x17e   :  { %1119 = vmatpush1.bf16.msra.mxu0 %v6160_v4  ;;  %1160 = vmatpush1.bf16.msra.mxu1 %v6166_v53  ;;  %8076 = vst [vmem:[#allocation122_spill] sm:$0xff] %v6249_v29  ;;  %8077 = vst [vmem:[#allocation123_spill] sm:$0xff] %v6252_v43  ;;  %v6257_v6 = vld [vmem:[#allocation6 + $0x198] sm:$0xff]  ;;  %v6261_v15 = vld [vmem:[#allocation6 + $0x180] sm:$0xff] }
 0x17f   :  { %1120 = vmatprep.subr.bf16.mxu0 %v6163_v63  ;;  %1161 = vmatprep.subr.bf16.mxu1 %v6168_v57  ;;  %8078 = vst [vmem:[#allocation124_spill] sm:$0xff] %v6255_v46  ;;  %8079 = vst [vmem:[#allocation125_spill] sm:$0xff] %v6257_v6  ;;  %v6264_v27 = vld [vmem:[#allocation6 + $0x1a8] sm:$0xff]  ;;  %v6267_v24 = vld [vmem:[#allocation6 + $0x190] sm:$0xff] }
 0x180   :  { %8080 = vst [vmem:[#allocation126_spill] sm:$0xff] %v6261_v15  ;;  %8081 = vst [vmem:[#allocation127_spill] sm:$0xff] %v6264_v27  ;;  %v6269_v25 = vld [vmem:[#allocation6 + $0x1b8] sm:$0xff]  ;;  %v6273_v61 = vld [vmem:[#allocation6 + $0x1a0] sm:$0xff] }
 0x181   :  { %8082 = vst [vmem:[#allocation128_spill] sm:$0xff] %v6267_v24  ;;  %8083 = vst [vmem:[#allocation129_spill] sm:$0xff] %v6273_v61 }
 0x182   :  { %1121 = vmatpush1.bf16.msra.mxu0 %v6172_v37  ;;  %1162 = vmatpush1.bf16.msra.mxu1 %v6178_v48 }
 0x183   :  { %1122 = vmatprep.subr.bf16.mxu0 %v6175_v9  ;;  %1163 = vmatprep.subr.bf16.mxu1 %v6180_v1 }
 0x186   :  { %1123 = vmatpush1.bf16.msra.mxu0 %v6184_v2  ;;  %1164 = vmatpush1.bf16.msra.mxu1 %v6190_v26 }
 0x187   :  { %1124 = vmatprep.subr.bf16.mxu0 %v6187_v35  ;;  %1165 = vmatprep.subr.bf16.mxu1 %v6192_v28 }
 0x18a   :  { %1125 = vmatpush1.bf16.msra.mxu0 %v6199_v10  ;;  %1166 = vmatpush1.bf16.msra.mxu1 %v6205_v45 }
 0x18b   :  { %1252 = vmatprep.subr.bf16.mxu0 %v6203_v11  ;;  %1293 = vmatprep.subr.bf16.mxu1 %v6207_v54 }
 0x18d   :  { %1143 = vmatmul.mubr.bf16.vlgmr.msra.gmra.mrb[32].mxu0 %v1077_v0  ;;  %1184 = vmatmul.mubr.bf16.vlgmr.msra.gmra.mrb[32].mxu1 %v1077_v0  ;;  %v6237_v0 = vld [vmem:[#allocation6 + $0x140] sm:$0xff] }
 0x18e   :  { %1253 = vmatpush1.bf16.msra.mxu0 %v6212_v58  ;;  %1294 = vmatpush1.bf16.msra.mxu1 %v6217_v39 }
 0x18f   :  { %1254 = vmatprep.subr.bf16.mxu0 %v6214_v51  ;;  %1295 = vmatprep.subr.bf16.mxu1 %v6219_v49 }
 0x190   :  { %1284 = vmatprep.mubr.bf16.mxu0 %v8060_v16  ;;  %1325 = vmatprep.mubr.bf16.mxu1 %v8060_v16 }
 0x192   :  { %1255 = vmatpush1.bf16.msra.mxu0 %v6223_v59  ;;  %1296 = vmatpush1.bf16.msra.mxu1 %v6229_v32 }
 0x193   :  { %1256 = vmatprep.subr.bf16.mxu0 %v6226_v50  ;;  %1297 = vmatprep.subr.bf16.mxu1 %v6232_v44 }
 0x196   :  { %1257 = vmatpush1.bf16.msra.mxu0 %v6237_v0  ;;  %1298 = vmatpush1.bf16.msra.mxu1 %v6243_v33 }
 0x197   :  { %1258 = vmatprep.subr.bf16.mxu0 %v6240_v38  ;;  %1299 = vmatprep.subr.bf16.mxu1 %v6245_v34 }
 0x19a   :  { %1259 = vmatpush1.bf16.msra.mxu0 %v6249_v29  ;;  %1300 = vmatpush1.bf16.msra.mxu1 %v6255_v46  ;;  %v6279_v46 = vld [vmem:[#allocation6 + $0x1b0] sm:$0xff]  ;;  %v6281_v29 = vld [vmem:[#allocation6 + $0x1d8] sm:$0xff] }
 0x19b   :  { %1260 = vmatprep.subr.bf16.mxu0 %v6252_v43  ;;  %1301 = vmatprep.subr.bf16.mxu1 %v6257_v6  ;;  %v6276_v43 = vld [vmem:[#allocation6 + $0x1c8] sm:$0xff]  ;;  %8085 = vst [vmem:[#allocation131_spill] sm:$0xff] %v6279_v46  ;;  %8086 = vst [vmem:[#allocation132_spill] sm:$0xff] %v6281_v29  ;;  %v6285_v6 = vld [vmem:[#allocation6 + $0x1c0] sm:$0xff] }
 0x19c   :  { %8084 = vst [vmem:[#allocation130_spill] sm:$0xff] %v6276_v43 }
 0x19e   :  { %1261 = vmatpush1.bf16.msra.mxu0 %v6261_v15  ;;  %1302 = vmatpush1.bf16.msra.mxu1 %v6267_v24  ;;  %v6291_v24 = vld [vmem:[#allocation6 + $0x1d0] sm:$0xff]  ;;  %v6293_v15 = vld [vmem:[#allocation6 + $0x1f8] sm:$0xff] }
 0x19f   :  { %1262 = vmatprep.subr.bf16.mxu0 %v6264_v27  ;;  %1303 = vmatprep.subr.bf16.mxu1 %v6269_v25  ;;  %v6288_v27 = vld [vmem:[#allocation6 + $0x1e8] sm:$0xff] }
 0x1a2   :  { %1263 = vmatpush1.bf16.msra.mxu0 %v6273_v61  ;;  %1304 = vmatpush1.bf16.msra.mxu1 %v6279_v46  ;;  %v5156_v61 = vld [vmem:[%s7867_s4 + $0x8] sm:$0xff]  ;;  %v6304_v46 = vld [vmem:[#allocation6 + $0x1f0] sm:$0xff] }
 0x1a3   :  { %1264 = vmatprep.subr.bf16.mxu0 %v6276_v43  ;;  %1305 = vmatprep.subr.bf16.mxu1 %v6281_v29  ;;  %v6300_v43 = vld [vmem:[#allocation6 + $0x1e0] sm:$0xff]  ;;  %v1218_v29 = vpack.c.bf16 %v5156_v61, %v5156_v61 }
 0x1a6   :  { %1265 = vmatpush1.bf16.msra.mxu0 %v6285_v6  ;;  %1306 = vmatpush1.bf16.msra.mxu1 %v6291_v24 }
 0x1a7   :  { %1266 = vmatprep.subr.bf16.mxu0 %v6288_v27  ;;  %1307 = vmatprep.subr.bf16.mxu1 %v6293_v15 }
 0x1aa   :  { %1267 = vmatpush1.bf16.msra.mxu0 %v6300_v43  ;;  %1308 = vmatpush1.bf16.msra.mxu1 %v6304_v46 }
 0x1ab   :  { %1395 = vmatprep.subr.bf16.mxu0 %v6108_v7  ;;  %1436 = vmatprep.subr.bf16.mxu1 %v6115_v14 }
 0x1ad   :  { %1285 = vmatmul.mubr.bf16.vlgmr.msra.gmra.mrb[36].mxu0 %v1218_v29  ;;  %1326 = vmatmul.mubr.bf16.vlgmr.msra.gmra.mrb[36].mxu1 %v1218_v29 }
 0x1ae   :  { %1396 = vmatpush1.bf16.msra.mxu0 %v6110_v41  ;;  %1437 = vmatpush1.bf16.msra.mxu1 %v6117_v31 }
 0x1af   :  { %1397 = vmatprep.subr.bf16.mxu0 %v6112_v12  ;;  %1438 = vmatprep.subr.bf16.mxu1 %v6121_v20 }
 0x1b0   :  { %1427 = vmatprep.mubr.bf16.mxu0 %v8060_v16  ;;  %1468 = vmatprep.mubr.bf16.mxu1 %v8060_v16 }
 0x1b2   :  { %1398 = vmatpush1.bf16.msra.mxu0 %v6124_v42  ;;  %1439 = vmatpush1.bf16.msra.mxu1 %v6130_v47 }
 0x1b3   :  { %1399 = vmatprep.subr.bf16.mxu0 %v6127_v8  ;;  %1440 = vmatprep.subr.bf16.mxu1 %v6132_v5 }
 0x1b6   :  { %1400 = vmatpush1.bf16.msra.mxu0 %v6136_v62  ;;  %1441 = vmatpush1.bf16.msra.mxu1 %v6142_v21 }
 0x1b7   :  { %1401 = vmatprep.subr.bf16.mxu0 %v6139_v18  ;;  %1442 = vmatprep.subr.bf16.mxu1 %v6144_v40 }
 0x1ba   :  { %1402 = vmatpush1.bf16.msra.mxu0 %v6148_v23  ;;  %1443 = vmatpush1.bf16.msra.mxu1 %v6154_v19 }
 0x1bb   :  { %1403 = vmatprep.subr.bf16.mxu0 %v6151_v30  ;;  %1444 = vmatprep.subr.bf16.mxu1 %v6156_v3 }
 0x1be   :  { %1404 = vmatpush1.bf16.msra.mxu0 %v6160_v4  ;;  %1445 = vmatpush1.bf16.msra.mxu1 %v6166_v53 }
 0x1bf   :  { %1405 = vmatprep.subr.bf16.mxu0 %v6163_v63  ;;  %1446 = vmatprep.subr.bf16.mxu1 %v6168_v57 }
 0x1c2   :  { %1406 = vmatpush1.bf16.msra.mxu0 %v6172_v37  ;;  %1447 = vmatpush1.bf16.msra.mxu1 %v6178_v48 }
 0x1c3   :  { %1407 = vmatprep.subr.bf16.mxu0 %v6175_v9  ;;  %1448 = vmatprep.subr.bf16.mxu1 %v6180_v1 }
 0x1c6   :  { %1408 = vmatpush1.bf16.msra.mxu0 %v6184_v2  ;;  %1449 = vmatpush1.bf16.msra.mxu1 %v6190_v26 }
 0x1c7   :  { %1409 = vmatprep.subr.bf16.mxu0 %v6187_v35  ;;  %1450 = vmatprep.subr.bf16.mxu1 %v6192_v28 }
 0x1ca   :  { %1410 = vmatpush1.bf16.msra.mxu0 %v6199_v10  ;;  %1451 = vmatpush1.bf16.msra.mxu1 %v6205_v45 }
 0x1cb   :  { %1536 = vmatprep.subr.bf16.mxu0 %v6203_v11  ;;  %1577 = vmatprep.subr.bf16.mxu1 %v6207_v54 }
 0x260   :  { %v1144_v61 = vpop.f32.mrb[32].mxu0  ;;  %v1185_v9 = vpop.f32.mrb[32].mxu1 }
 0x261   :  { %v1192_v29 = vadd.f32 %v1144_v61, %v5909_v52  ;;  %v1146_v1 = vpop.f32.mrb[33].mxu0  ;;  %v1187_v48 = vpop.f32.mrb[33].mxu1  ;;  %v1194_v28 = vadd.f32 %v1185_v9, %v5912_v55  ;;  %v1068_v9 = vld [vmem:[%s7868_s5] sm:$0xff] }
 0x262   :  { %v1193_v2 = vadd.f32 %v1146_v1, %v5915_v56  ;;  %v1148_v26 = vpop.f32.mrb[34].mxu0  ;;  %v1189_v10 = vpop.f32.mrb[34].mxu1  ;;  %v1195_v54 = vadd.f32 %v1187_v48, %v5918_v60 }
 0x263   :  { %v1196_v35 = vmul.f32 0.5, %v1192_v29  ;;  %v1149_v37 = vpop.f32.mrb[35].mxu0  ;;  %v1190_v45 = vpop.f32.mrb[35].mxu1 }
 0x264   :  { %v1200_v57 = vmul.f32 0.5, %v1193_v2  ;;  %v1205_v11 = vmul.f32 0.5, %v1195_v54 }
 0x265   :  { %5290 = vtanh.f32 %v1196_v35 }
 0x266   :  { %5292 = vtanh.f32 %v1200_v57 }
 0x267   :  { %5294 = vtanh.f32 %v1194_v28 }
 0x268   :  { %5296 = vtanh.f32 %v1205_v11 }
 0x26f   :  { %v5291_v52 = vpop.eup %5290 }
 0x270   :  { %v5293_v61 = vpop.eup %5292  ;;  %v1198_v63 = vmul.f32 0.5, %v5291_v52 }
 0x271   :  { %v5295_v53 = vpop.eup %5294  ;;  %v1202_v1 = vmul.f32 0.5, %v5293_v61 }
 0x272   :  { %v1199_v56 = vadd.f32 0.5, %v1198_v63  ;;  %v5297_v60 = vpop.eup %5296 }
 0x273   :  { %v1203_v55 = vadd.f32 0.5, %v1202_v1  ;;  %v1207_v54 = vmul.f32 0.5, %v5297_v60 }
 0x274   :  { %v1210_v2 = vmul.f32 %v5295_v53, %v1199_v56 }
 0x275   :  { %v1209_v45 = vmul.f32 %v1203_v55, %v1068_v9  ;;  %v1208_v48 = vadd.f32 0.5, %v1207_v54 }
 0x277   :  { %v6351_v26 = vadd.f32 %v1210_v2, %v1209_v45 }
 0x279   :  { %5298 = vtanh.f32 %v6351_v26 }
 0x280   :  { %v1286_v28 = vpop.f32.mrb[36].mxu0  ;;  %v1327_v57 = vpop.f32.mrb[36].mxu1 }
 0x281   :  { %v1334_v35 = vadd.f32 %v1286_v28, %v6095_v22  ;;  %v1288_v37 = vpop.f32.mrb[37].mxu0  ;;  %v1329_v10 = vpop.f32.mrb[37].mxu1  ;;  %v1336_v61 = vadd.f32 %v1327_v57, %v6098_v36 }
 0x282   :  { %v1335_v63 = vadd.f32 %v1288_v37, %v6101_v13  ;;  %v1290_v11 = vpop.f32.mrb[38].mxu0  ;;  %v1331_v1 = vpop.f32.mrb[38].mxu1  ;;  %v1337_v13 = vadd.f32 %v1329_v10, %v6104_v17  ;;  %v8090_v10 = vld [vmem:[#allocation123_spill] sm:$0xff] }
 0x283   :  { %v5299_v29 = vpop.eup %5298  ;;  %v1338_v52 = vmul.f32 0.5, %v1334_v35  ;;  %v1291_v53 = vpop.f32.mrb[39].mxu0  ;;  %v5157_v35 = vld [vmem:[%s7868_s5 + $0x8] sm:$0xff]  ;;  %v8094_v1 = vld [vmem:[#allocation127_spill] sm:$0xff] }
 0x284   :  { %v6357_v56 = vmul.f32 %v5299_v29, %v1208_v48  ;;  %v1342_v9 = vmul.f32 0.5, %v1335_v63  ;;  %v1332_v55 = vpop.f32.mrb[39].mxu1  ;;  %v1347_v36 = vmul.f32 0.5, %v1337_v13  ;;  %v8088_v63 = vld [vmem:[#allocation122_spill] sm:$0xff]  ;;  %v8089_v11 = vld [vmem:[#allocation124_spill] sm:$0xff]  ;;  %v8091_v29 = vld [vmem:[#allocation125_spill] sm:$0xff] }
 0x285   :  { %5300 = vtanh.f32 %v1338_v52  ;;  %v8092_v53 = vld [vmem:[#allocation126_spill] sm:$0xff]  ;;  %v8095_v55 = vld [vmem:[#allocation129_spill] sm:$0xff] }
 0x286   :  { %8087 = vst [vmem:[#allocation133_spill] sm:$0xff] %v6357_v56  ;;  %v1362_v22 = vpack.c.bf16 %v6357_v56, %v6357_v56  ;;  %5302 = vtanh.f32 %v1342_v9  ;;  %v6698_v56 = vld [vmem:[#allocation6 + $0x1c0] sm:$0xff] }
 0x287   :  { %5304 = vtanh.f32 %v1336_v61  ;;  %v8093_v61 = vld [vmem:[#allocation128_spill] sm:$0xff] }
 0x288   :  { %1428 = vmatmul.mubr.bf16.vlgmr.msra.gmra.mrb[40].mxu0 %v1362_v22  ;;  %1469 = vmatmul.mubr.bf16.vlgmr.msra.gmra.mrb[40].mxu1 %v1362_v22  ;;  %5306 = vtanh.f32 %v1347_v36  ;;  %v8096_v22 = vld [vmem:[#allocation131_spill] sm:$0xff]  ;;  %v8097_v36 = vld [vmem:[#allocation130_spill] sm:$0xff] }
 0x289   :  { %1537 = vmatpush1.bf16.msra.mxu0 %v6212_v58  ;;  %1578 = vmatpush1.bf16.msra.mxu1 %v6217_v39 }
 0x28a   :  { %1538 = vmatprep.subr.bf16.mxu0 %v6214_v51  ;;  %1579 = vmatprep.subr.bf16.mxu1 %v6219_v49 }
 0x28b   :  { %1568 = vmatprep.mubr.bf16.mxu0 %v8060_v16  ;;  %1609 = vmatprep.mubr.bf16.mxu1 %v8060_v16 }
 0x28d   :  { %1539 = vmatpush1.bf16.msra.mxu0 %v6223_v59  ;;  %1580 = vmatpush1.bf16.msra.mxu1 %v6229_v32 }
 0x28e   :  { %1540 = vmatprep.subr.bf16.mxu0 %v6226_v50  ;;  %1581 = vmatprep.subr.bf16.mxu1 %v6232_v44 }
 0x28f   :  { %v5301_v17 = vpop.eup %5300 }
 0x290   :  { %v5303_v2 = vpop.eup %5302  ;;  %v1340_v45 = vmul.f32 0.5, %v5301_v17  ;;  %v8098_v17 = vld [vmem:[#allocation132_spill] sm:$0xff] }
 0x291   :  { %v5305_v60 = vpop.eup %5304  ;;  %v1344_v54 = vmul.f32 0.5, %v5303_v2  ;;  %1541 = vmatpush1.bf16.msra.mxu0 %v6237_v0  ;;  %1582 = vmatpush1.bf16.msra.mxu1 %v6243_v33 }
 0x292   :  { %v1341_v28 = vadd.f32 0.5, %v1340_v45  ;;  %1542 = vmatprep.subr.bf16.mxu0 %v6240_v38  ;;  %1583 = vmatprep.subr.bf16.mxu1 %v6245_v34  ;;  %v5307_v9 = vpop.eup %5306 }
 0x293   :  { %v1345_v37 = vadd.f32 0.5, %v1344_v54  ;;  %v1349_v13 = vmul.f32 0.5, %v5307_v9 }
 0x294   :  { %v1352_v57 = vmul.f32 %v5305_v60, %v1341_v28 }
 0x295   :  { %v1351_v48 = vmul.f32 %v5157_v35, %v1345_v37  ;;  %1543 = vmatpush1.bf16.msra.mxu0 %v8088_v63  ;;  %1584 = vmatpush1.bf16.msra.mxu1 %v8089_v11  ;;  %v1350_v2 = vadd.f32 0.5, %v1349_v13  ;;  %v8117_v37 = vld [vmem:[#allocation53_spill] sm:$0xff] }
 0x296   :  { %1544 = vmatprep.subr.bf16.mxu0 %v8090_v10  ;;  %1585 = vmatprep.subr.bf16.mxu1 %v8091_v29 }
 0x297   :  { %v6383_v52 = vadd.f32 %v1352_v57, %v1351_v48 }
 0x299   :  { %5308 = vtanh.f32 %v6383_v52  ;;  %1545 = vmatpush1.bf16.msra.mxu0 %v8092_v53  ;;  %1586 = vmatpush1.bf16.msra.mxu1 %v8093_v61 }
 0x29a   :  { %1546 = vmatprep.subr.bf16.mxu0 %v8094_v1  ;;  %1587 = vmatprep.subr.bf16.mxu1 %v6269_v25 }
 0x29d   :  { %1547 = vmatpush1.bf16.msra.mxu0 %v8095_v55  ;;  %1588 = vmatpush1.bf16.msra.mxu1 %v8096_v22 }
 0x29e   :  { %1548 = vmatprep.subr.bf16.mxu0 %v8097_v36  ;;  %1589 = vmatprep.subr.bf16.mxu1 %v8098_v17 }
 0x2a1   :  { %1549 = vmatpush1.bf16.msra.mxu0 %v6285_v6  ;;  %1590 = vmatpush1.bf16.msra.mxu1 %v6291_v24 }
 0x2a2   :  { %1550 = vmatprep.subr.bf16.mxu0 %v6288_v27  ;;  %1591 = vmatprep.subr.bf16.mxu1 %v6293_v15 }
 0x2a3   :  { %v5309_v45 = vpop.eup %5308 }
 0x2a4   :  { %v6398_v60 = vmul.f32 %v5309_v45, %v1350_v2 }
 0x2a5   :  { %1551 = vmatpush1.bf16.msra.mxu0 %v6300_v43  ;;  %1592 = vmatpush1.bf16.msra.mxu1 %v6304_v46 }
 0x2a6   :  { %8099 = vst [vmem:[#allocation122_spill] sm:$0xff] %v6398_v60  ;;  %v6404_v54 = vpack.c.bf16 %v6398_v60, %v6398_v60  ;;  %1679 = vmatprep.subr.bf16.mxu0 %v6108_v7  ;;  %1720 = vmatprep.subr.bf16.mxu1 %v6115_v14  ;;  %v8101_v7 = vld [vmem:[#allocation108_spill] sm:$0xff]  ;;  %v8114_v14 = vld [vmem:[#allocation119_spill] sm:$0xff] }
 0x2a7   :  { %v6662_v60 = vld [vmem:[#allocation6 + $0x188] sm:$0xff] }
 0x2a8   :  { %8100 = vst [vmem:[#allocation124_spill] sm:$0xff] %v6404_v54  ;;  %1569 = vmatmul.mubr.bf16.vlgmr.msra.gmra.mrb[44].mxu0 %v6404_v54  ;;  %1610 = vmatmul.mubr.bf16.vlgmr.msra.gmra.mrb[44].mxu1 %v6404_v54 }
 0x2a9   :  { %1680 = vmatpush1.bf16.msra.mxu0 %v6110_v41  ;;  %1721 = vmatpush1.bf16.msra.mxu1 %v6117_v31  ;;  %v8112_v41 = vld [vmem:[#allocation118_spill] sm:$0xff]  ;;  %v8115_v31 = vld [vmem:[#allocation121_spill] sm:$0xff] }
 0x2aa   :  { %1681 = vmatprep.subr.bf16.mxu0 %v6112_v12  ;;  %1722 = vmatprep.subr.bf16.mxu1 %v6121_v20  ;;  %v8113_v12 = vld [vmem:[#allocation120_spill] sm:$0xff] }
 0x2ab   :  { %1711 = vmatprep.mubr.bf16.mxu0 %v8060_v16  ;;  %1752 = vmatprep.mubr.bf16.mxu1 %v8060_v16 }
 0x2ad   :  { %1682 = vmatpush1.bf16.msra.mxu0 %v6124_v42  ;;  %1723 = vmatpush1.bf16.msra.mxu1 %v6130_v47 }
 0x2ae   :  { %1683 = vmatprep.subr.bf16.mxu0 %v6127_v8  ;;  %1724 = vmatprep.subr.bf16.mxu1 %v6132_v5  ;;  %v8102_v5 = vld [vmem:[#allocation107_spill] sm:$0xff] }
 0x2af   :  { %v8116_v8 = vld [vmem:[#allocation51_spill] sm:$0xff] }
 0x2b1   :  { %1684 = vmatpush1.bf16.msra.mxu0 %v6136_v62  ;;  %1725 = vmatpush1.bf16.msra.mxu1 %v6142_v21  ;;  %v8103_v62 = vld [vmem:[#allocation109_spill] sm:$0xff]  ;;  %v8104_v21 = vld [vmem:[#allocation110_spill] sm:$0xff] }
 0x2b2   :  { %1685 = vmatprep.subr.bf16.mxu0 %v6139_v18  ;;  %1726 = vmatprep.subr.bf16.mxu1 %v6144_v40  ;;  %v8105_v18 = vld [vmem:[#allocation112_spill] sm:$0xff]  ;;  %v8106_v40 = vld [vmem:[#allocation111_spill] sm:$0xff] }
 0x2b5   :  { %1686 = vmatpush1.bf16.msra.mxu0 %v6148_v23  ;;  %1727 = vmatpush1.bf16.msra.mxu1 %v6154_v19  ;;  %v8107_v23 = vld [vmem:[#allocation113_spill] sm:$0xff]  ;;  %v8108_v19 = vld [vmem:[#allocation114_spill] sm:$0xff] }
 0x2b6   :  { %1687 = vmatprep.subr.bf16.mxu0 %v6151_v30  ;;  %1728 = vmatprep.subr.bf16.mxu1 %v6156_v3  ;;  %v8109_v30 = vld [vmem:[#allocation116_spill] sm:$0xff]  ;;  %v8110_v3 = vld [vmem:[#allocation115_spill] sm:$0xff] }
 0x2b9   :  { %1688 = vmatpush1.bf16.msra.mxu0 %v6160_v4  ;;  %1729 = vmatpush1.bf16.msra.mxu1 %v8101_v7  ;;  %v8111_v4 = vld [vmem:[#allocation117_spill] sm:$0xff] }
 0x2ba   :  { %1689 = vmatprep.subr.bf16.mxu0 %v8102_v5  ;;  %1730 = vmatprep.subr.bf16.mxu1 %v8103_v62  ;;  %v8118_v5 = vld [vmem:[#allocation52_spill] sm:$0xff] }
 0x2bb   :  { %8158 = vst [vmem:[#allocation52_spill] sm:$0xff] %v6698_v56 }
 0x2bd   :  { %1690 = vmatpush1.bf16.msra.mxu0 %v8104_v21  ;;  %1731 = vmatpush1.bf16.msra.mxu1 %v8105_v18  ;;  %v8119_v21 = vld [vmem:[#allocation54_spill] sm:$0xff] }
 0x2be   :  { %1691 = vmatprep.subr.bf16.mxu0 %v8106_v40  ;;  %1732 = vmatprep.subr.bf16.mxu1 %v8107_v23 }
 0x2c1   :  { %1692 = vmatpush1.bf16.msra.mxu0 %v8108_v19  ;;  %1733 = vmatpush1.bf16.msra.mxu1 %v8109_v30 }
 0x2c2   :  { %1693 = vmatprep.subr.bf16.mxu0 %v8110_v3  ;;  %1734 = vmatprep.subr.bf16.mxu1 %v8111_v4 }
 0x2c5   :  { %1694 = vmatpush1.bf16.msra.mxu0 %v8112_v41  ;;  %1735 = vmatpush1.bf16.msra.mxu1 %v8113_v12 }
 0x2c6   :  { %1820 = vmatprep.subr.bf16.mxu0 %v8114_v14  ;;  %1861 = vmatprep.subr.bf16.mxu1 %v8115_v31 }
 0x35b   :  { %v1429_v20 = vpop.f32.mrb[40].mxu0  ;;  %v1470_v42 = vpop.f32.mrb[40].mxu1 }
 0x35c   :  { %v1477_v47 = vadd.f32 %v1429_v20, %v8116_v8  ;;  %v1431_v28 = vpop.f32.mrb[41].mxu0  ;;  %v1472_v35 = vpop.f32.mrb[41].mxu1  ;;  %v1479_v62 = vadd.f32 %v1470_v42, %v8118_v5 }
 0x35d   :  { %v1478_v57 = vadd.f32 %v1431_v28, %v8117_v37  ;;  %v1433_v48 = vpop.f32.mrb[42].mxu0  ;;  %v1474_v9 = vpop.f32.mrb[42].mxu1  ;;  %v1480_v18 = vadd.f32 %v1472_v35, %v8119_v21  ;;  %v8120_v35 = vld [vmem:[#allocation103_spill] sm:$0xff] }
 0x35e   :  { %v1481_v13 = vmul.f32 0.5, %v1477_v47  ;;  %v1434_v2 = vpop.f32.mrb[43].mxu0  ;;  %v1475_v45 = vpop.f32.mrb[43].mxu1 }
 0x35f   :  { %v1485_v7 = vmul.f32 0.5, %v1478_v57  ;;  %v1490_v40 = vmul.f32 0.5, %v1480_v18 }
 0x360   :  { %5310 = vtanh.f32 %v1481_v13  ;;  %v8121_v13 = vld [vmem:[#allocation105_spill] sm:$0xff] }
 0x361   :  { %5312 = vtanh.f32 %v1485_v7 }
 0x362   :  { %5314 = vtanh.f32 %v1479_v62 }
 0x363   :  { %5316 = vtanh.f32 %v1490_v40 }
 0x36a   :  { %v5311_v23 = vpop.eup %5310 }
 0x36b   :  { %v5313_v19 = vpop.eup %5312  ;;  %v1483_v30 = vmul.f32 0.5, %v5311_v23  ;;  %v8123_v23 = vld [vmem:[#allocation104_spill] sm:$0xff] }
 0x36c   :  { %v1487_v3 = vmul.f32 0.5, %v5313_v19  ;;  %v5315_v41 = vpop.eup %5314 }
 0x36d   :  { %v1484_v4 = vadd.f32 0.5, %v1483_v30  ;;  %v5317_v42 = vpop.eup %5316 }
 0x36e   :  { %v1488_v12 = vadd.f32 0.5, %v1487_v3  ;;  %v1492_v8 = vmul.f32 0.5, %v5317_v42  ;;  %v8124_v3 = vld [vmem:[#allocation106_spill] sm:$0xff]  ;;  %v6556_v42 = vld [vmem:[#allocation6 + $0x80] sm:$0xff] }
 0x36f   :  { %v1495_v14 = vmul.f32 %v5315_v41, %v1484_v4  ;;  %8126 = vst [vmem:[#allocation126_spill] sm:$0xff] %v6556_v42 }
 0x370   :  { %v1494_v31 = vmul.f32 %v1488_v12, %v6351_v26  ;;  %v1493_v9 = vadd.f32 0.5, %v1492_v8  ;;  %v6558_v8 = vld [vmem:[#allocation6 + $0x90] sm:$0xff] }
 0x371   :  { %8127 = vst [vmem:[#allocation128_spill] sm:$0xff] %v6558_v8 }
 0x372   :  { %v6449_v20 = vadd.f32 %v1495_v14, %v1494_v31  ;;  %v6552_v31 = vld [vmem:[#allocation6 + $0x98] sm:$0xff] }
 0x374   :  { %5318 = vtanh.f32 %v6449_v20 }
 0x37b   :  { %v1570_v47 = vpop.f32.mrb[44].mxu0  ;;  %v1611_v28 = vpop.f32.mrb[44].mxu1 }
 0x37c   :  { %v1618_v37 = vadd.f32 %v1570_v47, %v8120_v35  ;;  %v1572_v57 = vpop.f32.mrb[45].mxu0  ;;  %v1613_v48 = vpop.f32.mrb[45].mxu1  ;;  %v1620_v19 = vadd.f32 %v1611_v28, %v8123_v23  ;;  %v6562_v47 = vld [vmem:[#allocation6 + $0xa8] sm:$0xff]  ;;  %v6564_v28 = vld [vmem:[#allocation6 + $0xb8] sm:$0xff]  ;;  %v6568_v35 = vld [vmem:[#allocation6 + $0xa0] sm:$0xff] }
 0x37d   :  { %v1619_v2 = vadd.f32 %v1572_v57, %v8121_v13  ;;  %v1574_v45 = vpop.f32.mrb[46].mxu0  ;;  %v1615_v7 = vpop.f32.mrb[46].mxu1  ;;  %v1621_v4 = vadd.f32 %v1613_v48, %v8124_v3  ;;  %8128 = vst [vmem:[#allocation127_spill] sm:$0xff] %v6562_v47  ;;  %8129 = vst [vmem:[#allocation129_spill] sm:$0xff] %v6564_v28  ;;  %v6574_v57 = vld [vmem:[#allocation6 + $0xc8] sm:$0xff]  ;;  %v6576_v48 = vld [vmem:[#allocation6 + $0xd8] sm:$0xff] }
 0x37e   :  { %v5319_v5 = vpop.eup %5318  ;;  %v1622_v62 = vmul.f32 0.5, %v1618_v37  ;;  %v1575_v26 = vpop.f32.mrb[47].mxu0  ;;  %8130 = vst [vmem:[#allocation131_spill] sm:$0xff] %v6568_v35  ;;  %v6570_v37 = vld [vmem:[#allocation6 + $0xb0] sm:$0xff]  ;;  %8132 = vst [vmem:[#allocation132_spill] sm:$0xff] %v6574_v57  ;;  %v6588_v45 = vld [vmem:[#allocation6 + $0xf8] sm:$0xff] }
 0x37f   :  { %v1616_v21 = vpop.f32.mrb[47].mxu1  ;;  %v6454_v18 = vmul.f32 %v5319_v5, %v1493_v9  ;;  %v1626_v40 = vmul.f32 0.5, %v1619_v2  ;;  %v1631_v41 = vmul.f32 0.5, %v1621_v4  ;;  %8131 = vst [vmem:[#allocation130_spill] sm:$0xff] %v6570_v37  ;;  %8133 = vst [vmem:[#allocation108_spill] sm:$0xff] %v6576_v48  ;;  %v6580_v9 = vld [vmem:[#allocation6 + $0xc0] sm:$0xff] }
 0x380   :  { %5320 = vtanh.f32 %v1622_v62  ;;  %8134 = vst [vmem:[#allocation107_spill] sm:$0xff] %v6580_v9  ;;  %v6582_v13 = vld [vmem:[#allocation6 + $0xd0] sm:$0xff]  ;;  %v6586_v2 = vld [vmem:[#allocation6 + $0xe8] sm:$0xff]  ;;  %8137 = vst [vmem:[#allocation112_spill] sm:$0xff] %v6588_v45 }
 0x381   :  { %8122 = vst [vmem:[#allocation123_spill] sm:$0xff] %v6454_v18  ;;  %v1646_v30 = vpack.c.bf16 %v6454_v18, %v6454_v18  ;;  %5322 = vtanh.f32 %v1626_v40  ;;  %8135 = vst [vmem:[#allocation109_spill] sm:$0xff] %v6582_v13  ;;  %v6592_v7 = vld [vmem:[#allocation6 + $0xe0] sm:$0xff]  ;;  %v6594_v5 = vld [vmem:[#allocation6 + $0xf0] sm:$0xff] }
 0x382   :  { %5324 = vtanh.f32 %v1620_v19  ;;  %8136 = vst [vmem:[#allocation110_spill] sm:$0xff] %v6586_v2  ;;  %8138 = vst [vmem:[#allocation111_spill] sm:$0xff] %v6592_v7  ;;  %v6598_v62 = vld [vmem:[#allocation6 + $0x108] sm:$0xff]  ;;  %v6600_v26 = vld [vmem:[#allocation6 + $0x118] sm:$0xff] }
 0x383   :  { %1712 = vmatmul.mubr.bf16.vlgmr.msra.gmra.mrb[48].mxu0 %v1646_v30  ;;  %1753 = vmatmul.mubr.bf16.vlgmr.msra.gmra.mrb[48].mxu1 %v1646_v30  ;;  %5326 = vtanh.f32 %v1631_v41  ;;  %8139 = vst [vmem:[#allocation113_spill] sm:$0xff] %v6594_v5  ;;  %8140 = vst [vmem:[#allocation114_spill] sm:$0xff] %v6598_v62  ;;  %v8142_v23 = vld [vmem:[#allocation55_spill] sm:$0xff]  ;;  %v8143_v4 = vld [vmem:[#allocation57_spill] sm:$0xff] }
 0x384   :  { %1821 = vmatpush1.bf16.msra.mxu0 %v6212_v58  ;;  %1862 = vmatpush1.bf16.msra.mxu1 %v6217_v39  ;;  %8141 = vst [vmem:[#allocation116_spill] sm:$0xff] %v6600_v26  ;;  %v6679_v18 = vld [vmem:[#allocation6 + $0x1b8] sm:$0xff] }
 0x385   :  { %1822 = vmatprep.subr.bf16.mxu0 %v6214_v51  ;;  %1863 = vmatprep.subr.bf16.mxu1 %v6219_v49  ;;  %8153 = vst [vmem:[#allocation120_spill] sm:$0xff] %v6679_v18 }
 0x386   :  { %1852 = vmatprep.mubr.bf16.mxu0 %v8060_v16  ;;  %1893 = vmatprep.mubr.bf16.mxu1 %v8060_v16 }
 0x388   :  { %1823 = vmatpush1.bf16.msra.mxu0 %v6223_v59  ;;  %1864 = vmatpush1.bf16.msra.mxu1 %v6229_v32 }
 0x389   :  { %1824 = vmatprep.subr.bf16.mxu0 %v6226_v50  ;;  %1865 = vmatprep.subr.bf16.mxu1 %v6232_v44 }
 0x38a   :  { %v5321_v58 = vpop.eup %5320 }
 0x38b   :  { %v5323_v12 = vpop.eup %5322  ;;  %v1624_v39 = vmul.f32 0.5, %v5321_v58 }
 0x38c   :  { %v1628_v14 = vmul.f32 0.5, %v5323_v12  ;;  %1825 = vmatpush1.bf16.msra.mxu0 %v6237_v0  ;;  %1866 = vmatpush1.bf16.msra.mxu1 %v6243_v33  ;;  %v5325_v49 = vpop.eup %5324 }
 0x38d   :  { %v1625_v51 = vadd.f32 0.5, %v1624_v39  ;;  %1826 = vmatprep.subr.bf16.mxu0 %v6240_v38  ;;  %1867 = vmatprep.subr.bf16.mxu1 %v6245_v34  ;;  %v5327_v33 = vpop.eup %5326 }
 0x38e   :  { %v1629_v32 = vadd.f32 0.5, %v1628_v14  ;;  %v1633_v34 = vmul.f32 0.5, %v5327_v33 }
 0x38f   :  { %v1636_v59 = vmul.f32 %v5325_v49, %v1625_v51 }
 0x390   :  { %v1635_v50 = vmul.f32 %v1629_v32, %v6383_v52  ;;  %1827 = vmatpush1.bf16.msra.mxu0 %v8088_v63  ;;  %1868 = vmatpush1.bf16.msra.mxu1 %v8089_v11  ;;  %v1634_v38 = vadd.f32 0.5, %v1633_v34  ;;  %v6520_v11 = vld [vmem:[#allocation6 + $0x20] sm:$0xff]  ;;  %v6528_v52 = vld [vmem:[#allocation6 + $0x58] sm:$0xff]  ;;  %v8144_v32 = vld [vmem:[#allocation56_spill] sm:$0xff] }
 0x391   :  { %1828 = vmatprep.subr.bf16.mxu0 %v8090_v10  ;;  %1869 = vmatprep.subr.bf16.mxu1 %v8091_v29  ;;  %v6522_v10 = vld [vmem:[#allocation6 + $0x30] sm:$0xff]  ;;  %v6526_v29 = vld [vmem:[#allocation6 + $0x48] sm:$0xff] }
 0x392   :  { %v6479_v44 = vadd.f32 %v1636_v59, %v1635_v50  ;;  %v8145_v50 = vld [vmem:[#allocation58_spill] sm:$0xff] }
 0x394   :  { %5328 = vtanh.f32 %v6479_v44  ;;  %1829 = vmatpush1.bf16.msra.mxu0 %v8092_v53  ;;  %1870 = vmatpush1.bf16.msra.mxu1 %v8093_v61  ;;  %v6532_v53 = vld [vmem:[#allocation6 + $0x40] sm:$0xff]  ;;  %v6534_v61 = vld [vmem:[#allocation6 + $0x50] sm:$0xff] }
 0x395   :  { %1830 = vmatprep.subr.bf16.mxu0 %v8094_v1  ;;  %1871 = vmatprep.subr.bf16.mxu1 %v6269_v25  ;;  %v6538_v1 = vld [vmem:[#allocation6 + $0x68] sm:$0xff] }
 0x398   :  { %1831 = vmatpush1.bf16.msra.mxu0 %v8095_v55  ;;  %1872 = vmatpush1.bf16.msra.mxu1 %v8096_v22  ;;  %v6540_v55 = vld [vmem:[#allocation6 + $0x78] sm:$0xff]  ;;  %v6544_v22 = vld [vmem:[#allocation6 + $0x60] sm:$0xff] }
 0x399   :  { %1832 = vmatprep.subr.bf16.mxu0 %v8097_v36  ;;  %1873 = vmatprep.subr.bf16.mxu1 %v8098_v17  ;;  %v6546_v36 = vld [vmem:[#allocation6 + $0x70] sm:$0xff]  ;;  %v6550_v17 = vld [vmem:[#allocation6 + $0x88] sm:$0xff] }
 0x39c   :  { %1833 = vmatpush1.bf16.msra.mxu0 %v6285_v6  ;;  %1874 = vmatpush1.bf16.msra.mxu1 %v6291_v24  ;;  %v6502_v6 = vld [vmem:[#allocation6 + $0x8] sm:$0xff]  ;;  %v6504_v24 = vld [vmem:[#allocation6 + $0x18] sm:$0xff] }
 0x39d   :  { %1834 = vmatprep.subr.bf16.mxu0 %v6288_v27  ;;  %1875 = vmatprep.subr.bf16.mxu1 %v6293_v15  ;;  %v6508_v27 = vld [vmem:[#allocation6] sm:$0xff]  ;;  %v6510_v15 = vld [vmem:[#allocation6 + $0x10] sm:$0xff] }
 0x39e   :  { %v5329_v25 = vpop.eup %5328 }
 0x39f   :  { %v6494_v0 = vmul.f32 %v5329_v25, %v1634_v38 }
 0x3a0   :  { %1835 = vmatpush1.bf16.msra.mxu0 %v6300_v43  ;;  %1876 = vmatpush1.bf16.msra.mxu1 %v6304_v46  ;;  %v6514_v46 = vld [vmem:[#allocation6 + $0x28] sm:$0xff]  ;;  %v6516_v43 = vld [vmem:[#allocation6 + $0x38] sm:$0xff] }
 0x3a1   :  { %8125 = vst [vmem:[#allocation125_spill] sm:$0xff] %v6494_v0  ;;  %v1787_v63 = vpack.c.bf16 %v6494_v0, %v6494_v0  ;;  %1963 = vmatprep.subr.bf16.mxu0 %v6502_v6  ;;  %2004 = vmatprep.subr.bf16.mxu1 %v6504_v24  ;;  %v6673_v0 = vld [vmem:[#allocation6 + $0x190] sm:$0xff] }
 0x3a2   :  { %8151 = vst [vmem:[#allocation117_spill] sm:$0xff] %v6673_v0 }
 0x3a3   :  { %1853 = vmatmul.mubr.bf16.vlgmr.msra.gmra.mrb[52].mxu0 %v1787_v63  ;;  %1894 = vmatmul.mubr.bf16.vlgmr.msra.gmra.mrb[52].mxu1 %v1787_v63 }
 0x3a4   :  { %1995 = vmatprep.mubr.bf16.mxu0 %v8060_v16  ;;  %2036 = vmatprep.mubr.bf16.mxu1 %v8060_v16 }
 0x3a5   :  { %1964 = vmatpush1.bf16.msra.mxu0 %v6508_v27  ;;  %2005 = vmatpush1.bf16.msra.mxu1 %v6510_v15 }
 0x3a6   :  { %1965 = vmatprep.subr.bf16.mxu0 %v6514_v46  ;;  %2006 = vmatprep.subr.bf16.mxu1 %v6516_v43 }
 0x3a9   :  { %1966 = vmatpush1.bf16.msra.mxu0 %v6520_v11  ;;  %2007 = vmatpush1.bf16.msra.mxu1 %v6522_v10 }
 0x3aa   :  { %1967 = vmatprep.subr.bf16.mxu0 %v6526_v29  ;;  %2008 = vmatprep.subr.bf16.mxu1 %v6528_v52 }
 0x3ad   :  { %1968 = vmatpush1.bf16.msra.mxu0 %v6532_v53  ;;  %2009 = vmatpush1.bf16.msra.mxu1 %v6534_v61 }
 0x3ae   :  { %1969 = vmatprep.subr.bf16.mxu0 %v6538_v1  ;;  %2010 = vmatprep.subr.bf16.mxu1 %v6540_v55 }
 0x3b1   :  { %1970 = vmatpush1.bf16.msra.mxu0 %v6544_v22  ;;  %2011 = vmatpush1.bf16.msra.mxu1 %v6546_v36 }
 0x3b2   :  { %1971 = vmatprep.subr.bf16.mxu0 %v6550_v17  ;;  %2012 = vmatprep.subr.bf16.mxu1 %v6552_v31 }
 0x3b5   :  { %1972 = vmatpush1.bf16.msra.mxu0 %v6556_v42  ;;  %2013 = vmatpush1.bf16.msra.mxu1 %v6558_v8 }
 0x3b6   :  { %1973 = vmatprep.subr.bf16.mxu0 %v6562_v47  ;;  %2014 = vmatprep.subr.bf16.mxu1 %v6564_v28 }
 0x3b9   :  { %1974 = vmatpush1.bf16.msra.mxu0 %v6568_v35  ;;  %2015 = vmatpush1.bf16.msra.mxu1 %v6570_v37 }
 0x3ba   :  { %1975 = vmatprep.subr.bf16.mxu0 %v6574_v57  ;;  %2016 = vmatprep.subr.bf16.mxu1 %v6576_v48 }
 0x3bd   :  { %1976 = vmatpush1.bf16.msra.mxu0 %v6580_v9  ;;  %2017 = vmatpush1.bf16.msra.mxu1 %v6582_v13 }
 0x3be   :  { %1977 = vmatprep.subr.bf16.mxu0 %v6586_v2  ;;  %2018 = vmatprep.subr.bf16.mxu1 %v6588_v45 }
 0x3c1   :  { %1978 = vmatpush1.bf16.msra.mxu0 %v6592_v7  ;;  %2019 = vmatpush1.bf16.msra.mxu1 %v6594_v5 }
 0x3c2   :  { %2104 = vmatprep.subr.bf16.mxu0 %v6598_v62  ;;  %2145 = vmatprep.subr.bf16.mxu1 %v6600_v26 }
 0x456   :  { %v1713_v21 = vpop.f32.mrb[48].mxu0  ;;  %v1754_v40 = vpop.f32.mrb[48].mxu1 }
 0x457   :  { %v1761_v19 = vadd.f32 %v1713_v21, %v8142_v23  ;;  %v1715_v30 = vpop.f32.mrb[49].mxu0  ;;  %v1756_v3 = vpop.f32.mrb[49].mxu1  ;;  %v1763_v59 = vadd.f32 %v1754_v40, %v8144_v32 }
 0x458   :  { %v1762_v41 = vadd.f32 %v1715_v30, %v8143_v4  ;;  %v1717_v58 = vpop.f32.mrb[50].mxu0  ;;  %v1758_v12 = vpop.f32.mrb[50].mxu1  ;;  %v1764_v33 = vadd.f32 %v1756_v3, %v8145_v50  ;;  %v8147_v50 = vld [vmem:[#allocation101_spill] sm:$0xff] }
 0x459   :  { %v1765_v39 = vmul.f32 0.5, %v1761_v19  ;;  %v1718_v14 = vpop.f32.mrb[51].mxu0  ;;  %v1759_v51 = vpop.f32.mrb[51].mxu1 }
 0x45a   :  { %v1769_v49 = vmul.f32 0.5, %v1762_v41  ;;  %v1774_v34 = vmul.f32 0.5, %v1764_v33  ;;  %v8146_v14 = vld [vmem:[#allocation99_spill] sm:$0xff] }
 0x45b   :  { %5330 = vtanh.f32 %v1765_v39 }
 0x45c   :  { %5332 = vtanh.f32 %v1769_v49 }
 0x45d   :  { %5334 = vtanh.f32 %v1763_v59 }
 0x45e   :  { %5336 = vtanh.f32 %v1774_v34 }
 0x465   :  { %v5331_v38 = vpop.eup %5330 }
 0x466   :  { %v5333_v25 = vpop.eup %5332  ;;  %v1767_v63 = vmul.f32 0.5, %v5331_v38 }
 0x467   :  { %v1771_v21 = vmul.f32 0.5, %v5333_v25  ;;  %v5335_v30 = vpop.eup %5334 }
 0x468   :  { %v1768_v23 = vadd.f32 0.5, %v1767_v63  ;;  %v5337_v40 = vpop.eup %5336 }
 0x469   :  { %v1772_v4 = vadd.f32 0.5, %v1771_v21  ;;  %v1776_v12 = vmul.f32 0.5, %v5337_v40  ;;  %v6619_v40 = vld [vmem:[#allocation6 + $0x100] sm:$0xff] }
 0x46a   :  { %v1779_v19 = vmul.f32 %v5335_v30, %v1768_v23 }
 0x46b   :  { %v1778_v58 = vmul.f32 %v1772_v4, %v6449_v20  ;;  %v1777_v59 = vadd.f32 0.5, %v1776_v12  ;;  %v8149_v4 = vld [vmem:[#allocation100_spill] sm:$0xff]  ;;  %v6621_v12 = vld [vmem:[#allocation6 + $0x110] sm:$0xff] }
 0x46d   :  { %v6609_v41 = vadd.f32 %v1779_v19, %v1778_v58 }
 0x46f   :  { %5338 = vtanh.f32 %v6609_v41 }
 0x476   :  { %v1854_v39 = vpop.f32.mrb[52].mxu0  ;;  %v1895_v3 = vpop.f32.mrb[52].mxu1 }
 0x477   :  { %v1902_v51 = vadd.f32 %v1854_v39, %v8146_v14  ;;  %v1856_v49 = vpop.f32.mrb[53].mxu0  ;;  %v1897_v32 = vpop.f32.mrb[53].mxu1  ;;  %v1904_v19 = vadd.f32 %v1895_v3, %v8149_v4  ;;  %v6623_v39 = vld [vmem:[#allocation6 + $0x128] sm:$0xff]  ;;  %v6625_v14 = vld [vmem:[#allocation6 + $0x138] sm:$0xff]  ;;  %v6632_v3 = vld [vmem:[#allocation6 + $0x120] sm:$0xff] }
 0x478   :  { %v1903_v33 = vadd.f32 %v1856_v49, %v8147_v50  ;;  %v1858_v34 = vpop.f32.mrb[54].mxu0  ;;  %v1899_v38 = vpop.f32.mrb[54].mxu1  ;;  %v6636_v50 = vld [vmem:[#allocation6 + $0x148] sm:$0xff] }
 0x479   :  { %v5339_v25 = vpop.eup %5338  ;;  %v1906_v63 = vmul.f32 0.5, %v1902_v51  ;;  %v1859_v20 = vpop.f32.mrb[55].mxu0  ;;  %v8150_v51 = vld [vmem:[#allocation102_spill] sm:$0xff]  ;;  %v6646_v34 = vld [vmem:[#allocation6 + $0x140] sm:$0xff]  ;;  %v6648_v38 = vld [vmem:[#allocation6 + $0x150] sm:$0xff] }
 0x47a   :  { %v1900_v21 = vpop.f32.mrb[55].mxu1  ;;  %v6614_v23 = vmul.f32 %v5339_v25, %v1777_v59  ;;  %v1910_v30 = vmul.f32 0.5, %v1903_v33  ;;  %v1905_v49 = vadd.f32 %v1897_v32, %v8150_v51  ;;  %v6634_v59 = vld [vmem:[#allocation6 + $0x130] sm:$0xff]  ;;  %v6638_v33 = vld [vmem:[#allocation6 + $0x158] sm:$0xff] }
 0x47b   :  { %5340 = vtanh.f32 %v1906_v63  ;;  %v6650_v63 = vld [vmem:[#allocation6 + $0x168] sm:$0xff]  ;;  %v6652_v20 = vld [vmem:[#allocation6 + $0x178] sm:$0xff]  ;;  %v6660_v51 = vld [vmem:[#allocation6 + $0x170] sm:$0xff] }
 0x47c   :  { %8148 = vst [vmem:[#allocation115_spill] sm:$0xff] %v6614_v23  ;;  %v1930_v58 = vpack.c.bf16 %v6614_v23, %v6614_v23  ;;  %5342 = vtanh.f32 %v1910_v30  ;;  %v1915_v32 = vmul.f32 0.5, %v1905_v49  ;;  %v6677_v23 = vld [vmem:[#allocation6 + $0x1a8] sm:$0xff] }
 0x47d   :  { %5344 = vtanh.f32 %v1904_v19  ;;  %8152 = vst [vmem:[#allocation118_spill] sm:$0xff] %v6677_v23 }
 0x47e   :  { %1996 = vmatmul.mubr.bf16.vlgmr.msra.gmra.mrb[56].mxu0 %v1930_v58  ;;  %2037 = vmatmul.mubr.bf16.vlgmr.msra.gmra.mrb[56].mxu1 %v1930_v58  ;;  %5346 = vtanh.f32 %v1915_v32  ;;  %v6658_v58 = vld [vmem:[#allocation6 + $0x160] sm:$0xff] }
 0x47f   :  { %2105 = vmatpush1.bf16.msra.mxu0 %v6619_v40  ;;  %2146 = vmatpush1.bf16.msra.mxu1 %v6621_v12 }
 0x480   :  { %2106 = vmatprep.subr.bf16.mxu0 %v6623_v39  ;;  %2147 = vmatprep.subr.bf16.mxu1 %v6625_v14 }
 0x481   :  { %2136 = vmatprep.mubr.bf16.mxu0 %v8060_v16  ;;  %2177 = vmatprep.mubr.bf16.mxu1 %v8060_v16 }
 0x483   :  { %2107 = vmatpush1.bf16.msra.mxu0 %v6632_v3  ;;  %2148 = vmatpush1.bf16.msra.mxu1 %v6634_v59 }
 0x484   :  { %2108 = vmatprep.subr.bf16.mxu0 %v6636_v50  ;;  %2149 = vmatprep.subr.bf16.mxu1 %v6638_v33 }
 0x485   :  { %v5341_v25 = vpop.eup %5340 }
 0x486   :  { %v5343_v21 = vpop.eup %5342  ;;  %v1908_v30 = vmul.f32 0.5, %v5341_v25  ;;  %v6664_v25 = vld [vmem:[#allocation6 + $0x198] sm:$0xff] }
 0x487   :  { %v1912_v4 = vmul.f32 0.5, %v5343_v21  ;;  %2109 = vmatpush1.bf16.msra.mxu0 %v6646_v34  ;;  %2150 = vmatpush1.bf16.msra.mxu1 %v6648_v38  ;;  %v5345_v49 = vpop.eup %5344 }
 0x488   :  { %v1909_v19 = vadd.f32 0.5, %v1908_v30  ;;  %2110 = vmatprep.subr.bf16.mxu0 %v6650_v63  ;;  %2151 = vmatprep.subr.bf16.mxu1 %v6652_v20  ;;  %v6671_v30 = vld [vmem:[#allocation6 + $0x180] sm:$0xff] }
 0x489   :  { %v1913_v54 = vadd.f32 0.5, %v1912_v4 }
 0x48a   :  { %v1920_v32 = vmul.f32 %v5345_v49, %v1909_v19  ;;  %v5347_v19 = vpop.eup %5346  ;;  %v6690_v49 = vld [vmem:[#allocation6 + $0x1c8] sm:$0xff] }
 0x48b   :  { %v1919_v21 = vmul.f32 %v1913_v54, %v6479_v44  ;;  %2111 = vmatpush1.bf16.msra.mxu0 %v6658_v58  ;;  %2152 = vmatpush1.bf16.msra.mxu1 %v6660_v51  ;;  %v6686_v54 = vld [vmem:[#allocation6 + $0x1a0] sm:$0xff]  ;;  %v6688_v44 = vld [vmem:[#allocation6 + $0x1b0] sm:$0xff]  ;;  %8156 = vst [vmem:[#allocation51_spill] sm:$0xff] %v6690_v49 }
 0x48c   :  { %2112 = vmatprep.subr.bf16.mxu0 %v6662_v60  ;;  %2153 = vmatprep.subr.bf16.mxu1 %v6664_v25  ;;  %8154 = vst [vmem:[#allocation119_spill] sm:$0xff] %v6686_v54  ;;  %8155 = vst [vmem:[#allocation121_spill] sm:$0xff] %v6688_v44 }
 0x48d   :  { %v6675_v4 = vadd.f32 %v1920_v32, %v1919_v21  ;;  %v6692_v32 = vld [vmem:[#allocation6 + $0x1d8] sm:$0xff]  ;;  %v1917_v21 = vmul.f32 0.5, %v5347_v19  ;;  %v6710_v19 = vld [vmem:[#allocation6 + $0x1e0] sm:$0xff] }
 0x48e   :  { %8157 = vst [vmem:[#allocation53_spill] sm:$0xff] %v6692_v32 }
 0x48f   :  { %5348 = vtanh.f32 %v6675_v4  ;;  %2113 = vmatpush1.bf16.msra.mxu0 %v6671_v30  ;;  %2154 = vmatpush1.bf16.msra.mxu1 %v6673_v0  ;;  %v6704_v0 = vld [vmem:[#allocation6 + $0x1f8] sm:$0xff] }
 0x490   :  { %2114 = vmatprep.subr.bf16.mxu0 %v6677_v23  ;;  %2155 = vmatprep.subr.bf16.mxu1 %v6679_v18  ;;  %v6700_v18 = vld [vmem:[#allocation6 + $0x1d0] sm:$0xff]  ;;  %v6702_v23 = vld [vmem:[#allocation6 + $0x1e8] sm:$0xff] }
 0x493   :  { %2115 = vmatpush1.bf16.msra.mxu0 %v6686_v54  ;;  %2156 = vmatpush1.bf16.msra.mxu1 %v6688_v44  ;;  %v1918_v54 = vadd.f32 0.5, %v1917_v21 }
 0x494   :  { %2116 = vmatprep.subr.bf16.mxu0 %v6690_v49  ;;  %2157 = vmatprep.subr.bf16.mxu1 %v6692_v32  ;;  %v6712_v32 = vld [vmem:[#allocation6 + $0x1f0] sm:$0xff] }
 0x497   :  { %2117 = vmatpush1.bf16.msra.mxu0 %v6698_v56  ;;  %2158 = vmatpush1.bf16.msra.mxu1 %v6700_v18 }
 0x498   :  { %2118 = vmatprep.subr.bf16.mxu0 %v6702_v23  ;;  %2159 = vmatprep.subr.bf16.mxu1 %v6704_v0 }
 0x499   :  { %v5349_v49 = vpop.eup %5348 }
 0x49a   :  { %v6714_v44 = vmul.f32 %v5349_v49, %v1918_v54  ;;  %v8160_v49 = vld [vmem:[#allocation59_spill] sm:$0xff] }
 0x49b   :  { %2119 = vmatpush1.bf16.msra.mxu0 %v6710_v19  ;;  %2160 = vmatpush1.bf16.msra.mxu1 %v6712_v32 }
 0x49c   :  { %8159 = vst [vmem:[#allocation54_spill] sm:$0xff] %v6714_v44  ;;  %v2071_v56 = vpack.c.bf16 %v6714_v44, %v6714_v44  ;;  %2247 = vmatprep.subr.bf16.mxu0 %v6502_v6  ;;  %2288 = vmatprep.subr.bf16.mxu1 %v6504_v24 }
 0x49e   :  { %2137 = vmatmul.mubr.bf16.vlgmr.msra.gmra.mrb[60].mxu0 %v2071_v56  ;;  %2178 = vmatmul.mubr.bf16.vlgmr.msra.gmra.mrb[60].mxu1 %v2071_v56 }
 0x49f   :  { %2248 = vmatpush1.bf16.msra.mxu0 %v6508_v27  ;;  %2289 = vmatpush1.bf16.msra.mxu1 %v6510_v15 }
 0x4a0   :  { %2249 = vmatprep.subr.bf16.mxu0 %v6514_v46  ;;  %2290 = vmatprep.subr.bf16.mxu1 %v6516_v43 }
 0x4a1   :  { %2279 = vmatprep.mubr.bf16.mxu0 %v8060_v16  ;;  %2320 = vmatprep.mubr.bf16.mxu1 %v8060_v16 }
 0x4a3   :  { %2250 = vmatpush1.bf16.msra.mxu0 %v6520_v11  ;;  %2291 = vmatpush1.bf16.msra.mxu1 %v6522_v10 }
 0x4a4   :  { %2251 = vmatprep.subr.bf16.mxu0 %v6526_v29  ;;  %2292 = vmatprep.subr.bf16.mxu1 %v6528_v52 }
 0x4a7   :  { %2252 = vmatpush1.bf16.msra.mxu0 %v6532_v53  ;;  %2293 = vmatpush1.bf16.msra.mxu1 %v6534_v61 }
 0x4a8   :  { %2253 = vmatprep.subr.bf16.mxu0 %v6538_v1  ;;  %2294 = vmatprep.subr.bf16.mxu1 %v6540_v55 }
 0x4ab   :  { %2254 = vmatpush1.bf16.msra.mxu0 %v6544_v22  ;;  %2295 = vmatpush1.bf16.msra.mxu1 %v6546_v36 }
 0x4ac   :  { %2255 = vmatprep.subr.bf16.mxu0 %v6550_v17  ;;  %2296 = vmatprep.subr.bf16.mxu1 %v6552_v31 }
 0x4af   :  { %2256 = vmatpush1.bf16.msra.mxu0 %v6556_v42  ;;  %2297 = vmatpush1.bf16.msra.mxu1 %v6558_v8 }
 0x4b0   :  { %2257 = vmatprep.subr.bf16.mxu0 %v6562_v47  ;;  %2298 = vmatprep.subr.bf16.mxu1 %v6564_v28 }
 0x4b3   :  { %2258 = vmatpush1.bf16.msra.mxu0 %v6568_v35  ;;  %2299 = vmatpush1.bf16.msra.mxu1 %v6570_v37 }
 0x4b4   :  { %2259 = vmatprep.subr.bf16.mxu0 %v6574_v57  ;;  %2300 = vmatprep.subr.bf16.mxu1 %v6576_v48  ;;  %v8161_v48 = vld [vmem:[#allocation61_spill] sm:$0xff] }
 0x4b7   :  { %2260 = vmatpush1.bf16.msra.mxu0 %v6580_v9  ;;  %2301 = vmatpush1.bf16.msra.mxu1 %v6582_v13 }
 0x4b8   :  { %2261 = vmatprep.subr.bf16.mxu0 %v6586_v2  ;;  %2302 = vmatprep.subr.bf16.mxu1 %v6588_v45 }
 0x4bb   :  { %2262 = vmatpush1.bf16.msra.mxu0 %v6592_v7  ;;  %2303 = vmatpush1.bf16.msra.mxu1 %v6594_v5  ;;  %v8162_v5 = vld [vmem:[#allocation60_spill] sm:$0xff] }
 0x4bc   :  { %2388 = vmatprep.subr.bf16.mxu0 %v6598_v62  ;;  %2429 = vmatprep.subr.bf16.mxu1 %v6600_v26  ;;  %v8163_v26 = vld [vmem:[#allocation62_spill] sm:$0xff] }
 0x551   :  { %v1997_v56 = vpop.f32.mrb[56].mxu0  ;;  %v2038_v54 = vpop.f32.mrb[56].mxu1 }
 0x552   :  { %v2045_v21 = vadd.f32 %v1997_v56, %v8160_v49  ;;  %v1999_v44 = vpop.f32.mrb[57].mxu0  ;;  %v2040_v9 = vpop.f32.mrb[57].mxu1  ;;  %v2047_v28 = vadd.f32 %v2038_v54, %v8162_v5 }
 0x553   :  { %v2046_v13 = vadd.f32 %v1999_v44, %v8161_v48  ;;  %v2001_v57 = vpop.f32.mrb[58].mxu0  ;;  %v2042_v2 = vpop.f32.mrb[58].mxu1  ;;  %v2048_v62 = vadd.f32 %v2040_v9, %v8163_v26 }
 0x554   :  { %v2049_v37 = vmul.f32 0.5, %v2045_v21  ;;  %v2002_v45 = vpop.f32.mrb[59].mxu0  ;;  %v2043_v35 = vpop.f32.mrb[59].mxu1 }
 0x555   :  { %v2053_v7 = vmul.f32 0.5, %v2046_v13  ;;  %v2058_v47 = vmul.f32 0.5, %v2048_v62 }
 0x556   :  { %5350 = vtanh.f32 %v2049_v37 }
 0x557   :  { %5352 = vtanh.f32 %v2053_v7  ;;  %v8164_v7 = vld [vmem:[#allocation95_spill] sm:$0xff] }
 0x558   :  { %5354 = vtanh.f32 %v2047_v28 }
 0x559   :  { %5356 = vtanh.f32 %v2058_v47  ;;  %v8165_v47 = vld [vmem:[#allocation97_spill] sm:$0xff] }
 0x560   :  { %v5351_v8 = vpop.eup %5350 }
 0x561   :  { %v5353_v56 = vpop.eup %5352  ;;  %v2051_v49 = vmul.f32 0.5, %v5351_v8 }
 0x562   :  { %v2055_v42 = vmul.f32 0.5, %v5353_v56  ;;  %v5355_v57 = vpop.eup %5354 }
 0x563   :  { %v2052_v48 = vadd.f32 0.5, %v2051_v49  ;;  %v5357_v37 = vpop.eup %5356 }
 0x564   :  { %v2056_v2 = vadd.f32 0.5, %v2055_v42  ;;  %v2060_v28 = vmul.f32 0.5, %v5357_v37 }
 0x565   :  { %v2063_v44 = vmul.f32 %v5355_v57, %v2052_v48 }
 0x566   :  { %v2062_v35 = vmul.f32 %v2056_v2, %v6609_v41  ;;  %v2061_v26 = vadd.f32 0.5, %v2060_v28  ;;  %v8168_v28 = vld [vmem:[#allocation98_spill] sm:$0xff] }
 0x568   :  { %v6761_v13 = vadd.f32 %v2063_v44, %v2062_v35  ;;  %v8167_v44 = vld [vmem:[#allocation96_spill] sm:$0xff] }
 0x56a   :  { %5358 = vtanh.f32 %v6761_v13 }
 0x571   :  { %v2138_v45 = vpop.f32.mrb[60].mxu0  ;;  %v2179_v9 = vpop.f32.mrb[60].mxu1 }
 0x572   :  { %v2186_v5 = vadd.f32 %v2138_v45, %v8164_v7  ;;  %v2140_v62 = vpop.f32.mrb[61].mxu0  ;;  %v2181_v8 = vpop.f32.mrb[61].mxu1  ;;  %v2188_v35 = vadd.f32 %v2179_v9, %v8167_v44  ;;  %v8173_v44 = vld [vmem:[#allocation121_spill] sm:$0xff] }
 0x573   :  { %v2187_v54 = vadd.f32 %v2140_v62, %v8165_v47  ;;  %v2142_v21 = vpop.f32.mrb[62].mxu0  ;;  %v2183_v42 = vpop.f32.mrb[62].mxu1  ;;  %v2189_v45 = vadd.f32 %v2181_v8, %v8168_v28  ;;  %v8175_v28 = vld [vmem:[#allocation53_spill] sm:$0xff] }
 0x574   :  { %v5359_v56 = vpop.eup %5358  ;;  %v2190_v49 = vmul.f32 0.5, %v2186_v5  ;;  %v2143_v41 = vpop.f32.mrb[63].mxu0 }
 0x575   :  { %v2184_v48 = vpop.f32.mrb[63].mxu1  ;;  %v6766_v57 = vmul.f32 %v5359_v56, %v2061_v26  ;;  %v2194_v2 = vmul.f32 0.5, %v2187_v54  ;;  %v2199_v9 = vmul.f32 0.5, %v2189_v45  ;;  %v8170_v41 = vld [vmem:[#allocation118_spill] sm:$0xff]  ;;  %v8176_v45 = vld [vmem:[#allocation52_spill] sm:$0xff] }
 0x576   :  { %5360 = vtanh.f32 %v2190_v49  ;;  %v8169_v49 = vld [vmem:[#allocation117_spill] sm:$0xff]  ;;  %v8171_v48 = vld [vmem:[#allocation120_spill] sm:$0xff] }
 0x577   :  { %8166 = vst [vmem:[#allocation103_spill] sm:$0xff] %v6766_v57  ;;  %v2214_v37 = vpack.c.bf16 %v6766_v57, %v6766_v57  ;;  %5362 = vtanh.f32 %v2194_v2  ;;  %v8172_v2 = vld [vmem:[#allocation119_spill] sm:$0xff]  ;;  %v7083_v57 = vld [vmem:[#allocation6 + $0x1b8] sm:$0xff] }
 0x578   :  { %5364 = vtanh.f32 %v2188_v35  ;;  %8215 = vst [vmem:[#allocation58_spill] sm:$0xff] %v7083_v57 }
 0x579   :  { %2280 = vmatmul.mubr.bf16.vlgmr.msra.gmra.mrb[64].mxu0 %v2214_v37  ;;  %2321 = vmatmul.mubr.bf16.vlgmr.msra.gmra.mrb[64].mxu1 %v2214_v37  ;;  %5366 = vtanh.f32 %v2199_v9  ;;  %v8174_v37 = vld [vmem:[#allocation51_spill] sm:$0xff] }
 0x57a   :  { %2389 = vmatpush1.bf16.msra.mxu0 %v6619_v40  ;;  %2430 = vmatpush1.bf16.msra.mxu1 %v6621_v12 }
 0x57b   :  { %2390 = vmatprep.subr.bf16.mxu0 %v6623_v39  ;;  %2431 = vmatprep.subr.bf16.mxu1 %v6625_v14 }
 0x57c   :  { %2420 = vmatprep.mubr.bf16.mxu0 %v8060_v16  ;;  %2461 = vmatprep.mubr.bf16.mxu1 %v8060_v16 }
 0x57e   :  { %2391 = vmatpush1.bf16.msra.mxu0 %v6632_v3  ;;  %2432 = vmatpush1.bf16.msra.mxu1 %v6634_v59 }
 0x57f   :  { %2392 = vmatprep.subr.bf16.mxu0 %v6636_v50  ;;  %2433 = vmatprep.subr.bf16.mxu1 %v6638_v33 }
 0x580   :  { %v5361_v7 = vpop.eup %5360 }
 0x581   :  { %v5363_v5 = vpop.eup %5362  ;;  %v2192_v62 = vmul.f32 0.5, %v5361_v7 }
 0x582   :  { %v2196_v8 = vmul.f32 0.5, %v5363_v5  ;;  %2393 = vmatpush1.bf16.msra.mxu0 %v6646_v34  ;;  %2434 = vmatpush1.bf16.msra.mxu1 %v6648_v38  ;;  %v5365_v47 = vpop.eup %5364 }
 0x583   :  { %v2193_v26 = vadd.f32 0.5, %v2192_v62  ;;  %2394 = vmatprep.subr.bf16.mxu0 %v6650_v63  ;;  %2435 = vmatprep.subr.bf16.mxu1 %v6652_v20 }
 0x584   :  { %v2197_v54 = vadd.f32 0.5, %v2196_v8  ;;  %v8194_v8 = vld [vmem:[#allocation63_spill] sm:$0xff] }
 0x585   :  { %v2204_v21 = vmul.f32 %v5365_v47, %v2193_v26 }
 0x586   :  { %v2203_v42 = vmul.f32 %v2197_v54, %v6675_v4  ;;  %2395 = vmatpush1.bf16.msra.mxu0 %v6658_v58  ;;  %2436 = vmatpush1.bf16.msra.mxu1 %v6660_v51  ;;  %v5367_v4 = vpop.eup %5366 }
 0x587   :  { %2396 = vmatprep.subr.bf16.mxu0 %v6662_v60  ;;  %2437 = vmatprep.subr.bf16.mxu1 %v6664_v25  ;;  %v2201_v35 = vmul.f32 0.5, %v5367_v4 }
 0x588   :  { %v6791_v56 = vadd.f32 %v2204_v21, %v2203_v42  ;;  %v8195_v21 = vld [vmem:[#allocation65_spill] sm:$0xff] }
 0x589   :  { %v2202_v9 = vadd.f32 0.5, %v2201_v35 }
 0x58a   :  { %5368 = vtanh.f32 %v6791_v56  ;;  %2397 = vmatpush1.bf16.msra.mxu0 %v6671_v30  ;;  %2438 = vmatpush1.bf16.msra.mxu1 %v8169_v49 }
 0x58b   :  { %2398 = vmatprep.subr.bf16.mxu0 %v8170_v41  ;;  %2439 = vmatprep.subr.bf16.mxu1 %v8171_v48 }
 0x58e   :  { %2399 = vmatpush1.bf16.msra.mxu0 %v8172_v2  ;;  %2440 = vmatpush1.bf16.msra.mxu1 %v8173_v44 }
 0x58f   :  { %2400 = vmatprep.subr.bf16.mxu0 %v8174_v37  ;;  %2441 = vmatprep.subr.bf16.mxu1 %v8175_v28 }
 0x592   :  { %2401 = vmatpush1.bf16.msra.mxu0 %v8176_v45  ;;  %2442 = vmatpush1.bf16.msra.mxu1 %v6700_v18 }
 0x593   :  { %2402 = vmatprep.subr.bf16.mxu0 %v6702_v23  ;;  %2443 = vmatprep.subr.bf16.mxu1 %v6704_v0 }
 0x594   :  { %v5369_v7 = vpop.eup %5368 }
 0x595   :  { %v6806_v5 = vmul.f32 %v5369_v7, %v2202_v9 }
 0x596   :  { %2403 = vmatpush1.bf16.msra.mxu0 %v6710_v19  ;;  %2444 = vmatpush1.bf16.msra.mxu1 %v6712_v32 }
 0x597   :  { %8177 = vst [vmem:[#allocation105_spill] sm:$0xff] %v6806_v5  ;;  %v2355_v62 = vpack.c.bf16 %v6806_v5, %v6806_v5  ;;  %2531 = vmatprep.subr.bf16.mxu0 %v6502_v6  ;;  %2572 = vmatprep.subr.bf16.mxu1 %v6504_v24  ;;  %v8178_v6 = vld [vmem:[#allocation126_spill] sm:$0xff]  ;;  %v8179_v24 = vld [vmem:[#allocation128_spill] sm:$0xff] }
 0x598   :  { %v7081_v5 = vld [vmem:[#allocation6 + $0x1a8] sm:$0xff] }
 0x599   :  { %2421 = vmatmul.mubr.bf16.vlgmr.msra.gmra.mrb[68].mxu0 %v2355_v62  ;;  %2462 = vmatmul.mubr.bf16.vlgmr.msra.gmra.mrb[68].mxu1 %v2355_v62  ;;  %8214 = vst [vmem:[#allocation56_spill] sm:$0xff] %v7081_v5 }
 0x59a   :  { %2532 = vmatpush1.bf16.msra.mxu0 %v6508_v27  ;;  %2573 = vmatpush1.bf16.msra.mxu1 %v6510_v15  ;;  %v8180_v27 = vld [vmem:[#allocation127_spill] sm:$0xff]  ;;  %v8181_v15 = vld [vmem:[#allocation129_spill] sm:$0xff] }
 0x59b   :  { %2533 = vmatprep.subr.bf16.mxu0 %v6514_v46  ;;  %2574 = vmatprep.subr.bf16.mxu1 %v6516_v43  ;;  %v8182_v46 = vld [vmem:[#allocation131_spill] sm:$0xff]  ;;  %v8183_v43 = vld [vmem:[#allocation130_spill] sm:$0xff] }
 0x59c   :  { %2563 = vmatprep.mubr.bf16.mxu0 %v8060_v16  ;;  %2604 = vmatprep.mubr.bf16.mxu1 %v8060_v16 }
 0x59e   :  { %2534 = vmatpush1.bf16.msra.mxu0 %v6520_v11  ;;  %2575 = vmatpush1.bf16.msra.mxu1 %v6522_v10  ;;  %v8184_v11 = vld [vmem:[#allocation132_spill] sm:$0xff] }
 0x59f   :  { %2535 = vmatprep.subr.bf16.mxu0 %v6526_v29  ;;  %2576 = vmatprep.subr.bf16.mxu1 %v6528_v52  ;;  %v8185_v10 = vld [vmem:[#allocation108_spill] sm:$0xff]  ;;  %v8186_v29 = vld [vmem:[#allocation107_spill] sm:$0xff]  ;;  %v8187_v52 = vld [vmem:[#allocation109_spill] sm:$0xff] }
 0x5a2   :  { %2536 = vmatpush1.bf16.msra.mxu0 %v6532_v53  ;;  %2577 = vmatpush1.bf16.msra.mxu1 %v6534_v61  ;;  %v8188_v53 = vld [vmem:[#allocation110_spill] sm:$0xff]  ;;  %v8189_v61 = vld [vmem:[#allocation112_spill] sm:$0xff] }
 0x5a3   :  { %2537 = vmatprep.subr.bf16.mxu0 %v6538_v1  ;;  %2578 = vmatprep.subr.bf16.mxu1 %v6540_v55  ;;  %v8190_v1 = vld [vmem:[#allocation111_spill] sm:$0xff]  ;;  %v8191_v55 = vld [vmem:[#allocation113_spill] sm:$0xff] }
 0x5a6   :  { %2538 = vmatpush1.bf16.msra.mxu0 %v6544_v22  ;;  %2579 = vmatpush1.bf16.msra.mxu1 %v6546_v36  ;;  %v8192_v22 = vld [vmem:[#allocation114_spill] sm:$0xff]  ;;  %v8193_v36 = vld [vmem:[#allocation116_spill] sm:$0xff] }
 0x5a7   :  { %2539 = vmatprep.subr.bf16.mxu0 %v6550_v17  ;;  %2580 = vmatprep.subr.bf16.mxu1 %v6552_v31 }
 0x5aa   :  { %2540 = vmatpush1.bf16.msra.mxu0 %v8178_v6  ;;  %2581 = vmatpush1.bf16.msra.mxu1 %v8179_v24  ;;  %v8196_v24 = vld [vmem:[#allocation64_spill] sm:$0xff] }
 0x5ab   :  { %2541 = vmatprep.subr.bf16.mxu0 %v8180_v27  ;;  %2582 = vmatprep.subr.bf16.mxu1 %v8181_v15  ;;  %v8197_v15 = vld [vmem:[#allocation66_spill] sm:$0xff] }
 0x5ae   :  { %2542 = vmatpush1.bf16.msra.mxu0 %v8182_v46  ;;  %2583 = vmatpush1.bf16.msra.mxu1 %v8183_v43 }
 0x5af   :  { %2543 = vmatprep.subr.bf16.mxu0 %v8184_v11  ;;  %2584 = vmatprep.subr.bf16.mxu1 %v8185_v10 }
 0x5b2   :  { %2544 = vmatpush1.bf16.msra.mxu0 %v8186_v29  ;;  %2585 = vmatpush1.bf16.msra.mxu1 %v8187_v52 }
 0x5b3   :  { %2545 = vmatprep.subr.bf16.mxu0 %v8188_v53  ;;  %2586 = vmatprep.subr.bf16.mxu1 %v8189_v61 }
 0x5b6   :  { %2546 = vmatpush1.bf16.msra.mxu0 %v8190_v1  ;;  %2587 = vmatpush1.bf16.msra.mxu1 %v8191_v55 }
 0x5b7   :  { %2672 = vmatprep.subr.bf16.mxu0 %v8192_v22  ;;  %2713 = vmatprep.subr.bf16.mxu1 %v8193_v36 }
 0x64c   :  { %v2281_v17 = vpop.f32.mrb[64].mxu0  ;;  %v2322_v31 = vpop.f32.mrb[64].mxu1 }
 0x64d   :  { %v2329_v26 = vadd.f32 %v2281_v17, %v8194_v8  ;;  %v2283_v47 = vpop.f32.mrb[65].mxu0  ;;  %v2324_v54 = vpop.f32.mrb[65].mxu1  ;;  %v2331_v27 = vadd.f32 %v2322_v31, %v8196_v24 }
 0x64e   :  { %v2330_v42 = vadd.f32 %v2283_v47, %v8195_v21  ;;  %v2285_v4 = vpop.f32.mrb[66].mxu0  ;;  %v2326_v35 = vpop.f32.mrb[66].mxu1  ;;  %v2332_v46 = vadd.f32 %v2324_v54, %v8197_v15  ;;  %v8198_v47 = vld [vmem:[#allocation91_spill] sm:$0xff] }
 0x64f   :  { %v2333_v9 = vmul.f32 0.5, %v2329_v26  ;;  %v2286_v7 = vpop.f32.mrb[67].mxu0  ;;  %v2327_v62 = vpop.f32.mrb[67].mxu1  ;;  %v8199_v35 = vld [vmem:[#allocation93_spill] sm:$0xff] }
 0x650   :  { %v2337_v6 = vmul.f32 0.5, %v2330_v42  ;;  %v2342_v43 = vmul.f32 0.5, %v2332_v46 }
 0x651   :  { %5370 = vtanh.f32 %v2333_v9 }
 0x652   :  { %5372 = vtanh.f32 %v2337_v6 }
 0x653   :  { %5374 = vtanh.f32 %v2331_v27 }
 0x654   :  { %5376 = vtanh.f32 %v2342_v43  ;;  %v8201_v43 = vld [vmem:[#allocation92_spill] sm:$0xff] }
 0x65b   :  { %v5371_v11 = vpop.eup %5370 }
 0x65c   :  { %v5373_v10 = vpop.eup %5372  ;;  %v2335_v29 = vmul.f32 0.5, %v5371_v11 }
 0x65d   :  { %v2339_v52 = vmul.f32 0.5, %v5373_v10  ;;  %v5375_v61 = vpop.eup %5374 }
 0x65e   :  { %v2336_v53 = vadd.f32 0.5, %v2335_v29  ;;  %v5377_v17 = vpop.eup %5376  ;;  %v8202_v29 = vld [vmem:[#allocation94_spill] sm:$0xff] }
 0x65f   :  { %v2340_v1 = vadd.f32 0.5, %v2339_v52  ;;  %v2344_v31 = vmul.f32 0.5, %v5377_v17  ;;  %v6962_v17 = vld [vmem:[#allocation6 + $0x90] sm:$0xff] }
 0x660   :  { %v2347_v55 = vmul.f32 %v5375_v61, %v2336_v53 }
 0x661   :  { %v2346_v22 = vmul.f32 %v2340_v1, %v6761_v13  ;;  %v2345_v4 = vadd.f32 0.5, %v2344_v31  ;;  %v6966_v31 = vld [vmem:[#allocation6 + $0xa8] sm:$0xff] }
 0x663   :  { %v6853_v36 = vadd.f32 %v2347_v55, %v2346_v22  ;;  %v6956_v55 = vld [vmem:[#allocation6 + $0x98] sm:$0xff]  ;;  %v6960_v22 = vld [vmem:[#allocation6 + $0x80] sm:$0xff] }
 0x665   :  { %5378 = vtanh.f32 %v6853_v36 }
 0x66c   :  { %v2422_v8 = vpop.f32.mrb[68].mxu0  ;;  %v2463_v26 = vpop.f32.mrb[68].mxu1 }
 0x66d   :  { %v2470_v54 = vadd.f32 %v2422_v8, %v8198_v47  ;;  %v2424_v21 = vpop.f32.mrb[69].mxu0  ;;  %v2465_v42 = vpop.f32.mrb[69].mxu1  ;;  %v2472_v11 = vadd.f32 %v2463_v26, %v8201_v43  ;;  %v6968_v8 = vld [vmem:[#allocation6 + $0xb8] sm:$0xff]  ;;  %v6972_v26 = vld [vmem:[#allocation6 + $0xa0] sm:$0xff]  ;;  %v6974_v47 = vld [vmem:[#allocation6 + $0xb0] sm:$0xff] }
 0x66e   :  { %v2471_v9 = vadd.f32 %v2424_v21, %v8199_v35  ;;  %v2426_v7 = vpop.f32.mrb[70].mxu0  ;;  %v2467_v62 = vpop.f32.mrb[70].mxu1  ;;  %v2473_v52 = vadd.f32 %v2465_v42, %v8202_v29  ;;  %v6980_v21 = vld [vmem:[#allocation6 + $0xd8] sm:$0xff]  ;;  %v6984_v42 = vld [vmem:[#allocation6 + $0xc0] sm:$0xff]  ;;  %v6990_v35 = vld [vmem:[#allocation6 + $0xe8] sm:$0xff] }
 0x66f   :  { %v5379_v6 = vpop.eup %5378  ;;  %v2474_v24 = vmul.f32 0.5, %v2470_v54  ;;  %v2427_v13 = vpop.f32.mrb[71].mxu0  ;;  %v6978_v54 = vld [vmem:[#allocation6 + $0xc8] sm:$0xff]  ;;  %v6996_v7 = vld [vmem:[#allocation6 + $0xe0] sm:$0xff]  ;;  %v6998_v62 = vld [vmem:[#allocation6 + $0xf0] sm:$0xff] }
 0x670   :  { %v2468_v27 = vpop.f32.mrb[71].mxu1  ;;  %v6858_v15 = vmul.f32 %v5379_v6, %v2345_v4  ;;  %v2478_v46 = vmul.f32 0.5, %v2471_v9  ;;  %v2483_v53 = vmul.f32 0.5, %v2473_v52  ;;  %v6986_v4 = vld [vmem:[#allocation6 + $0xd0] sm:$0xff]  ;;  %v6992_v9 = vld [vmem:[#allocation6 + $0xf8] sm:$0xff]  ;;  %v7002_v6 = vld [vmem:[#allocation6 + $0x108] sm:$0xff] }
 0x671   :  { %5380 = vtanh.f32 %v2474_v24  ;;  %v7004_v24 = vld [vmem:[#allocation6 + $0x118] sm:$0xff]  ;;  %v8205_v29 = vld [vmem:[#allocation69_spill] sm:$0xff] }
 0x672   :  { %8200 = vst [vmem:[#allocation104_spill] sm:$0xff] %v6858_v15  ;;  %v2498_v10 = vpack.c.bf16 %v6858_v15, %v6858_v15  ;;  %5382 = vtanh.f32 %v2478_v46  ;;  %v8204_v46 = vld [vmem:[#allocation67_spill] sm:$0xff]  ;;  %v7077_v15 = vld [vmem:[#allocation6 + $0x190] sm:$0xff] }
 0x673   :  { %5384 = vtanh.f32 %v2472_v11  ;;  %8213 = vst [vmem:[#allocation57_spill] sm:$0xff] %v7077_v15 }
 0x674   :  { %2564 = vmatmul.mubr.bf16.vlgmr.msra.gmra.mrb[72].mxu0 %v2498_v10  ;;  %2605 = vmatmul.mubr.bf16.vlgmr.msra.gmra.mrb[72].mxu1 %v2498_v10  ;;  %5386 = vtanh.f32 %v2483_v53 }
 0x675   :  { %2673 = vmatpush1.bf16.msra.mxu0 %v6619_v40  ;;  %2714 = vmatpush1.bf16.msra.mxu1 %v6621_v12 }
 0x676   :  { %2674 = vmatprep.subr.bf16.mxu0 %v6623_v39  ;;  %2715 = vmatprep.subr.bf16.mxu1 %v6625_v14 }
 0x677   :  { %2704 = vmatprep.mubr.bf16.mxu0 %v8060_v16  ;;  %2745 = vmatprep.mubr.bf16.mxu1 %v8060_v16 }
 0x679   :  { %2675 = vmatpush1.bf16.msra.mxu0 %v6632_v3  ;;  %2716 = vmatpush1.bf16.msra.mxu1 %v6634_v59 }
 0x67a   :  { %2676 = vmatprep.subr.bf16.mxu0 %v6636_v50  ;;  %2717 = vmatprep.subr.bf16.mxu1 %v6638_v33 }
 0x67b   :  { %v5381_v40 = vpop.eup %5380 }
 0x67c   :  { %v5383_v61 = vpop.eup %5382  ;;  %v2476_v12 = vmul.f32 0.5, %v5381_v40 }
 0x67d   :  { %v2480_v1 = vmul.f32 0.5, %v5383_v61  ;;  %2677 = vmatpush1.bf16.msra.mxu0 %v6646_v34  ;;  %2718 = vmatpush1.bf16.msra.mxu1 %v6648_v38  ;;  %v5385_v14 = vpop.eup %5384 }
 0x67e   :  { %v2477_v39 = vadd.f32 0.5, %v2476_v12  ;;  %2678 = vmatprep.subr.bf16.mxu0 %v6650_v63  ;;  %2719 = vmatprep.subr.bf16.mxu1 %v6652_v20  ;;  %v5387_v34 = vpop.eup %5386 }
 0x67f   :  { %v2481_v3 = vadd.f32 0.5, %v2480_v1 }
 0x680   :  { %v2488_v59 = vmul.f32 %v5385_v14, %v2477_v39  ;;  %v8206_v14 = vld [vmem:[#allocation68_spill] sm:$0xff] }
 0x681   :  { %v2487_v50 = vmul.f32 %v2481_v3, %v6791_v56  ;;  %2679 = vmatpush1.bf16.msra.mxu0 %v6658_v58  ;;  %2720 = vmatpush1.bf16.msra.mxu1 %v6660_v51  ;;  %v6914_v51 = vld [vmem:[#allocation6 + $0x10] sm:$0xff]  ;;  %v6930_v56 = vld [vmem:[#allocation6 + $0x48] sm:$0xff] }
 0x682   :  { %2680 = vmatprep.subr.bf16.mxu0 %v6662_v60  ;;  %2721 = vmatprep.subr.bf16.mxu1 %v6664_v25  ;;  %v2485_v60 = vmul.f32 0.5, %v5387_v34  ;;  %v6918_v25 = vld [vmem:[#allocation6 + $0x28] sm:$0xff] }
 0x683   :  { %v6883_v33 = vadd.f32 %v2488_v59, %v2487_v50  ;;  %v8207_v59 = vld [vmem:[#allocation70_spill] sm:$0xff] }
 0x684   :  { %v2486_v38 = vadd.f32 0.5, %v2485_v60 }
 0x685   :  { %5388 = vtanh.f32 %v6883_v33  ;;  %2681 = vmatpush1.bf16.msra.mxu0 %v6671_v30  ;;  %2722 = vmatpush1.bf16.msra.mxu1 %v8169_v49  ;;  %v6920_v30 = vld [vmem:[#allocation6 + $0x38] sm:$0xff] }
 0x686   :  { %2682 = vmatprep.subr.bf16.mxu0 %v8170_v41  ;;  %2723 = vmatprep.subr.bf16.mxu1 %v8171_v48  ;;  %v6932_v49 = vld [vmem:[#allocation6 + $0x58] sm:$0xff]  ;;  %v6936_v41 = vld [vmem:[#allocation6 + $0x40] sm:$0xff]  ;;  %v6938_v48 = vld [vmem:[#allocation6 + $0x50] sm:$0xff] }
 0x689   :  { %2683 = vmatpush1.bf16.msra.mxu0 %v8172_v2  ;;  %2724 = vmatpush1.bf16.msra.mxu1 %v8173_v44  ;;  %v6942_v2 = vld [vmem:[#allocation6 + $0x68] sm:$0xff]  ;;  %v6944_v44 = vld [vmem:[#allocation6 + $0x78] sm:$0xff] }
 0x68a   :  { %2684 = vmatprep.subr.bf16.mxu0 %v8174_v37  ;;  %2725 = vmatprep.subr.bf16.mxu1 %v8175_v28  ;;  %v6948_v37 = vld [vmem:[#allocation6 + $0x60] sm:$0xff]  ;;  %v6950_v28 = vld [vmem:[#allocation6 + $0x70] sm:$0xff] }
 0x68d   :  { %2685 = vmatpush1.bf16.msra.mxu0 %v8176_v45  ;;  %2726 = vmatpush1.bf16.msra.mxu1 %v6700_v18  ;;  %v6906_v18 = vld [vmem:[#allocation6 + $0x8] sm:$0xff] }
 0x68e   :  { %2686 = vmatprep.subr.bf16.mxu0 %v6702_v23  ;;  %2727 = vmatprep.subr.bf16.mxu1 %v6704_v0  ;;  %v6908_v23 = vld [vmem:[#allocation6 + $0x18] sm:$0xff]  ;;  %v6912_v0 = vld [vmem:[#allocation6] sm:$0xff]  ;;  %v6954_v45 = vld [vmem:[#allocation6 + $0x88] sm:$0xff] }
 0x68f   :  { %v5389_v63 = vpop.eup %5388 }
 0x690   :  { %v6898_v20 = vmul.f32 %v5389_v63, %v2486_v38 }
 0x691   :  { %2687 = vmatpush1.bf16.msra.mxu0 %v6710_v19  ;;  %2728 = vmatpush1.bf16.msra.mxu1 %v6712_v32  ;;  %v6924_v32 = vld [vmem:[#allocation6 + $0x20] sm:$0xff]  ;;  %v6926_v19 = vld [vmem:[#allocation6 + $0x30] sm:$0xff] }
 0x692   :  { %8203 = vst [vmem:[#allocation106_spill] sm:$0xff] %v6898_v20  ;;  %v2639_v58 = vpack.c.bf16 %v6898_v20, %v6898_v20  ;;  %2815 = vmatprep.subr.bf16.mxu0 %v6906_v18  ;;  %2856 = vmatprep.subr.bf16.mxu1 %v6908_v23  ;;  %v7102_v20 = vld [vmem:[#allocation6 + $0x1c0] sm:$0xff] }
 0x693   :  { %8220 = vst [vmem:[#allocation59_spill] sm:$0xff] %v7102_v20 }
 0x694   :  { %2705 = vmatmul.mubr.bf16.vlgmr.msra.gmra.mrb[76].mxu0 %v2639_v58  ;;  %2746 = vmatmul.mubr.bf16.vlgmr.msra.gmra.mrb[76].mxu1 %v2639_v58 }
 0x695   :  { %2847 = vmatprep.mubr.bf16.mxu0 %v8060_v16  ;;  %2888 = vmatprep.mubr.bf16.mxu1 %v8060_v16 }
 0x696   :  { %2816 = vmatpush1.bf16.msra.mxu0 %v6912_v0  ;;  %2857 = vmatpush1.bf16.msra.mxu1 %v6914_v51 }
 0x697   :  { %2817 = vmatprep.subr.bf16.mxu0 %v6918_v25  ;;  %2858 = vmatprep.subr.bf16.mxu1 %v6920_v30 }
 0x69a   :  { %2818 = vmatpush1.bf16.msra.mxu0 %v6924_v32  ;;  %2859 = vmatpush1.bf16.msra.mxu1 %v6926_v19 }
 0x69b   :  { %2819 = vmatprep.subr.bf16.mxu0 %v6930_v56  ;;  %2860 = vmatprep.subr.bf16.mxu1 %v6932_v49 }
 0x69e   :  { %2820 = vmatpush1.bf16.msra.mxu0 %v6936_v41  ;;  %2861 = vmatpush1.bf16.msra.mxu1 %v6938_v48 }
 0x69f   :  { %2821 = vmatprep.subr.bf16.mxu0 %v6942_v2  ;;  %2862 = vmatprep.subr.bf16.mxu1 %v6944_v44 }
 0x6a2   :  { %2822 = vmatpush1.bf16.msra.mxu0 %v6948_v37  ;;  %2863 = vmatpush1.bf16.msra.mxu1 %v6950_v28 }
 0x6a3   :  { %2823 = vmatprep.subr.bf16.mxu0 %v6954_v45  ;;  %2864 = vmatprep.subr.bf16.mxu1 %v6956_v55 }
 0x6a6   :  { %2824 = vmatpush1.bf16.msra.mxu0 %v6960_v22  ;;  %2865 = vmatpush1.bf16.msra.mxu1 %v6962_v17 }
 0x6a7   :  { %2825 = vmatprep.subr.bf16.mxu0 %v6966_v31  ;;  %2866 = vmatprep.subr.bf16.mxu1 %v6968_v8 }
 0x6aa   :  { %2826 = vmatpush1.bf16.msra.mxu0 %v6972_v26  ;;  %2867 = vmatpush1.bf16.msra.mxu1 %v6974_v47 }
 0x6ab   :  { %2827 = vmatprep.subr.bf16.mxu0 %v6978_v54  ;;  %2868 = vmatprep.subr.bf16.mxu1 %v6980_v21 }
 0x6ae   :  { %2828 = vmatpush1.bf16.msra.mxu0 %v6984_v42  ;;  %2869 = vmatpush1.bf16.msra.mxu1 %v6986_v4 }
 0x6af   :  { %2829 = vmatprep.subr.bf16.mxu0 %v6990_v35  ;;  %2870 = vmatprep.subr.bf16.mxu1 %v6992_v9 }
 0x6b2   :  { %2830 = vmatpush1.bf16.msra.mxu0 %v6996_v7  ;;  %2871 = vmatpush1.bf16.msra.mxu1 %v6998_v62 }
 0x6b3   :  { %2956 = vmatprep.subr.bf16.mxu0 %v7002_v6  ;;  %2997 = vmatprep.subr.bf16.mxu1 %v7004_v24 }
 0x747   :  { %v2565_v13 = vpop.f32.mrb[72].mxu0  ;;  %v2606_v27 = vpop.f32.mrb[72].mxu1 }
 0x748   :  { %v2613_v43 = vadd.f32 %v2565_v13, %v8204_v46  ;;  %v2567_v11 = vpop.f32.mrb[73].mxu0  ;;  %v2608_v10 = vpop.f32.mrb[73].mxu1  ;;  %v2615_v3 = vadd.f32 %v2606_v27, %v8206_v14 }
 0x749   :  { %v2614_v52 = vadd.f32 %v2567_v11, %v8205_v29  ;;  %v2569_v53 = vpop.f32.mrb[74].mxu0  ;;  %v2610_v40 = vpop.f32.mrb[74].mxu1  ;;  %v2616_v50 = vadd.f32 %v2608_v10, %v8207_v59 }
 0x74a   :  { %v2617_v61 = vmul.f32 0.5, %v2613_v43  ;;  %v2570_v12 = vpop.f32.mrb[75].mxu0  ;;  %v2611_v1 = vpop.f32.mrb[75].mxu1 }
 0x74b   :  { %v2621_v39 = vmul.f32 0.5, %v2614_v52  ;;  %v2626_v34 = vmul.f32 0.5, %v2616_v50 }
 0x74c   :  { %5390 = vtanh.f32 %v2617_v61  ;;  %v8208_v61 = vld [vmem:[#allocation87_spill] sm:$0xff] }
 0x74d   :  { %5392 = vtanh.f32 %v2621_v39 }
 0x74e   :  { %5394 = vtanh.f32 %v2615_v3  ;;  %v8209_v3 = vld [vmem:[#allocation89_spill] sm:$0xff] }
 0x74f   :  { %5396 = vtanh.f32 %v2626_v34 }
 0x756   :  { %v5391_v60 = vpop.eup %5390 }
 0x757   :  { %v5393_v38 = vpop.eup %5392  ;;  %v2619_v63 = vmul.f32 0.5, %v5391_v60 }
 0x758   :  { %v2623_v58 = vmul.f32 0.5, %v5393_v38  ;;  %v5395_v46 = vpop.eup %5394 }
 0x759   :  { %v2620_v13 = vadd.f32 0.5, %v2619_v63  ;;  %v5397_v27 = vpop.eup %5396 }
 0x75a   :  { %v2624_v11 = vadd.f32 0.5, %v2623_v58  ;;  %v2628_v53 = vmul.f32 0.5, %v5397_v27  ;;  %v7025_v27 = vld [vmem:[#allocation6 + $0x110] sm:$0xff] }
 0x75b   :  { %v2631_v43 = vmul.f32 %v5395_v46, %v2620_v13  ;;  %v8211_v46 = vld [vmem:[#allocation88_spill] sm:$0xff] }
 0x75c   :  { %v2630_v29 = vmul.f32 %v2624_v11, %v6853_v36  ;;  %v2629_v14 = vadd.f32 0.5, %v2628_v53  ;;  %v7027_v53 = vld [vmem:[#allocation6 + $0x128] sm:$0xff] }
 0x75e   :  { %v7013_v52 = vadd.f32 %v2631_v43, %v2630_v29  ;;  %v7023_v29 = vld [vmem:[#allocation6 + $0x100] sm:$0xff] }
 0x760   :  { %5398 = vtanh.f32 %v7013_v52 }
 0x767   :  { %v2706_v40 = vpop.f32.mrb[76].mxu0  ;;  %v2747_v10 = vpop.f32.mrb[76].mxu1 }
 0x768   :  { %v2754_v12 = vadd.f32 %v2706_v40, %v8208_v61  ;;  %v2708_v1 = vpop.f32.mrb[77].mxu0  ;;  %v2749_v39 = vpop.f32.mrb[77].mxu1  ;;  %v2756_v11 = vadd.f32 %v2747_v10, %v8211_v46  ;;  %v7029_v40 = vld [vmem:[#allocation6 + $0x138] sm:$0xff]  ;;  %v7036_v10 = vld [vmem:[#allocation6 + $0x120] sm:$0xff] }
 0x769   :  { %v2755_v59 = vadd.f32 %v2708_v1, %v8209_v3  ;;  %v2710_v50 = vpop.f32.mrb[78].mxu0  ;;  %v2751_v34 = vpop.f32.mrb[78].mxu1  ;;  %v8212_v61 = vld [vmem:[#allocation90_spill] sm:$0xff]  ;;  %v7038_v1 = vld [vmem:[#allocation6 + $0x130] sm:$0xff] }
 0x76a   :  { %v5399_v60 = vpop.eup %5398  ;;  %v2758_v38 = vmul.f32 0.5, %v2754_v12  ;;  %v2711_v36 = vpop.f32.mrb[79].mxu0  ;;  %v2757_v12 = vadd.f32 %v2749_v39, %v8212_v61  ;;  %v7042_v3 = vld [vmem:[#allocation6 + $0x158] sm:$0xff]  ;;  %v7052_v50 = vld [vmem:[#allocation6 + $0x150] sm:$0xff] }
 0x76b   :  { %v2752_v63 = vpop.f32.mrb[79].mxu1  ;;  %v7018_v58 = vmul.f32 %v5399_v60, %v2629_v14  ;;  %v2762_v13 = vmul.f32 0.5, %v2755_v59  ;;  %v7040_v14 = vld [vmem:[#allocation6 + $0x148] sm:$0xff]  ;;  %v7050_v59 = vld [vmem:[#allocation6 + $0x140] sm:$0xff] }
 0x76c   :  { %5400 = vtanh.f32 %v2758_v38  ;;  %v2767_v39 = vmul.f32 0.5, %v2757_v12  ;;  %v7054_v60 = vld [vmem:[#allocation6 + $0x168] sm:$0xff]  ;;  %v7056_v38 = vld [vmem:[#allocation6 + $0x178] sm:$0xff] }
 0x76d   :  { %8210 = vst [vmem:[#allocation55_spill] sm:$0xff] %v7018_v58  ;;  %v2782_v43 = vpack.c.bf16 %v7018_v58, %v7018_v58  ;;  %5402 = vtanh.f32 %v2762_v13  ;;  %v7066_v58 = vld [vmem:[#allocation6 + $0x188] sm:$0xff] }
 0x76e   :  { %5404 = vtanh.f32 %v2756_v11  ;;  %v7062_v11 = vld [vmem:[#allocation6 + $0x160] sm:$0xff] }
 0x76f   :  { %2848 = vmatmul.mubr.bf16.vlgmr.msra.gmra.mrb[80].mxu0 %v2782_v43  ;;  %2889 = vmatmul.mubr.bf16.vlgmr.msra.gmra.mrb[80].mxu1 %v2782_v43  ;;  %5406 = vtanh.f32 %v2767_v39  ;;  %v7064_v43 = vld [vmem:[#allocation6 + $0x170] sm:$0xff] }
 0x770   :  { %2957 = vmatpush1.bf16.msra.mxu0 %v7023_v29  ;;  %2998 = vmatpush1.bf16.msra.mxu1 %v7025_v27 }
 0x771   :  { %2958 = vmatprep.subr.bf16.mxu0 %v7027_v53  ;;  %2999 = vmatprep.subr.bf16.mxu1 %v7029_v40 }
 0x772   :  { %2988 = vmatprep.mubr.bf16.mxu0 %v8060_v16  ;;  %3029 = vmatprep.mubr.bf16.mxu1 %v8060_v16 }
 0x774   :  { %2959 = vmatpush1.bf16.msra.mxu0 %v7036_v10  ;;  %3000 = vmatpush1.bf16.msra.mxu1 %v7038_v1 }
 0x775   :  { %2960 = vmatprep.subr.bf16.mxu0 %v7040_v14  ;;  %3001 = vmatprep.subr.bf16.mxu1 %v7042_v3 }
 0x776   :  { %v5401_v34 = vpop.eup %5400 }
 0x777   :  { %v5403_v36 = vpop.eup %5402  ;;  %v2760_v63 = vmul.f32 0.5, %v5401_v34  ;;  %v7068_v34 = vld [vmem:[#allocation6 + $0x198] sm:$0xff] }
 0x778   :  { %v2764_v13 = vmul.f32 0.5, %v5403_v36  ;;  %2961 = vmatpush1.bf16.msra.mxu0 %v7050_v59  ;;  %3002 = vmatpush1.bf16.msra.mxu1 %v7052_v50  ;;  %v5405_v61 = vpop.eup %5404 }
 0x779   :  { %v2761_v46 = vadd.f32 0.5, %v2760_v63  ;;  %2962 = vmatprep.subr.bf16.mxu0 %v7054_v60  ;;  %3003 = vmatprep.subr.bf16.mxu1 %v7056_v38  ;;  %v7075_v63 = vld [vmem:[#allocation6 + $0x180] sm:$0xff] }
 0x77a   :  { %v2765_v12 = vadd.f32 0.5, %v2764_v13 }
 0x77b   :  { %v2772_v39 = vmul.f32 %v5405_v61, %v2761_v46  ;;  %v7092_v46 = vld [vmem:[#allocation6 + $0x1b0] sm:$0xff]  ;;  %v5407_v61 = vpop.eup %5406 }
 0x77c   :  { %v2771_v36 = vmul.f32 %v2765_v12, %v6883_v33  ;;  %2963 = vmatpush1.bf16.msra.mxu0 %v7062_v11  ;;  %3004 = vmatpush1.bf16.msra.mxu1 %v7064_v43  ;;  %v7090_v33 = vld [vmem:[#allocation6 + $0x1a0] sm:$0xff]  ;;  %8217 = vst [vmem:[#allocation101_spill] sm:$0xff] %v7092_v46  ;;  %v7094_v12 = vld [vmem:[#allocation6 + $0x1c8] sm:$0xff] }
 0x77d   :  { %2964 = vmatprep.subr.bf16.mxu0 %v7066_v58  ;;  %3005 = vmatprep.subr.bf16.mxu1 %v7068_v34  ;;  %8216 = vst [vmem:[#allocation99_spill] sm:$0xff] %v7090_v33  ;;  %8218 = vst [vmem:[#allocation100_spill] sm:$0xff] %v7094_v12 }
 0x77e   :  { %v7079_v13 = vadd.f32 %v2772_v39, %v2771_v36  ;;  %v7096_v39 = vld [vmem:[#allocation6 + $0x1d8] sm:$0xff]  ;;  %v2769_v36 = vmul.f32 0.5, %v5407_v61  ;;  %v7114_v61 = vld [vmem:[#allocation6 + $0x1e0] sm:$0xff] }
 0x77f   :  { %8219 = vst [vmem:[#allocation102_spill] sm:$0xff] %v7096_v39 }
 0x780   :  { %5408 = vtanh.f32 %v7079_v13  ;;  %2965 = vmatpush1.bf16.msra.mxu0 %v7075_v63  ;;  %3006 = vmatpush1.bf16.msra.mxu1 %v7077_v15  ;;  %v7108_v15 = vld [vmem:[#allocation6 + $0x1f8] sm:$0xff] }
 0x781   :  { %2966 = vmatprep.subr.bf16.mxu0 %v7081_v5  ;;  %3007 = vmatprep.subr.bf16.mxu1 %v7083_v57  ;;  %v7104_v57 = vld [vmem:[#allocation6 + $0x1d0] sm:$0xff]  ;;  %v7106_v5 = vld [vmem:[#allocation6 + $0x1e8] sm:$0xff] }
 0x784   :  { %2967 = vmatpush1.bf16.msra.mxu0 %v7090_v33  ;;  %3008 = vmatpush1.bf16.msra.mxu1 %v7092_v46  ;;  %v2770_v33 = vadd.f32 0.5, %v2769_v36 }
 0x785   :  { %2968 = vmatprep.subr.bf16.mxu0 %v7094_v12  ;;  %3009 = vmatprep.subr.bf16.mxu1 %v7096_v39  ;;  %v7116_v39 = vld [vmem:[#allocation6 + $0x1f0] sm:$0xff] }
 0x788   :  { %2969 = vmatpush1.bf16.msra.mxu0 %v7102_v20  ;;  %3010 = vmatpush1.bf16.msra.mxu1 %v7104_v57 }
 0x789   :  { %2970 = vmatprep.subr.bf16.mxu0 %v7106_v5  ;;  %3011 = vmatprep.subr.bf16.mxu1 %v7108_v15 }
 0x78a   :  { %v5409_v12 = vpop.eup %5408 }
 0x78b   :  { %v7118_v46 = vmul.f32 %v5409_v12, %v2770_v33 }
 0x78c   :  { %2971 = vmatpush1.bf16.msra.mxu0 %v7114_v61  ;;  %3012 = vmatpush1.bf16.msra.mxu1 %v7116_v39 }
 0x78d   :  { %v2923_v20 = vpack.c.bf16 %v7118_v46, %v7118_v46  ;;  %3099 = vmatprep.subr.bf16.mxu0 %v6906_v18  ;;  %3140 = vmatprep.subr.bf16.mxu1 %v6908_v23  ;;  %v8221_v23 = vld [vmem:[#allocation71_spill] sm:$0xff] }
 0x78f   :  { %2989 = vmatmul.mubr.bf16.vlgmr.msra.gmra.mrb[84].mxu0 %v2923_v20  ;;  %3030 = vmatmul.mubr.bf16.vlgmr.msra.gmra.mrb[84].mxu1 %v2923_v20 }
 0x790   :  { %3100 = vmatpush1.bf16.msra.mxu0 %v6912_v0  ;;  %3141 = vmatpush1.bf16.msra.mxu1 %v6914_v51 }
 0x791   :  { %3101 = vmatprep.subr.bf16.mxu0 %v6918_v25  ;;  %3142 = vmatprep.subr.bf16.mxu1 %v6920_v30  ;;  %v8222_v30 = vld [vmem:[#allocation73_spill] sm:$0xff] }
 0x792   :  { %3131 = vmatprep.mubr.bf16.mxu0 %v8060_v16  ;;  %3172 = vmatprep.mubr.bf16.mxu1 %v8060_v16 }
 0x794   :  { %3102 = vmatpush1.bf16.msra.mxu0 %v6924_v32  ;;  %3143 = vmatpush1.bf16.msra.mxu1 %v6926_v19 }
 0x795   :  { %3103 = vmatprep.subr.bf16.mxu0 %v6930_v56  ;;  %3144 = vmatprep.subr.bf16.mxu1 %v6932_v49 }
 0x798   :  { %3104 = vmatpush1.bf16.msra.mxu0 %v6936_v41  ;;  %3145 = vmatpush1.bf16.msra.mxu1 %v6938_v48 }
 0x799   :  { %3105 = vmatprep.subr.bf16.mxu0 %v6942_v2  ;;  %3146 = vmatprep.subr.bf16.mxu1 %v6944_v44  ;;  %v8223_v44 = vld [vmem:[#allocation72_spill] sm:$0xff] }
 0x79c   :  { %3106 = vmatpush1.bf16.msra.mxu0 %v6948_v37  ;;  %3147 = vmatpush1.bf16.msra.mxu1 %v6950_v28  ;;  %v8224_v28 = vld [vmem:[#allocation74_spill] sm:$0xff] }
 0x79d   :  { %3107 = vmatprep.subr.bf16.mxu0 %v6954_v45  ;;  %3148 = vmatprep.subr.bf16.mxu1 %v6956_v55 }
 0x7a0   :  { %3108 = vmatpush1.bf16.msra.mxu0 %v6960_v22  ;;  %3149 = vmatpush1.bf16.msra.mxu1 %v6962_v17 }
 0x7a1   :  { %3109 = vmatprep.subr.bf16.mxu0 %v6966_v31  ;;  %3150 = vmatprep.subr.bf16.mxu1 %v6968_v8 }
 0x7a4   :  { %3110 = vmatpush1.bf16.msra.mxu0 %v6972_v26  ;;  %3151 = vmatpush1.bf16.msra.mxu1 %v6974_v47 }
 0x7a5   :  { %3111 = vmatprep.subr.bf16.mxu0 %v6978_v54  ;;  %3152 = vmatprep.subr.bf16.mxu1 %v6980_v21 }
 0x7a8   :  { %3112 = vmatpush1.bf16.msra.mxu0 %v6984_v42  ;;  %3153 = vmatpush1.bf16.msra.mxu1 %v6986_v4 }
 0x7a9   :  { %3113 = vmatprep.subr.bf16.mxu0 %v6990_v35  ;;  %3154 = vmatprep.subr.bf16.mxu1 %v6992_v9 }
 0x7ac   :  { %3114 = vmatpush1.bf16.msra.mxu0 %v6996_v7  ;;  %3155 = vmatpush1.bf16.msra.mxu1 %v6998_v62 }
 0x7ad   :  { %3240 = vmatprep.subr.bf16.mxu0 %v7002_v6  ;;  %3281 = vmatprep.subr.bf16.mxu1 %v7004_v24  ;;  %v8225_v6 = vld [vmem:[#allocation83_spill] sm:$0xff] }
 0x842   :  { %v2849_v20 = vpop.f32.mrb[80].mxu0  ;;  %v2890_v18 = vpop.f32.mrb[80].mxu1 }
 0x843   :  { %v2897_v0 = vadd.f32 %v2849_v20, %v8221_v23  ;;  %v2851_v51 = vpop.f32.mrb[81].mxu0  ;;  %v2892_v25 = vpop.f32.mrb[81].mxu1  ;;  %v2899_v37 = vadd.f32 %v2890_v18, %v8223_v44  ;;  %v8226_v20 = vld [vmem:[#allocation85_spill] sm:$0xff] }
 0x844   :  { %v2898_v32 = vadd.f32 %v2851_v51, %v8222_v30  ;;  %v2853_v19 = vpop.f32.mrb[82].mxu0  ;;  %v2894_v56 = vpop.f32.mrb[82].mxu1  ;;  %v2900_v45 = vadd.f32 %v2892_v25, %v8224_v28 }
 0x845   :  { %v2901_v49 = vmul.f32 0.5, %v2897_v0  ;;  %v2854_v41 = vpop.f32.mrb[83].mxu0  ;;  %v2895_v48 = vpop.f32.mrb[83].mxu1  ;;  %v8227_v56 = vld [vmem:[#allocation84_spill] sm:$0xff] }
 0x846   :  { %v2905_v2 = vmul.f32 0.5, %v2898_v32  ;;  %v2910_v55 = vmul.f32 0.5, %v2900_v45  ;;  %v8228_v48 = vld [vmem:[#allocation86_spill] sm:$0xff]  ;;  %v8236_v45 = vld [vmem:[#allocation59_spill] sm:$0xff] }
 0x847   :  { %5410 = vtanh.f32 %v2901_v49 }
 0x848   :  { %5412 = vtanh.f32 %v2905_v2 }
 0x849   :  { %5414 = vtanh.f32 %v2899_v37 }
 0x84a   :  { %5416 = vtanh.f32 %v2910_v55 }
 0x851   :  { %v5411_v22 = vpop.eup %5410 }
 0x852   :  { %v5413_v17 = vpop.eup %5412  ;;  %v2903_v31 = vmul.f32 0.5, %v5411_v22 }
 0x853   :  { %v2907_v8 = vmul.f32 0.5, %v5413_v17  ;;  %v5415_v47 = vpop.eup %5414 }
 0x854   :  { %v2904_v26 = vadd.f32 0.5, %v2903_v31  ;;  %v5417_v35 = vpop.eup %5416 }
 0x855   :  { %v2908_v54 = vadd.f32 0.5, %v2907_v8  ;;  %v2912_v9 = vmul.f32 0.5, %v5417_v35 }
 0x856   :  { %v2915_v21 = vmul.f32 %v5415_v47, %v2904_v26 }
 0x857   :  { %v2914_v42 = vmul.f32 %v2908_v54, %v7013_v52  ;;  %v2913_v36 = vadd.f32 0.5, %v2912_v9  ;;  %v8238_v54 = vld [vmem:[#allocation77_spill] sm:$0xff] }
 0x859   :  { %v7165_v4 = vadd.f32 %v2915_v21, %v2914_v42 }
 0x85b   :  { %5418 = vtanh.f32 %v7165_v4 }
 0x862   :  { %v2990_v7 = vpop.f32.mrb[84].mxu0  ;;  %v3031_v62 = vpop.f32.mrb[84].mxu1 }
 0x863   :  { %v3038_v24 = vadd.f32 %v2990_v7, %v8225_v6  ;;  %v2992_v33 = vpop.f32.mrb[85].mxu0  ;;  %v3033_v12 = vpop.f32.mrb[85].mxu1  ;;  %v3040_v49 = vadd.f32 %v3031_v62, %v8227_v56  ;;  %v8240_v6 = vld [vmem:[#allocation78_spill] sm:$0xff] }
 0x864   :  { %v3039_v18 = vadd.f32 %v2992_v33, %v8226_v20  ;;  %v2994_v23 = vpop.f32.mrb[86].mxu0  ;;  %v3035_v0 = vpop.f32.mrb[86].mxu1  ;;  %v3041_v2 = vadd.f32 %v3033_v12, %v8228_v48  ;;  %v8241_v48 = vld [vmem:[#allocation79_spill] sm:$0xff] }
 0x865   :  { %v5419_v51 = vpop.eup %5418  ;;  %v3042_v25 = vmul.f32 0.5, %v3038_v24  ;;  %v2995_v52 = vpop.f32.mrb[87].mxu0 }
 0x866   :  { %v3036_v30 = vpop.f32.mrb[87].mxu1  ;;  %v7170_v32 = vmul.f32 %v5419_v51, %v2913_v36  ;;  %v3046_v19 = vmul.f32 0.5, %v3039_v18  ;;  %v3051_v44 = vmul.f32 0.5, %v3041_v2 }
 0x867   :  { %5420 = vtanh.f32 %v3042_v25 }
 0x868   :  { %v3066_v41 = vpack.c.bf16 %v7170_v32, %v7170_v32  ;;  %5422 = vtanh.f32 %v3046_v19 }
 0x869   :  { %5424 = vtanh.f32 %v3040_v49 }
 0x86a   :  { %3132 = vmatmul.mubr.bf16.vlgmr.msra.gmra.mrb[88].mxu0 %v3066_v41  ;;  %3173 = vmatmul.mubr.bf16.vlgmr.msra.gmra.mrb[88].mxu1 %v3066_v41  ;;  %5426 = vtanh.f32 %v3051_v44 }
 0x86b   :  { %3241 = vmatpush1.bf16.msra.mxu0 %v7023_v29  ;;  %3282 = vmatpush1.bf16.msra.mxu1 %v7025_v27 }
 0x86c   :  { %3242 = vmatprep.subr.bf16.mxu0 %v7027_v53  ;;  %3283 = vmatprep.subr.bf16.mxu1 %v7029_v40 }
 0x86d   :  { %3272 = vmatprep.mubr.bf16.mxu0 %v8060_v16  ;;  %3313 = vmatprep.mubr.bf16.mxu1 %v8060_v16 }
 0x86f   :  { %3243 = vmatpush1.bf16.msra.mxu0 %v7036_v10  ;;  %3284 = vmatpush1.bf16.msra.mxu1 %v7038_v1 }
 0x870   :  { %3244 = vmatprep.subr.bf16.mxu0 %v7040_v14  ;;  %3285 = vmatprep.subr.bf16.mxu1 %v7042_v3 }
 0x871   :  { %v5421_v29 = vpop.eup %5420 }
 0x872   :  { %v5423_v37 = vpop.eup %5422  ;;  %v3044_v27 = vmul.f32 0.5, %v5421_v29 }
 0x873   :  { %v3048_v28 = vmul.f32 0.5, %v5423_v37  ;;  %3245 = vmatpush1.bf16.msra.mxu0 %v7050_v59  ;;  %3286 = vmatpush1.bf16.msra.mxu1 %v7052_v50  ;;  %v5425_v40 = vpop.eup %5424  ;;  %v8229_v59 = vld [vmem:[#allocation57_spill] sm:$0xff]  ;;  %v8230_v50 = vld [vmem:[#allocation56_spill] sm:$0xff] }
 0x874   :  { %v3045_v53 = vadd.f32 0.5, %v3044_v27  ;;  %3246 = vmatprep.subr.bf16.mxu0 %v7054_v60  ;;  %3287 = vmatprep.subr.bf16.mxu1 %v7056_v38  ;;  %v8231_v60 = vld [vmem:[#allocation58_spill] sm:$0xff]  ;;  %v5427_v38 = vpop.eup %5426  ;;  %v8242_v27 = vld [vmem:[#allocation81_spill] sm:$0xff] }
 0x875   :  { %v3049_v10 = vadd.f32 0.5, %v3048_v28 }
 0x876   :  { %v3056_v1 = vmul.f32 %v5425_v40, %v3045_v53 }
 0x877   :  { %v3055_v14 = vmul.f32 %v3049_v10, %v7079_v13  ;;  %3247 = vmatpush1.bf16.msra.mxu0 %v7062_v11  ;;  %3288 = vmatpush1.bf16.msra.mxu1 %v7064_v43  ;;  %v8232_v11 = vld [vmem:[#allocation99_spill] sm:$0xff]  ;;  %v8233_v43 = vld [vmem:[#allocation101_spill] sm:$0xff]  ;;  %v8234_v13 = vld [vmem:[#allocation100_spill] sm:$0xff] }
 0x878   :  { %3248 = vmatprep.subr.bf16.mxu0 %v7066_v58  ;;  %3289 = vmatprep.subr.bf16.mxu1 %v7068_v34  ;;  %v3053_v58 = vmul.f32 0.5, %v5427_v38  ;;  %v8235_v34 = vld [vmem:[#allocation102_spill] sm:$0xff] }
 0x879   :  { %v7195_v3 = vadd.f32 %v3056_v1, %v3055_v14 }
 0x87b   :  { %5428 = vtanh.f32 %v7195_v3  ;;  %3249 = vmatpush1.bf16.msra.mxu0 %v7075_v63  ;;  %3290 = vmatpush1.bf16.msra.mxu1 %v8229_v59  ;;  %v3054_v63 = vadd.f32 0.5, %v3053_v58 }
 0x87c   :  { %3250 = vmatprep.subr.bf16.mxu0 %v8230_v50  ;;  %3291 = vmatprep.subr.bf16.mxu1 %v8231_v60  ;;  %v8243_v60 = vld [vmem:[#allocation80_spill] sm:$0xff] }
 0x87f   :  { %3251 = vmatpush1.bf16.msra.mxu0 %v8232_v11  ;;  %3292 = vmatpush1.bf16.msra.mxu1 %v8233_v43  ;;  %v8244_v11 = vld [vmem:[#allocation82_spill] sm:$0xff] }
 0x880   :  { %3252 = vmatprep.subr.bf16.mxu0 %v8234_v13  ;;  %3293 = vmatprep.subr.bf16.mxu1 %v8235_v34 }
 0x883   :  { %3253 = vmatpush1.bf16.msra.mxu0 %v8236_v45  ;;  %3294 = vmatpush1.bf16.msra.mxu1 %v7104_v57  ;;  %v8237_v57 = vld [vmem:[#allocation75_spill] sm:$0xff] }
 0x884   :  { %3254 = vmatprep.subr.bf16.mxu0 %v7106_v5  ;;  %3295 = vmatprep.subr.bf16.mxu1 %v7108_v15 }
 0x885   :  { %v5429_v55 = vpop.eup %5428 }
 0x886   :  { %v7210_v22 = vmul.f32 %v5429_v55, %v3054_v63 }
 0x887   :  { %3255 = vmatpush1.bf16.msra.mxu0 %v7114_v61  ;;  %3296 = vmatpush1.bf16.msra.mxu1 %v7116_v39  ;;  %v8239_v39 = vld [vmem:[#allocation76_spill] sm:$0xff] }
 0x888   :  { %v3207_v17 = vpack.c.bf16 %v7210_v22, %v7210_v22 }
 0x88a   :  { %3273 = vmatmul.mubr.bf16.vlgmr.msra.gmra.mrb[92].mxu0 %v3207_v17  ;;  %3314 = vmatmul.mubr.bf16.vlgmr.msra.gmra.mrb[92].mxu1 %v3207_v17 }
 0x93d   :  { %v3133_v31 = vpop.f32.mrb[88].mxu0  ;;  %v3174_v8 = vpop.f32.mrb[88].mxu1 }
 0x93e   :  { %v3181_v26 = vadd.f32 %v3133_v31, %v8237_v57  ;;  %v3135_v47 = vpop.f32.mrb[89].mxu0  ;;  %v3176_v5 = vpop.f32.mrb[89].mxu1  ;;  %v3183_v62 = vadd.f32 %v3174_v8, %v8239_v39 }
 0x93f   :  { %v3182_v15 = vadd.f32 %v3135_v47, %v8238_v54  ;;  %v3137_v21 = vpop.f32.mrb[90].mxu0  ;;  %v3178_v42 = vpop.f32.mrb[90].mxu1  ;;  %v3184_v24 = vadd.f32 %v3176_v5, %v8240_v6 }
 0x940   :  { %v3185_v35 = vmul.f32 0.5, %v3181_v26  ;;  %v3138_v9 = vpop.f32.mrb[91].mxu0  ;;  %v3179_v61 = vpop.f32.mrb[91].mxu1 }
 0x941   :  { %v3189_v7 = vmul.f32 0.5, %v3182_v15  ;;  %v3194_v33 = vmul.f32 0.5, %v3184_v24 }
 0x942   :  { %5430 = vtanh.f32 %v3185_v35 }
 0x943   :  { %5432 = vtanh.f32 %v3189_v7 }
 0x944   :  { %5434 = vtanh.f32 %v3183_v62 }
 0x945   :  { %5436 = vtanh.f32 %v3194_v33 }
 0x94c   :  { %v5431_v12 = vpop.eup %5430 }
 0x94d   :  { %v5433_v36 = vpop.eup %5432  ;;  %v3187_v20 = vmul.f32 0.5, %v5431_v12 }
 0x94e   :  { %v3191_v18 = vmul.f32 0.5, %v5433_v36  ;;  %v5435_v0 = vpop.eup %5434 }
 0x94f   :  { %v3188_v23 = vadd.f32 0.5, %v3187_v20  ;;  %v5437_v19 = vpop.eup %5436 }
 0x950   :  { %v3192_v51 = vadd.f32 0.5, %v3191_v18  ;;  %v3196_v56 = vmul.f32 0.5, %v5437_v19 }
 0x951   :  { %v3199_v25 = vmul.f32 %v5435_v0, %v3188_v23 }
 0x952   :  { %v3198_v52 = vmul.f32 %v3192_v51, %v7165_v4  ;;  %v3197_v37 = vadd.f32 0.5, %v3196_v56 }
 0x954   :  { %v3200_v30 = vadd.f32 %v3199_v25, %v3198_v52 }
 0x956   :  { %5438 = vtanh.f32 %v3200_v30 }
 0x95d   :  { %v3274_v49 = vpop.f32.mrb[92].mxu0  ;;  %v3315_v41 = vpop.f32.mrb[92].mxu1 }
 0x95e   :  { %v3322_v2 = vadd.f32 %v3274_v49, %v8241_v48  ;;  %v3276_v44 = vpop.f32.mrb[93].mxu0  ;;  %v3317_v29 = vpop.f32.mrb[93].mxu1  ;;  %v3324_v38 = vadd.f32 %v3315_v41, %v8243_v60 }
 0x95f   :  { %v3323_v28 = vadd.f32 %v3276_v44, %v8242_v27  ;;  %v3278_v53 = vpop.f32.mrb[94].mxu0  ;;  %v3319_v40 = vpop.f32.mrb[94].mxu1  ;;  %v3325_v43 = vadd.f32 %v3317_v29, %v8244_v11 }
 0x960   :  { %v5439_v10 = vpop.eup %5438  ;;  %v3326_v1 = vmul.f32 0.5, %v3322_v2  ;;  %v3279_v14 = vpop.f32.mrb[95].mxu0 }
 0x961   :  { %v3320_v59 = vpop.f32.mrb[95].mxu1  ;;  %v7223_v4 = vmul.f32 %v5439_v10, %v3197_v37  ;;  %v3330_v50 = vmul.f32 0.5, %v3323_v28  ;;  %v3335_v58 = vmul.f32 0.5, %v3325_v43 }
 0x962   :  { %5440 = vtanh.f32 %v3326_v1 }
 0x963   :  { %5442 = vtanh.f32 %v3330_v50 }
 0x964   :  { %5444 = vtanh.f32 %v3324_v38 }
 0x965   :  { %5446 = vtanh.f32 %v3335_v58 }
 0x96c   :  { %v5441_v13 = vpop.eup %5440 }
 0x96d   :  { %v5443_v34 = vpop.eup %5442  ;;  %v3328_v45 = vmul.f32 0.5, %v5441_v13 }
 0x96e   :  { %v3332_v63 = vmul.f32 0.5, %v5443_v34  ;;  %v5445_v17 = vpop.eup %5444 }
 0x96f   :  { %v3329_v55 = vadd.f32 0.5, %v3328_v45  ;;  %v5447_v47 = vpop.eup %5446 }
 0x970   :  { %v3333_v31 = vadd.f32 0.5, %v3332_v63  ;;  %v3337_v5 = vmul.f32 0.5, %v5447_v47 }
 0x971   :  { %v3340_v8 = vmul.f32 %v5445_v17, %v3329_v55 }
 0x972   :  { %v3339_v57 = vmul.f32 %v3333_v31, %v7195_v3  ;;  %v3338_v54 = vadd.f32 0.5, %v3337_v5 }
 0x974   :  { %v3341_v26 = vadd.f32 %v3340_v8, %v3339_v57 }
 0x976   :  { %5448 = vtanh.f32 %v3341_v26 }
 0x980   :  { %v5449_v15 = vpop.eup %5448 }
 0x981   :  { %v3343_v21 = vmul.f32 %v5449_v15, %v3338_v54 }
 0x982   :  { %5600 = dma.done.wait [#allocation9 + $0x1], 16384 }
 0x983   :  { %5601 = vsyncadd [#allocation9 + $0x1], 4294950912  ;;  %v3367_v42 = vpack.c.bf16 %v7210_v22, %v3343_v21  ;;  %v3375_v35 = vld [vmem:[#allocation5 + $0x8] sm:$0xff]  ;;  %v3377_v9 = vld [vmem:[#allocation5 + $0x18] sm:$0xff] }
 0x984   :  { %v3374_v61 = vld [vmem:[#allocation5] sm:$0xff]  ;;  %3460 = vmatprep.subr.bf16.mxu0 %v3375_v35  ;;  %3533 = vmatprep.subr.bf16.mxu1 %v3377_v9  ;;  %v3376_v7 = vld [vmem:[#allocation5 + $0x10] sm:$0xff]  ;;  %v3379_v3 = vld [vmem:[#allocation5 + $0x48] sm:$0xff] }
 0x985   :  { %3492 = vmatprep.mubr.bf16.mxu0 %v3367_v42  ;;  %3565 = vmatprep.mubr.bf16.mxu1 %v3367_v42  ;;  %v3381_v39 = vld [vmem:[#allocation5 + $0x58] sm:$0xff]  ;;  %v3378_v62 = vld [vmem:[#allocation5 + $0x40] sm:$0xff]  ;;  %v3380_v6 = vld [vmem:[#allocation5 + $0x50] sm:$0xff] }
 0x986   :  { %3461 = vmatpush1.bf16.msra.mxu0 %v3374_v61  ;;  %3534 = vmatpush1.bf16.msra.mxu1 %v3376_v7  ;;  %v3383_v24 = vld [vmem:[#allocation5 + $0x88] sm:$0xff]  ;;  %v3385_v33 = vld [vmem:[#allocation5 + $0x98] sm:$0xff]  ;;  %v3382_v22 = vld [vmem:[#allocation5 + $0x80] sm:$0xff] }
 0x987   :  { %3462 = vmatprep.subr.bf16.mxu0 %v3379_v3  ;;  %3535 = vmatprep.subr.bf16.mxu1 %v3381_v39  ;;  %v3384_v12 = vld [vmem:[#allocation5 + $0x90] sm:$0xff]  ;;  %v3387_v36 = vld [vmem:[#allocation5 + $0xc8] sm:$0xff]  ;;  %v3389_v20 = vld [vmem:[#allocation5 + $0xd8] sm:$0xff] }
 0x988   :  { %v3386_v18 = vld [vmem:[#allocation5 + $0xc0] sm:$0xff]  ;;  %v3388_v23 = vld [vmem:[#allocation5 + $0xd0] sm:$0xff]  ;;  %v3391_v0 = vld [vmem:[#allocation5 + $0x108] sm:$0xff] }
 0x989   :  { %v3393_v51 = vld [vmem:[#allocation5 + $0x118] sm:$0xff]  ;;  %v3390_v25 = vld [vmem:[#allocation5 + $0x100] sm:$0xff]  ;;  %v3392_v52 = vld [vmem:[#allocation5 + $0x110] sm:$0xff] }
 0x98a   :  { %3463 = vmatpush1.bf16.msra.mxu0 %v3378_v62  ;;  %3536 = vmatpush1.bf16.msra.mxu1 %v3380_v6  ;;  %v3395_v30 = vld [vmem:[#allocation5 + $0x148] sm:$0xff]  ;;  %v3397_v19 = vld [vmem:[#allocation5 + $0x158] sm:$0xff]  ;;  %v3394_v56 = vld [vmem:[#allocation5 + $0x140] sm:$0xff] }
 0x98b   :  { %3464 = vmatprep.subr.bf16.mxu0 %v3383_v24  ;;  %3537 = vmatprep.subr.bf16.mxu1 %v3385_v33  ;;  %v3396_v49 = vld [vmem:[#allocation5 + $0x150] sm:$0xff]  ;;  %v3399_v41 = vld [vmem:[#allocation5 + $0x188] sm:$0xff]  ;;  %v3401_v48 = vld [vmem:[#allocation5 + $0x198] sm:$0xff] }
 0x98c   :  { %v3398_v2 = vld [vmem:[#allocation5 + $0x180] sm:$0xff]  ;;  %v3400_v44 = vld [vmem:[#allocation5 + $0x190] sm:$0xff]  ;;  %v3403_v29 = vld [vmem:[#allocation5 + $0x1c8] sm:$0xff] }
 0x98d   :  { %v3405_v37 = vld [vmem:[#allocation5 + $0x1d8] sm:$0xff]  ;;  %v3402_v27 = vld [vmem:[#allocation5 + $0x1c0] sm:$0xff]  ;;  %v3404_v28 = vld [vmem:[#allocation5 + $0x1d0] sm:$0xff] }
 0x98e   :  { %3465 = vmatpush1.bf16.msra.mxu0 %v3382_v22  ;;  %3538 = vmatpush1.bf16.msra.mxu1 %v3384_v12  ;;  %v3407_v53 = vld [vmem:[#allocation5 + $0x208] sm:$0xff]  ;;  %v3409_v40 = vld [vmem:[#allocation5 + $0x218] sm:$0xff]  ;;  %v3406_v10 = vld [vmem:[#allocation5 + $0x200] sm:$0xff] }
 0x98f   :  { %3466 = vmatprep.subr.bf16.mxu0 %v3387_v36  ;;  %3539 = vmatprep.subr.bf16.mxu1 %v3389_v20  ;;  %v3408_v1 = vld [vmem:[#allocation5 + $0x210] sm:$0xff]  ;;  %v3411_v14 = vld [vmem:[#allocation5 + $0x248] sm:$0xff]  ;;  %v3413_v59 = vld [vmem:[#allocation5 + $0x258] sm:$0xff] }
 0x990   :  { %v3410_v50 = vld [vmem:[#allocation5 + $0x240] sm:$0xff]  ;;  %v3412_v60 = vld [vmem:[#allocation5 + $0x250] sm:$0xff]  ;;  %v3415_v38 = vld [vmem:[#allocation5 + $0x288] sm:$0xff] }
 0x991   :  { %v3417_v11 = vld [vmem:[#allocation5 + $0x298] sm:$0xff]  ;;  %v3414_v43 = vld [vmem:[#allocation5 + $0x280] sm:$0xff]  ;;  %v3416_v58 = vld [vmem:[#allocation5 + $0x290] sm:$0xff] }
 0x992   :  { %3467 = vmatpush1.bf16.msra.mxu0 %v3386_v18  ;;  %3540 = vmatpush1.bf16.msra.mxu1 %v3388_v23  ;;  %v3419_v13 = vld [vmem:[#allocation5 + $0x2c8] sm:$0xff]  ;;  %v3421_v34 = vld [vmem:[#allocation5 + $0x2d8] sm:$0xff]  ;;  %v3418_v45 = vld [vmem:[#allocation5 + $0x2c0] sm:$0xff] }
 0x993   :  { %3468 = vmatprep.subr.bf16.mxu0 %v3391_v0  ;;  %3541 = vmatprep.subr.bf16.mxu1 %v3393_v51  ;;  %v3420_v63 = vld [vmem:[#allocation5 + $0x2d0] sm:$0xff]  ;;  %v3423_v55 = vld [vmem:[#allocation5 + $0x308] sm:$0xff]  ;;  %v3425_v17 = vld [vmem:[#allocation5 + $0x318] sm:$0xff] }
 0x994   :  { %v3422_v31 = vld [vmem:[#allocation5 + $0x300] sm:$0xff]  ;;  %v3424_v8 = vld [vmem:[#allocation5 + $0x310] sm:$0xff]  ;;  %v3427_v57 = vld [vmem:[#allocation5 + $0x348] sm:$0xff] }
 0x995   :  { %v3429_v26 = vld [vmem:[#allocation5 + $0x358] sm:$0xff]  ;;  %v3426_v47 = vld [vmem:[#allocation5 + $0x340] sm:$0xff]  ;;  %v3428_v5 = vld [vmem:[#allocation5 + $0x350] sm:$0xff] }
 0x996   :  { %3469 = vmatpush1.bf16.msra.mxu0 %v3390_v25  ;;  %3542 = vmatpush1.bf16.msra.mxu1 %v3392_v52  ;;  %v3431_v54 = vld [vmem:[#allocation5 + $0x388] sm:$0xff]  ;;  %v3433_v15 = vld [vmem:[#allocation5 + $0x398] sm:$0xff]  ;;  %v3430_v21 = vld [vmem:[#allocation5 + $0x380] sm:$0xff] }
 0x997   :  { %3470 = vmatprep.subr.bf16.mxu0 %v3395_v30  ;;  %3543 = vmatprep.subr.bf16.mxu1 %v3397_v19  ;;  %v3432_v42 = vld [vmem:[#allocation5 + $0x390] sm:$0xff]  ;;  %v3435_v35 = vld [vmem:[#allocation5 + $0x3c8] sm:$0xff]  ;;  %v3437_v9 = vld [vmem:[#allocation5 + $0x3d8] sm:$0xff] }
 0x998   :  { %v3434_v61 = vld [vmem:[#allocation5 + $0x3c0] sm:$0xff]  ;;  %v3436_v7 = vld [vmem:[#allocation5 + $0x3d0] sm:$0xff]  ;;  %v3643_v3 = vld [vmem:[#allocation5 + $0x28] sm:$0xff] }
 0x999   :  { %v3645_v39 = vld [vmem:[#allocation5 + $0x38] sm:$0xff]  ;;  %v8245_v62 = vld [vmem:[#allocation133_spill] sm:$0xff]  ;;  %v8246_v6 = vld [vmem:[#allocation123_spill] sm:$0xff] }
 0x99a   :  { %3471 = vmatpush1.bf16.msra.mxu0 %v3394_v56  ;;  %3544 = vmatpush1.bf16.msra.mxu1 %v3396_v49  ;;  %v3366_v24 = vpack.c.bf16 %v8246_v6, %v8245_v62  ;;  %v3642_v33 = vld [vmem:[#allocation5 + $0x20] sm:$0xff]  ;;  %v3644_v22 = vld [vmem:[#allocation5 + $0x30] sm:$0xff]  ;;  %v3647_v12 = vld [vmem:[#allocation5 + $0x68] sm:$0xff] }
 0x99b   :  { %3472 = vmatprep.subr.bf16.mxu0 %v3399_v41  ;;  %3545 = vmatprep.subr.bf16.mxu1 %v3401_v48  ;;  %v3649_v36 = vld [vmem:[#allocation5 + $0x78] sm:$0xff]  ;;  %v3646_v23 = vld [vmem:[#allocation5 + $0x60] sm:$0xff]  ;;  %v3648_v0 = vld [vmem:[#allocation5 + $0x70] sm:$0xff] }
 0x99c   :  { %v8247_v20 = vld [vmem:[#allocation106_spill] sm:$0xff]  ;;  %v3651_v51 = vld [vmem:[#allocation5 + $0xa8] sm:$0xff]  ;;  %v8248_v52 = vld [vmem:[#allocation115_spill] sm:$0xff] }
 0x99d   :  { %v3369_v18 = vpack.c.bf16 %v8247_v20, %v7118_v46  ;;  %v3653_v25 = vld [vmem:[#allocation5 + $0xb8] sm:$0xff]  ;;  %v8249_v30 = vld [vmem:[#allocation103_spill] sm:$0xff]  ;;  %v3652_v56 = vld [vmem:[#allocation5 + $0xb0] sm:$0xff] }
 0x99e   :  { %3473 = vmatpush1.bf16.msra.mxu0 %v3398_v2  ;;  %3546 = vmatpush1.bf16.msra.mxu1 %v3400_v44  ;;  %v3368_v19 = vpack.c.bf16 %v8249_v30, %v8248_v52  ;;  %v3650_v46 = vld [vmem:[#allocation5 + $0xa0] sm:$0xff]  ;;  %v3655_v49 = vld [vmem:[#allocation5 + $0xe8] sm:$0xff]  ;;  %v3657_v41 = vld [vmem:[#allocation5 + $0xf8] sm:$0xff] }
 0x99f   :  { %3474 = vmatprep.subr.bf16.mxu0 %v3403_v29  ;;  %3547 = vmatprep.subr.bf16.mxu1 %v3405_v37  ;;  %v8250_v48 = vld [vmem:[#allocation105_spill] sm:$0xff]  ;;  %v8251_v2 = vld [vmem:[#allocation54_spill] sm:$0xff]  ;;  %v3654_v29 = vld [vmem:[#allocation5 + $0xe0] sm:$0xff] }
 0x9a0   :  { %v3371_v44 = vpack.c.bf16 %v8251_v2, %v8250_v48  ;;  %v3656_v37 = vld [vmem:[#allocation5 + $0xf0] sm:$0xff]  ;;  %v3689_v62 = vld [vmem:[#allocation5 + $0x2f8] sm:$0xff]  ;;  %v3686_v6 = vld [vmem:[#allocation5 + $0x2e0] sm:$0xff]  ;;  %v3640_v2 = vpack.c.bf16 %v7223_v4, %v7223_v4 }
 0x9a1   :  { %v3695_v20 = vld [vmem:[#allocation5 + $0x368] sm:$0xff]  ;;  %v3698_v52 = vld [vmem:[#allocation5 + $0x3a0] sm:$0xff]  ;;  %v3700_v30 = vld [vmem:[#allocation5 + $0x3b0] sm:$0xff] }
 0x9a2   :  { %3475 = vmatpush1.bf16.msra.mxu0 %v3402_v27  ;;  %3548 = vmatpush1.bf16.msra.mxu1 %v3404_v28  ;;  %v3659_v27 = vld [vmem:[#allocation5 + $0x128] sm:$0xff]  ;;  %v3661_v28 = vld [vmem:[#allocation5 + $0x138] sm:$0xff] }
 0x9a3   :  { %3476 = vmatprep.subr.bf16.mxu0 %v3407_v53  ;;  %3549 = vmatprep.subr.bf16.mxu1 %v3409_v40  ;;  %v8252_v53 = vld [vmem:[#allocation104_spill] sm:$0xff]  ;;  %v8253_v40 = vld [vmem:[#allocation55_spill] sm:$0xff]  ;;  %v3819_v48 = vld [vmem:[#allocation6 + $0x318] sm:$0xff] }
 0x9a6   :  { %3477 = vmatpush1.bf16.msra.mxu0 %v3406_v10  ;;  %3550 = vmatpush1.bf16.msra.mxu1 %v3408_v1  ;;  %v3370_v10 = vpack.c.bf16 %v8253_v40, %v8252_v53  ;;  %v3658_v1 = vld [vmem:[#allocation5 + $0x120] sm:$0xff]  ;;  %v3822_v53 = vld [vmem:[#allocation6 + $0x330] sm:$0xff]  ;;  %v3825_v40 = vld [vmem:[#allocation6 + $0x348] sm:$0xff] }
 0x9a7   :  { %3478 = vmatprep.subr.bf16.mxu0 %v3411_v14  ;;  %3551 = vmatprep.subr.bf16.mxu1 %v3413_v59  ;;  %v3660_v14 = vld [vmem:[#allocation5 + $0x130] sm:$0xff]  ;;  %v3663_v59 = vld [vmem:[#allocation5 + $0x168] sm:$0xff] }
 0x9aa   :  { %3479 = vmatpush1.bf16.msra.mxu0 %v3410_v50  ;;  %3552 = vmatpush1.bf16.msra.mxu1 %v3412_v60  ;;  %v3665_v50 = vld [vmem:[#allocation5 + $0x178] sm:$0xff]  ;;  %v8254_v60 = vld [vmem:[#allocation125_spill] sm:$0xff] }
 0x9ab   :  { %3480 = vmatprep.subr.bf16.mxu0 %v3415_v38  ;;  %3553 = vmatprep.subr.bf16.mxu1 %v3417_v11  ;;  %v8255_v38 = vld [vmem:[#allocation122_spill] sm:$0xff] }
 0x9ac   :  { %v3373_v11 = vpack.c.bf16 %v8255_v38, %v8254_v60  ;;  %v3830_v60 = vld [vmem:[#allocation6 + $0x370] sm:$0xff]  ;;  %v3833_v38 = vld [vmem:[#allocation6 + $0x388] sm:$0xff] }
 0x9ae   :  { %3481 = vmatpush1.bf16.msra.mxu0 %v3414_v43  ;;  %3554 = vmatpush1.bf16.msra.mxu1 %v3416_v58  ;;  %v3662_v43 = vld [vmem:[#allocation5 + $0x160] sm:$0xff]  ;;  %v3664_v58 = vld [vmem:[#allocation5 + $0x170] sm:$0xff] }
 0x9af   :  { %3482 = vmatprep.subr.bf16.mxu0 %v3419_v13  ;;  %3555 = vmatprep.subr.bf16.mxu1 %v3421_v34  ;;  %v3667_v13 = vld [vmem:[#allocation5 + $0x1a8] sm:$0xff]  ;;  %v3669_v34 = vld [vmem:[#allocation5 + $0x1b8] sm:$0xff] }
 0x9b2   :  { %3483 = vmatpush1.bf16.msra.mxu0 %v3418_v45  ;;  %3556 = vmatpush1.bf16.msra.mxu1 %v3420_v63  ;;  %v3372_v45 = vpack.c.bf16 %v7223_v4, %v7170_v32  ;;  %v3666_v63 = vld [vmem:[#allocation5 + $0x1a0] sm:$0xff] }
 0x9b3   :  { %3484 = vmatprep.subr.bf16.mxu0 %v3423_v55  ;;  %3557 = vmatprep.subr.bf16.mxu1 %v3425_v17  ;;  %v3668_v55 = vld [vmem:[#allocation5 + $0x1b0] sm:$0xff]  ;;  %v3671_v17 = vld [vmem:[#allocation5 + $0x1e8] sm:$0xff]  ;;  %v3674_v32 = vld [vmem:[#allocation5 + $0x220] sm:$0xff] }
 0x9b4   :  { %v3824_v4 = vld [vmem:[#allocation6 + $0x340] sm:$0xff] }
 0x9b6   :  { %3485 = vmatpush1.bf16.msra.mxu0 %v3422_v31  ;;  %3558 = vmatpush1.bf16.msra.mxu1 %v3424_v8  ;;  %v3673_v31 = vld [vmem:[#allocation5 + $0x1f8] sm:$0xff]  ;;  %v3670_v8 = vld [vmem:[#allocation5 + $0x1e0] sm:$0xff] }
 0x9b7   :  { %3486 = vmatprep.subr.bf16.mxu0 %v3427_v57  ;;  %3559 = vmatprep.subr.bf16.mxu1 %v3429_v26  ;;  %v3672_v57 = vld [vmem:[#allocation5 + $0x1f0] sm:$0xff]  ;;  %v3675_v26 = vld [vmem:[#allocation5 + $0x228] sm:$0xff] }
 0x9ba   :  { %3487 = vmatpush1.bf16.msra.mxu0 %v3426_v47  ;;  %3560 = vmatpush1.bf16.msra.mxu1 %v3428_v5  ;;  %v3677_v47 = vld [vmem:[#allocation5 + $0x238] sm:$0xff]  ;;  %v8256_v5 = vld [vmem:[#allocation124_spill] sm:$0xff] }
 0x9bb   :  { %3488 = vmatprep.subr.bf16.mxu0 %v3431_v54  ;;  %3561 = vmatprep.subr.bf16.mxu1 %v3433_v15  ;;  %v3676_v54 = vld [vmem:[#allocation5 + $0x230] sm:$0xff]  ;;  %v3679_v15 = vld [vmem:[#allocation5 + $0x268] sm:$0xff] }
 0x9be   :  { %3489 = vmatpush1.bf16.msra.mxu0 %v3430_v21  ;;  %3562 = vmatpush1.bf16.msra.mxu1 %v3432_v42  ;;  %v3681_v21 = vld [vmem:[#allocation5 + $0x278] sm:$0xff]  ;;  %v3678_v42 = vld [vmem:[#allocation5 + $0x260] sm:$0xff] }
 0x9bf   :  { %3490 = vmatprep.subr.bf16.mxu0 %v3435_v35  ;;  %3563 = vmatprep.subr.bf16.mxu1 %v3437_v9  ;;  %v3680_v35 = vld [vmem:[#allocation5 + $0x270] sm:$0xff]  ;;  %v3683_v9 = vld [vmem:[#allocation5 + $0x2a8] sm:$0xff] }
 0x9c2   :  { %3491 = vmatpush1.bf16.msra.mxu0 %v3434_v61  ;;  %3564 = vmatpush1.bf16.msra.mxu1 %v3436_v7  ;;  %v3685_v61 = vld [vmem:[#allocation5 + $0x2b8] sm:$0xff]  ;;  %v3682_v7 = vld [vmem:[#allocation5 + $0x2a0] sm:$0xff] }
 0x9c3   :  { %3728 = vmatprep.subr.bf16.mxu0 %v3643_v3  ;;  %3769 = vmatprep.subr.bf16.mxu1 %v3645_v39  ;;  %v3684_v3 = vld [vmem:[#allocation5 + $0x2b0] sm:$0xff]  ;;  %v3687_v39 = vld [vmem:[#allocation5 + $0x2e8] sm:$0xff] }
 0x9c5   :  { %3493 = vmatmul.mubr.bf16.vlgmr.msra.gmra.mrb[96].mxu0 %v3366_v24  ;;  %3566 = vmatmul.mubr.bf16.vlgmr.msra.gmra.mrb[96].mxu1 %v3366_v24  ;;  %v3688_v24 = vld [vmem:[#allocation5 + $0x2f0] sm:$0xff] }
 0x9c6   :  { %3729 = vmatpush1.bf16.msra.mxu0 %v3642_v33  ;;  %3770 = vmatpush1.bf16.msra.mxu1 %v3644_v22  ;;  %v3691_v33 = vld [vmem:[#allocation5 + $0x328] sm:$0xff]  ;;  %v3693_v22 = vld [vmem:[#allocation5 + $0x338] sm:$0xff] }
 0x9c7   :  { %3730 = vmatprep.subr.bf16.mxu0 %v3647_v12  ;;  %3771 = vmatprep.subr.bf16.mxu1 %v3649_v36  ;;  %v3690_v12 = vld [vmem:[#allocation5 + $0x320] sm:$0xff]  ;;  %v3692_v36 = vld [vmem:[#allocation5 + $0x330] sm:$0xff] }
 0x9c8   :  { %3502 = vmatprep.mubr.bf16.mxu0 %v3369_v18  ;;  %3575 = vmatprep.mubr.bf16.mxu1 %v3369_v18  ;;  %v3697_v18 = vld [vmem:[#allocation5 + $0x378] sm:$0xff] }
 0x9ca   :  { %3731 = vmatpush1.bf16.msra.mxu0 %v3646_v23  ;;  %3772 = vmatpush1.bf16.msra.mxu1 %v3648_v0  ;;  %v3694_v23 = vld [vmem:[#allocation5 + $0x360] sm:$0xff]  ;;  %v3696_v0 = vld [vmem:[#allocation5 + $0x370] sm:$0xff] }
 0x9cb   :  { %3732 = vmatprep.subr.bf16.mxu0 %v3651_v51  ;;  %3773 = vmatprep.subr.bf16.mxu1 %v3653_v25  ;;  %v3699_v51 = vld [vmem:[#allocation5 + $0x3a8] sm:$0xff]  ;;  %v3701_v25 = vld [vmem:[#allocation5 + $0x3b8] sm:$0xff] }
 0x9cd   :  { %3503 = vmatmul.mubr.bf16.gmra.mrb[100].mxu0 %v3368_v19  ;;  %3576 = vmatmul.mubr.bf16.gmra.mrb[100].mxu1 %v3368_v19  ;;  %v3703_v19 = vld [vmem:[#allocation5 + $0x3e8] sm:$0xff] }
 0x9ce   :  { %3733 = vmatpush1.bf16.msra.mxu0 %v3650_v46  ;;  %3774 = vmatpush1.bf16.msra.mxu1 %v3652_v56  ;;  %v3705_v46 = vld [vmem:[#allocation5 + $0x3f8] sm:$0xff]  ;;  %v3702_v56 = vld [vmem:[#allocation5 + $0x3e0] sm:$0xff] }
 0x9cf   :  { %3734 = vmatprep.subr.bf16.mxu0 %v3655_v49  ;;  %3775 = vmatprep.subr.bf16.mxu1 %v3657_v41  ;;  %v3704_v49 = vld [vmem:[#allocation5 + $0x3f0] sm:$0xff]  ;;  %v3817_v41 = vld [vmem:[#allocation6 + $0x308] sm:$0xff] }
 0x9d0   :  { %3512 = vmatprep.mubr.bf16.mxu0 %v3371_v44  ;;  %3585 = vmatprep.mubr.bf16.mxu1 %v3371_v44  ;;  %v3816_v44 = vld [vmem:[#allocation6 + $0x300] sm:$0xff] }
 0x9d2   :  { %3735 = vmatpush1.bf16.msra.mxu0 %v3654_v29  ;;  %3776 = vmatpush1.bf16.msra.mxu1 %v3656_v37  ;;  %v3818_v29 = vld [vmem:[#allocation6 + $0x310] sm:$0xff]  ;;  %v3821_v37 = vld [vmem:[#allocation6 + $0x328] sm:$0xff] }
 0x9d3   :  { %3736 = vmatprep.subr.bf16.mxu0 %v3659_v27  ;;  %3777 = vmatprep.subr.bf16.mxu1 %v3661_v28  ;;  %v3823_v27 = vld [vmem:[#allocation6 + $0x338] sm:$0xff]  ;;  %v3820_v28 = vld [vmem:[#allocation6 + $0x320] sm:$0xff] }
 0x9d5   :  { %3513 = vmatmul.mubr.bf16.gmra.mrb[104].mxu0 %v3370_v10  ;;  %3586 = vmatmul.mubr.bf16.gmra.mrb[104].mxu1 %v3370_v10  ;;  %v3827_v10 = vld [vmem:[#allocation6 + $0x358] sm:$0xff] }
 0x9d6   :  { %3737 = vmatpush1.bf16.msra.mxu0 %v3658_v1  ;;  %3778 = vmatpush1.bf16.msra.mxu1 %v3660_v14  ;;  %v3826_v1 = vld [vmem:[#allocation6 + $0x350] sm:$0xff]  ;;  %v3829_v14 = vld [vmem:[#allocation6 + $0x368] sm:$0xff] }
 0x9d7   :  { %3738 = vmatprep.subr.bf16.mxu0 %v3663_v59  ;;  %3779 = vmatprep.subr.bf16.mxu1 %v3665_v50  ;;  %v3831_v59 = vld [vmem:[#allocation6 + $0x378] sm:$0xff]  ;;  %v3828_v50 = vld [vmem:[#allocation6 + $0x360] sm:$0xff] }
 0x9d8   :  { %3522 = vmatprep.mubr.bf16.mxu0 %v3373_v11  ;;  %3595 = vmatprep.mubr.bf16.mxu1 %v3373_v11  ;;  %v3835_v11 = vld [vmem:[#allocation6 + $0x398] sm:$0xff] }
 0x9da   :  { %3739 = vmatpush1.bf16.msra.mxu0 %v3662_v43  ;;  %3780 = vmatpush1.bf16.msra.mxu1 %v3664_v58  ;;  %v3832_v43 = vld [vmem:[#allocation6 + $0x380] sm:$0xff]  ;;  %v3834_v58 = vld [vmem:[#allocation6 + $0x390] sm:$0xff] }
 0x9db   :  { %3740 = vmatprep.subr.bf16.mxu0 %v3667_v13  ;;  %3781 = vmatprep.subr.bf16.mxu1 %v3669_v34  ;;  %v3837_v13 = vld [vmem:[#allocation6 + $0x3a8] sm:$0xff]  ;;  %v3839_v34 = vld [vmem:[#allocation6 + $0x3b8] sm:$0xff] }
 0x9dd   :  { %3523 = vmatmul.mubr.bf16.gmra.mrb[108].mxu0 %v3372_v45  ;;  %3596 = vmatmul.mubr.bf16.gmra.mrb[108].mxu1 %v3372_v45  ;;  %v3836_v45 = vld [vmem:[#allocation6 + $0x3a0] sm:$0xff] }
 0x9de   :  { %3741 = vmatpush1.bf16.msra.mxu0 %v3666_v63  ;;  %3782 = vmatpush1.bf16.msra.mxu1 %v3668_v55  ;;  %v3838_v63 = vld [vmem:[#allocation6 + $0x3b0] sm:$0xff]  ;;  %v3841_v55 = vld [vmem:[#allocation6 + $0x3c8] sm:$0xff] }
 0x9df   :  { %3742 = vmatprep.subr.bf16.mxu0 %v3671_v17  ;;  %3783 = vmatprep.subr.bf16.mxu1 %v3673_v31  ;;  %v3843_v17 = vld [vmem:[#allocation6 + $0x3d8] sm:$0xff]  ;;  %v3840_v31 = vld [vmem:[#allocation6 + $0x3c0] sm:$0xff] }
 0x9e0   :  { %3760 = vmatprep.mubr.bf16.mxu0 %v8256_v5  ;;  %3801 = vmatprep.mubr.bf16.mxu1 %v8256_v5  ;;  %v3844_v5 = vld [vmem:[#allocation6 + $0x3e0] sm:$0xff] }
 0x9e2   :  { %3743 = vmatpush1.bf16.msra.mxu0 %v3670_v8  ;;  %3784 = vmatpush1.bf16.msra.mxu1 %v3672_v57  ;;  %v3842_v8 = vld [vmem:[#allocation6 + $0x3d0] sm:$0xff]  ;;  %v3845_v57 = vld [vmem:[#allocation6 + $0x3e8] sm:$0xff] }
 0x9e3   :  { %3744 = vmatprep.subr.bf16.mxu0 %v3675_v26  ;;  %3785 = vmatprep.subr.bf16.mxu1 %v3677_v47  ;;  %v3847_v26 = vld [vmem:[#allocation6 + $0x3f8] sm:$0xff] }
 0x9e4   :  { %v5158_v47 = vld [vmem:[%s7867_s4 + $0x18] sm:$0xff] }
 0x9e6   :  { %3745 = vmatpush1.bf16.msra.mxu0 %v3674_v32  ;;  %3786 = vmatpush1.bf16.msra.mxu1 %v3676_v54  ;;  %v3846_v32 = vld [vmem:[#allocation6 + $0x3f0] sm:$0xff]  ;;  %v7252_v54 = vld [vmem:[#allocation6 + $0x208] sm:$0xff] }
 0x9e7   :  { %3746 = vmatprep.subr.bf16.mxu0 %v3679_v15  ;;  %3787 = vmatprep.subr.bf16.mxu1 %v3681_v21  ;;  %v7254_v15 = vld [vmem:[#allocation6 + $0x218] sm:$0xff]  ;;  %v3814_v21 = vpack.c.bf16 %v5158_v47, %v5158_v47 }
 0x9ea   :  { %3747 = vmatpush1.bf16.msra.mxu0 %v3678_v42  ;;  %3788 = vmatpush1.bf16.msra.mxu1 %v3680_v35  ;;  %v7258_v42 = vld [vmem:[#allocation6 + $0x200] sm:$0xff]  ;;  %v7260_v35 = vld [vmem:[#allocation6 + $0x210] sm:$0xff] }
 0x9eb   :  { %3748 = vmatprep.subr.bf16.mxu0 %v3683_v9  ;;  %3789 = vmatprep.subr.bf16.mxu1 %v3685_v61  ;;  %v7262_v9 = vld [vmem:[#allocation6 + $0x228] sm:$0xff]  ;;  %v7264_v61 = vld [vmem:[#allocation6 + $0x238] sm:$0xff] }
 0x9ee   :  { %3749 = vmatpush1.bf16.msra.mxu0 %v3682_v7  ;;  %3790 = vmatpush1.bf16.msra.mxu1 %v3684_v3  ;;  %v7270_v7 = vld [vmem:[#allocation6 + $0x220] sm:$0xff]  ;;  %v7272_v3 = vld [vmem:[#allocation6 + $0x230] sm:$0xff] }
 0x9ef   :  { %3750 = vmatprep.subr.bf16.mxu0 %v3687_v39  ;;  %3791 = vmatprep.subr.bf16.mxu1 %v3689_v62  ;;  %v7274_v39 = vld [vmem:[#allocation6 + $0x248] sm:$0xff]  ;;  %v7276_v62 = vld [vmem:[#allocation6 + $0x258] sm:$0xff] }
 0x9f2   :  { %3751 = vmatpush1.bf16.msra.mxu0 %v3686_v6  ;;  %3792 = vmatpush1.bf16.msra.mxu1 %v3688_v24  ;;  %v7284_v6 = vld [vmem:[#allocation6 + $0x240] sm:$0xff]  ;;  %v7286_v24 = vld [vmem:[#allocation6 + $0x250] sm:$0xff] }
 0x9f3   :  { %3752 = vmatprep.subr.bf16.mxu0 %v3691_v33  ;;  %3793 = vmatprep.subr.bf16.mxu1 %v3693_v22  ;;  %v7288_v33 = vld [vmem:[#allocation6 + $0x268] sm:$0xff]  ;;  %v7290_v22 = vld [vmem:[#allocation6 + $0x278] sm:$0xff] }
 0x9f6   :  { %3753 = vmatpush1.bf16.msra.mxu0 %v3690_v12  ;;  %3794 = vmatpush1.bf16.msra.mxu1 %v3692_v36  ;;  %v7296_v12 = vld [vmem:[#allocation6 + $0x260] sm:$0xff]  ;;  %v7298_v36 = vld [vmem:[#allocation6 + $0x270] sm:$0xff] }
 0x9f7   :  { %3754 = vmatprep.subr.bf16.mxu0 %v3695_v20  ;;  %3795 = vmatprep.subr.bf16.mxu1 %v3697_v18  ;;  %v7300_v20 = vld [vmem:[#allocation6 + $0x288] sm:$0xff]  ;;  %v7302_v18 = vld [vmem:[#allocation6 + $0x298] sm:$0xff] }
 0x9fa   :  { %3755 = vmatpush1.bf16.msra.mxu0 %v3694_v23  ;;  %3796 = vmatpush1.bf16.msra.mxu1 %v3696_v0  ;;  %v7308_v23 = vld [vmem:[#allocation6 + $0x280] sm:$0xff]  ;;  %v7310_v0 = vld [vmem:[#allocation6 + $0x290] sm:$0xff] }
 0x9fb   :  { %3756 = vmatprep.subr.bf16.mxu0 %v3699_v51  ;;  %3797 = vmatprep.subr.bf16.mxu1 %v3701_v25  ;;  %v7312_v51 = vld [vmem:[#allocation6 + $0x2a8] sm:$0xff]  ;;  %v7314_v25 = vld [vmem:[#allocation6 + $0x2b8] sm:$0xff] }
 0x9fe   :  { %3757 = vmatpush1.bf16.msra.mxu0 %v3698_v52  ;;  %3798 = vmatpush1.bf16.msra.mxu1 %v3700_v30  ;;  %v7320_v52 = vld [vmem:[#allocation6 + $0x2a0] sm:$0xff]  ;;  %v7322_v30 = vld [vmem:[#allocation6 + $0x2b0] sm:$0xff] }
 0x9ff   :  { %3758 = vmatprep.subr.bf16.mxu0 %v3703_v19  ;;  %3799 = vmatprep.subr.bf16.mxu1 %v3705_v46  ;;  %v7324_v19 = vld [vmem:[#allocation6 + $0x2c8] sm:$0xff]  ;;  %v7326_v46 = vld [vmem:[#allocation6 + $0x2d8] sm:$0xff] }
 0xa02   :  { %3759 = vmatpush1.bf16.msra.mxu0 %v3702_v56  ;;  %3800 = vmatpush1.bf16.msra.mxu1 %v3704_v49  ;;  %v7332_v56 = vld [vmem:[#allocation6 + $0x2c0] sm:$0xff]  ;;  %v7334_v49 = vld [vmem:[#allocation6 + $0x2d0] sm:$0xff] }
 0xa03   :  { %3848 = vmatprep.subr.bf16.mxu0 %v3817_v41  ;;  %3889 = vmatprep.subr.bf16.mxu1 %v3819_v48  ;;  %v7336_v41 = vld [vmem:[#allocation6 + $0x2e8] sm:$0xff]  ;;  %v7338_v48 = vld [vmem:[#allocation6 + $0x2f8] sm:$0xff] }
 0xa05   :  { %3761 = vmatmul.mubr.bf16.vlgmr.msra.gmra.mrb[112].mxu0 %v3640_v2  ;;  %3802 = vmatmul.mubr.bf16.vlgmr.msra.gmra.mrb[112].mxu1 %v3640_v2  ;;  %v5160_v2 = vld [vmem:[%s7867_s4 + $0x10] sm:$0xff] }
 0xa06   :  { %3849 = vmatpush1.bf16.msra.mxu0 %v3816_v44  ;;  %3890 = vmatpush1.bf16.msra.mxu1 %v3818_v29  ;;  %v7347_v44 = vld [vmem:[#allocation6 + $0x2e0] sm:$0xff]  ;;  %v7349_v29 = vld [vmem:[#allocation6 + $0x2f0] sm:$0xff] }
 0xa07   :  { %3850 = vmatprep.subr.bf16.mxu0 %v3821_v37  ;;  %3891 = vmatprep.subr.bf16.mxu1 %v3823_v27  ;;  %v3960_v37 = vpack.c.bf16 %v5160_v2, %v5160_v2  ;;  %v3438_v27 = vld [vmem:[%s7866_s3] sm:$0xf] }
 0xa08   :  { %3880 = vmatprep.mubr.bf16.mxu0 %v8060_v16  ;;  %3921 = vmatprep.mubr.bf16.mxu1 %v8060_v16 }
 0xa0a   :  { %3851 = vmatpush1.bf16.msra.mxu0 %v3820_v28  ;;  %3892 = vmatpush1.bf16.msra.mxu1 %v3822_v53  ;;  %v8257_v28 = vld [vmem:[#allocation47_spill] sm:$0xff] }
 0xa0b   :  { %3852 = vmatprep.subr.bf16.mxu0 %v3825_v40  ;;  %3893 = vmatprep.subr.bf16.mxu1 %v3827_v10  ;;  %v7393_v53 = vrot.slane %v3438_v27, %v8257_v28  ;;  %v8258_v40 = vld [vmem:[#allocation48_spill] sm:$0xff] }
 0xa0c   :  { %v7396_v10 = vrot.slane %v3438_v27, %v8258_v40 }
 0xa0e   :  { %3853 = vmatpush1.bf16.msra.mxu0 %v3824_v4  ;;  %3894 = vmatpush1.bf16.msra.mxu1 %v3826_v1 }
 0xa0f   :  { %3854 = vmatprep.subr.bf16.mxu0 %v3829_v14  ;;  %3895 = vmatprep.subr.bf16.mxu1 %v3831_v59  ;;  %v8259_v14 = vld [vmem:[#allocation50_spill] sm:$0xff] }
 0xa10   :  { %v7403_v59 = vrot.slane %v3438_v27, %v8259_v14 }
 0xa12   :  { %3855 = vmatpush1.bf16.msra.mxu0 %v3828_v50  ;;  %3896 = vmatpush1.bf16.msra.mxu1 %v3830_v60 }
 0xa13   :  { %3856 = vmatprep.subr.bf16.mxu0 %v3833_v38  ;;  %3897 = vmatprep.subr.bf16.mxu1 %v3835_v11  ;;  %v8260_v38 = vld [vmem:[#allocation49_spill] sm:$0xff] }
 0xa14   :  { %v7410_v11 = vrot.slane %v3438_v27, %v8260_v38 }
 0xa16   :  { %3857 = vmatpush1.bf16.msra.mxu0 %v3832_v43  ;;  %3898 = vmatpush1.bf16.msra.mxu1 %v3834_v58 }
 0xa17   :  { %3858 = vmatprep.subr.bf16.mxu0 %v3837_v13  ;;  %3899 = vmatprep.subr.bf16.mxu1 %v3839_v34 }
 0xa1a   :  { %3859 = vmatpush1.bf16.msra.mxu0 %v3836_v45  ;;  %3900 = vmatpush1.bf16.msra.mxu1 %v3838_v63 }
 0xa1b   :  { %3860 = vmatprep.subr.bf16.mxu0 %v3841_v55  ;;  %3901 = vmatprep.subr.bf16.mxu1 %v3843_v17 }
 0xa1e   :  { %3861 = vmatpush1.bf16.msra.mxu0 %v3840_v31  ;;  %3902 = vmatpush1.bf16.msra.mxu1 %v3842_v8 }
 0xa1f   :  { %3862 = vmatprep.subr.bf16.mxu0 %v3845_v57  ;;  %3903 = vmatprep.subr.bf16.mxu1 %v3847_v26 }
 0xa22   :  { %3863 = vmatpush1.bf16.msra.mxu0 %v3844_v5  ;;  %3904 = vmatpush1.bf16.msra.mxu1 %v3846_v32 }
 0xa23   :  { %3994 = vmatprep.subr.bf16.mxu0 %v7252_v54  ;;  %4035 = vmatprep.subr.bf16.mxu1 %v7254_v15 }
 0xa25   :  { %3881 = vmatmul.mubr.bf16.vlgmr.msra.gmra.mrb[112].mxu0 %v3814_v21  ;;  %3922 = vmatmul.mubr.bf16.vlgmr.msra.gmra.mrb[112].mxu1 %v3814_v21 }
 0xa26   :  { %3995 = vmatpush1.bf16.msra.mxu0 %v7258_v42  ;;  %4036 = vmatpush1.bf16.msra.mxu1 %v7260_v35 }
 0xa27   :  { %3996 = vmatprep.subr.bf16.mxu0 %v7262_v9  ;;  %4037 = vmatprep.subr.bf16.mxu1 %v7264_v61 }
 0xa28   :  { %4026 = vmatprep.mubr.bf16.mxu0 %v8060_v16  ;;  %4067 = vmatprep.mubr.bf16.mxu1 %v8060_v16 }
 0xa2a   :  { %3997 = vmatpush1.bf16.msra.mxu0 %v7270_v7  ;;  %4038 = vmatpush1.bf16.msra.mxu1 %v7272_v3 }
 0xa2b   :  { %3998 = vmatprep.subr.bf16.mxu0 %v7274_v39  ;;  %4039 = vmatprep.subr.bf16.mxu1 %v7276_v62 }
 0xa2e   :  { %3999 = vmatpush1.bf16.msra.mxu0 %v7284_v6  ;;  %4040 = vmatpush1.bf16.msra.mxu1 %v7286_v24 }
 0xa2f   :  { %4000 = vmatprep.subr.bf16.mxu0 %v7288_v33  ;;  %4041 = vmatprep.subr.bf16.mxu1 %v7290_v22 }
 0xa32   :  { %4001 = vmatpush1.bf16.msra.mxu0 %v7296_v12  ;;  %4042 = vmatpush1.bf16.msra.mxu1 %v7298_v36 }
 0xa33   :  { %4002 = vmatprep.subr.bf16.mxu0 %v7300_v20  ;;  %4043 = vmatprep.subr.bf16.mxu1 %v7302_v18 }
 0xa36   :  { %4003 = vmatpush1.bf16.msra.mxu0 %v7308_v23  ;;  %4044 = vmatpush1.bf16.msra.mxu1 %v7310_v0 }
 0xa37   :  { %4004 = vmatprep.subr.bf16.mxu0 %v7312_v51  ;;  %4045 = vmatprep.subr.bf16.mxu1 %v7314_v25 }
 0xa3a   :  { %4005 = vmatpush1.bf16.msra.mxu0 %v7320_v52  ;;  %4046 = vmatpush1.bf16.msra.mxu1 %v7322_v30 }
 0xa3b   :  { %4006 = vmatprep.subr.bf16.mxu0 %v7324_v19  ;;  %4047 = vmatprep.subr.bf16.mxu1 %v7326_v46 }
 0xa3e   :  { %4007 = vmatpush1.bf16.msra.mxu0 %v7332_v56  ;;  %4048 = vmatpush1.bf16.msra.mxu1 %v7334_v49 }
 0xa3f   :  { %4008 = vmatprep.subr.bf16.mxu0 %v7336_v41  ;;  %4049 = vmatprep.subr.bf16.mxu1 %v7338_v48 }
 0xa42   :  { %4009 = vmatpush1.bf16.msra.mxu0 %v7347_v44  ;;  %4050 = vmatpush1.bf16.msra.mxu1 %v7349_v29 }
 0xa43   :  { %4103 = vmatprep.subr.bf16.mxu0 %v7252_v54  ;;  %4144 = vmatprep.subr.bf16.mxu1 %v7254_v15 }
 0xa45   :  { %4027 = vmatmul.mubr.bf16.vlgmr.msra.gmra.mrb[116].mxu0 %v3960_v37  ;;  %4068 = vmatmul.mubr.bf16.vlgmr.msra.gmra.mrb[116].mxu1 %v3960_v37 }
 0xa46   :  { %4104 = vmatpush1.bf16.msra.mxu0 %v7258_v42  ;;  %4145 = vmatpush1.bf16.msra.mxu1 %v7260_v35 }
 0xa47   :  { %4105 = vmatprep.subr.bf16.mxu0 %v7262_v9  ;;  %4146 = vmatprep.subr.bf16.mxu1 %v7264_v61 }
 0xa48   :  { %4135 = vmatprep.mubr.bf16.mxu0 %v8060_v16  ;;  %4176 = vmatprep.mubr.bf16.mxu1 %v8060_v16 }
 0xa4a   :  { %4106 = vmatpush1.bf16.msra.mxu0 %v7270_v7  ;;  %4147 = vmatpush1.bf16.msra.mxu1 %v7272_v3 }
 0xa4b   :  { %4107 = vmatprep.subr.bf16.mxu0 %v7274_v39  ;;  %4148 = vmatprep.subr.bf16.mxu1 %v7276_v62 }
 0xa4e   :  { %4108 = vmatpush1.bf16.msra.mxu0 %v7284_v6  ;;  %4149 = vmatpush1.bf16.msra.mxu1 %v7286_v24 }
 0xa4f   :  { %4109 = vmatprep.subr.bf16.mxu0 %v7288_v33  ;;  %4150 = vmatprep.subr.bf16.mxu1 %v7290_v22 }
 0xa52   :  { %4110 = vmatpush1.bf16.msra.mxu0 %v7296_v12  ;;  %4151 = vmatpush1.bf16.msra.mxu1 %v7298_v36 }
 0xa53   :  { %4111 = vmatprep.subr.bf16.mxu0 %v7300_v20  ;;  %4152 = vmatprep.subr.bf16.mxu1 %v7302_v18 }
 0xa56   :  { %4112 = vmatpush1.bf16.msra.mxu0 %v7308_v23  ;;  %4153 = vmatpush1.bf16.msra.mxu1 %v7310_v0 }
 0xa57   :  { %4113 = vmatprep.subr.bf16.mxu0 %v7312_v51  ;;  %4154 = vmatprep.subr.bf16.mxu1 %v7314_v25 }
 0xa5a   :  { %4114 = vmatpush1.bf16.msra.mxu0 %v7320_v52  ;;  %4155 = vmatpush1.bf16.msra.mxu1 %v7322_v30 }
 0xa5b   :  { %4115 = vmatprep.subr.bf16.mxu0 %v7324_v19  ;;  %4156 = vmatprep.subr.bf16.mxu1 %v7326_v46 }
 0xa5e   :  { %4116 = vmatpush1.bf16.msra.mxu0 %v7332_v56  ;;  %4157 = vmatpush1.bf16.msra.mxu1 %v7334_v49 }
 0xa5f   :  { %4117 = vmatprep.subr.bf16.mxu0 %v7336_v41  ;;  %4158 = vmatprep.subr.bf16.mxu1 %v7338_v48 }
 0xa62   :  { %4118 = vmatpush1.bf16.msra.mxu0 %v7347_v44  ;;  %4159 = vmatpush1.bf16.msra.mxu1 %v7349_v29 }
 0xa63   :  { %4212 = vmatprep.subr.bf16.mxu0 %v7252_v54  ;;  %4253 = vmatprep.subr.bf16.mxu1 %v7254_v15 }
 0xa98   :  { %v7398_v4 = vpop.f32.mrb[96].mxu0  ;;  %v7400_v1 = vpop.f32.mrb[96].mxu1 }
 0xa99   :  { %v7405_v50 = vpop.f32.mrb[97].mxu0  ;;  %v7407_v60 = vpop.f32.mrb[97].mxu1 }
 0xa9a   :  { %v3498_v43 = vpop.f32.mrb[98].mxu0  ;;  %v3571_v58 = vpop.f32.mrb[98].mxu1 }
 0xa9b   :  { %v7413_v13 = vadd.f32 %v3498_v43, %v7393_v53  ;;  %v3500_v34 = vpop.f32.mrb[99].mxu0  ;;  %v7416_v45 = vadd.f32 %v3571_v58, %v7396_v10  ;;  %v3573_v63 = vpop.f32.mrb[99].mxu1 }
 0xa9c   :  { %v7419_v55 = vadd.f32 %v3500_v34, %v7410_v11  ;;  %v7422_v17 = vadd.f32 %v3573_v63, %v7403_v59 }
 0xa9d   :  { %8261 = vst [vmem:[#allocation61_spill] sm:$0xff] %v7413_v13  ;;  %8262 = vst [vmem:[#allocation60_spill] sm:$0xff] %v7416_v45 }
 0xa9e   :  { %8263 = vst [vmem:[#allocation62_spill] sm:$0xff] %v7419_v55  ;;  %8264 = vst [vmem:[#allocation95_spill] sm:$0xff] %v7422_v17 }
 0xaa0   :  { %v3504_v31 = vpop.f32.mrb[100].mxu0  ;;  %v3577_v8 = vpop.f32.mrb[100].mxu1 }
 0xaa1   :  { %v7425_v57 = vadd.f32 %v3504_v31, %v7393_v53  ;;  %v3506_v26 = vpop.f32.mrb[101].mxu0  ;;  %v7428_v47 = vadd.f32 %v3577_v8, %v7396_v10  ;;  %v3579_v5 = vpop.f32.mrb[101].mxu1 }
 0xaa2   :  { %v7431_v32 = vadd.f32 %v3506_v26, %v7410_v11  ;;  %v3508_v21 = vpop.f32.mrb[102].mxu0  ;;  %v7434_v2 = vadd.f32 %v3579_v5, %v7403_v59  ;;  %v3581_v37 = vpop.f32.mrb[102].mxu1 }
 0xaa3   :  { %8265 = vst [vmem:[#allocation97_spill] sm:$0xff] %v7425_v57  ;;  %8266 = vst [vmem:[#allocation96_spill] sm:$0xff] %v7428_v47  ;;  %v7437_v27 = vadd.f32 %v3508_v21, %v7393_v53  ;;  %v3510_v43 = vpop.f32.mrb[103].mxu0  ;;  %v7440_v58 = vadd.f32 %v3581_v37, %v7396_v10  ;;  %v3583_v34 = vpop.f32.mrb[103].mxu1 }
 0xaa4   :  { %8267 = vst [vmem:[#allocation98_spill] sm:$0xff] %v7431_v32  ;;  %8268 = vst [vmem:[#allocation117_spill] sm:$0xff] %v7434_v2  ;;  %v7443_v63 = vadd.f32 %v3510_v43, %v7410_v11  ;;  %v7446_v31 = vadd.f32 %v3583_v34, %v7403_v59 }
 0xaa5   :  { %8269 = vst [vmem:[#allocation118_spill] sm:$0xff] %v7437_v27  ;;  %8270 = vst [vmem:[#allocation120_spill] sm:$0xff] %v7440_v58 }
 0xaa6   :  { %8271 = vst [vmem:[#allocation119_spill] sm:$0xff] %v7443_v63  ;;  %8272 = vst [vmem:[#allocation121_spill] sm:$0xff] %v7446_v31 }
 0xaa8   :  { %v3514_v8 = vpop.f32.mrb[104].mxu0  ;;  %v3587_v26 = vpop.f32.mrb[104].mxu1 }
 0xaa9   :  { %v7449_v5 = vadd.f32 %v3514_v8, %v7393_v53  ;;  %v3516_v2 = vpop.f32.mrb[105].mxu0  ;;  %v7452_v21 = vadd.f32 %v3587_v26, %v7396_v10  ;;  %v3589_v27 = vpop.f32.mrb[105].mxu1 }
 0xaaa   :  { %v7455_v37 = vadd.f32 %v3516_v2, %v7410_v11  ;;  %v3518_v58 = vpop.f32.mrb[106].mxu0  ;;  %v7458_v43 = vadd.f32 %v3589_v27, %v7403_v59  ;;  %v3591_v63 = vpop.f32.mrb[106].mxu1 }
 0xaab   :  { %8273 = vst [vmem:[#allocation51_spill] sm:$0xff] %v7449_v5  ;;  %8274 = vst [vmem:[#allocation53_spill] sm:$0xff] %v7452_v21  ;;  %v7461_v34 = vadd.f32 %v3518_v58, %v7393_v53  ;;  %v3520_v31 = vpop.f32.mrb[107].mxu0  ;;  %v7464_v8 = vadd.f32 %v3591_v63, %v7396_v10  ;;  %v3593_v5 = vpop.f32.mrb[107].mxu1 }
 0xaac   :  { %8275 = vst [vmem:[#allocation52_spill] sm:$0xff] %v7455_v37  ;;  %8276 = vst [vmem:[#allocation126_spill] sm:$0xff] %v7458_v43  ;;  %v7467_v26 = vadd.f32 %v3520_v31, %v7410_v11  ;;  %v7470_v21 = vadd.f32 %v3593_v5, %v7403_v59 }
 0xaad   :  { %8277 = vst [vmem:[#allocation128_spill] sm:$0xff] %v7461_v34  ;;  %8278 = vst [vmem:[#allocation127_spill] sm:$0xff] %v7464_v8 }
 0xaae   :  { %8279 = vst [vmem:[#allocation129_spill] sm:$0xff] %v7467_v26  ;;  %8280 = vst [vmem:[#allocation131_spill] sm:$0xff] %v7470_v21 }
 0xab0   :  { %v3524_v2 = vpop.f32.mrb[108].mxu0  ;;  %v3597_v37 = vpop.f32.mrb[108].mxu1 }
 0xab1   :  { %v7473_v27 = vadd.f32 %v3524_v2, %v7393_v53  ;;  %v3526_v43 = vpop.f32.mrb[109].mxu0  ;;  %v7476_v58 = vadd.f32 %v3597_v37, %v7396_v10  ;;  %v3599_v34 = vpop.f32.mrb[109].mxu1 }
 0xab2   :  { %v7479_v63 = vadd.f32 %v3526_v43, %v7410_v11  ;;  %v3528_v8 = vpop.f32.mrb[110].mxu0  ;;  %v7482_v31 = vadd.f32 %v3599_v34, %v7403_v59  ;;  %v3601_v26 = vpop.f32.mrb[110].mxu1  ;;  %v3706_v43 = vld [vmem:[%s7866_s3 + $0x4] sm:$0xf] }
 0xab3   :  { %8281 = vst [vmem:[#allocation130_spill] sm:$0xff] %v7473_v27  ;;  %8282 = vst [vmem:[#allocation132_spill] sm:$0xff] %v7476_v58  ;;  %v7485_v5 = vadd.f32 %v3528_v8, %v7393_v53  ;;  %v3530_v21 = vpop.f32.mrb[111].mxu0  ;;  %v7488_v2 = vadd.f32 %v3601_v26, %v7396_v10  ;;  %v3603_v27 = vpop.f32.mrb[111].mxu1  ;;  %v3711_v34 = vrot.slane %v3706_v43, %v8257_v28 }
 0xab4   :  { %8283 = vst [vmem:[#allocation108_spill] sm:$0xff] %v7479_v63  ;;  %8284 = vst [vmem:[#allocation107_spill] sm:$0xff] %v7482_v31  ;;  %v7491_v37 = vadd.f32 %v3530_v21, %v7410_v11  ;;  %v7494_v58 = vadd.f32 %v3603_v27, %v7403_v59  ;;  %v3715_v8 = vrot.slane %v3706_v43, %v8260_v38 }
 0xab5   :  { %8285 = vst [vmem:[#allocation109_spill] sm:$0xff] %v7485_v5  ;;  %8286 = vst [vmem:[#allocation110_spill] sm:$0xff] %v7488_v2  ;;  %v3719_v26 = vrot.slane %v3706_v43, %v8258_v40  ;;  %v3723_v28 = vrot.slane %v3706_v43, %v8259_v14  ;;  %v3570_v43 = vadd.f32 %v7407_v60, %v7403_v59 }
 0xab6   :  { %8287 = vst [vmem:[#allocation112_spill] sm:$0xff] %v7491_v37  ;;  %8288 = vst [vmem:[#allocation111_spill] sm:$0xff] %v7494_v58 }
 0xaf8   :  { %v3882_v5 = vpop.f32.mrb[112].mxu0  ;;  %v3923_v31 = vpop.f32.mrb[112].mxu1 }
 0xaf9   :  { %v5255_v63 = vadd.f32 %v3882_v5, %v3711_v34  ;;  %v3884_v2 = vpop.f32.mrb[113].mxu0  ;;  %v3925_v32 = vpop.f32.mrb[113].mxu1  ;;  %v5257_v55 = vadd.f32 %v3923_v31, %v3719_v26 }
 0xafa   :  { %v5256_v21 = vadd.f32 %v3884_v2, %v3715_v8  ;;  %v3886_v37 = vpop.f32.mrb[114].mxu0  ;;  %v3927_v47 = vpop.f32.mrb[114].mxu1  ;;  %v5258_v38 = vadd.f32 %v3925_v32, %v3723_v28  ;;  %v3568_v32 = vadd.f32 %v7400_v1, %v7396_v10 }
 0xafb   :  { %v3934_v27 = vmul.f32 0.5, %v5255_v63  ;;  %v3887_v58 = vpop.f32.mrb[115].mxu0  ;;  %v3928_v57 = vpop.f32.mrb[115].mxu1  ;;  %v5159_v47 = vld [vmem:[%s7868_s5 + $0x18] sm:$0xff] }
 0xafc   :  { %v3938_v17 = vmul.f32 0.5, %v5256_v21  ;;  %v3943_v45 = vmul.f32 0.5, %v5258_v38 }
 0xafd   :  { %5450 = vtanh.f32 %v3934_v27 }
 0xafe   :  { %5452 = vtanh.f32 %v3938_v17  ;;  %v3495_v17 = vadd.f32 %v7398_v4, %v7393_v53 }
 0xaff   :  { %5454 = vtanh.f32 %v5257_v55 }
 0xb00   :  { %5456 = vtanh.f32 %v3943_v45  ;;  %v3497_v45 = vadd.f32 %v7405_v50, %v7410_v11 }
 0xb07   :  { %v5451_v5 = vpop.eup %5450 }
 0xb08   :  { %v5453_v34 = vpop.eup %5452  ;;  %v3936_v40 = vmul.f32 0.5, %v5451_v5 }
 0xb09   :  { %v3940_v13 = vmul.f32 0.5, %v5453_v34  ;;  %v5455_v57 = vpop.eup %5454 }
 0xb0a   :  { %v3937_v2 = vadd.f32 0.5, %v3936_v40  ;;  %v5457_v14 = vpop.eup %5456 }
 0xb0b   :  { %v3941_v58 = vadd.f32 0.5, %v3940_v13  ;;  %v3945_v55 = vmul.f32 0.5, %v5457_v14 }
 0xb0c   :  { %v3948_v63 = vmul.f32 %v5455_v57, %v3937_v2 }
 0xb0d   :  { %v3947_v31 = vmul.f32 %v5159_v47, %v3941_v58  ;;  %v3946_v38 = vadd.f32 0.5, %v3945_v55 }
 0xb0f   :  { %v3949_v37 = vadd.f32 %v3948_v63, %v3947_v31  ;;  %v5161_v31 = vld [vmem:[%s7868_s5 + $0x10] sm:$0xff] }
 0xb11   :  { %5458 = vtanh.f32 %v3949_v37 }
 0xb18   :  { %v4028_v8 = vpop.f32.mrb[116].mxu0  ;;  %v4069_v13 = vpop.f32.mrb[116].mxu1 }
 0xb19   :  { %v4076_v26 = vadd.f32 %v4028_v8, %v3495_v17  ;;  %v4078_v21 = vadd.f32 %v4069_v13, %v3568_v32  ;;  %v4030_v27 = vpop.f32.mrb[117].mxu0  ;;  %v4071_v28 = vpop.f32.mrb[117].mxu1 }
 0xb1a   :  { %v4077_v5 = vadd.f32 %v4030_v27, %v3497_v45  ;;  %v4079_v34 = vadd.f32 %v4071_v28, %v3570_v43  ;;  %v4032_v40 = vpop.f32.mrb[118].mxu0  ;;  %v4073_v53 = vpop.f32.mrb[118].mxu1 }
 0xb1b   :  { %v5459_v4 = vpop.eup %5458  ;;  %v4080_v2 = vmul.f32 0.5, %v4076_v26  ;;  %v4033_v10 = vpop.f32.mrb[119].mxu0 }
 0xb1c   :  { %v4074_v1 = vpop.f32.mrb[119].mxu1  ;;  %v7514_v47 = vmul.f32 %v5459_v4, %v3946_v38  ;;  %v4084_v50 = vmul.f32 0.5, %v4077_v5  ;;  %v4089_v59 = vmul.f32 0.5, %v4079_v34  ;;  %v8289_v38 = vld [vmem:[#allocation61_spill] sm:$0xff]  ;;  %v8290_v34 = vld [vmem:[#allocation60_spill] sm:$0xff] }
 0xb1d   :  { %5460 = vtanh.f32 %v4080_v2  ;;  %v8291_v2 = vld [vmem:[#allocation62_spill] sm:$0xff]  ;;  %v8292_v1 = vld [vmem:[#allocation95_spill] sm:$0xff] }
 0xb1e   :  { %5462 = vtanh.f32 %v4084_v50 }
 0xb1f   :  { %5464 = vtanh.f32 %v4078_v21 }
 0xb20   :  { %5466 = vtanh.f32 %v4089_v59 }
 0xb27   :  { %v5461_v60 = vpop.eup %5460 }
 0xb28   :  { %v5463_v11 = vpop.eup %5462  ;;  %v4082_v57 = vmul.f32 0.5, %v5461_v60 }
 0xb29   :  { %v4086_v58 = vmul.f32 0.5, %v5463_v11  ;;  %v5465_v37 = vpop.eup %5464 }
 0xb2a   :  { %v4083_v63 = vadd.f32 0.5, %v4082_v57  ;;  %v5467_v45 = vpop.eup %5466 }
 0xb2b   :  { %v4087_v14 = vadd.f32 0.5, %v4086_v58  ;;  %v4091_v43 = vmul.f32 0.5, %v5467_v45 }
 0xb2c   :  { %v4094_v55 = vmul.f32 %v5465_v37, %v4083_v63 }
 0xb2d   :  { %v4093_v17 = vmul.f32 %v5161_v31, %v4087_v14  ;;  %v4092_v8 = vadd.f32 0.5, %v4091_v43 }
 0xb2f   :  { %v7519_v32 = vadd.f32 %v4094_v55, %v4093_v17 }
 0xb31   :  { %5468 = vtanh.f32 %v7519_v32 }
 0xb3b   :  { %v5469_v13 = vpop.eup %5468 }
 0xb3c   :  { %v4097_v26 = vmul.f32 %v5469_v13, %v4092_v8 }
 0xb3e   :  { %v4102_v21 = vpack.c.bf16 %v4097_v26, %v4097_v26 }
 0xb40   :  { %4136 = vmatmul.mubr.bf16.vlgmr.msra.gmra.mrb[120].mxu0 %v4102_v21  ;;  %4177 = vmatmul.mubr.bf16.vlgmr.msra.gmra.mrb[120].mxu1 %v4102_v21 }
 0xb41   :  { %4213 = vmatpush1.bf16.msra.mxu0 %v7258_v42  ;;  %4254 = vmatpush1.bf16.msra.mxu1 %v7260_v35 }
 0xb42   :  { %4214 = vmatprep.subr.bf16.mxu0 %v7262_v9  ;;  %4255 = vmatprep.subr.bf16.mxu1 %v7264_v61 }
 0xb43   :  { %4244 = vmatprep.mubr.bf16.mxu0 %v8060_v16  ;;  %4285 = vmatprep.mubr.bf16.mxu1 %v8060_v16 }
 0xb45   :  { %4215 = vmatpush1.bf16.msra.mxu0 %v7270_v7  ;;  %4256 = vmatpush1.bf16.msra.mxu1 %v7272_v3 }
 0xb46   :  { %4216 = vmatprep.subr.bf16.mxu0 %v7274_v39  ;;  %4257 = vmatprep.subr.bf16.mxu1 %v7276_v62 }
 0xb49   :  { %4217 = vmatpush1.bf16.msra.mxu0 %v7284_v6  ;;  %4258 = vmatpush1.bf16.msra.mxu1 %v7286_v24 }
 0xb4a   :  { %4218 = vmatprep.subr.bf16.mxu0 %v7288_v33  ;;  %4259 = vmatprep.subr.bf16.mxu1 %v7290_v22 }
 0xb4d   :  { %4219 = vmatpush1.bf16.msra.mxu0 %v7296_v12  ;;  %4260 = vmatpush1.bf16.msra.mxu1 %v7298_v36 }
 0xb4e   :  { %4220 = vmatprep.subr.bf16.mxu0 %v7300_v20  ;;  %4261 = vmatprep.subr.bf16.mxu1 %v7302_v18 }
 0xb51   :  { %4221 = vmatpush1.bf16.msra.mxu0 %v7308_v23  ;;  %4262 = vmatpush1.bf16.msra.mxu1 %v7310_v0 }
 0xb52   :  { %4222 = vmatprep.subr.bf16.mxu0 %v7312_v51  ;;  %4263 = vmatprep.subr.bf16.mxu1 %v7314_v25 }
 0xb55   :  { %4223 = vmatpush1.bf16.msra.mxu0 %v7320_v52  ;;  %4264 = vmatpush1.bf16.msra.mxu1 %v7322_v30 }
 0xb56   :  { %4224 = vmatprep.subr.bf16.mxu0 %v7324_v19  ;;  %4265 = vmatprep.subr.bf16.mxu1 %v7326_v46 }
 0xb59   :  { %4225 = vmatpush1.bf16.msra.mxu0 %v7332_v56  ;;  %4266 = vmatpush1.bf16.msra.mxu1 %v7334_v49 }
 0xb5a   :  { %4226 = vmatprep.subr.bf16.mxu0 %v7336_v41  ;;  %4267 = vmatprep.subr.bf16.mxu1 %v7338_v48 }
 0xb5d   :  { %4227 = vmatpush1.bf16.msra.mxu0 %v7347_v44  ;;  %4268 = vmatpush1.bf16.msra.mxu1 %v7349_v29 }
 0xb5e   :  { %4321 = vmatprep.subr.bf16.mxu0 %v7252_v54  ;;  %4362 = vmatprep.subr.bf16.mxu1 %v7254_v15 }
 0xc13   :  { %v4137_v27 = vpop.f32.mrb[120].mxu0  ;;  %v4178_v28 = vpop.f32.mrb[120].mxu1 }
 0xc14   :  { %v4185_v5 = vadd.f32 %v4137_v27, %v8289_v38  ;;  %v4187_v40 = vadd.f32 %v4178_v28, %v8290_v34  ;;  %v4139_v53 = vpop.f32.mrb[121].mxu0  ;;  %v4180_v4 = vpop.f32.mrb[121].mxu1 }
 0xc15   :  { %v4186_v10 = vadd.f32 %v4139_v53, %v8291_v2  ;;  %v4188_v50 = vadd.f32 %v4180_v4, %v8292_v1  ;;  %v4141_v59 = vpop.f32.mrb[122].mxu0  ;;  %v4182_v60 = vpop.f32.mrb[122].mxu1  ;;  %v8293_v4 = vld [vmem:[#allocation97_spill] sm:$0xff] }
 0xc16   :  { %v4189_v11 = vmul.f32 0.5, %v4185_v5  ;;  %v4142_v57 = vpop.f32.mrb[123].mxu0  ;;  %v4183_v58 = vpop.f32.mrb[123].mxu1  ;;  %v8295_v60 = vld [vmem:[#allocation98_spill] sm:$0xff] }
 0xc17   :  { %v4193_v63 = vmul.f32 0.5, %v4186_v10  ;;  %v4198_v31 = vmul.f32 0.5, %v4188_v50  ;;  %v8294_v10 = vld [vmem:[#allocation96_spill] sm:$0xff]  ;;  %v8296_v57 = vld [vmem:[#allocation117_spill] sm:$0xff] }
 0xc18   :  { %5470 = vtanh.f32 %v4189_v11 }
 0xc19   :  { %5472 = vtanh.f32 %v4193_v63 }
 0xc1a   :  { %5474 = vtanh.f32 %v4187_v40 }
 0xc1b   :  { %5476 = vtanh.f32 %v4198_v31 }
 0xc22   :  { %v5471_v37 = vpop.eup %5470 }
 0xc23   :  { %v5473_v14 = vpop.eup %5472  ;;  %v4191_v55 = vmul.f32 0.5, %v5471_v37 }
 0xc24   :  { %v4195_v17 = vmul.f32 0.5, %v5473_v14  ;;  %v5475_v43 = vpop.eup %5474 }
 0xc25   :  { %v4192_v45 = vadd.f32 0.5, %v4191_v55  ;;  %v5477_v27 = vpop.eup %5476 }
 0xc26   :  { %v4196_v8 = vadd.f32 0.5, %v4195_v17  ;;  %v4200_v28 = vmul.f32 0.5, %v5477_v27 }
 0xc27   :  { %v4203_v13 = vmul.f32 %v5475_v43, %v4192_v45 }
 0xc28   :  { %v4202_v26 = vmul.f32 %v4196_v8, %v7519_v32  ;;  %v4201_v38 = vadd.f32 0.5, %v4200_v28 }
 0xc2a   :  { %v7561_v21 = vadd.f32 %v4203_v13, %v4202_v26 }
 0xc2c   :  { %5478 = vtanh.f32 %v7561_v21 }
 0xc36   :  { %v5479_v5 = vpop.eup %5478 }
 0xc37   :  { %v4206_v34 = vmul.f32 %v5479_v5, %v4201_v38 }
 0xc39   :  { %v4211_v40 = vpack.c.bf16 %v4206_v34, %v4206_v34 }
 0xc3b   :  { %4245 = vmatmul.mubr.bf16.vlgmr.msra.gmra.mrb[124].mxu0 %v4211_v40  ;;  %4286 = vmatmul.mubr.bf16.vlgmr.msra.gmra.mrb[124].mxu1 %v4211_v40 }
 0xc3c   :  { %4322 = vmatpush1.bf16.msra.mxu0 %v7258_v42  ;;  %4363 = vmatpush1.bf16.msra.mxu1 %v7260_v35 }
 0xc3d   :  { %4323 = vmatprep.subr.bf16.mxu0 %v7262_v9  ;;  %4364 = vmatprep.subr.bf16.mxu1 %v7264_v61 }
 0xc3e   :  { %4353 = vmatprep.mubr.bf16.mxu0 %v8060_v16  ;;  %4394 = vmatprep.mubr.bf16.mxu1 %v8060_v16 }
 0xc40   :  { %4324 = vmatpush1.bf16.msra.mxu0 %v7270_v7  ;;  %4365 = vmatpush1.bf16.msra.mxu1 %v7272_v3 }
 0xc41   :  { %4325 = vmatprep.subr.bf16.mxu0 %v7274_v39  ;;  %4366 = vmatprep.subr.bf16.mxu1 %v7276_v62 }
 0xc44   :  { %4326 = vmatpush1.bf16.msra.mxu0 %v7284_v6  ;;  %4367 = vmatpush1.bf16.msra.mxu1 %v7286_v24 }
 0xc45   :  { %4327 = vmatprep.subr.bf16.mxu0 %v7288_v33  ;;  %4368 = vmatprep.subr.bf16.mxu1 %v7290_v22 }
 0xc48   :  { %4328 = vmatpush1.bf16.msra.mxu0 %v7296_v12  ;;  %4369 = vmatpush1.bf16.msra.mxu1 %v7298_v36 }
 0xc49   :  { %4329 = vmatprep.subr.bf16.mxu0 %v7300_v20  ;;  %4370 = vmatprep.subr.bf16.mxu1 %v7302_v18 }
 0xc4c   :  { %4330 = vmatpush1.bf16.msra.mxu0 %v7308_v23  ;;  %4371 = vmatpush1.bf16.msra.mxu1 %v7310_v0 }
 0xc4d   :  { %4331 = vmatprep.subr.bf16.mxu0 %v7312_v51  ;;  %4372 = vmatprep.subr.bf16.mxu1 %v7314_v25 }
 0xc50   :  { %4332 = vmatpush1.bf16.msra.mxu0 %v7320_v52  ;;  %4373 = vmatpush1.bf16.msra.mxu1 %v7322_v30 }
 0xc51   :  { %4333 = vmatprep.subr.bf16.mxu0 %v7324_v19  ;;  %4374 = vmatprep.subr.bf16.mxu1 %v7326_v46 }
 0xc54   :  { %4334 = vmatpush1.bf16.msra.mxu0 %v7332_v56  ;;  %4375 = vmatpush1.bf16.msra.mxu1 %v7334_v49 }
 0xc55   :  { %4335 = vmatprep.subr.bf16.mxu0 %v7336_v41  ;;  %4376 = vmatprep.subr.bf16.mxu1 %v7338_v48 }
 0xc58   :  { %4336 = vmatpush1.bf16.msra.mxu0 %v7347_v44  ;;  %4377 = vmatpush1.bf16.msra.mxu1 %v7349_v29 }
 0xc59   :  { %4430 = vmatprep.subr.bf16.mxu0 %v7252_v54  ;;  %4471 = vmatprep.subr.bf16.mxu1 %v7254_v15 }
 0xd0e   :  { %v4246_v32 = vpop.f32.mrb[124].mxu0  ;;  %v4287_v53 = vpop.f32.mrb[124].mxu1 }
 0xd0f   :  { %v4294_v2 = vadd.f32 %v4246_v32, %v8293_v4  ;;  %v4296_v1 = vadd.f32 %v4287_v53, %v8294_v10  ;;  %v4248_v50 = vpop.f32.mrb[125].mxu0  ;;  %v4289_v59 = vpop.f32.mrb[125].mxu1 }
 0xd10   :  { %v4295_v11 = vadd.f32 %v4248_v50, %v8295_v60  ;;  %v4297_v58 = vadd.f32 %v4289_v59, %v8296_v57  ;;  %v4250_v63 = vpop.f32.mrb[126].mxu0  ;;  %v4291_v31 = vpop.f32.mrb[126].mxu1  ;;  %v8297_v59 = vld [vmem:[#allocation118_spill] sm:$0xff] }
 0xd11   :  { %v4298_v37 = vmul.f32 0.5, %v4294_v2  ;;  %v4251_v14 = vpop.f32.mrb[127].mxu0  ;;  %v4292_v55 = vpop.f32.mrb[127].mxu1  ;;  %v8299_v31 = vld [vmem:[#allocation119_spill] sm:$0xff] }
 0xd12   :  { %v4302_v17 = vmul.f32 0.5, %v4295_v11  ;;  %v4307_v45 = vmul.f32 0.5, %v4297_v58  ;;  %v8298_v11 = vld [vmem:[#allocation120_spill] sm:$0xff]  ;;  %v8300_v14 = vld [vmem:[#allocation121_spill] sm:$0xff] }
 0xd13   :  { %5480 = vtanh.f32 %v4298_v37 }
 0xd14   :  { %5482 = vtanh.f32 %v4302_v17 }
 0xd15   :  { %5484 = vtanh.f32 %v4296_v1 }
 0xd16   :  { %5486 = vtanh.f32 %v4307_v45 }
 0xd1d   :  { %v5481_v43 = vpop.eup %5480 }
 0xd1e   :  { %v5483_v8 = vpop.eup %5482  ;;  %v4300_v13 = vmul.f32 0.5, %v5481_v43 }
 0xd1f   :  { %v4304_v26 = vmul.f32 0.5, %v5483_v8  ;;  %v5485_v28 = vpop.eup %5484 }
 0xd20   :  { %v4301_v27 = vadd.f32 0.5, %v4300_v13  ;;  %v5487_v32 = vpop.eup %5486 }
 0xd21   :  { %v4305_v38 = vadd.f32 0.5, %v4304_v26  ;;  %v4309_v53 = vmul.f32 0.5, %v5487_v32 }
 0xd22   :  { %v4312_v5 = vmul.f32 %v5485_v28, %v4301_v27 }
 0xd23   :  { %v4311_v34 = vmul.f32 %v4305_v38, %v7561_v21  ;;  %v4310_v4 = vadd.f32 0.5, %v4309_v53 }
 0xd25   :  { %v7603_v40 = vadd.f32 %v4312_v5, %v4311_v34 }
 0xd27   :  { %5488 = vtanh.f32 %v7603_v40 }
 0xd31   :  { %v5489_v2 = vpop.eup %5488 }
 0xd32   :  { %v4315_v10 = vmul.f32 %v5489_v2, %v4310_v4 }
 0xd34   :  { %v4320_v1 = vpack.c.bf16 %v4315_v10, %v4315_v10 }
 0xd36   :  { %4354 = vmatmul.mubr.bf16.vlgmr.msra.gmra.mrb[128].mxu0 %v4320_v1  ;;  %4395 = vmatmul.mubr.bf16.vlgmr.msra.gmra.mrb[128].mxu1 %v4320_v1 }
 0xd37   :  { %4431 = vmatpush1.bf16.msra.mxu0 %v7258_v42  ;;  %4472 = vmatpush1.bf16.msra.mxu1 %v7260_v35 }
 0xd38   :  { %4432 = vmatprep.subr.bf16.mxu0 %v7262_v9  ;;  %4473 = vmatprep.subr.bf16.mxu1 %v7264_v61 }
 0xd39   :  { %4462 = vmatprep.mubr.bf16.mxu0 %v8060_v16  ;;  %4503 = vmatprep.mubr.bf16.mxu1 %v8060_v16 }
 0xd3b   :  { %4433 = vmatpush1.bf16.msra.mxu0 %v7270_v7  ;;  %4474 = vmatpush1.bf16.msra.mxu1 %v7272_v3 }
 0xd3c   :  { %4434 = vmatprep.subr.bf16.mxu0 %v7274_v39  ;;  %4475 = vmatprep.subr.bf16.mxu1 %v7276_v62 }
 0xd3f   :  { %4435 = vmatpush1.bf16.msra.mxu0 %v7284_v6  ;;  %4476 = vmatpush1.bf16.msra.mxu1 %v7286_v24 }
 0xd40   :  { %4436 = vmatprep.subr.bf16.mxu0 %v7288_v33  ;;  %4477 = vmatprep.subr.bf16.mxu1 %v7290_v22 }
 0xd43   :  { %4437 = vmatpush1.bf16.msra.mxu0 %v7296_v12  ;;  %4478 = vmatpush1.bf16.msra.mxu1 %v7298_v36 }
 0xd44   :  { %4438 = vmatprep.subr.bf16.mxu0 %v7300_v20  ;;  %4479 = vmatprep.subr.bf16.mxu1 %v7302_v18 }
 0xd47   :  { %4439 = vmatpush1.bf16.msra.mxu0 %v7308_v23  ;;  %4480 = vmatpush1.bf16.msra.mxu1 %v7310_v0 }
 0xd48   :  { %4440 = vmatprep.subr.bf16.mxu0 %v7312_v51  ;;  %4481 = vmatprep.subr.bf16.mxu1 %v7314_v25 }
 0xd4b   :  { %4441 = vmatpush1.bf16.msra.mxu0 %v7320_v52  ;;  %4482 = vmatpush1.bf16.msra.mxu1 %v7322_v30 }
 0xd4c   :  { %4442 = vmatprep.subr.bf16.mxu0 %v7324_v19  ;;  %4483 = vmatprep.subr.bf16.mxu1 %v7326_v46 }
 0xd4f   :  { %4443 = vmatpush1.bf16.msra.mxu0 %v7332_v56  ;;  %4484 = vmatpush1.bf16.msra.mxu1 %v7334_v49 }
 0xd50   :  { %4444 = vmatprep.subr.bf16.mxu0 %v7336_v41  ;;  %4485 = vmatprep.subr.bf16.mxu1 %v7338_v48 }
 0xd53   :  { %4445 = vmatpush1.bf16.msra.mxu0 %v7347_v44  ;;  %4486 = vmatpush1.bf16.msra.mxu1 %v7349_v29 }
 0xd54   :  { %4539 = vmatprep.subr.bf16.mxu0 %v7252_v54  ;;  %4580 = vmatprep.subr.bf16.mxu1 %v7254_v15 }
 0xe09   :  { %v4355_v21 = vpop.f32.mrb[128].mxu0  ;;  %v4396_v50 = vpop.f32.mrb[128].mxu1 }
 0xe0a   :  { %v4403_v60 = vadd.f32 %v4355_v21, %v8297_v59  ;;  %v4405_v57 = vadd.f32 %v4396_v50, %v8298_v11  ;;  %v4357_v58 = vpop.f32.mrb[129].mxu0  ;;  %v4398_v63 = vpop.f32.mrb[129].mxu1 }
 0xe0b   :  { %v4404_v37 = vadd.f32 %v4357_v58, %v8299_v31  ;;  %v4406_v55 = vadd.f32 %v4398_v63, %v8300_v14  ;;  %v4359_v17 = vpop.f32.mrb[130].mxu0  ;;  %v4400_v45 = vpop.f32.mrb[130].mxu1  ;;  %v7690_v14 = vld [vmem:[#allocation6 + $0x200] sm:$0xff] }
 0xe0c   :  { %v4407_v43 = vmul.f32 0.5, %v4403_v60  ;;  %v4360_v8 = vpop.f32.mrb[131].mxu0  ;;  %v4401_v13 = vpop.f32.mrb[131].mxu1  ;;  %v7696_v17 = vld [vmem:[#allocation6 + $0x228] sm:$0xff]  ;;  %v7699_v45 = vld [vmem:[#allocation6 + $0x238] sm:$0xff] }
 0xe0d   :  { %v4411_v26 = vmul.f32 0.5, %v4404_v37  ;;  %v4416_v27 = vmul.f32 0.5, %v4406_v55  ;;  %v7693_v55 = vld [vmem:[#allocation6 + $0x210] sm:$0xff]  ;;  %v7710_v13 = vld [vmem:[#allocation6 + $0x248] sm:$0xff] }
 0xe0e   :  { %5490 = vtanh.f32 %v4407_v43  ;;  %v7704_v43 = vld [vmem:[#allocation6 + $0x220] sm:$0xff]  ;;  %v7707_v8 = vld [vmem:[#allocation6 + $0x230] sm:$0xff] }
 0xe0f   :  { %5492 = vtanh.f32 %v4411_v26  ;;  %v7713_v26 = vld [vmem:[#allocation6 + $0x258] sm:$0xff] }
 0xe10   :  { %5494 = vtanh.f32 %v4405_v57 }
 0xe11   :  { %5496 = vtanh.f32 %v4416_v27  ;;  %v7716_v27 = vld [vmem:[#allocation6 + $0x240] sm:$0xff] }
 0xe18   :  { %v5491_v28 = vpop.eup %5490 }
 0xe19   :  { %v5493_v38 = vpop.eup %5492  ;;  %v4409_v5 = vmul.f32 0.5, %v5491_v28  ;;  %v7719_v28 = vld [vmem:[#allocation6 + $0x250] sm:$0xff] }
 0xe1a   :  { %v4413_v34 = vmul.f32 0.5, %v5493_v38  ;;  %v5495_v53 = vpop.eup %5494  ;;  %v7722_v38 = vld [vmem:[#allocation6 + $0x268] sm:$0xff] }
 0xe1b   :  { %v4410_v32 = vadd.f32 0.5, %v4409_v5  ;;  %v5497_v21 = vpop.eup %5496  ;;  %v7725_v5 = vld [vmem:[#allocation6 + $0x278] sm:$0xff] }
 0xe1c   :  { %v4414_v4 = vadd.f32 0.5, %v4413_v34  ;;  %v4418_v50 = vmul.f32 0.5, %v5497_v21  ;;  %v7728_v34 = vld [vmem:[#allocation6 + $0x260] sm:$0xff]  ;;  %v7749_v21 = vld [vmem:[#allocation6 + $0x2b8] sm:$0xff] }
 0xe1d   :  { %v4421_v2 = vmul.f32 %v5495_v53, %v4410_v32  ;;  %v7731_v32 = vld [vmem:[#allocation6 + $0x270] sm:$0xff]  ;;  %v7734_v53 = vld [vmem:[#allocation6 + $0x288] sm:$0xff] }
 0xe1e   :  { %v4420_v10 = vmul.f32 %v4414_v4, %v7603_v40  ;;  %v4419_v59 = vadd.f32 0.5, %v4418_v50  ;;  %v7737_v4 = vld [vmem:[#allocation6 + $0x298] sm:$0xff]  ;;  %v7752_v50 = vld [vmem:[#allocation6 + $0x2a0] sm:$0xff] }
 0xe20   :  { %v7645_v1 = vadd.f32 %v4421_v2, %v4420_v10  ;;  %v7740_v2 = vld [vmem:[#allocation6 + $0x280] sm:$0xff]  ;;  %v7743_v10 = vld [vmem:[#allocation6 + $0x290] sm:$0xff] }
 0xe22   :  { %5498 = vtanh.f32 %v7645_v1 }
 0xe2c   :  { %v5499_v60 = vpop.eup %5498 }
 0xe2d   :  { %v4424_v11 = vmul.f32 %v5499_v60, %v4419_v59  ;;  %v7755_v59 = vld [vmem:[#allocation6 + $0x2b0] sm:$0xff]  ;;  %v7758_v60 = vld [vmem:[#allocation6 + $0x2c8] sm:$0xff] }
 0xe2f   :  { %v4429_v57 = vpack.c.bf16 %v4424_v11, %v4424_v11  ;;  %v7761_v11 = vld [vmem:[#allocation6 + $0x2d8] sm:$0xff] }
 0xe31   :  { %4463 = vmatmul.mubr.bf16.vlgmr.msra.gmra.mrb[132].mxu0 %v4429_v57  ;;  %4504 = vmatmul.mubr.bf16.vlgmr.msra.gmra.mrb[132].mxu1 %v4429_v57  ;;  %v7764_v57 = vld [vmem:[#allocation6 + $0x2c0] sm:$0xff] }
 0xe32   :  { %4540 = vmatpush1.bf16.msra.mxu0 %v7258_v42  ;;  %4581 = vmatpush1.bf16.msra.mxu1 %v7260_v35 }
 0xe33   :  { %4541 = vmatprep.subr.bf16.mxu0 %v7262_v9  ;;  %4582 = vmatprep.subr.bf16.mxu1 %v7264_v61  ;;  %v8301_v9 = vld [vmem:[#allocation51_spill] sm:$0xff] }
 0xe34   :  { %4571 = vmatprep.mubr.bf16.mxu0 %v8060_v16  ;;  %4612 = vmatprep.mubr.bf16.mxu1 %v8060_v16 }
 0xe36   :  { %4542 = vmatpush1.bf16.msra.mxu0 %v7270_v7  ;;  %4583 = vmatpush1.bf16.msra.mxu1 %v7272_v3  ;;  %v8302_v7 = vld [vmem:[#allocation53_spill] sm:$0xff] }
 0xe37   :  { %4543 = vmatprep.subr.bf16.mxu0 %v7274_v39  ;;  %4584 = vmatprep.subr.bf16.mxu1 %v7276_v62 }
 0xe3a   :  { %4544 = vmatpush1.bf16.msra.mxu0 %v7284_v6  ;;  %4585 = vmatpush1.bf16.msra.mxu1 %v7286_v24  ;;  %v8303_v6 = vld [vmem:[#allocation52_spill] sm:$0xff] }
 0xe3b   :  { %4545 = vmatprep.subr.bf16.mxu0 %v7288_v33  ;;  %4586 = vmatprep.subr.bf16.mxu1 %v7290_v22  ;;  %v8304_v33 = vld [vmem:[#allocation126_spill] sm:$0xff] }
 0xe3e   :  { %4546 = vmatpush1.bf16.msra.mxu0 %v7296_v12  ;;  %4587 = vmatpush1.bf16.msra.mxu1 %v7298_v36 }
 0xe3f   :  { %4547 = vmatprep.subr.bf16.mxu0 %v7300_v20  ;;  %4588 = vmatprep.subr.bf16.mxu1 %v7302_v18 }
 0xe42   :  { %4548 = vmatpush1.bf16.msra.mxu0 %v7308_v23  ;;  %4589 = vmatpush1.bf16.msra.mxu1 %v7310_v0 }
 0xe43   :  { %4549 = vmatprep.subr.bf16.mxu0 %v7312_v51  ;;  %4590 = vmatprep.subr.bf16.mxu1 %v7314_v25 }
 0xe46   :  { %4550 = vmatpush1.bf16.msra.mxu0 %v7320_v52  ;;  %4591 = vmatpush1.bf16.msra.mxu1 %v7322_v30 }
 0xe47   :  { %4551 = vmatprep.subr.bf16.mxu0 %v7324_v19  ;;  %4592 = vmatprep.subr.bf16.mxu1 %v7326_v46 }
 0xe4a   :  { %4552 = vmatpush1.bf16.msra.mxu0 %v7332_v56  ;;  %4593 = vmatpush1.bf16.msra.mxu1 %v7334_v49 }
 0xe4b   :  { %4553 = vmatprep.subr.bf16.mxu0 %v7336_v41  ;;  %4594 = vmatprep.subr.bf16.mxu1 %v7338_v48 }
 0xe4e   :  { %4554 = vmatpush1.bf16.msra.mxu0 %v7347_v44  ;;  %4595 = vmatpush1.bf16.msra.mxu1 %v7349_v29 }
 0xe4f   :  { %4648 = vmatprep.subr.bf16.mxu0 %v7252_v54  ;;  %4689 = vmatprep.subr.bf16.mxu1 %v7254_v15 }
 0xf04   :  { %v4464_v42 = vpop.f32.mrb[132].mxu0  ;;  %v4505_v35 = vpop.f32.mrb[132].mxu1 }
 0xf05   :  { %v4512_v61 = vadd.f32 %v4464_v42, %v8301_v9  ;;  %v4514_v3 = vadd.f32 %v4505_v35, %v8302_v7  ;;  %v4466_v39 = vpop.f32.mrb[133].mxu0  ;;  %v4507_v62 = vpop.f32.mrb[133].mxu1  ;;  %v7767_v42 = vld [vmem:[#allocation6 + $0x2d0] sm:$0xff]  ;;  %v7770_v35 = vld [vmem:[#allocation6 + $0x2e8] sm:$0xff]  ;;  %v7773_v9 = vld [vmem:[#allocation6 + $0x2f8] sm:$0xff] }
 0xf06   :  { %v4513_v24 = vadd.f32 %v4466_v39, %v8303_v6  ;;  %v4515_v22 = vadd.f32 %v4507_v62, %v8304_v33  ;;  %v4468_v12 = vpop.f32.mrb[134].mxu0  ;;  %v4509_v36 = vpop.f32.mrb[134].mxu1  ;;  %v5569_v7 = vld [vmem:[#allocation6 + $0x218] sm:$0xff]  ;;  %v8305_v62 = vld [vmem:[#allocation128_spill] sm:$0xff] }
 0xf07   :  { %v4516_v20 = vmul.f32 0.5, %v4512_v61  ;;  %v4469_v18 = vpop.f32.mrb[135].mxu0  ;;  %v4510_v23 = vpop.f32.mrb[135].mxu1  ;;  %v5568_v61 = vld [vmem:[#allocation6 + $0x208] sm:$0xff]  ;;  %v8307_v36 = vld [vmem:[#allocation129_spill] sm:$0xff] }
 0xf08   :  { %v4520_v54 = vmul.f32 0.5, %v4513_v24  ;;  %v4525_v15 = vmul.f32 0.5, %v4515_v22  ;;  %v8306_v24 = vld [vmem:[#allocation127_spill] sm:$0xff] }
 0xf09   :  { %5500 = vtanh.f32 %v4516_v20  ;;  %v8308_v18 = vld [vmem:[#allocation131_spill] sm:$0xff] }
 0xf0a   :  { %5502 = vtanh.f32 %v4520_v54 }
 0xf0b   :  { %5504 = vtanh.f32 %v4514_v3 }
 0xf0c   :  { %5506 = vtanh.f32 %v4525_v15 }
 0xf13   :  { %v5501_v0 = vpop.eup %5500 }
 0xf14   :  { %v5503_v51 = vpop.eup %5502  ;;  %v4518_v25 = vmul.f32 0.5, %v5501_v0 }
 0xf15   :  { %v4522_v52 = vmul.f32 0.5, %v5503_v51  ;;  %v5505_v19 = vpop.eup %5504 }
 0xf16   :  { %v4519_v30 = vadd.f32 0.5, %v4518_v25  ;;  %v5507_v48 = vpop.eup %5506 }
 0xf17   :  { %v4523_v46 = vadd.f32 0.5, %v4522_v52  ;;  %v4527_v40 = vmul.f32 0.5, %v5507_v48 }
 0xf18   :  { %v4530_v56 = vmul.f32 %v5505_v19, %v4519_v30 }
 0xf19   :  { %v4529_v49 = vmul.f32 %v4523_v46, %v7645_v1  ;;  %v4528_v58 = vadd.f32 0.5, %v4527_v40  ;;  %v7746_v1 = vld [vmem:[#allocation6 + $0x2a8] sm:$0xff] }
 0xf1b   :  { %v7687_v41 = vadd.f32 %v4530_v56, %v4529_v49 }
 0xf1d   :  { %5508 = vtanh.f32 %v7687_v41 }
 0xf27   :  { %v5509_v63 = vpop.eup %5508 }
 0xf28   :  { %v4533_v31 = vmul.f32 %v5509_v63, %v4528_v58 }
 0xf2a   :  { %v4538_v37 = vpack.c.bf16 %v4533_v31, %v4533_v31 }
 0xf2c   :  { %4572 = vmatmul.mubr.bf16.vlgmr.msra.gmra.mrb[136].mxu0 %v4538_v37  ;;  %4613 = vmatmul.mubr.bf16.vlgmr.msra.gmra.mrb[136].mxu1 %v4538_v37 }
 0xf2d   :  { %4649 = vmatpush1.bf16.msra.mxu0 %v7690_v14  ;;  %4690 = vmatpush1.bf16.msra.mxu1 %v7693_v55 }
 0xf2e   :  { %4650 = vmatprep.subr.bf16.mxu0 %v7696_v17  ;;  %4691 = vmatprep.subr.bf16.mxu1 %v7699_v45 }
 0xf2f   :  { %4680 = vmatprep.mubr.bf16.mxu0 %v8060_v16  ;;  %4721 = vmatprep.mubr.bf16.mxu1 %v8060_v16 }
 0xf31   :  { %4651 = vmatpush1.bf16.msra.mxu0 %v7704_v43  ;;  %4692 = vmatpush1.bf16.msra.mxu1 %v7707_v8 }
 0xf32   :  { %4652 = vmatprep.subr.bf16.mxu0 %v7710_v13  ;;  %4693 = vmatprep.subr.bf16.mxu1 %v7713_v26 }
 0xf35   :  { %4653 = vmatpush1.bf16.msra.mxu0 %v7716_v27  ;;  %4694 = vmatpush1.bf16.msra.mxu1 %v7719_v28 }
 0xf36   :  { %4654 = vmatprep.subr.bf16.mxu0 %v7722_v38  ;;  %4695 = vmatprep.subr.bf16.mxu1 %v7725_v5 }
 0xf39   :  { %4655 = vmatpush1.bf16.msra.mxu0 %v7728_v34  ;;  %4696 = vmatpush1.bf16.msra.mxu1 %v7731_v32 }
 0xf3a   :  { %4656 = vmatprep.subr.bf16.mxu0 %v7734_v53  ;;  %4697 = vmatprep.subr.bf16.mxu1 %v7737_v4 }
 0xf3d   :  { %4657 = vmatpush1.bf16.msra.mxu0 %v7740_v2  ;;  %4698 = vmatpush1.bf16.msra.mxu1 %v7743_v10 }
 0xf3e   :  { %4658 = vmatprep.subr.bf16.mxu0 %v7746_v1  ;;  %4699 = vmatprep.subr.bf16.mxu1 %v7749_v21 }
 0xf41   :  { %4659 = vmatpush1.bf16.msra.mxu0 %v7752_v50  ;;  %4700 = vmatpush1.bf16.msra.mxu1 %v7755_v59 }
 0xf42   :  { %4660 = vmatprep.subr.bf16.mxu0 %v7758_v60  ;;  %4701 = vmatprep.subr.bf16.mxu1 %v7761_v11 }
 0xf45   :  { %4661 = vmatpush1.bf16.msra.mxu0 %v7764_v57  ;;  %4702 = vmatpush1.bf16.msra.mxu1 %v7767_v42 }
 0xf46   :  { %4662 = vmatprep.subr.bf16.mxu0 %v7770_v35  ;;  %4703 = vmatprep.subr.bf16.mxu1 %v7773_v9 }
 0xf49   :  { %4663 = vmatpush1.bf16.msra.mxu0 %v7347_v44  ;;  %4704 = vmatpush1.bf16.msra.mxu1 %v7349_v29 }
 0xf4a   :  { %4757 = vmatprep.subr.bf16.mxu0 %v5568_v61  ;;  %4798 = vmatprep.subr.bf16.mxu1 %v5569_v7 }
 0xfff   :  { %v4573_v3 = vpop.f32.mrb[136].mxu0  ;;  %v4614_v39 = vpop.f32.mrb[136].mxu1 }
0x1000   :  { %v4621_v6 = vadd.f32 %v4573_v3, %v8305_v62  ;;  %v4623_v33 = vadd.f32 %v4614_v39, %v8306_v24  ;;  %v4575_v22 = vpop.f32.mrb[137].mxu0  ;;  %v4616_v12 = vpop.f32.mrb[137].mxu1 }
0x1001   :  { %v4622_v20 = vadd.f32 %v4575_v22, %v8307_v36  ;;  %v4624_v23 = vadd.f32 %v4616_v12, %v8308_v18  ;;  %v4577_v54 = vpop.f32.mrb[138].mxu0  ;;  %v4618_v44 = vpop.f32.mrb[138].mxu1 }
0x1002   :  { %v4625_v15 = vmul.f32 0.5, %v4621_v6  ;;  %v4578_v29 = vpop.f32.mrb[139].mxu0  ;;  %v4619_v0 = vpop.f32.mrb[139].mxu1  ;;  %v8314_v44 = vld [vmem:[#allocation110_spill] sm:$0xff] }
0x1003   :  { %v4629_v51 = vmul.f32 0.5, %v4622_v20  ;;  %v4634_v25 = vmul.f32 0.5, %v4624_v23  ;;  %v8313_v23 = vld [vmem:[#allocation109_spill] sm:$0xff] }
0x1004   :  { %5510 = vtanh.f32 %v4625_v15 }
0x1005   :  { %5512 = vtanh.f32 %v4629_v51  ;;  %v8315_v51 = vld [vmem:[#allocation112_spill] sm:$0xff] }
0x1006   :  { %5514 = vtanh.f32 %v4623_v33 }
0x1007   :  { %5516 = vtanh.f32 %v4634_v25 }
0x100e   :  { %v5511_v52 = vpop.eup %5510 }
0x100f   :  { %v5513_v30 = vpop.eup %5512  ;;  %v4627_v19 = vmul.f32 0.5, %v5511_v52  ;;  %v8316_v52 = vld [vmem:[#allocation111_spill] sm:$0xff] }
0x1010   :  { %v4631_v46 = vmul.f32 0.5, %v5513_v30  ;;  %v5515_v49 = vpop.eup %5514 }
0x1011   :  { %v4628_v56 = vadd.f32 0.5, %v4627_v19  ;;  %v5517_v31 = vpop.eup %5516 }
0x1012   :  { %v4632_v48 = vadd.f32 0.5, %v4631_v46  ;;  %v4636_v37 = vmul.f32 0.5, %v5517_v31 }
0x1013   :  { %v4639_v40 = vmul.f32 %v5515_v49, %v4628_v56 }
0x1014   :  { %v4638_v58 = vmul.f32 %v4632_v48, %v7687_v41  ;;  %v4637_v61 = vadd.f32 0.5, %v4636_v37  ;;  %v5571_v41 = vld [vmem:[#allocation6 + $0x2f0] sm:$0xff] }
0x1016   :  { %v7783_v63 = vadd.f32 %v4639_v40, %v4638_v58 }
0x1018   :  { %5518 = vtanh.f32 %v7783_v63 }
0x1022   :  { %v5519_v7 = vpop.eup %5518 }
0x1023   :  { %v4642_v3 = vmul.f32 %v5519_v7, %v4637_v61 }
0x1025   :  { %v4647_v39 = vpack.c.bf16 %v4642_v3, %v4642_v3 }
0x1027   :  { %4681 = vmatmul.mubr.bf16.vlgmr.msra.gmra.mrb[140].mxu0 %v4647_v39  ;;  %4722 = vmatmul.mubr.bf16.vlgmr.msra.gmra.mrb[140].mxu1 %v4647_v39 }
0x1028   :  { %4758 = vmatpush1.bf16.msra.mxu0 %v7690_v14  ;;  %4799 = vmatpush1.bf16.msra.mxu1 %v7693_v55 }
0x1029   :  { %4759 = vmatprep.subr.bf16.mxu0 %v7696_v17  ;;  %4800 = vmatprep.subr.bf16.mxu1 %v7699_v45  ;;  %v8309_v17 = vld [vmem:[#allocation130_spill] sm:$0xff] }
0x102a   :  { %4789 = vmatprep.mubr.bf16.mxu0 %v8060_v16  ;;  %4830 = vmatprep.mubr.bf16.mxu1 %v8060_v16  ;;  %v5570_v16 = vld [vmem:[#allocation6 + $0x2e0] sm:$0xff] }
0x102c   :  { %4760 = vmatpush1.bf16.msra.mxu0 %v7704_v43  ;;  %4801 = vmatpush1.bf16.msra.mxu1 %v7707_v8  ;;  %v8310_v43 = vld [vmem:[#allocation132_spill] sm:$0xff] }
0x102d   :  { %4761 = vmatprep.subr.bf16.mxu0 %v7710_v13  ;;  %4802 = vmatprep.subr.bf16.mxu1 %v7713_v26 }
0x1030   :  { %4762 = vmatpush1.bf16.msra.mxu0 %v7716_v27  ;;  %4803 = vmatpush1.bf16.msra.mxu1 %v7719_v28  ;;  %v8311_v27 = vld [vmem:[#allocation108_spill] sm:$0xff] }
0x1031   :  { %4763 = vmatprep.subr.bf16.mxu0 %v7722_v38  ;;  %4804 = vmatprep.subr.bf16.mxu1 %v7725_v5  ;;  %v8312_v38 = vld [vmem:[#allocation107_spill] sm:$0xff] }
0x1034   :  { %4764 = vmatpush1.bf16.msra.mxu0 %v7728_v34  ;;  %4805 = vmatpush1.bf16.msra.mxu1 %v7731_v32 }
0x1035   :  { %4765 = vmatprep.subr.bf16.mxu0 %v7734_v53  ;;  %4806 = vmatprep.subr.bf16.mxu1 %v7737_v4 }
0x1038   :  { %4766 = vmatpush1.bf16.msra.mxu0 %v7740_v2  ;;  %4807 = vmatpush1.bf16.msra.mxu1 %v7743_v10 }
0x1039   :  { %4767 = vmatprep.subr.bf16.mxu0 %v7746_v1  ;;  %4808 = vmatprep.subr.bf16.mxu1 %v7749_v21 }
0x103c   :  { %4768 = vmatpush1.bf16.msra.mxu0 %v7752_v50  ;;  %4809 = vmatpush1.bf16.msra.mxu1 %v7755_v59 }
0x103d   :  { %4769 = vmatprep.subr.bf16.mxu0 %v7758_v60  ;;  %4810 = vmatprep.subr.bf16.mxu1 %v7761_v11 }
0x1040   :  { %4770 = vmatpush1.bf16.msra.mxu0 %v7764_v57  ;;  %4811 = vmatpush1.bf16.msra.mxu1 %v7767_v42 }
0x1041   :  { %4771 = vmatprep.subr.bf16.mxu0 %v7770_v35  ;;  %4812 = vmatprep.subr.bf16.mxu1 %v7773_v9 }
0x1044   :  { %4772 = vmatpush1.bf16.msra.mxu0 %v5570_v16  ;;  %4813 = vmatpush1.bf16.msra.mxu1 %v5571_v41 }
0x10fa   :  { %v4682_v14 = vpop.f32.mrb[140].mxu0  ;;  %v4723_v55 = vpop.f32.mrb[140].mxu1 }
0x10fb   :  { %v4730_v45 = vadd.f32 %v4682_v14, %v8309_v17  ;;  %v4732_v8 = vadd.f32 %v4723_v55, %v8310_v43  ;;  %v4684_v13 = vpop.f32.mrb[141].mxu0  ;;  %v4725_v26 = vpop.f32.mrb[141].mxu1 }
0x10fc   :  { %v4731_v28 = vadd.f32 %v4684_v13, %v8311_v27  ;;  %v4733_v5 = vadd.f32 %v4725_v26, %v8312_v38  ;;  %v4686_v34 = vpop.f32.mrb[142].mxu0  ;;  %v4727_v32 = vpop.f32.mrb[142].mxu1 }
0x10fd   :  { %v4734_v53 = vmul.f32 0.5, %v4730_v45  ;;  %v4687_v4 = vpop.f32.mrb[143].mxu0  ;;  %v4728_v2 = vpop.f32.mrb[143].mxu1 }
0x10fe   :  { %v4738_v10 = vmul.f32 0.5, %v4731_v28  ;;  %v4743_v1 = vmul.f32 0.5, %v4733_v5 }
0x10ff   :  { %5520 = vtanh.f32 %v4734_v53 }
0x1100   :  { %5522 = vtanh.f32 %v4738_v10 }
0x1101   :  { %5524 = vtanh.f32 %v4732_v8 }
0x1102   :  { %5526 = vtanh.f32 %v4743_v1 }
0x1109   :  { %v5521_v21 = vpop.eup %5520 }
0x110a   :  { %v5523_v50 = vpop.eup %5522  ;;  %v4736_v59 = vmul.f32 0.5, %v5521_v21 }
0x110b   :  { %v4740_v60 = vmul.f32 0.5, %v5523_v50  ;;  %v5525_v57 = vpop.eup %5524 }
0x110c   :  { %v4737_v11 = vadd.f32 0.5, %v4736_v59  ;;  %v5527_v6 = vpop.eup %5526 }
0x110d   :  { %v4741_v42 = vadd.f32 0.5, %v4740_v60  ;;  %v4745_v24 = vmul.f32 0.5, %v5527_v6 }
0x110e   :  { %v4748_v35 = vmul.f32 %v5525_v57, %v4737_v11 }
0x110f   :  { %v4747_v9 = vmul.f32 %v4741_v42, %v7783_v63  ;;  %v4746_v33 = vadd.f32 0.5, %v4745_v24 }
0x1111   :  { %v4749_v62 = vadd.f32 %v4748_v35, %v4747_v9 }
0x1113   :  { %5528 = vtanh.f32 %v4749_v62 }
0x111d   :  { %v5529_v22 = vpop.eup %5528 }
0x111e   :  { %v4751_v12 = vmul.f32 %v5529_v22, %v4746_v33 }
0x1120   :  { %v4756_v36 = vpack.c.bf16 %v4751_v12, %v4751_v12 }
0x1122   :  { %4790 = vmatmul.mubr.bf16.vlgmr.msra.gmra.mrb[144].mxu0 %v4756_v36  ;;  %4831 = vmatmul.mubr.bf16.vlgmr.msra.gmra.mrb[144].mxu1 %v4756_v36 }
0x11f5   :  { %v4791_v20 = vpop.f32.mrb[144].mxu0  ;;  %v4832_v18 = vpop.f32.mrb[144].mxu1 }
0x11f6   :  { %v4839_v54 = vadd.f32 %v4791_v20, %v8313_v23  ;;  %v4841_v15 = vadd.f32 %v4832_v18, %v8314_v44  ;;  %v4793_v29 = vpop.f32.mrb[145].mxu0  ;;  %v4834_v0 = vpop.f32.mrb[145].mxu1 }
0x11f7   :  { %v4840_v25 = vadd.f32 %v4793_v29, %v8315_v51  ;;  %v4842_v30 = vadd.f32 %v4834_v0, %v8316_v52  ;;  %v4795_v19 = vpop.f32.mrb[146].mxu0  ;;  %v4836_v46 = vpop.f32.mrb[146].mxu1 }
0x11f8   :  { %v4843_v56 = vmul.f32 0.5, %v4839_v54  ;;  %v4796_v49 = vpop.f32.mrb[147].mxu0  ;;  %v4837_v48 = vpop.f32.mrb[147].mxu1 }
0x11f9   :  { %v4847_v40 = vmul.f32 0.5, %v4840_v25  ;;  %v4852_v58 = vmul.f32 0.5, %v4842_v30 }
0x11fa   :  { %5530 = vtanh.f32 %v4843_v56 }
0x11fb   :  { %5532 = vtanh.f32 %v4847_v40 }
0x11fc   :  { %5534 = vtanh.f32 %v4841_v15 }
0x11fd   :  { %5536 = vtanh.f32 %v4852_v58 }
0x1204   :  { %v5531_v63 = vpop.eup %5530 }
0x1205   :  { %v5533_v31 = vpop.eup %5532  ;;  %v4845_v37 = vmul.f32 0.5, %v5531_v63 }
0x1206   :  { %v4849_v61 = vmul.f32 0.5, %v5533_v31  ;;  %v5535_v3 = vpop.eup %5534 }
0x1207   :  { %v4846_v7 = vadd.f32 0.5, %v4845_v37  ;;  %v5537_v55 = vpop.eup %5536 }
0x1208   :  { %v4850_v39 = vadd.f32 0.5, %v4849_v61  ;;  %v4854_v17 = vmul.f32 0.5, %v5537_v55 }
0x1209   :  { %v4857_v16 = vmul.f32 %v5535_v3, %v4846_v7 }
0x120a   :  { %v4856_v41 = vmul.f32 %v4850_v39, %v4749_v62  ;;  %v4855_v45 = vadd.f32 0.5, %v4854_v17 }
0x120c   :  { %v4858_v14 = vadd.f32 %v4857_v16, %v4856_v41 }
0x120e   :  { %5538 = vtanh.f32 %v4858_v14 }
0x1218   :  { %v5539_v43 = vpop.eup %5538 }
0x1219   :  { %v4860_v8 = vmul.f32 %v5539_v43, %v4855_v45 }
0x121a   :  { %5602 = dma.done.wait [#allocation9 + $0x2], 2048 }
0x121b   :  { %5603 = vsyncadd [#allocation9 + $0x2], 4294965248 }
0x121c   :  { %5604 = dma.done.wait [#allocation9 + $0x3], 1024 }
0x121d   :  { %5605 = vsyncadd [#allocation9 + $0x3], 4294966272  ;;  %v5623_v13 = vmov 0.0   ;;  %v8317_v26 = vld [vmem:[#allocation31_spill] sm:$0xff]  ;;  %vm5624_vm0 = vmmov 0   ;;  %v8319_v28 = vld [vmem:[#allocation32_spill] sm:$0xff]  ;;  %v4877_v59 = vpack.c.bf16 %v7514_v47, %v7514_v47  ;;  %v4868_v60 = vpack.c.bf16 %v4860_v8, %v4860_v8 }
0x121e   :  { %5195 = vmatprep.subr.bf16.mxu0 %v5623_v13  ;;  %5215 = vmatprep.subr.bf16.mxu1 %v5623_v13  ;;  %v8318_v27 = vld [vmem:[#allocation23_spill] sm:$0xff]  ;;  %v8320_v38 = vld [vmem:[#allocation24_spill] sm:$0xff]  ;;  %v8321_v5 = vld [vmem:[#allocation33_spill] sm:$0xff] }
0x121f   :  { %5196 = vmatpush3.bf16.msra.mxu0 %v8317_v26  ;;  %5216 = vmatpush3.bf16.msra.mxu1 %v8318_v27  ;;  %v8322_v34 = vld [vmem:[#allocation25_spill] sm:$0xff]  ;;  %v8323_v32 = vld [vmem:[#allocation34_spill] sm:$0xff]  ;;  %v8325_v4 = vld [vmem:[#allocation35_spill] sm:$0xff] }
0x1220   :  { %5197 = vmatprep.subr.bf16.mxu0 %v5623_v13  ;;  %5217 = vmatprep.subr.bf16.mxu1 %v5623_v13  ;;  %v8324_v53 = vld [vmem:[#allocation26_spill] sm:$0xff]  ;;  %v8326_v2 = vld [vmem:[#allocation27_spill] sm:$0xff]  ;;  %v8327_v10 = vld [vmem:[#allocation36_spill] sm:$0xff] }
0x1221   :  { %5211 = vmatprep.mubr.msk.bf16.mxu0 %vm5624_vm0, %v5623_v13  ;;  %5231 = vmatprep.mubr.msk.bf16.mxu1 %vm5624_vm0, %v5623_v13  ;;  %v8328_v1 = vld [vmem:[#allocation28_spill] sm:$0xff]  ;;  %v8329_v21 = vld [vmem:[#allocation37_spill] sm:$0xff]  ;;  %v8331_v11 = vld [vmem:[#allocation38_spill] sm:$0xff] }
0x1222   :  { %v8330_v50 = vld [vmem:[#allocation29_spill] sm:$0xff]  ;;  %v8332_v57 = vld [vmem:[#allocation30_spill] sm:$0xff]  ;;  %v8333_v42 = vld [vmem:[#allocation39_spill] sm:$0xff] }
0x1223   :  { %5198 = vmatpush3.bf16.msra.mxu0 %v8319_v28  ;;  %5218 = vmatpush3.bf16.msra.mxu1 %v8320_v38  ;;  %v8334_v35 = vld [vmem:[#allocation40_spill] sm:$0xff]  ;;  %v8335_v9 = vld [vmem:[#allocation41_spill] sm:$0xff]  ;;  %v8336_v47 = vld [vmem:[#allocation42_spill] sm:$0xff] }
0x1224   :  { %5199 = vmatprep.subr.bf16.mxu0 %v5623_v13  ;;  %5219 = vmatprep.subr.bf16.mxu1 %v5623_v13  ;;  %v8337_v62 = vld [vmem:[#allocation43_spill] sm:$0xff]  ;;  %v8338_v6 = vld [vmem:[#allocation44_spill] sm:$0xff]  ;;  %v8339_v24 = vld [vmem:[#allocation45_spill] sm:$0xff] }
0x1225   :  { %v8340_v33 = vld [vmem:[#allocation46_spill] sm:$0xff]  ;;  %v5162_v36 = vld [vmem:[%s7869_s6] ss:$0 sm:$0xff] }
0x1226   :  { %v5163_v52 = vld [vmem:[%s7870_s7] ss:$0 sm:$0xff] }
0x1227   :  { %5200 = vmatpush3.bf16.msra.mxu0 %v8321_v5  ;;  %5220 = vmatpush3.bf16.msra.mxu1 %v8322_v34 }
0x1228   :  { %5201 = vmatprep.subr.bf16.mxu0 %v5623_v13  ;;  %5221 = vmatprep.subr.bf16.mxu1 %v5623_v13 }
0x122b   :  { %5202 = vmatpush3.bf16.msra.mxu0 %v8323_v32  ;;  %5222 = vmatpush3.bf16.msra.mxu1 %v8324_v53 }
0x122c   :  { %5203 = vmatprep.subr.bf16.mxu0 %v5623_v13  ;;  %5223 = vmatprep.subr.bf16.mxu1 %v5623_v13 }
0x122f   :  { %5204 = vmatpush3.bf16.msra.mxu0 %v8325_v4  ;;  %5224 = vmatpush3.bf16.msra.mxu1 %v8326_v2 }
0x1230   :  { %5205 = vmatprep.subr.bf16.mxu0 %v5623_v13  ;;  %5225 = vmatprep.subr.bf16.mxu1 %v5623_v13 }
0x1233   :  { %5206 = vmatpush3.bf16.msra.mxu0 %v8327_v10  ;;  %5226 = vmatpush3.bf16.msra.mxu1 %v8328_v1 }
0x1234   :  { %5207 = vmatprep.subr.bf16.mxu0 %v5623_v13  ;;  %5227 = vmatprep.subr.bf16.mxu1 %v5623_v13 }
0x1237   :  { %5208 = vmatpush3.bf16.msra.mxu0 %v8329_v21  ;;  %5228 = vmatpush3.bf16.msra.mxu1 %v8330_v50 }
0x1238   :  { %5209 = vmatprep.subr.bf16.mxu0 %v5623_v13  ;;  %5229 = vmatprep.subr.bf16.mxu1 %v5623_v13 }
0x123b   :  { %5210 = vmatpush3.bf16.msra.mxu0 %v8331_v11  ;;  %5230 = vmatpush3.bf16.msra.mxu1 %v8332_v57 }
0x123c   :  { %5235 = vmatprep.subr.bf16.mxu0 %v5623_v13 }
0x123e   :  { %5212 = vmatmul.mubr.bf16.vlgmr.msra.gmra.mrb[148].mxu0 %v4877_v59  ;;  %5232 = vmatmul.mubr.bf16.vlgmr.msra.gmra.mrb[148].mxu1 %v4868_v60 }
0x123f   :  { %5236 = vmatpush3.bf16.msra.mxu0 %v8333_v42  ;;  %5251 = vmatprep.mubr.msk.bf16.mxu0 %vm5624_vm0, %v5623_v13 }
0x1240   :  { %5237 = vmatprep.subr.bf16.mxu0 %v5623_v13 }
0x1243   :  { %5238 = vmatpush3.bf16.msra.mxu0 %v8334_v35 }
0x1244   :  { %5239 = vmatprep.subr.bf16.mxu0 %v5623_v13 }
0x1247   :  { %5240 = vmatpush3.bf16.msra.mxu0 %v8335_v9 }
0x1248   :  { %5241 = vmatprep.subr.bf16.mxu0 %v5623_v13 }
0x124b   :  { %5242 = vmatpush3.bf16.msra.mxu0 %v8336_v47 }
0x124c   :  { %5243 = vmatprep.subr.bf16.mxu0 %v5623_v13 }
0x124f   :  { %5244 = vmatpush3.bf16.msra.mxu0 %v8337_v62 }
0x1250   :  { %5245 = vmatprep.subr.bf16.mxu0 %v5623_v13 }
0x1253   :  { %5246 = vmatpush3.bf16.msra.mxu0 %v8338_v6 }
0x1254   :  { %5247 = vmatprep.subr.bf16.mxu0 %v5623_v13 }
0x1257   :  { %5248 = vmatpush3.bf16.msra.mxu0 %v8339_v24 }
0x1258   :  { %5249 = vmatprep.subr.bf16.mxu0 %v5623_v13 }
0x125b   :  { %5250 = vmatpush3.bf16.msra.mxu0 %v8340_v33 }
0x1311   :  { %v4920_v22 = vpop.f32.mrb[148].mxu0  ;;  %v4960_v12 = vpop.f32.mrb[148].mxu1 }
0x1312   :  { %v4961_v20 = vadd.f32 %v4960_v12, %v4920_v22  ;;  %v5213_v18 = vpop.f32.mrb[149].mxu0  ;;  %v5233_v23 = vpop.f32.mrb[149].mxu1 }
0x1313   :  { %v4923_v54 = vpop.f32.mrb[150].mxu0  ;;  %v4963_v44 = vpop.f32.mrb[150].mxu1 }
0x1314   :  { %v4973_v15 = vadd.f32 %v5162_v36, %v4961_v20  ;;  %v5214_v29 = vpop.f32.mrb[151].mxu0  ;;  %v5234_v0 = vpop.f32.mrb[151].mxu1 }
0x1316   :  { %v4974_v51 = vmax.f32 %v4973_v15, 0.0 }
0x1318   :  { %v4975_v25 = vpack.c.bf16 %v4974_v51, %v4974_v51 }
0x131a   :  { %5252 = vmatmul.mubr.bf16.vlgmr.msra.gmra.mrb[152].mxu0 %v4975_v25 }
0x13ed   :  { %v5025_v30 = vpop.f32.mrb[152].mxu0 }
0x13ee   :  { %v5026_v19 = vadd.f32 %v5163_v52, %v5025_v30  ;;  %v5253_v46 = vpop.f32.mrb[153].mxu0 }
0x13ef   :  { %v5028_v56 = vpop.f32.mrb[154].mxu0 }
0x13f0   :  { %v5031_v49 = vmul.f32 0.5, %v5026_v19  ;;  %v5254_v48 = vpop.f32.mrb[155].mxu0 }
0x13f2   :  { %5572 = vtanh.f32 %v5031_v49 }
0x13fc   :  { %v5573_v40 = vpop.eup %5572 }
0x13fd   :  { %v5033_v58 = vmul.f32 0.5, %v5573_v40 }
0x13ff   :  { %v5034_v63 = vadd.f32 0.5, %v5033_v58 }
0x1401   :  { %5035 = vst [vmem:[%s7875_s12] sm:$0xff] %v5034_v63 }
0x1402   :  { %5040 = vsyncpa [#allocation11], 1 }
0x1403   :  { %5041 = vsyncmov [#allocation9] }
0x1406   :  { %s5042_s28 = vpop.sfrf %5041 }
0x1407   :  { %p5164_p8 = scmp.ne.s32.totalorder %s5042_s28, 0 }
0x1409   :  { %5046 = shalt.err (%p5164_p8)  }
0x140a   :  { %5048 = vsyncmov [#allocation9 + $0x1] }
0x140d   :  { %s5049_s7 = vpop.sfrf %5048 }
0x140e   :  { %p5165_p9 = scmp.ne.s32.totalorder %s5049_s7, 0 }
0x1410   :  { %5053 = shalt.err (%p5165_p9)  }
0x1411   :  { %5055 = vsyncmov [#allocation9 + $0x2] }
0x1414   :  { %s5056_s0 = vpop.sfrf %5055 }
0x1415   :  { %p5166_p10 = scmp.ne.s32.totalorder %s5056_s0, 0 }
0x1417   :  { %5060 = shalt.err (%p5166_p10)  }
0x1418   :  { %5062 = vsyncmov [#allocation9 + $0x3] }
0x141b   :  { %s5063_s29 = vpop.sfrf %5062 }
0x141c   :  { %p5167_p11 = scmp.ne.s32.totalorder %s5063_s29, 0 }
0x141e   :  { %5067 = shalt.err (%p5167_p11)  }

</bundles_post_ra>
